<compile_context>
chip_gen: v5e
topology: v5e:2x2
jax: 0.10.0
libtpu: 0.0.40
codegen_flags: <defaults>
</compile_context>

<pallas_src>
import functools
import math

import jax
import jax.numpy as jnp
from jax.experimental import pallas as pl
from jax.experimental.pallas import tpu as pltpu

BN_EPS = 1e-5
BN_SCALE = float(1.0 / math.sqrt(1.0 + BN_EPS))  # eval-mode BN, default stats
SEG_LEN = 100


def _ru(x, m):
    return ((x + m - 1) // m) * m


def _dim_tile(d, cap, mult):
    """Choose (tile, padded_extent) for one dim."""
    ds = _ru(max(d, mult), mult)
    if ds <= cap:
        return ds, ds
    return cap, _ru(ds, cap)


_HW_CFG = None


def _hw_cfg():
    """Per-generation tile caps / VMEM budget (v7x has 64 MiB per TC)."""
    global _HW_CFG
    if _HW_CFG is None:
        try:
            vmem = int(pltpu.get_tpu_info().vmem_capacity_bytes)
        except Exception:
            vmem = 64 * 1024 * 1024
        if vmem >= 100 * 1024 * 1024:          # v5e / v6e: 128 MiB VMEM
            _HW_CFG = dict(tm=512, tn=256, tk=1024, vmem=64 * 1024 * 1024)
        else:                                   # v7x-class: 64 MiB per TC
            _HW_CFG = dict(tm=256, tn=256, tk=512, vmem=40 * 1024 * 1024)
    return _HW_CFG


# ----------------------------------------------------------------------------
# Fused matmul kernel:  out = epilogue( [relu](A) @ B )
#   epi = "none"         -> acc
#   epi = "relu"         -> max(acc, 0)                     (BN folded into B)
#   epi = "bias_relu"    -> max(acc + bias, 0)              (CAM linear1)
#   epi = "bias_sigmoid" -> sigmoid(acc + bias)             (CAM gate logits)
#   epi = "add_relu"     -> max(acc + aux, 0)               (FCM residual)
# ----------------------------------------------------------------------------
def _mm_kernel(*refs, epi, a_relu):
    if epi in ("bias_relu", "bias_sigmoid"):
        a_ref, b_ref, bias_ref, o_ref, acc_ref = refs
    elif epi == "add_relu":
        a_ref, b_ref, aux_ref, o_ref, acc_ref = refs
    else:
        a_ref, b_ref, o_ref, acc_ref = refs

    kk = pl.program_id(2)

    @pl.when(kk == 0)
    def _():
        acc_ref[...] = jnp.zeros_like(acc_ref)

    a = a_ref[...]
    if a_relu:  # fused pre-conv BN+ReLU (BN scale folded into weights)
        a = jnp.maximum(a, 0)
    acc_ref[...] += jnp.dot(a, b_ref[...], preferred_element_type=jnp.float32)

    @pl.when(kk == pl.num_programs(2) - 1)
    def _():
        acc = acc_ref[...]
        if epi == "relu":
            res = jnp.maximum(acc, 0.0)
        elif epi == "bias_relu":
            res = jnp.maximum(acc + bias_ref[...], 0.0)
        elif epi == "bias_sigmoid":
            res = jax.nn.sigmoid(acc + bias_ref[...])
        elif epi == "add_relu":
            res = jnp.maximum(acc + aux_ref[...].astype(jnp.float32), 0.0)
        else:
            res = acc
        o_ref[...] = res.astype(o_ref.dtype)


def fused_matmul(a, wp, *, epi="none", a_relu=False, bias=None, aux=None,
                 out_dtype=jnp.bfloat16):
    """a: (M, K) activations; wp: prepared weight dict {'w': (K, N) bf16, 'n': N}."""
    M, K = a.shape
    w = wp["w"]
    N = wp["n"]
    assert w.shape[0] == K, (w.shape, K)
    cfg = _hw_cfg()
    tm, Mp = _dim_tile(M, cfg["tm"], 16)
    tn, Np = _dim_tile(N, cfg["tn"], 128)
    tk, Kp = _dim_tile(K, cfg["tk"], 128)

    a_p = jnp.pad(a.astype(jnp.bfloat16), ((0, Mp - M), (0, Kp - K)))
    b_p = jnp.pad(w, ((0, Kp - K), (0, Np - N)))

    in_specs = [pl.BlockSpec((tm, tk), lambda i, j, kk: (i, kk)),
                pl.BlockSpec((tk, tn), lambda i, j, kk: (kk, j))]
    args = [a_p, b_p]
    if epi in ("bias_relu", "bias_sigmoid"):
        bias_p = jnp.pad(bias.astype(jnp.float32).reshape(1, N),
                         ((0, 0), (0, Np - N)))
        in_specs.append(pl.BlockSpec((1, tn), lambda i, j, kk: (0, j)))
        args.append(bias_p)
    if epi == "add_relu":
        aux_p = jnp.pad(aux.astype(jnp.bfloat16), ((0, Mp - M), (0, Np - N)))
        in_specs.append(pl.BlockSpec((tm, tn), lambda i, j, kk: (i, j)))
        args.append(aux_p)

    out = pl.pallas_call(
        functools.partial(_mm_kernel, epi=epi, a_relu=a_relu),
        out_shape=jax.ShapeDtypeStruct((Mp, Np), out_dtype),
        grid_spec=pltpu.PrefetchScalarGridSpec(
            num_scalar_prefetch=0,
            grid=(Mp // tm, Np // tn, Kp // tk),
            in_specs=in_specs,
            out_specs=pl.BlockSpec((tm, tn), lambda i, j, kk: (i, j)),
            scratch_shapes=[pltpu.VMEM((tm, tn), jnp.float32)]),
        compiler_params=pltpu.CompilerParams(
            dimension_semantics=("parallel", "parallel", "arbitrary"),
            vmem_limit_bytes=cfg["vmem"]),
    )(*args)
    return out[:M, :N]


# ----------------------------------------------------------------------------
# In-kernel tap-accumulation conv1d (stride 1, dilated) with fused gate mul.
# A haloed, per-batch-resident time block is sliced k times inside the kernel
# (no im2col materialization of the input).
# ----------------------------------------------------------------------------
def _tapconv_kernel(*refs, epi, k, dilation, tm, hp):
    if epi == "mul":
        x_ref, w_ref, aux_ref, o_ref = refs
    else:
        x_ref, w_ref, o_ref = refs

    i = pl.program_id(1)
    row0 = pl.multiple_of(i * tm, 8)
    xb = x_ref[0, pl.ds(row0, tm + hp), :]          # (tm + hp, Cinp) bf16

    tn = o_ref.shape[-1]
    acc = jnp.zeros((tm, tn), jnp.float32)
    for d in range(k):
        a = xb[d * dilation: d * dilation + tm, :]  # static shifted slice
        acc = acc + jnp.dot(a, w_ref[d], preferred_element_type=jnp.float32)

    if epi == "mul":
        res = acc * aux_ref[0].astype(jnp.float32)
    else:
        res = acc
    o_ref[0] = res.astype(o_ref.dtype)


def conv1d_taps(x, wp, *, k, dilation, padding, epi="none", aux=None,
                out_dtype=jnp.bfloat16):
    """x: (B, T, Cin); wp['w']: (k, Cin, Cout) bf16 (pre-scaled). stride == 1."""
    B, T, Cin = x.shape
    Cout = wp["n"]
    cfg = _hw_cfg()

    T_out = T + 2 * padding - dilation * (k - 1)
    tm, Tout_p = _dim_tile(T_out, cfg["tm"], 16)
    tn, Np = _dim_tile(Cout, cfg["tn"], 128)
    Cinp = _ru(max(Cin, 128), 128)
    halo = (k - 1) * dilation
    hp = _ru(max(halo, 8), 8)
    Tp = Tout_p + hp

    x_p = jnp.pad(x.astype(jnp.bfloat16),
                  ((0, 0), (padding, Tp - T - padding), (0, Cinp - Cin)))
    w_p = jnp.pad(wp["w"], ((0, 0), (0, Cinp - wp["w"].shape[1]), (0, Np - Cout)))

    in_specs = [pl.BlockSpec((1, Tp, Cinp), lambda b, i, j: (b, 0, 0)),
                pl.BlockSpec((k, Cinp, tn), lambda b, i, j: (0, 0, j))]
    args = [x_p, w_p]
    if epi == "mul":
        aux_p = jnp.pad(aux.astype(jnp.bfloat16),
                        ((0, 0), (0, Tout_p - T_out), (0, Np - Cout)))
        in_specs.append(pl.BlockSpec((1, tm, tn), lambda b, i, j: (b, i, j)))
        args.append(aux_p)

    out = pl.pallas_call(
        functools.partial(_tapconv_kernel, epi=epi, k=k, dilation=dilation,
                          tm=tm, hp=hp),
        out_shape=jax.ShapeDtypeStruct((B, Tout_p, Np), out_dtype),
        grid_spec=pltpu.PrefetchScalarGridSpec(
            num_scalar_prefetch=0,
            grid=(B, Tout_p // tm, Np // tn),
            in_specs=in_specs,
            out_specs=pl.BlockSpec((1, tm, tn), lambda b, i, j: (b, i, j))),
        compiler_params=pltpu.CompilerParams(
            dimension_semantics=("parallel", "parallel", "parallel"),
            vmem_limit_bytes=cfg["vmem"]),
    )(*args)
    return out[:, :T_out, :Cout]


# ----------------------------------------------------------------------------
# StatsPool kernel, tiled over T (f32 sum / sum-of-squares accumulation),
# with the out_nonlinear BN+ReLU fused in.
# ----------------------------------------------------------------------------
def _stats_kernel(x_ref, mean_ref, std_ref, s_ref, ss_ref, *, t_total):
    ti = pl.program_id(1)

    @pl.when(ti == 0)
    def _():
        s_ref[...] = jnp.zeros_like(s_ref)
        ss_ref[...] = jnp.zeros_like(ss_ref)

    x = jnp.maximum(x_ref[0].astype(jnp.float32), 0.0) * BN_SCALE  # (tt, Cp)
    s_ref[...] += jnp.sum(x, axis=0, keepdims=True)
    ss_ref[...] += jnp.sum(x * x, axis=0, keepdims=True)

    @pl.when(ti == pl.num_programs(1) - 1)
    def _():
        inv_t = 1.0 / t_total
        mean = s_ref[...] * inv_t
        var = (ss_ref[...] - t_total * mean * mean) * (1.0 / max(t_total - 1, 1))
        mean_ref[0] = mean
        std_ref[0] = jnp.sqrt(jnp.maximum(var, 0.0))   # clamp fp cancellation


def stats_pool(h):
    """out_nonlinear(BN+ReLU) + StatsPool: (B, T, C) bf16 -> (B, 2C) f32."""
    B, T, C = h.shape
    cfg = _hw_cfg()
    Cp = _ru(max(C, 128), 128)
    tt, Tp = _dim_tile(T, 512, 16)
    h_p = jnp.pad(h.astype(jnp.bfloat16), ((0, 0), (0, Tp - T), (0, Cp - C)))
    mean, std = pl.pallas_call(
        functools.partial(_stats_kernel, t_total=T),
        out_shape=(jax.ShapeDtypeStruct((B, 1, Cp), jnp.float32),
                   jax.ShapeDtypeStruct((B, 1, Cp), jnp.float32)),
        grid_spec=pltpu.PrefetchScalarGridSpec(
            num_scalar_prefetch=0,
            grid=(B, Tp // tt),
            in_specs=[pl.BlockSpec((1, tt, Cp), lambda b, t: (b, t, 0))],
            out_specs=(pl.BlockSpec((1, 1, Cp), lambda b, t: (b, 0, 0)),
                       pl.BlockSpec((1, 1, Cp), lambda b, t: (b, 0, 0))),
            scratch_shapes=[pltpu.VMEM((1, Cp), jnp.float32),
                            pltpu.VMEM((1, Cp), jnp.float32)]),
        compiler_params=pltpu.CompilerParams(
            dimension_semantics=("parallel", "arbitrary"),
            vmem_limit_bytes=cfg["vmem"]),
    )(h_p)
    return jnp.concatenate([mean[:, 0, :C], std[:, 0, :C]], axis=-1)


# ----------------------------------------------------------------------------
# Conv lowering glue
# ----------------------------------------------------------------------------
def conv1x1(x, wp, *, epi="none", a_relu=False, bias=None,
            out_dtype=jnp.bfloat16):
    B, T, Cin = x.shape
    out = fused_matmul(x.reshape(B * T, Cin), wp, epi=epi, a_relu=a_relu,
                       bias=bias, out_dtype=out_dtype)
    return out.reshape(B, T, wp["n"])


def conv1d_im2col(x, wp, *, stride, padding, dilation=1, epi="none",
                  a_relu=False):
    """Strided 1-D conv (TDNN). TODO(synk): replace im2col with in-kernel
    strided tap accumulation."""
    B, T, Cin = x.shape
    k = wp["k"]
    T_out = (T + 2 * padding - dilation * (k - 1) - 1) // stride + 1
    xp = jnp.pad(x, ((0, 0), (padding, padding), (0, 0)))
    taps = [xp[:, j * dilation: j * dilation + stride * (T_out - 1) + 1: stride, :]
            for j in range(k)]
    a = jnp.stack(taps, axis=2).reshape(B * T_out, k * Cin)
    out = fused_matmul(a, wp, epi=epi, a_relu=a_relu)
    return out.reshape(B, T_out, wp["n"])


def conv2d_im2col(x, wp, *, stride, padding, epi="none", aux=None):
    """3x3/1x1 2-D convs of the FCM head. TODO(synk): replace im2col with an
    in-kernel 2-D tap-accumulation kernel."""
    B, H, W, Cin = x.shape
    kh, kw = wp["kh"], wp["kw"]
    sh, sw = stride
    H_out = (H + 2 * padding - kh) // sh + 1
    W_out = (W + 2 * padding - kw) // sw + 1
    xp = jnp.pad(x, ((0, 0), (padding, padding), (padding, padding), (0, 0)))
    taps = []
    for i in range(kh):
        for j in range(kw):
            taps.append(xp[:, i: i + sh * (H_out - 1) + 1: sh,
                           j: j + sw * (W_out - 1) + 1: sw, :])
    a = jnp.stack(taps, axis=3).reshape(B * H_out * W_out, kh * kw * Cin)
    aux2 = aux.reshape(B * H_out * W_out, -1) if aux is not None else None
    out = fused_matmul(a, wp, epi=epi, aux=aux2)
    return out.reshape(B, H_out, W_out, wp["n"])


# ----------------------------------------------------------------------------
# Model layers
# ----------------------------------------------------------------------------
def basic_res_block(x, p):
    s = p["stride"]
    out = conv2d_im2col(x, p["conv1"], stride=(s, 1), padding=1, epi="relu")
    if "sc" in p:
        short = conv2d_im2col(x, p["sc"], stride=(s, 1), padding=0, epi="none")
    else:
        short = x
    # conv2 + BN + residual add + ReLU all fused in the matmul epilogue
    return conv2d_im2col(out, p["conv2"], stride=(1, 1), padding=1,
                         epi="add_relu", aux=short)


def fcm_forward(x, p):
    """FCM head.  x: (B, F, T, 1) -> (B, T, 32 * (F // 8))."""
    out = conv2d_im2col(x, p["conv1"], stride=(1, 1), padding=1, epi="relu")
    for blk in p["layer1"]:
        out = basic_res_block(out, blk)
    for blk in p["layer2"]:
        out = basic_res_block(out, blk)
    out = conv2d_im2col(out, p["conv2"], stride=(2, 1), padding=1, epi="relu")
    B, F2, T, C = out.shape
    # torch: (B, C, F2, T).reshape(B, C*F2, T) -> channel index = c*F2 + f
    return jnp.transpose(out, (0, 2, 3, 1)).reshape(B, T, C * F2)


def cam_dense_layer(x, p, k, dilation):
    # nonlinear1(BN+ReLU) -> linear1 -> nonlinear2(BN+ReLU), fused into 1 matmul
    # (prologue ReLU, BN scales folded into weights, epilogue ReLU).
    h = conv1x1(x, p["linear1"], a_relu=True, epi="relu")        # (B,T,bn_ch) bf16
    B, T, C = h.shape

    # CAM context path on segment-pooled features (no seg_len repetition).
    n_seg = -(-T // SEG_LEN)
    pad = n_seg * SEG_LEN - T
    h_pad = jnp.pad(h, ((0, 0), (0, pad), (0, 0)))
    seg_sums = h_pad.reshape(B, n_seg, SEG_LEN, C).sum(axis=2, dtype=jnp.float32)
    counts = jnp.minimum(SEG_LEN, T - jnp.arange(n_seg) * SEG_LEN
                         ).astype(jnp.float32)
    seg_mean = seg_sums / counts[None, :, None]
    glob_mean = seg_sums.sum(axis=1, keepdims=True) / T
    ctx = glob_mean + seg_mean                                   # (B, n_seg, C)

    c = conv1x1(ctx, p["cam1"], epi="bias_relu", bias=p["cam1_b"])
    m = conv1x1(c, p["cam2"], epi="bias_sigmoid", bias=p["cam2_b"])
    m_t = jnp.repeat(m, SEG_LEN, axis=1)[:, :T, :]               # (B, T, growth)

    # local dilated conv with the sigmoid-gate multiply fused into its epilogue
    return conv1d_taps(h, p["local"], k=k, dilation=dilation,
                       padding=(k - 1) // 2 * dilation, epi="mul", aux=m_t)


def campplus_forward(params, x):
    """x: (B, T, feat_dim) -> (B, embedding_size)."""
    h = jnp.transpose(x, (0, 2, 1))[..., None]                   # (B, F, T, 1)
    h = fcm_forward(h, params["head"])                           # (B, T, C) bf16
    h = conv1d_im2col(h, params["tdnn"], stride=2, padding=2, epi="relu")
    for blk in params["blocks"]:
        for layer in blk["layers"]:
            new = cam_dense_layer(h, layer, blk["k"], blk["dilation"])
            # TODO(synk): dense connectivity still concatenates (O(L^2) copies);
            # K-segment accumulation into the matmul would make it O(L).
            h = jnp.concatenate([h, new], axis=-1)
        # transit: BN+ReLU fused as ReLU prologue into 1x1 conv (bias=False)
        h = conv1x1(h, blk["transit"], a_relu=True, epi="none")
    stats = stats_pool(h)                                        # (B, 2C) f32
    # DenseLayer: linear (bias=False) + 'batchnorm_' (affine=False) folded
    return fused_matmul(stats, params["dense"], epi="none",
                        out_dtype=jnp.float32)


# ----------------------------------------------------------------------------
# Parameter construction + one-time weight preparation
# (transpose to matmul layout, fold eval-mode BN scale, cast to bf16)
# ----------------------------------------------------------------------------
def _prep_mm_1d(w, scale):
    """(Cout, Cin, k) torch layout -> matmul layout (k*Cin, Cout) bf16."""
    cout, cin, k = w.shape
    wm = jnp.transpose(w, (2, 1, 0)).reshape(k * cin, cout) * scale
    return {"w": wm.astype(jnp.bfloat16), "n": int(cout), "k": int(k)}


def _prep_mm_2d(w, scale):
    """(Cout, Cin, kh, kw) -> (kh*kw*Cin, Cout) bf16."""
    cout, cin, kh, kw = w.shape
    wm = jnp.transpose(w, (2, 3, 1, 0)).reshape(kh * kw * cin, cout) * scale
    return {"w": wm.astype(jnp.bfloat16), "n": int(cout),
            "kh": int(kh), "kw": int(kw)}


def _prep_tap_1d(w, scale):
    """(Cout, Cin, k) -> tap layout (k, Cin, Cout) bf16."""
    cout, cin, k = w.shape
    wt = jnp.transpose(w, (2, 1, 0)) * scale
    return {"w": wt.astype(jnp.bfloat16), "n": int(cout), "k": int(k)}


def build_campplus_params(feat_dim=80, embedding_size=192, growth_rate=32,
                          bn_size=4, init_channels=128, seed=0):
    keys = iter(jax.random.split(jax.random.PRNGKey(seed), 4096))

    def conv_w(cout, cin, *ks):
        fan_in = cin * math.prod(ks)
        std = math.sqrt(2.0 / fan_in)               # kaiming-normal-like
        return jax.random.normal(next(keys), (cout, cin) + tuple(ks),
                                 jnp.float32) * std

    m = 32                                          # FCM m_channels (fixed)
    head = {"conv1": _prep_mm_2d(conv_w(m, 1, 3, 3), BN_SCALE)}

    def res_layer(in_planes, planes, num_blocks, stride):
        blocks = []
        for s in [stride] + [1] * (num_blocks - 1):
            blk = {"stride": s,
                   "conv1": _prep_mm_2d(conv_w(planes, in_planes, 3, 3), BN_SCALE),
                   "conv2": _prep_mm_2d(conv_w(planes, planes, 3, 3), BN_SCALE)}
            if s != 1 or in_planes != planes:
                blk["sc"] = _prep_mm_2d(conv_w(planes, in_planes, 1, 1), BN_SCALE)
            blocks.append(blk)
            in_planes = planes
        return blocks, in_planes

    head["layer1"], ip = res_layer(m, m, 2, 2)
    head["layer2"], ip = res_layer(ip, m, 2, 2)
    head["conv2"] = _prep_mm_2d(conv_w(m, m, 3, 3), BN_SCALE)
    channels = m * (feat_dim // 8)

    params = {"head": head,
              "tdnn": _prep_mm_1d(conv_w(init_channels, channels, 5), BN_SCALE)}
    channels = init_channels
    bn_ch = bn_size * growth_rate
    blocks = []
    for (num_layers, k, dilation) in zip((12, 24, 16), (3, 3, 3), (1, 2, 2)):
        layers = []
        for i in range(num_layers):
            cin = channels + i * growth_rate
            layers.append({
                # nonlinear1 BN scale folded into linear1
                "linear1": _prep_mm_1d(conv_w(bn_ch, cin, 1), BN_SCALE),
                # nonlinear2 BN scale folded into local / cam1
                "local": _prep_tap_1d(conv_w(growth_rate, bn_ch, k), BN_SCALE),
                "cam1": _prep_mm_1d(conv_w(bn_ch // 2, bn_ch, 1), BN_SCALE),
                "cam1_b": jnp.zeros((bn_ch // 2,), jnp.float32),
                "cam2": _prep_mm_1d(conv_w(growth_rate, bn_ch // 2, 1), 1.0),
                "cam2_b": jnp.zeros((growth_rate,), jnp.float32),
            })
        channels = channels + num_layers * growth_rate
        blocks.append({"k": k, "dilation": dilation, "layers": layers,
                       "transit": _prep_mm_1d(conv_w(channels // 2, channels, 1),
                                              BN_SCALE)})
        channels //= 2
    params["blocks"] = blocks
    params["dense"] = _prep_mm_1d(conv_w(embedding_size, channels * 2, 1),
                                  BN_SCALE)
    return params


# ----------------------------------------------------------------------------
if __name__ == "__main__":
    # Small, module-consistent hyperparameters.
    B, T, FEAT = 2, 32, 16
    EMB, GROWTH, BN_SIZE, INIT_CH = 32, 8, 2, 32

    params = build_campplus_params(feat_dim=FEAT, embedding_size=EMB,
                                   growth_rate=GROWTH, bn_size=BN_SIZE,
                                   init_channels=INIT_CH, seed=0)

    x = jax.random.normal(jax.random.PRNGKey(0), (B, T, FEAT), jnp.float32)

    # Single jit over the whole forward; params closed over so weight padding
    # is constant-folded at compile time.
    fwd = jax.jit(lambda inp: campplus_forward(params, inp))

    emb = jax.block_until_ready(fwd(x))

    assert emb.shape == (B, EMB), emb.shape
    assert emb.dtype == jnp.float32
    assert bool(jnp.all(jnp.isfinite(emb)))
    print("KERNEL_OK")
</pallas_src>

<mosaic_0001>
module attributes {stable_mosaic.version = 11 : i64} {
  func.func @_mm_kernel(%arg0: i32, %arg1: i32, %arg2: i32, %arg3: memref<256x128xbf16, #tpu.memory_space<vmem>>, %arg4: memref<128x128xbf16, #tpu.memory_space<vmem>>, %arg5: memref<256x128xbf16, #tpu.memory_space<vmem>>, %arg6: memref<256x128xf32, #tpu.memory_space<vmem>>) attributes {dimension_semantics = [#tpu.dimension_semantics<parallel>, #tpu.dimension_semantics<parallel>, #tpu.dimension_semantics<arbitrary>], iteration_bounds = array<i64: 4, 1, 1>, scalar_prefetch = 0 : i64, scratch_operands = 1 : i64, tpu.core_type = #tpu.core_type<tc>, window_params = [{transform_indices = @transform_0, window_bounds = array<i64: 256, 128>}, {transform_indices = @transform_1, window_bounds = array<i64: 128, 128>}, {transform_indices = @transform_2, window_bounds = array<i64: 256, 128>}]} {
    %c0_i32 = arith.constant 0 : i32
    %0 = arith.cmpi eq, %arg2, %c0_i32 : i32
    %1 = arith.extui %0 : i1 to i32
    %c0_i32_0 = arith.constant 0 : i32
    %2 = arith.cmpi ne, %1, %c0_i32_0 : i32
    scf.if %2 {
      %cst_10 = arith.constant 0.000000e+00 : f32
      %12 = vector.broadcast %cst_10 : f32 to vector<256x128xf32>
      %c0_11 = arith.constant 0 : index
      %c0_12 = arith.constant 0 : index
      %13 = vector.load %arg6[%c0_11, %c0_12] : memref<256x128xf32, #tpu.memory_space<vmem>>, vector<256x128xf32>
      tpu.vector_store %arg6[%c0_11, %c0_12], %12 {strides = array<i32>} : memref<256x128xf32, #tpu.memory_space<vmem>>, vector<256x128xf32>,
    } else {
    }
    %c0 = arith.constant 0 : index
    %c0_1 = arith.constant 0 : index
    %3 = vector.load %arg3[%c0, %c0_1] : memref<256x128xbf16, #tpu.memory_space<vmem>>, vector<256x128xbf16>
    %c0_2 = arith.constant 0 : index
    %c0_3 = arith.constant 0 : index
    %4 = vector.load %arg6[%c0_2, %c0_3] : memref<256x128xf32, #tpu.memory_space<vmem>>, vector<256x128xf32>
    %c0_4 = arith.constant 0 : index
    %c0_5 = arith.constant 0 : index
    %5 = vector.load %arg4[%c0_4, %c0_5] : memref<128x128xbf16, #tpu.memory_space<vmem>>, vector<128x128xbf16>
    %cst = arith.constant dense<0.000000e+00> : vector<256x128xf32>
    %6 = tpu.matmul %3, %5, %cst {dimension_numbers = #tpu.dot_dimension_numbers<[1], [0], [0], [1], [0, 0, 1, 1], [], []>} : vector<256x128xbf16>, vector<128x128xbf16>, vector<256x128xf32> -> vector<256x128xf32>
    %7 = arith.addf %4, %6 : vector<256x128xf32>
    %c0_6 = arith.constant 0 : index
    %c0_7 = arith.constant 0 : index
    %8 = vector.load %arg6[%c0_6, %c0_7] : memref<256x128xf32, #tpu.memory_space<vmem>>, vector<256x128xf32>
    tpu.vector_store %arg6[%c0_6, %c0_7], %7 {strides = array<i32>} : memref<256x128xf32, #tpu.memory_space<vmem>>, vector<256x128xf32>,
    %c0_i32_8 = arith.constant 0 : i32
    %9 = arith.cmpi eq, %arg2, %c0_i32_8 : i32
    %10 = arith.extui %9 : i1 to i32
    %c0_i32_9 = arith.constant 0 : i32
    %11 = arith.cmpi ne, %10, %c0_i32_9 : i32
    scf.if %11 {
      %c0_10 = arith.constant 0 : index
      %c0_11 = arith.constant 0 : index
      %12 = vector.load %arg6[%c0_10, %c0_11] : memref<256x128xf32, #tpu.memory_space<vmem>>, vector<256x128xf32>
      %cst_12 = arith.constant 0.000000e+00 : f32
      %13 = vector.broadcast %cst_12 : f32 to vector<256x128xf32>
      %14 = arith.maximumf %12, %13 : vector<256x128xf32>
      %15 = arith.truncf %14 : vector<256x128xf32> to vector<256x128xbf16>
      %c0_13 = arith.constant 0 : index
      %c0_14 = arith.constant 0 : index
      %16 = vector.load %arg5[%c0_13, %c0_14] : memref<256x128xbf16, #tpu.memory_space<vmem>>, vector<256x128xbf16>
      tpu.vector_store %arg5[%c0_13, %c0_14], %15 {strides = array<i32>} : memref<256x128xbf16, #tpu.memory_space<vmem>>, vector<256x128xbf16>,
    } else {
    }
    return
  }
  func.func @transform_0(%arg0: i32, %arg1: i32, %arg2: i32) -> (i32, i32) {
    %c0_i32 = arith.constant 0 : i32
    return %arg0, %arg2 : i32, i32
  }
  func.func @transform_1(%arg0: i32, %arg1: i32, %arg2: i32) -> (i32, i32) {
    %c0_i32 = arith.constant 0 : i32
    return %arg2, %arg1 : i32, i32
  }
  func.func @transform_2(%arg0: i32, %arg1: i32, %arg2: i32) -> (i32, i32) {
    %c0_i32 = arith.constant 0 : i32
    return %arg0, %arg1 : i32, i32
  }
}

module attributes {stable_mosaic.version = 11 : i64} {
  func.func @_mm_kernel(%arg0: i32, %arg1: i32, %arg2: i32, %arg3: memref<256x384xbf16, #tpu.memory_space<vmem>>, %arg4: memref<384x128xbf16, #tpu.memory_space<vmem>>, %arg5: memref<256x128xbf16, #tpu.memory_space<vmem>>, %arg6: memref<256x128xf32, #tpu.memory_space<vmem>>) attributes {dimension_semantics = [#tpu.dimension_semantics<parallel>, #tpu.dimension_semantics<parallel>, #tpu.dimension_semantics<arbitrary>], iteration_bounds = array<i64: 2, 1, 1>, scalar_prefetch = 0 : i64, scratch_operands = 1 : i64, tpu.core_type = #tpu.core_type<tc>, window_params = [{transform_indices = @transform_0, window_bounds = array<i64: 256, 384>}, {transform_indices = @transform_1, window_bounds = array<i64: 384, 128>}, {transform_indices = @transform_2, window_bounds = array<i64: 256, 128>}]} {
    %c0_i32 = arith.constant 0 : i32
    %0 = arith.cmpi eq, %arg2, %c0_i32 : i32
    %1 = arith.extui %0 : i1 to i32
    %c0_i32_0 = arith.constant 0 : i32
    %2 = arith.cmpi ne, %1, %c0_i32_0 : i32
    scf.if %2 {
      %cst_10 = arith.constant 0.000000e+00 : f32
      %12 = vector.broadcast %cst_10 : f32 to vector<256x128xf32>
      %c0_11 = arith.constant 0 : index
      %c0_12 = arith.constant 0 : index
      %13 = vector.load %arg6[%c0_11, %c0_12] : memref<256x128xf32, #tpu.memory_space<vmem>>, vector<256x128xf32>
      tpu.vector_store %arg6[%c0_11, %c0_12], %12 {strides = array<i32>} : memref<256x128xf32, #tpu.memory_space<vmem>>, vector<256x128xf32>,
    } else {
    }
    %c0 = arith.constant 0 : index
    %c0_1 = arith.constant 0 : index
    %3 = vector.load %arg3[%c0, %c0_1] : memref<256x384xbf16, #tpu.memory_space<vmem>>, vector<256x384xbf16>
    %c0_2 = arith.constant 0 : index
    %c0_3 = arith.constant 0 : index
    %4 = vector.load %arg6[%c0_2, %c0_3] : memref<256x128xf32, #tpu.memory_space<vmem>>, vector<256x128xf32>
    %c0_4 = arith.constant 0 : index
    %c0_5 = arith.constant 0 : index
    %5 = vector.load %arg4[%c0_4, %c0_5] : memref<384x128xbf16, #tpu.memory_space<vmem>>, vector<384x128xbf16>
    %cst = arith.constant dense<0.000000e+00> : vector<256x128xf32>
    %6 = tpu.matmul %3, %5, %cst {dimension_numbers = #tpu.dot_dimension_numbers<[1], [0], [0], [1], [0, 0, 1, 1], [], []>} : vector<256x384xbf16>, vector<384x128xbf16>, vector<256x128xf32> -> vector<256x128xf32>
    %7 = arith.addf %4, %6 : vector<256x128xf32>
    %c0_6 = arith.constant 0 : index
    %c0_7 = arith.constant 0 : index
    %8 = vector.load %arg6[%c0_6, %c0_7] : memref<256x128xf32, #tpu.memory_space<vmem>>, vector<256x128xf32>
    tpu.vector_store %arg6[%c0_6, %c0_7], %7 {strides = array<i32>} : memref<256x128xf32, #tpu.memory_space<vmem>>, vector<256x128xf32>,
    %c0_i32_8 = arith.constant 0 : i32
    %9 = arith.cmpi eq, %arg2, %c0_i32_8 : i32
    %10 = arith.extui %9 : i1 to i32
    %c0_i32_9 = arith.constant 0 : i32
    %11 = arith.cmpi ne, %10, %c0_i32_9 : i32
    scf.if %11 {
      %c0_10 = arith.constant 0 : index
      %c0_11 = arith.constant 0 : index
      %12 = vector.load %arg6[%c0_10, %c0_11] : memref<256x128xf32, #tpu.memory_space<vmem>>, vector<256x128xf32>
      %cst_12 = arith.constant 0.000000e+00 : f32
      %13 = vector.broadcast %cst_12 : f32 to vector<256x128xf32>
      %14 = arith.maximumf %12, %13 : vector<256x128xf32>
      %15 = arith.truncf %14 : vector<256x128xf32> to vector<256x128xbf16>
      %c0_13 = arith.constant 0 : index
      %c0_14 = arith.constant 0 : index
      %16 = vector.load %arg5[%c0_13, %c0_14] : memref<256x128xbf16, #tpu.memory_space<vmem>>, vector<256x128xbf16>
      tpu.vector_store %arg5[%c0_13, %c0_14], %15 {strides = array<i32>} : memref<256x128xbf16, #tpu.memory_space<vmem>>, vector<256x128xbf16>,
    } else {
    }
    return
  }
  func.func @transform_0(%arg0: i32, %arg1: i32, %arg2: i32) -> (i32, i32) {
    %c0_i32 = arith.constant 0 : i32
    return %arg0, %arg2 : i32, i32
  }
  func.func @transform_1(%arg0: i32, %arg1: i32, %arg2: i32) -> (i32, i32) {
    %c0_i32 = arith.constant 0 : i32
    return %arg2, %arg1 : i32, i32
  }
  func.func @transform_2(%arg0: i32, %arg1: i32, %arg2: i32) -> (i32, i32) {
    %c0_i32 = arith.constant 0 : i32
    return %arg0, %arg1 : i32, i32
  }
}

module attributes {stable_mosaic.version = 11 : i64} {
  func.func @_mm_kernel(%arg0: i32, %arg1: i32, %arg2: i32, %arg3: memref<256x128xbf16, #tpu.memory_space<vmem>>, %arg4: memref<128x128xbf16, #tpu.memory_space<vmem>>, %arg5: memref<256x128xbf16, #tpu.memory_space<vmem>>, %arg6: memref<256x128xf32, #tpu.memory_space<vmem>>) attributes {dimension_semantics = [#tpu.dimension_semantics<parallel>, #tpu.dimension_semantics<parallel>, #tpu.dimension_semantics<arbitrary>], iteration_bounds = array<i64: 2, 1, 1>, scalar_prefetch = 0 : i64, scratch_operands = 1 : i64, tpu.core_type = #tpu.core_type<tc>, window_params = [{transform_indices = @transform_0, window_bounds = array<i64: 256, 128>}, {transform_indices = @transform_1, window_bounds = array<i64: 128, 128>}, {transform_indices = @transform_2, window_bounds = array<i64: 256, 128>}]} {
    %c0_i32 = arith.constant 0 : i32
    %0 = arith.cmpi eq, %arg2, %c0_i32 : i32
    %1 = arith.extui %0 : i1 to i32
    %c0_i32_0 = arith.constant 0 : i32
    %2 = arith.cmpi ne, %1, %c0_i32_0 : i32
    scf.if %2 {
      %cst_10 = arith.constant 0.000000e+00 : f32
      %12 = vector.broadcast %cst_10 : f32 to vector<256x128xf32>
      %c0_11 = arith.constant 0 : index
      %c0_12 = arith.constant 0 : index
      %13 = vector.load %arg6[%c0_11, %c0_12] : memref<256x128xf32, #tpu.memory_space<vmem>>, vector<256x128xf32>
      tpu.vector_store %arg6[%c0_11, %c0_12], %12 {strides = array<i32>} : memref<256x128xf32, #tpu.memory_space<vmem>>, vector<256x128xf32>,
    } else {
    }
    %c0 = arith.constant 0 : index
    %c0_1 = arith.constant 0 : index
    %3 = vector.load %arg3[%c0, %c0_1] : memref<256x128xbf16, #tpu.memory_space<vmem>>, vector<256x128xbf16>
    %c0_2 = arith.constant 0 : index
    %c0_3 = arith.constant 0 : index
    %4 = vector.load %arg6[%c0_2, %c0_3] : memref<256x128xf32, #tpu.memory_space<vmem>>, vector<256x128xf32>
    %c0_4 = arith.constant 0 : index
    %c0_5 = arith.constant 0 : index
    %5 = vector.load %arg4[%c0_4, %c0_5] : memref<128x128xbf16, #tpu.memory_space<vmem>>, vector<128x128xbf16>
    %cst = arith.constant dense<0.000000e+00> : vector<256x128xf32>
    %6 = tpu.matmul %3, %5, %cst {dimension_numbers = #tpu.dot_dimension_numbers<[1], [0], [0], [1], [0, 0, 1, 1], [], []>} : vector<256x128xbf16>, vector<128x128xbf16>, vector<256x128xf32> -> vector<256x128xf32>
    %7 = arith.addf %4, %6 : vector<256x128xf32>
    %c0_6 = arith.constant 0 : index
    %c0_7 = arith.constant 0 : index
    %8 = vector.load %arg6[%c0_6, %c0_7] : memref<256x128xf32, #tpu.memory_space<vmem>>, vector<256x128xf32>
    tpu.vector_store %arg6[%c0_6, %c0_7], %7 {strides = array<i32>} : memref<256x128xf32, #tpu.memory_space<vmem>>, vector<256x128xf32>,
    %c0_i32_8 = arith.constant 0 : i32
    %9 = arith.cmpi eq, %arg2, %c0_i32_8 : i32
    %10 = arith.extui %9 : i1 to i32
    %c0_i32_9 = arith.constant 0 : i32
    %11 = arith.cmpi ne, %10, %c0_i32_9 : i32
    scf.if %11 {
      %c0_10 = arith.constant 0 : index
      %c0_11 = arith.constant 0 : index
      %12 = vector.load %arg6[%c0_10, %c0_11] : memref<256x128xf32, #tpu.memory_space<vmem>>, vector<256x128xf32>
      %13 = arith.truncf %12 : vector<256x128xf32> to vector<256x128xbf16>
      %c0_12 = arith.constant 0 : index
      %c0_13 = arith.constant 0 : index
      %14 = vector.load %arg5[%c0_12, %c0_13] : memref<256x128xbf16, #tpu.memory_space<vmem>>, vector<256x128xbf16>
      tpu.vector_store %arg5[%c0_12, %c0_13], %13 {strides = array<i32>} : memref<256x128xbf16, #tpu.memory_space<vmem>>, vector<256x128xbf16>,
    } else {
    }
    return
  }
  func.func @transform_0(%arg0: i32, %arg1: i32, %arg2: i32) -> (i32, i32) {
    %c0_i32 = arith.constant 0 : i32
    return %arg0, %arg2 : i32, i32
  }
  func.func @transform_1(%arg0: i32, %arg1: i32, %arg2: i32) -> (i32, i32) {
    %c0_i32 = arith.constant 0 : i32
    return %arg2, %arg1 : i32, i32
  }
  func.func @transform_2(%arg0: i32, %arg1: i32, %arg2: i32) -> (i32, i32) {
    %c0_i32 = arith.constant 0 : i32
    return %arg0, %arg1 : i32, i32
  }
}

module attributes {stable_mosaic.version = 11 : i64} {
  func.func @_mm_kernel(%arg0: i32, %arg1: i32, %arg2: i32, %arg3: memref<256x384xbf16, #tpu.memory_space<vmem>>, %arg4: memref<384x128xbf16, #tpu.memory_space<vmem>>, %arg5: memref<256x128xbf16, #tpu.memory_space<vmem>>, %arg6: memref<256x128xbf16, #tpu.memory_space<vmem>>, %arg7: memref<256x128xf32, #tpu.memory_space<vmem>>) attributes {dimension_semantics = [#tpu.dimension_semantics<parallel>, #tpu.dimension_semantics<parallel>, #tpu.dimension_semantics<arbitrary>], iteration_bounds = array<i64: 2, 1, 1>, scalar_prefetch = 0 : i64, scratch_operands = 1 : i64, tpu.core_type = #tpu.core_type<tc>, window_params = [{transform_indices = @transform_0, window_bounds = array<i64: 256, 384>}, {transform_indices = @transform_1, window_bounds = array<i64: 384, 128>}, {transform_indices = @transform_2, window_bounds = array<i64: 256, 128>}, {transform_indices = @transform_3, window_bounds = array<i64: 256, 128>}]} {
    %c0_i32 = arith.constant 0 : i32
    %0 = arith.cmpi eq, %arg2, %c0_i32 : i32
    %1 = arith.extui %0 : i1 to i32
    %c0_i32_0 = arith.constant 0 : i32
    %2 = arith.cmpi ne, %1, %c0_i32_0 : i32
    scf.if %2 {
      %cst_10 = arith.constant 0.000000e+00 : f32
      %12 = vector.broadcast %cst_10 : f32 to vector<256x128xf32>
      %c0_11 = arith.constant 0 : index
      %c0_12 = arith.constant 0 : index
      %13 = vector.load %arg7[%c0_11, %c0_12] : memref<256x128xf32, #tpu.memory_space<vmem>>, vector<256x128xf32>
      tpu.vector_store %arg7[%c0_11, %c0_12], %12 {strides = array<i32>} : memref<256x128xf32, #tpu.memory_space<vmem>>, vector<256x128xf32>,
    } else {
    }
    %c0 = arith.constant 0 : index
    %c0_1 = arith.constant 0 : index
    %3 = vector.load %arg3[%c0, %c0_1] : memref<256x384xbf16, #tpu.memory_space<vmem>>, vector<256x384xbf16>
    %c0_2 = arith.constant 0 : index
    %c0_3 = arith.constant 0 : index
    %4 = vector.load %arg7[%c0_2, %c0_3] : memref<256x128xf32, #tpu.memory_space<vmem>>, vector<256x128xf32>
    %c0_4 = arith.constant 0 : index
    %c0_5 = arith.constant 0 : index
    %5 = vector.load %arg4[%c0_4, %c0_5] : memref<384x128xbf16, #tpu.memory_space<vmem>>, vector<384x128xbf16>
    %cst = arith.constant dense<0.000000e+00> : vector<256x128xf32>
    %6 = tpu.matmul %3, %5, %cst {dimension_numbers = #tpu.dot_dimension_numbers<[1], [0], [0], [1], [0, 0, 1, 1], [], []>} : vector<256x384xbf16>, vector<384x128xbf16>, vector<256x128xf32> -> vector<256x128xf32>
    %7 = arith.addf %4, %6 : vector<256x128xf32>
    %c0_6 = arith.constant 0 : index
    %c0_7 = arith.constant 0 : index
    %8 = vector.load %arg7[%c0_6, %c0_7] : memref<256x128xf32, #tpu.memory_space<vmem>>, vector<256x128xf32>
    tpu.vector_store %arg7[%c0_6, %c0_7], %7 {strides = array<i32>} : memref<256x128xf32, #tpu.memory_space<vmem>>, vector<256x128xf32>,
    %c0_i32_8 = arith.constant 0 : i32
    %9 = arith.cmpi eq, %arg2, %c0_i32_8 : i32
    %10 = arith.extui %9 : i1 to i32
    %c0_i32_9 = arith.constant 0 : i32
    %11 = arith.cmpi ne, %10, %c0_i32_9 : i32
    scf.if %11 {
      %c0_10 = arith.constant 0 : index
      %c0_11 = arith.constant 0 : index
      %12 = vector.load %arg7[%c0_10, %c0_11] : memref<256x128xf32, #tpu.memory_space<vmem>>, vector<256x128xf32>
      %c0_12 = arith.constant 0 : index
      %c0_13 = arith.constant 0 : index
      %13 = vector.load %arg5[%c0_12, %c0_13] : memref<256x128xbf16, #tpu.memory_space<vmem>>, vector<256x128xbf16>
      %14 = arith.extf %13 : vector<256x128xbf16> to vector<256x128xf32>
      %15 = arith.addf %12, %14 : vector<256x128xf32>
      %cst_14 = arith.constant 0.000000e+00 : f32
      %16 = vector.broadcast %cst_14 : f32 to vector<256x128xf32>
      %17 = arith.maximumf %15, %16 : vector<256x128xf32>
      %18 = arith.truncf %17 : vector<256x128xf32> to vector<256x128xbf16>
      %c0_15 = arith.constant 0 : index
      %c0_16 = arith.constant 0 : index
      %19 = vector.load %arg6[%c0_15, %c0_16] : memref<256x128xbf16, #tpu.memory_space<vmem>>, vector<256x128xbf16>
      tpu.vector_store %arg6[%c0_15, %c0_16], %18 {strides = array<i32>} : memref<256x128xbf16, #tpu.memory_space<vmem>>, vector<256x128xbf16>,
    } else {
    }
    return
  }
  func.func @transform_0(%arg0: i32, %arg1: i32, %arg2: i32) -> (i32, i32) {
    %c0_i32 = arith.constant 0 : i32
    return %arg0, %arg2 : i32, i32
  }
  func.func @transform_1(%arg0: i32, %arg1: i32, %arg2: i32) -> (i32, i32) {
    %c0_i32 = arith.constant 0 : i32
    return %arg2, %arg1 : i32, i32
  }
  func.func @transform_2(%arg0: i32, %arg1: i32, %arg2: i32) -> (i32, i32) {
    %c0_i32 = arith.constant 0 : i32
    return %arg0, %arg1 : i32, i32
  }
  func.func @transform_3(%arg0: i32, %arg1: i32, %arg2: i32) -> (i32, i32) {
    %c0_i32 = arith.constant 0 : i32
    return %arg0, %arg1 : i32, i32
  }
}

module attributes {stable_mosaic.version = 11 : i64} {
  func.func @_mm_kernel(%arg0: i32, %arg1: i32, %arg2: i32, %arg3: memref<256x384xbf16, #tpu.memory_space<vmem>>, %arg4: memref<384x128xbf16, #tpu.memory_space<vmem>>, %arg5: memref<256x128xbf16, #tpu.memory_space<vmem>>, %arg6: memref<256x128xf32, #tpu.memory_space<vmem>>) attributes {dimension_semantics = [#tpu.dimension_semantics<parallel>, #tpu.dimension_semantics<parallel>, #tpu.dimension_semantics<arbitrary>], iteration_bounds = array<i64: 1, 1, 1>, scalar_prefetch = 0 : i64, scratch_operands = 1 : i64, tpu.core_type = #tpu.core_type<tc>, window_params = [{transform_indices = @transform_0, window_bounds = array<i64: 256, 384>}, {transform_indices = @transform_1, window_bounds = array<i64: 384, 128>}, {transform_indices = @transform_2, window_bounds = array<i64: 256, 128>}]} {
    %c0_i32 = arith.constant 0 : i32
    %0 = arith.cmpi eq, %arg2, %c0_i32 : i32
    %1 = arith.extui %0 : i1 to i32
    %c0_i32_0 = arith.constant 0 : i32
    %2 = arith.cmpi ne, %1, %c0_i32_0 : i32
    scf.if %2 {
      %cst_10 = arith.constant 0.000000e+00 : f32
      %12 = vector.broadcast %cst_10 : f32 to vector<256x128xf32>
      %c0_11 = arith.constant 0 : index
      %c0_12 = arith.constant 0 : index
      %13 = vector.load %arg6[%c0_11, %c0_12] : memref<256x128xf32, #tpu.memory_space<vmem>>, vector<256x128xf32>
      tpu.vector_store %arg6[%c0_11, %c0_12], %12 {strides = array<i32>} : memref<256x128xf32, #tpu.memory_space<vmem>>, vector<256x128xf32>,
    } else {
    }
    %c0 = arith.constant 0 : index
    %c0_1 = arith.constant 0 : index
    %3 = vector.load %arg3[%c0, %c0_1] : memref<256x384xbf16, #tpu.memory_space<vmem>>, vector<256x384xbf16>
    %c0_2 = arith.constant 0 : index
    %c0_3 = arith.constant 0 : index
    %4 = vector.load %arg6[%c0_2, %c0_3] : memref<256x128xf32, #tpu.memory_space<vmem>>, vector<256x128xf32>
    %c0_4 = arith.constant 0 : index
    %c0_5 = arith.constant 0 : index
    %5 = vector.load %arg4[%c0_4, %c0_5] : memref<384x128xbf16, #tpu.memory_space<vmem>>, vector<384x128xbf16>
    %cst = arith.constant dense<0.000000e+00> : vector<256x128xf32>
    %6 = tpu.matmul %3, %5, %cst {dimension_numbers = #tpu.dot_dimension_numbers<[1], [0], [0], [1], [0, 0, 1, 1], [], []>} : vector<256x384xbf16>, vector<384x128xbf16>, vector<256x128xf32> -> vector<256x128xf32>
    %7 = arith.addf %4, %6 : vector<256x128xf32>
    %c0_6 = arith.constant 0 : index
    %c0_7 = arith.constant 0 : index
    %8 = vector.load %arg6[%c0_6, %c0_7] : memref<256x128xf32, #tpu.memory_space<vmem>>, vector<256x128xf32>
    tpu.vector_store %arg6[%c0_6, %c0_7], %7 {strides = array<i32>} : memref<256x128xf32, #tpu.memory_space<vmem>>, vector<256x128xf32>,
    %c0_i32_8 = arith.constant 0 : i32
    %9 = arith.cmpi eq, %arg2, %c0_i32_8 : i32
    %10 = arith.extui %9 : i1 to i32
    %c0_i32_9 = arith.constant 0 : i32
    %11 = arith.cmpi ne, %10, %c0_i32_9 : i32
    scf.if %11 {
      %c0_10 = arith.constant 0 : index
      %c0_11 = arith.constant 0 : index
      %12 = vector.load %arg6[%c0_10, %c0_11] : memref<256x128xf32, #tpu.memory_space<vmem>>, vector<256x128xf32>
      %cst_12 = arith.constant 0.000000e+00 : f32
      %13 = vector.broadcast %cst_12 : f32 to vector<256x128xf32>
      %14 = arith.maximumf %12, %13 : vector<256x128xf32>
      %15 = arith.truncf %14 : vector<256x128xf32> to vector<256x128xbf16>
      %c0_13 = arith.constant 0 : index
      %c0_14 = arith.constant 0 : index
      %16 = vector.load %arg5[%c0_13, %c0_14] : memref<256x128xbf16, #tpu.memory_space<vmem>>, vector<256x128xbf16>
      tpu.vector_store %arg5[%c0_13, %c0_14], %15 {strides = array<i32>} : memref<256x128xbf16, #tpu.memory_space<vmem>>, vector<256x128xbf16>,
    } else {
    }
    return
  }
  func.func @transform_0(%arg0: i32, %arg1: i32, %arg2: i32) -> (i32, i32) {
    %c0_i32 = arith.constant 0 : i32
    return %arg0, %arg2 : i32, i32
  }
  func.func @transform_1(%arg0: i32, %arg1: i32, %arg2: i32) -> (i32, i32) {
    %c0_i32 = arith.constant 0 : i32
    return %arg2, %arg1 : i32, i32
  }
  func.func @transform_2(%arg0: i32, %arg1: i32, %arg2: i32) -> (i32, i32) {
    %c0_i32 = arith.constant 0 : i32
    return %arg0, %arg1 : i32, i32
  }
}

module attributes {stable_mosaic.version = 11 : i64} {
  func.func @_mm_kernel(%arg0: i32, %arg1: i32, %arg2: i32, %arg3: memref<256x128xbf16, #tpu.memory_space<vmem>>, %arg4: memref<128x128xbf16, #tpu.memory_space<vmem>>, %arg5: memref<256x128xbf16, #tpu.memory_space<vmem>>, %arg6: memref<256x128xf32, #tpu.memory_space<vmem>>) attributes {dimension_semantics = [#tpu.dimension_semantics<parallel>, #tpu.dimension_semantics<parallel>, #tpu.dimension_semantics<arbitrary>], iteration_bounds = array<i64: 1, 1, 1>, scalar_prefetch = 0 : i64, scratch_operands = 1 : i64, tpu.core_type = #tpu.core_type<tc>, window_params = [{transform_indices = @transform_0, window_bounds = array<i64: 256, 128>}, {transform_indices = @transform_1, window_bounds = array<i64: 128, 128>}, {transform_indices = @transform_2, window_bounds = array<i64: 256, 128>}]} {
    %c0_i32 = arith.constant 0 : i32
    %0 = arith.cmpi eq, %arg2, %c0_i32 : i32
    %1 = arith.extui %0 : i1 to i32
    %c0_i32_0 = arith.constant 0 : i32
    %2 = arith.cmpi ne, %1, %c0_i32_0 : i32
    scf.if %2 {
      %cst_10 = arith.constant 0.000000e+00 : f32
      %12 = vector.broadcast %cst_10 : f32 to vector<256x128xf32>
      %c0_11 = arith.constant 0 : index
      %c0_12 = arith.constant 0 : index
      %13 = vector.load %arg6[%c0_11, %c0_12] : memref<256x128xf32, #tpu.memory_space<vmem>>, vector<256x128xf32>
      tpu.vector_store %arg6[%c0_11, %c0_12], %12 {strides = array<i32>} : memref<256x128xf32, #tpu.memory_space<vmem>>, vector<256x128xf32>,
    } else {
    }
    %c0 = arith.constant 0 : index
    %c0_1 = arith.constant 0 : index
    %3 = vector.load %arg3[%c0, %c0_1] : memref<256x128xbf16, #tpu.memory_space<vmem>>, vector<256x128xbf16>
    %c0_2 = arith.constant 0 : index
    %c0_3 = arith.constant 0 : index
    %4 = vector.load %arg6[%c0_2, %c0_3] : memref<256x128xf32, #tpu.memory_space<vmem>>, vector<256x128xf32>
    %c0_4 = arith.constant 0 : index
    %c0_5 = arith.constant 0 : index
    %5 = vector.load %arg4[%c0_4, %c0_5] : memref<128x128xbf16, #tpu.memory_space<vmem>>, vector<128x128xbf16>
    %cst = arith.constant dense<0.000000e+00> : vector<256x128xf32>
    %6 = tpu.matmul %3, %5, %cst {dimension_numbers = #tpu.dot_dimension_numbers<[1], [0], [0], [1], [0, 0, 1, 1], [], []>} : vector<256x128xbf16>, vector<128x128xbf16>, vector<256x128xf32> -> vector<256x128xf32>
    %7 = arith.addf %4, %6 : vector<256x128xf32>
    %c0_6 = arith.constant 0 : index
    %c0_7 = arith.constant 0 : index
    %8 = vector.load %arg6[%c0_6, %c0_7] : memref<256x128xf32, #tpu.memory_space<vmem>>, vector<256x128xf32>
    tpu.vector_store %arg6[%c0_6, %c0_7], %7 {strides = array<i32>} : memref<256x128xf32, #tpu.memory_space<vmem>>, vector<256x128xf32>,
    %c0_i32_8 = arith.constant 0 : i32
    %9 = arith.cmpi eq, %arg2, %c0_i32_8 : i32
    %10 = arith.extui %9 : i1 to i32
    %c0_i32_9 = arith.constant 0 : i32
    %11 = arith.cmpi ne, %10, %c0_i32_9 : i32
    scf.if %11 {
      %c0_10 = arith.constant 0 : index
      %c0_11 = arith.constant 0 : index
      %12 = vector.load %arg6[%c0_10, %c0_11] : memref<256x128xf32, #tpu.memory_space<vmem>>, vector<256x128xf32>
      %13 = arith.truncf %12 : vector<256x128xf32> to vector<256x128xbf16>
      %c0_12 = arith.constant 0 : index
      %c0_13 = arith.constant 0 : index
      %14 = vector.load %arg5[%c0_12, %c0_13] : memref<256x128xbf16, #tpu.memory_space<vmem>>, vector<256x128xbf16>
      tpu.vector_store %arg5[%c0_12, %c0_13], %13 {strides = array<i32>} : memref<256x128xbf16, #tpu.memory_space<vmem>>, vector<256x128xbf16>,
    } else {
    }
    return
  }
  func.func @transform_0(%arg0: i32, %arg1: i32, %arg2: i32) -> (i32, i32) {
    %c0_i32 = arith.constant 0 : i32
    return %arg0, %arg2 : i32, i32
  }
  func.func @transform_1(%arg0: i32, %arg1: i32, %arg2: i32) -> (i32, i32) {
    %c0_i32 = arith.constant 0 : i32
    return %arg2, %arg1 : i32, i32
  }
  func.func @transform_2(%arg0: i32, %arg1: i32, %arg2: i32) -> (i32, i32) {
    %c0_i32 = arith.constant 0 : i32
    return %arg0, %arg1 : i32, i32
  }
}

module attributes {stable_mosaic.version = 11 : i64} {
  func.func @_mm_kernel(%arg0: i32, %arg1: i32, %arg2: i32, %arg3: memref<256x384xbf16, #tpu.memory_space<vmem>>, %arg4: memref<384x128xbf16, #tpu.memory_space<vmem>>, %arg5: memref<256x128xbf16, #tpu.memory_space<vmem>>, %arg6: memref<256x128xbf16, #tpu.memory_space<vmem>>, %arg7: memref<256x128xf32, #tpu.memory_space<vmem>>) attributes {dimension_semantics = [#tpu.dimension_semantics<parallel>, #tpu.dimension_semantics<parallel>, #tpu.dimension_semantics<arbitrary>], iteration_bounds = array<i64: 1, 1, 1>, scalar_prefetch = 0 : i64, scratch_operands = 1 : i64, tpu.core_type = #tpu.core_type<tc>, window_params = [{transform_indices = @transform_0, window_bounds = array<i64: 256, 384>}, {transform_indices = @transform_1, window_bounds = array<i64: 384, 128>}, {transform_indices = @transform_2, window_bounds = array<i64: 256, 128>}, {transform_indices = @transform_3, window_bounds = array<i64: 256, 128>}]} {
    %c0_i32 = arith.constant 0 : i32
    %0 = arith.cmpi eq, %arg2, %c0_i32 : i32
    %1 = arith.extui %0 : i1 to i32
    %c0_i32_0 = arith.constant 0 : i32
    %2 = arith.cmpi ne, %1, %c0_i32_0 : i32
    scf.if %2 {
      %cst_10 = arith.constant 0.000000e+00 : f32
      %12 = vector.broadcast %cst_10 : f32 to vector<256x128xf32>
      %c0_11 = arith.constant 0 : index
      %c0_12 = arith.constant 0 : index
      %13 = vector.load %arg7[%c0_11, %c0_12] : memref<256x128xf32, #tpu.memory_space<vmem>>, vector<256x128xf32>
      tpu.vector_store %arg7[%c0_11, %c0_12], %12 {strides = array<i32>} : memref<256x128xf32, #tpu.memory_space<vmem>>, vector<256x128xf32>,
    } else {
    }
    %c0 = arith.constant 0 : index
    %c0_1 = arith.constant 0 : index
    %3 = vector.load %arg3[%c0, %c0_1] : memref<256x384xbf16, #tpu.memory_space<vmem>>, vector<256x384xbf16>
    %c0_2 = arith.constant 0 : index
    %c0_3 = arith.constant 0 : index
    %4 = vector.load %arg7[%c0_2, %c0_3] : memref<256x128xf32, #tpu.memory_space<vmem>>, vector<256x128xf32>
    %c0_4 = arith.constant 0 : index
    %c0_5 = arith.constant 0 : index
    %5 = vector.load %arg4[%c0_4, %c0_5] : memref<384x128xbf16, #tpu.memory_space<vmem>>, vector<384x128xbf16>
    %cst = arith.constant dense<0.000000e+00> : vector<256x128xf32>
    %6 = tpu.matmul %3, %5, %cst {dimension_numbers = #tpu.dot_dimension_numbers<[1], [0], [0], [1], [0, 0, 1, 1], [], []>} : vector<256x384xbf16>, vector<384x128xbf16>, vector<256x128xf32> -> vector<256x128xf32>
    %7 = arith.addf %4, %6 : vector<256x128xf32>
    %c0_6 = arith.constant 0 : index
    %c0_7 = arith.constant 0 : index
    %8 = vector.load %arg7[%c0_6, %c0_7] : memref<256x128xf32, #tpu.memory_space<vmem>>, vector<256x128xf32>
    tpu.vector_store %arg7[%c0_6, %c0_7], %7 {strides = array<i32>} : memref<256x128xf32, #tpu.memory_space<vmem>>, vector<256x128xf32>,
    %c0_i32_8 = arith.constant 0 : i32
    %9 = arith.cmpi eq, %arg2, %c0_i32_8 : i32
    %10 = arith.extui %9 : i1 to i32
    %c0_i32_9 = arith.constant 0 : i32
    %11 = arith.cmpi ne, %10, %c0_i32_9 : i32
    scf.if %11 {
      %c0_10 = arith.constant 0 : index
      %c0_11 = arith.constant 0 : index
      %12 = vector.load %arg7[%c0_10, %c0_11] : memref<256x128xf32, #tpu.memory_space<vmem>>, vector<256x128xf32>
      %c0_12 = arith.constant 0 : index
      %c0_13 = arith.constant 0 : index
      %13 = vector.load %arg5[%c0_12, %c0_13] : memref<256x128xbf16, #tpu.memory_space<vmem>>, vector<256x128xbf16>
      %14 = arith.extf %13 : vector<256x128xbf16> to vector<256x128xf32>
      %15 = arith.addf %12, %14 : vector<256x128xf32>
      %cst_14 = arith.constant 0.000000e+00 : f32
      %16 = vector.broadcast %cst_14 : f32 to vector<256x128xf32>
      %17 = arith.maximumf %15, %16 : vector<256x128xf32>
      %18 = arith.truncf %17 : vector<256x128xf32> to vector<256x128xbf16>
      %c0_15 = arith.constant 0 : index
      %c0_16 = arith.constant 0 : index
      %19 = vector.load %arg6[%c0_15, %c0_16] : memref<256x128xbf16, #tpu.memory_space<vmem>>, vector<256x128xbf16>
      tpu.vector_store %arg6[%c0_15, %c0_16], %18 {strides = array<i32>} : memref<256x128xbf16, #tpu.memory_space<vmem>>, vector<256x128xbf16>,
    } else {
    }
    return
  }
  func.func @transform_0(%arg0: i32, %arg1: i32, %arg2: i32) -> (i32, i32) {
    %c0_i32 = arith.constant 0 : i32
    return %arg0, %arg2 : i32, i32
  }
  func.func @transform_1(%arg0: i32, %arg1: i32, %arg2: i32) -> (i32, i32) {
    %c0_i32 = arith.constant 0 : i32
    return %arg2, %arg1 : i32, i32
  }
  func.func @transform_2(%arg0: i32, %arg1: i32, %arg2: i32) -> (i32, i32) {
    %c0_i32 = arith.constant 0 : i32
    return %arg0, %arg1 : i32, i32
  }
  func.func @transform_3(%arg0: i32, %arg1: i32, %arg2: i32) -> (i32, i32) {
    %c0_i32 = arith.constant 0 : i32
    return %arg0, %arg1 : i32, i32
  }
}

module attributes {stable_mosaic.version = 11 : i64} {
  func.func @_mm_kernel(%arg0: i32, %arg1: i32, %arg2: i32, %arg3: memref<128x384xbf16, #tpu.memory_space<vmem>>, %arg4: memref<384x128xbf16, #tpu.memory_space<vmem>>, %arg5: memref<128x128xbf16, #tpu.memory_space<vmem>>, %arg6: memref<128x128xf32, #tpu.memory_space<vmem>>) attributes {dimension_semantics = [#tpu.dimension_semantics<parallel>, #tpu.dimension_semantics<parallel>, #tpu.dimension_semantics<arbitrary>], iteration_bounds = array<i64: 1, 1, 1>, scalar_prefetch = 0 : i64, scratch_operands = 1 : i64, tpu.core_type = #tpu.core_type<tc>, window_params = [{transform_indices = @transform_0, window_bounds = array<i64: 128, 384>}, {transform_indices = @transform_1, window_bounds = array<i64: 384, 128>}, {transform_indices = @transform_2, window_bounds = array<i64: 128, 128>}]} {
    %c0_i32 = arith.constant 0 : i32
    %0 = arith.cmpi eq, %arg2, %c0_i32 : i32
    %1 = arith.extui %0 : i1 to i32
    %c0_i32_0 = arith.constant 0 : i32
    %2 = arith.cmpi ne, %1, %c0_i32_0 : i32
    scf.if %2 {
      %cst_10 = arith.constant 0.000000e+00 : f32
      %12 = vector.broadcast %cst_10 : f32 to vector<128x128xf32>
      %c0_11 = arith.constant 0 : index
      %c0_12 = arith.constant 0 : index
      %13 = vector.load %arg6[%c0_11, %c0_12] : memref<128x128xf32, #tpu.memory_space<vmem>>, vector<128x128xf32>
      tpu.vector_store %arg6[%c0_11, %c0_12], %12 {strides = array<i32>} : memref<128x128xf32, #tpu.memory_space<vmem>>, vector<128x128xf32>,
    } else {
    }
    %c0 = arith.constant 0 : index
    %c0_1 = arith.constant 0 : index
    %3 = vector.load %arg3[%c0, %c0_1] : memref<128x384xbf16, #tpu.memory_space<vmem>>, vector<128x384xbf16>
    %c0_2 = arith.constant 0 : index
    %c0_3 = arith.constant 0 : index
    %4 = vector.load %arg6[%c0_2, %c0_3] : memref<128x128xf32, #tpu.memory_space<vmem>>, vector<128x128xf32>
    %c0_4 = arith.constant 0 : index
    %c0_5 = arith.constant 0 : index
    %5 = vector.load %arg4[%c0_4, %c0_5] : memref<384x128xbf16, #tpu.memory_space<vmem>>, vector<384x128xbf16>
    %cst = arith.constant dense<0.000000e+00> : vector<128x128xf32>
    %6 = tpu.matmul %3, %5, %cst {dimension_numbers = #tpu.dot_dimension_numbers<[1], [0], [0], [1], [0, 0, 1, 1], [], []>} : vector<128x384xbf16>, vector<384x128xbf16>, vector<128x128xf32> -> vector<128x128xf32>
    %7 = arith.addf %4, %6 : vector<128x128xf32>
    %c0_6 = arith.constant 0 : index
    %c0_7 = arith.constant 0 : index
    %8 = vector.load %arg6[%c0_6, %c0_7] : memref<128x128xf32, #tpu.memory_space<vmem>>, vector<128x128xf32>
    tpu.vector_store %arg6[%c0_6, %c0_7], %7 {strides = array<i32>} : memref<128x128xf32, #tpu.memory_space<vmem>>, vector<128x128xf32>,
    %c0_i32_8 = arith.constant 0 : i32
    %9 = arith.cmpi eq, %arg2, %c0_i32_8 : i32
    %10 = arith.extui %9 : i1 to i32
    %c0_i32_9 = arith.constant 0 : i32
    %11 = arith.cmpi ne, %10, %c0_i32_9 : i32
    scf.if %11 {
      %c0_10 = arith.constant 0 : index
      %c0_11 = arith.constant 0 : index
      %12 = vector.load %arg6[%c0_10, %c0_11] : memref<128x128xf32, #tpu.memory_space<vmem>>, vector<128x128xf32>
      %cst_12 = arith.constant 0.000000e+00 : f32
      %13 = vector.broadcast %cst_12 : f32 to vector<128x128xf32>
      %14 = arith.maximumf %12, %13 : vector<128x128xf32>
      %15 = arith.truncf %14 : vector<128x128xf32> to vector<128x128xbf16>
      %c0_13 = arith.constant 0 : index
      %c0_14 = arith.constant 0 : index
      %16 = vector.load %arg5[%c0_13, %c0_14] : memref<128x128xbf16, #tpu.memory_space<vmem>>, vector<128x128xbf16>
      tpu.vector_store %arg5[%c0_13, %c0_14], %15 {strides = array<i32>} : memref<128x128xbf16, #tpu.memory_space<vmem>>, vector<128x128xbf16>,
    } else {
    }
    return
  }
  func.func @transform_0(%arg0: i32, %arg1: i32, %arg2: i32) -> (i32, i32) {
    %c0_i32 = arith.constant 0 : i32
    return %arg0, %arg2 : i32, i32
  }
  func.func @transform_1(%arg0: i32, %arg1: i32, %arg2: i32) -> (i32, i32) {
    %c0_i32 = arith.constant 0 : i32
    return %arg2, %arg1 : i32, i32
  }
  func.func @transform_2(%arg0: i32, %arg1: i32, %arg2: i32) -> (i32, i32) {
    %c0_i32 = arith.constant 0 : i32
    return %arg0, %arg1 : i32, i32
  }
}

module attributes {stable_mosaic.version = 11 : i64} {
  func.func @_mm_kernel(%arg0: i32, %arg1: i32, %arg2: i32, %arg3: memref<32x384xbf16, #tpu.memory_space<vmem>>, %arg4: memref<384x128xbf16, #tpu.memory_space<vmem>>, %arg5: memref<32x128xbf16, #tpu.memory_space<vmem>>, %arg6: memref<32x128xf32, #tpu.memory_space<vmem>>) attributes {dimension_semantics = [#tpu.dimension_semantics<parallel>, #tpu.dimension_semantics<parallel>, #tpu.dimension_semantics<arbitrary>], iteration_bounds = array<i64: 1, 1, 1>, scalar_prefetch = 0 : i64, scratch_operands = 1 : i64, tpu.core_type = #tpu.core_type<tc>, window_params = [{transform_indices = @transform_0, window_bounds = array<i64: 32, 384>}, {transform_indices = @transform_1, window_bounds = array<i64: 384, 128>}, {transform_indices = @transform_2, window_bounds = array<i64: 32, 128>}]} {
    %c0_i32 = arith.constant 0 : i32
    %0 = arith.cmpi eq, %arg2, %c0_i32 : i32
    %1 = arith.extui %0 : i1 to i32
    %c0_i32_0 = arith.constant 0 : i32
    %2 = arith.cmpi ne, %1, %c0_i32_0 : i32
    scf.if %2 {
      %cst_10 = arith.constant 0.000000e+00 : f32
      %12 = vector.broadcast %cst_10 : f32 to vector<32x128xf32>
      %c0_11 = arith.constant 0 : index
      %c0_12 = arith.constant 0 : index
      %13 = vector.load %arg6[%c0_11, %c0_12] : memref<32x128xf32, #tpu.memory_space<vmem>>, vector<32x128xf32>
      tpu.vector_store %arg6[%c0_11, %c0_12], %12 {strides = array<i32>} : memref<32x128xf32, #tpu.memory_space<vmem>>, vector<32x128xf32>,
    } else {
    }
    %c0 = arith.constant 0 : index
    %c0_1 = arith.constant 0 : index
    %3 = vector.load %arg3[%c0, %c0_1] : memref<32x384xbf16, #tpu.memory_space<vmem>>, vector<32x384xbf16>
    %c0_2 = arith.constant 0 : index
    %c0_3 = arith.constant 0 : index
    %4 = vector.load %arg6[%c0_2, %c0_3] : memref<32x128xf32, #tpu.memory_space<vmem>>, vector<32x128xf32>
    %c0_4 = arith.constant 0 : index
    %c0_5 = arith.constant 0 : index
    %5 = vector.load %arg4[%c0_4, %c0_5] : memref<384x128xbf16, #tpu.memory_space<vmem>>, vector<384x128xbf16>
    %cst = arith.constant dense<0.000000e+00> : vector<32x128xf32>
    %6 = tpu.matmul %3, %5, %cst {dimension_numbers = #tpu.dot_dimension_numbers<[1], [0], [0], [1], [0, 0, 1, 1], [], []>} : vector<32x384xbf16>, vector<384x128xbf16>, vector<32x128xf32> -> vector<32x128xf32>
    %7 = arith.addf %4, %6 : vector<32x128xf32>
    %c0_6 = arith.constant 0 : index
    %c0_7 = arith.constant 0 : index
    %8 = vector.load %arg6[%c0_6, %c0_7] : memref<32x128xf32, #tpu.memory_space<vmem>>, vector<32x128xf32>
    tpu.vector_store %arg6[%c0_6, %c0_7], %7 {strides = array<i32>} : memref<32x128xf32, #tpu.memory_space<vmem>>, vector<32x128xf32>,
    %c0_i32_8 = arith.constant 0 : i32
    %9 = arith.cmpi eq, %arg2, %c0_i32_8 : i32
    %10 = arith.extui %9 : i1 to i32
    %c0_i32_9 = arith.constant 0 : i32
    %11 = arith.cmpi ne, %10, %c0_i32_9 : i32
    scf.if %11 {
      %c0_10 = arith.constant 0 : index
      %c0_11 = arith.constant 0 : index
      %12 = vector.load %arg6[%c0_10, %c0_11] : memref<32x128xf32, #tpu.memory_space<vmem>>, vector<32x128xf32>
      %cst_12 = arith.constant 0.000000e+00 : f32
      %13 = vector.broadcast %cst_12 : f32 to vector<32x128xf32>
      %14 = arith.maximumf %12, %13 : vector<32x128xf32>
      %15 = arith.truncf %14 : vector<32x128xf32> to vector<32x128xbf16>
      %c0_13 = arith.constant 0 : index
      %c0_14 = arith.constant 0 : index
      %16 = vector.load %arg5[%c0_13, %c0_14] : memref<32x128xbf16, #tpu.memory_space<vmem>>, vector<32x128xbf16>
      tpu.vector_store %arg5[%c0_13, %c0_14], %15 {strides = array<i32>} : memref<32x128xbf16, #tpu.memory_space<vmem>>, vector<32x128xbf16>,
    } else {
    }
    return
  }
  func.func @transform_0(%arg0: i32, %arg1: i32, %arg2: i32) -> (i32, i32) {
    %c0_i32 = arith.constant 0 : i32
    return %arg0, %arg2 : i32, i32
  }
  func.func @transform_1(%arg0: i32, %arg1: i32, %arg2: i32) -> (i32, i32) {
    %c0_i32 = arith.constant 0 : i32
    return %arg2, %arg1 : i32, i32
  }
  func.func @transform_2(%arg0: i32, %arg1: i32, %arg2: i32) -> (i32, i32) {
    %c0_i32 = arith.constant 0 : i32
    return %arg0, %arg1 : i32, i32
  }
}

module attributes {stable_mosaic.version = 11 : i64} {
  func.func @_mm_kernel(%arg0: i32, %arg1: i32, %arg2: i32, %arg3: memref<16x128xbf16, #tpu.memory_space<vmem>>, %arg4: memref<128x128xbf16, #tpu.memory_space<vmem>>, %arg5: memref<1x128xf32, #tpu.memory_space<vmem>>, %arg6: memref<16x128xbf16, #tpu.memory_space<vmem>>, %arg7: memref<16x128xf32, #tpu.memory_space<vmem>>) attributes {dimension_semantics = [#tpu.dimension_semantics<parallel>, #tpu.dimension_semantics<parallel>, #tpu.dimension_semantics<arbitrary>], iteration_bounds = array<i64: 1, 1, 1>, scalar_prefetch = 0 : i64, scratch_operands = 1 : i64, tpu.core_type = #tpu.core_type<tc>, window_params = [{transform_indices = @transform_0, window_bounds = array<i64: 16, 128>}, {transform_indices = @transform_1, window_bounds = array<i64: 128, 128>}, {transform_indices = @transform_2, window_bounds = array<i64: 1, 128>}, {transform_indices = @transform_3, window_bounds = array<i64: 16, 128>}]} {
    %c0_i32 = arith.constant 0 : i32
    %0 = arith.cmpi eq, %arg2, %c0_i32 : i32
    %1 = arith.extui %0 : i1 to i32
    %c0_i32_0 = arith.constant 0 : i32
    %2 = arith.cmpi ne, %1, %c0_i32_0 : i32
    scf.if %2 {
      %cst_10 = arith.constant 0.000000e+00 : f32
      %12 = vector.broadcast %cst_10 : f32 to vector<16x128xf32>
      %c0_11 = arith.constant 0 : index
      %c0_12 = arith.constant 0 : index
      %13 = vector.load %arg7[%c0_11, %c0_12] : memref<16x128xf32, #tpu.memory_space<vmem>>, vector<16x128xf32>
      tpu.vector_store %arg7[%c0_11, %c0_12], %12 {strides = array<i32>} : memref<16x128xf32, #tpu.memory_space<vmem>>, vector<16x128xf32>,
    } else {
    }
    %c0 = arith.constant 0 : index
    %c0_1 = arith.constant 0 : index
    %3 = vector.load %arg3[%c0, %c0_1] : memref<16x128xbf16, #tpu.memory_space<vmem>>, vector<16x128xbf16>
    %c0_2 = arith.constant 0 : index
    %c0_3 = arith.constant 0 : index
    %4 = vector.load %arg7[%c0_2, %c0_3] : memref<16x128xf32, #tpu.memory_space<vmem>>, vector<16x128xf32>
    %c0_4 = arith.constant 0 : index
    %c0_5 = arith.constant 0 : index
    %5 = vector.load %arg4[%c0_4, %c0_5] : memref<128x128xbf16, #tpu.memory_space<vmem>>, vector<128x128xbf16>
    %cst = arith.constant dense<0.000000e+00> : vector<16x128xf32>
    %6 = tpu.matmul %3, %5, %cst {dimension_numbers = #tpu.dot_dimension_numbers<[1], [0], [0], [1], [0, 0, 1, 1], [], []>} : vector<16x128xbf16>, vector<128x128xbf16>, vector<16x128xf32> -> vector<16x128xf32>
    %7 = arith.addf %4, %6 : vector<16x128xf32>
    %c0_6 = arith.constant 0 : index
    %c0_7 = arith.constant 0 : index
    %8 = vector.load %arg7[%c0_6, %c0_7] : memref<16x128xf32, #tpu.memory_space<vmem>>, vector<16x128xf32>
    tpu.vector_store %arg7[%c0_6, %c0_7], %7 {strides = array<i32>} : memref<16x128xf32, #tpu.memory_space<vmem>>, vector<16x128xf32>,
    %c0_i32_8 = arith.constant 0 : i32
    %9 = arith.cmpi eq, %arg2, %c0_i32_8 : i32
    %10 = arith.extui %9 : i1 to i32
    %c0_i32_9 = arith.constant 0 : i32
    %11 = arith.cmpi ne, %10, %c0_i32_9 : i32
    scf.if %11 {
      %c0_10 = arith.constant 0 : index
      %c0_11 = arith.constant 0 : index
      %12 = vector.load %arg7[%c0_10, %c0_11] : memref<16x128xf32, #tpu.memory_space<vmem>>, vector<16x128xf32>
      %c0_12 = arith.constant 0 : index
      %c0_13 = arith.constant 0 : index
      %13 = vector.load %arg5[%c0_12, %c0_13] : memref<1x128xf32, #tpu.memory_space<vmem>>, vector<1x128xf32>
      %14 = vector.broadcast %13 : vector<1x128xf32> to vector<16x128xf32>
      %15 = arith.addf %12, %14 : vector<16x128xf32>
      %cst_14 = arith.constant 0.000000e+00 : f32
      %16 = vector.broadcast %cst_14 : f32 to vector<16x128xf32>
      %17 = arith.maximumf %15, %16 : vector<16x128xf32>
      %18 = arith.truncf %17 : vector<16x128xf32> to vector<16x128xbf16>
      %c0_15 = arith.constant 0 : index
      %c0_16 = arith.constant 0 : index
      %19 = vector.load %arg6[%c0_15, %c0_16] : memref<16x128xbf16, #tpu.memory_space<vmem>>, vector<16x128xbf16>
      tpu.vector_store %arg6[%c0_15, %c0_16], %18 {strides = array<i32>} : memref<16x128xbf16, #tpu.memory_space<vmem>>, vector<16x128xbf16>,
    } else {
    }
    return
  }
  func.func @transform_0(%arg0: i32, %arg1: i32, %arg2: i32) -> (i32, i32) {
    %c0_i32 = arith.constant 0 : i32
    return %arg0, %arg2 : i32, i32
  }
  func.func @transform_1(%arg0: i32, %arg1: i32, %arg2: i32) -> (i32, i32) {
    %c0_i32 = arith.constant 0 : i32
    return %arg2, %arg1 : i32, i32
  }
  func.func @transform_2(%arg0: i32, %arg1: i32, %arg2: i32) -> (i32, i32) {
    %c0_i32 = arith.constant 0 : i32
    %c0_i32_0 = arith.constant 0 : i32
    return %c0_i32, %arg1 : i32, i32
  }
  func.func @transform_3(%arg0: i32, %arg1: i32, %arg2: i32) -> (i32, i32) {
    %c0_i32 = arith.constant 0 : i32
    return %arg0, %arg1 : i32, i32
  }
}

module attributes {stable_mosaic.version = 11 : i64} {
  func.func @_mm_kernel(%arg0: i32, %arg1: i32, %arg2: i32, %arg3: memref<32x128xbf16, #tpu.memory_space<vmem>>, %arg4: memref<128x128xbf16, #tpu.memory_space<vmem>>, %arg5: memref<32x128xbf16, #tpu.memory_space<vmem>>, %arg6: memref<32x128xf32, #tpu.memory_space<vmem>>) attributes {dimension_semantics = [#tpu.dimension_semantics<parallel>, #tpu.dimension_semantics<parallel>, #tpu.dimension_semantics<arbitrary>], iteration_bounds = array<i64: 1, 1, 1>, scalar_prefetch = 0 : i64, scratch_operands = 1 : i64, tpu.core_type = #tpu.core_type<tc>, window_params = [{transform_indices = @transform_0, window_bounds = array<i64: 32, 128>}, {transform_indices = @transform_1, window_bounds = array<i64: 128, 128>}, {transform_indices = @transform_2, window_bounds = array<i64: 32, 128>}]} {
    %c0_i32 = arith.constant 0 : i32
    %0 = arith.cmpi eq, %arg2, %c0_i32 : i32
    %1 = arith.extui %0 : i1 to i32
    %c0_i32_0 = arith.constant 0 : i32
    %2 = arith.cmpi ne, %1, %c0_i32_0 : i32
    scf.if %2 {
      %cst_11 = arith.constant 0.000000e+00 : f32
      %14 = vector.broadcast %cst_11 : f32 to vector<32x128xf32>
      %c0_12 = arith.constant 0 : index
      %c0_13 = arith.constant 0 : index
      %15 = vector.load %arg6[%c0_12, %c0_13] : memref<32x128xf32, #tpu.memory_space<vmem>>, vector<32x128xf32>
      tpu.vector_store %arg6[%c0_12, %c0_13], %14 {strides = array<i32>} : memref<32x128xf32, #tpu.memory_space<vmem>>, vector<32x128xf32>,
    } else {
    }
    %c0 = arith.constant 0 : index
    %c0_1 = arith.constant 0 : index
    %3 = vector.load %arg3[%c0, %c0_1] : memref<32x128xbf16, #tpu.memory_space<vmem>>, vector<32x128xbf16>
    %cst = arith.constant 0.000000e+00 : bf16
    %4 = vector.broadcast %cst : bf16 to vector<32x128xbf16>
    %5 = arith.maximumf %3, %4 : vector<32x128xbf16>
    %c0_2 = arith.constant 0 : index
    %c0_3 = arith.constant 0 : index
    %6 = vector.load %arg6[%c0_2, %c0_3] : memref<32x128xf32, #tpu.memory_space<vmem>>, vector<32x128xf32>
    %c0_4 = arith.constant 0 : index
    %c0_5 = arith.constant 0 : index
    %7 = vector.load %arg4[%c0_4, %c0_5] : memref<128x128xbf16, #tpu.memory_space<vmem>>, vector<128x128xbf16>
    %cst_6 = arith.constant dense<0.000000e+00> : vector<32x128xf32>
    %8 = tpu.matmul %5, %7, %cst_6 {dimension_numbers = #tpu.dot_dimension_numbers<[1], [0], [0], [1], [0, 0, 1, 1], [], []>} : vector<32x128xbf16>, vector<128x128xbf16>, vector<32x128xf32> -> vector<32x128xf32>
    %9 = arith.addf %6, %8 : vector<32x128xf32>
    %c0_7 = arith.constant 0 : index
    %c0_8 = arith.constant 0 : index
    %10 = vector.load %arg6[%c0_7, %c0_8] : memref<32x128xf32, #tpu.memory_space<vmem>>, vector<32x128xf32>
    tpu.vector_store %arg6[%c0_7, %c0_8], %9 {strides = array<i32>} : memref<32x128xf32, #tpu.memory_space<vmem>>, vector<32x128xf32>,
    %c0_i32_9 = arith.constant 0 : i32
    %11 = arith.cmpi eq, %arg2, %c0_i32_9 : i32
    %12 = arith.extui %11 : i1 to i32
    %c0_i32_10 = arith.constant 0 : i32
    %13 = arith.cmpi ne, %12, %c0_i32_10 : i32
    scf.if %13 {
      %c0_11 = arith.constant 0 : index
      %c0_12 = arith.constant 0 : index
      %14 = vector.load %arg6[%c0_11, %c0_12] : memref<32x128xf32, #tpu.memory_space<vmem>>, vector<32x128xf32>
      %cst_13 = arith.constant 0.000000e+00 : f32
      %15 = vector.broadcast %cst_13 : f32 to vector<32x128xf32>
      %16 = arith.maximumf %14, %15 : vector<32x128xf32>
      %17 = arith.truncf %16 : vector<32x128xf32> to vector<32x128xbf16>
      %c0_14 = arith.constant 0 : index
      %c0_15 = arith.constant 0 : index
      %18 = vector.load %arg5[%c0_14, %c0_15] : memref<32x128xbf16, #tpu.memory_space<vmem>>, vector<32x128xbf16>
      tpu.vector_store %arg5[%c0_14, %c0_15], %17 {strides = array<i32>} : memref<32x128xbf16, #tpu.memory_space<vmem>>, vector<32x128xbf16>,
    } else {
    }
    return
  }
  func.func @transform_0(%arg0: i32, %arg1: i32, %arg2: i32) -> (i32, i32) {
    %c0_i32 = arith.constant 0 : i32
    return %arg0, %arg2 : i32, i32
  }
  func.func @transform_1(%arg0: i32, %arg1: i32, %arg2: i32) -> (i32, i32) {
    %c0_i32 = arith.constant 0 : i32
    return %arg2, %arg1 : i32, i32
  }
  func.func @transform_2(%arg0: i32, %arg1: i32, %arg2: i32) -> (i32, i32) {
    %c0_i32 = arith.constant 0 : i32
    return %arg0, %arg1 : i32, i32
  }
}

module attributes {stable_mosaic.version = 11 : i64} {
  func.func @_mm_kernel(%arg0: i32, %arg1: i32, %arg2: i32, %arg3: memref<16x128xbf16, #tpu.memory_space<vmem>>, %arg4: memref<128x128xbf16, #tpu.memory_space<vmem>>, %arg5: memref<1x128xf32, #tpu.memory_space<vmem>>, %arg6: memref<16x128xbf16, #tpu.memory_space<vmem>>, %arg7: memref<16x128xf32, #tpu.memory_space<vmem>>) attributes {dimension_semantics = [#tpu.dimension_semantics<parallel>, #tpu.dimension_semantics<parallel>, #tpu.dimension_semantics<arbitrary>], iteration_bounds = array<i64: 1, 1, 1>, scalar_prefetch = 0 : i64, scratch_operands = 1 : i64, tpu.core_type = #tpu.core_type<tc>, window_params = [{transform_indices = @transform_0, window_bounds = array<i64: 16, 128>}, {transform_indices = @transform_1, window_bounds = array<i64: 128, 128>}, {transform_indices = @transform_2, window_bounds = array<i64: 1, 128>}, {transform_indices = @transform_3, window_bounds = array<i64: 16, 128>}]} {
    %c0_i32 = arith.constant 0 : i32
    %0 = arith.cmpi eq, %arg2, %c0_i32 : i32
    %1 = arith.extui %0 : i1 to i32
    %c0_i32_0 = arith.constant 0 : i32
    %2 = arith.cmpi ne, %1, %c0_i32_0 : i32
    scf.if %2 {
      %cst_10 = arith.constant 0.000000e+00 : f32
      %12 = vector.broadcast %cst_10 : f32 to vector<16x128xf32>
      %c0_11 = arith.constant 0 : index
      %c0_12 = arith.constant 0 : index
      %13 = vector.load %arg7[%c0_11, %c0_12] : memref<16x128xf32, #tpu.memory_space<vmem>>, vector<16x128xf32>
      tpu.vector_store %arg7[%c0_11, %c0_12], %12 {strides = array<i32>} : memref<16x128xf32, #tpu.memory_space<vmem>>, vector<16x128xf32>,
    } else {
    }
    %c0 = arith.constant 0 : index
    %c0_1 = arith.constant 0 : index
    %3 = vector.load %arg3[%c0, %c0_1] : memref<16x128xbf16, #tpu.memory_space<vmem>>, vector<16x128xbf16>
    %c0_2 = arith.constant 0 : index
    %c0_3 = arith.constant 0 : index
    %4 = vector.load %arg7[%c0_2, %c0_3] : memref<16x128xf32, #tpu.memory_space<vmem>>, vector<16x128xf32>
    %c0_4 = arith.constant 0 : index
    %c0_5 = arith.constant 0 : index
    %5 = vector.load %arg4[%c0_4, %c0_5] : memref<128x128xbf16, #tpu.memory_space<vmem>>, vector<128x128xbf16>
    %cst = arith.constant dense<0.000000e+00> : vector<16x128xf32>
    %6 = tpu.matmul %3, %5, %cst {dimension_numbers = #tpu.dot_dimension_numbers<[1], [0], [0], [1], [0, 0, 1, 1], [], []>} : vector<16x128xbf16>, vector<128x128xbf16>, vector<16x128xf32> -> vector<16x128xf32>
    %7 = arith.addf %4, %6 : vector<16x128xf32>
    %c0_6 = arith.constant 0 : index
    %c0_7 = arith.constant 0 : index
    %8 = vector.load %arg7[%c0_6, %c0_7] : memref<16x128xf32, #tpu.memory_space<vmem>>, vector<16x128xf32>
    tpu.vector_store %arg7[%c0_6, %c0_7], %7 {strides = array<i32>} : memref<16x128xf32, #tpu.memory_space<vmem>>, vector<16x128xf32>,
    %c0_i32_8 = arith.constant 0 : i32
    %9 = arith.cmpi eq, %arg2, %c0_i32_8 : i32
    %10 = arith.extui %9 : i1 to i32
    %c0_i32_9 = arith.constant 0 : i32
    %11 = arith.cmpi ne, %10, %c0_i32_9 : i32
    scf.if %11 {
      %c0_10 = arith.constant 0 : index
      %c0_11 = arith.constant 0 : index
      %12 = vector.load %arg7[%c0_10, %c0_11] : memref<16x128xf32, #tpu.memory_space<vmem>>, vector<16x128xf32>
      %c0_12 = arith.constant 0 : index
      %c0_13 = arith.constant 0 : index
      %13 = vector.load %arg5[%c0_12, %c0_13] : memref<1x128xf32, #tpu.memory_space<vmem>>, vector<1x128xf32>
      %14 = vector.broadcast %13 : vector<1x128xf32> to vector<16x128xf32>
      %15 = arith.addf %12, %14 : vector<16x128xf32>
      %16 = arith.negf %15 : vector<16x128xf32>
      %17 = math.exp %16 : vector<16x128xf32>
      %cst_14 = arith.constant 1.000000e+00 : f32
      %18 = vector.broadcast %cst_14 : f32 to vector<16x128xf32>
      %19 = arith.addf %18, %17 : vector<16x128xf32>
      %20 = arith.divf %18, %19 : vector<16x128xf32>
      %21 = arith.truncf %20 : vector<16x128xf32> to vector<16x128xbf16>
      %c0_15 = arith.constant 0 : index
      %c0_16 = arith.constant 0 : index
      %22 = vector.load %arg6[%c0_15, %c0_16] : memref<16x128xbf16, #tpu.memory_space<vmem>>, vector<16x128xbf16>
      tpu.vector_store %arg6[%c0_15, %c0_16], %21 {strides = array<i32>} : memref<16x128xbf16, #tpu.memory_space<vmem>>, vector<16x128xbf16>,
    } else {
    }
    return
  }
  func.func @transform_0(%arg0: i32, %arg1: i32, %arg2: i32) -> (i32, i32) {
    %c0_i32 = arith.constant 0 : i32
    return %arg0, %arg2 : i32, i32
  }
  func.func @transform_1(%arg0: i32, %arg1: i32, %arg2: i32) -> (i32, i32) {
    %c0_i32 = arith.constant 0 : i32
    return %arg2, %arg1 : i32, i32
  }
  func.func @transform_2(%arg0: i32, %arg1: i32, %arg2: i32) -> (i32, i32) {
    %c0_i32 = arith.constant 0 : i32
    %c0_i32_0 = arith.constant 0 : i32
    return %c0_i32, %arg1 : i32, i32
  }
  func.func @transform_3(%arg0: i32, %arg1: i32, %arg2: i32) -> (i32, i32) {
    %c0_i32 = arith.constant 0 : i32
    return %arg0, %arg1 : i32, i32
  }
}

module attributes {stable_mosaic.version = 11 : i64} {
  func.func @_mm_kernel(%arg0: i32, %arg1: i32, %arg2: i32, %arg3: memref<16x128xbf16, #tpu.memory_space<vmem>>, %arg4: memref<128x128xbf16, #tpu.memory_space<vmem>>, %arg5: memref<1x128xf32, #tpu.memory_space<vmem>>, %arg6: memref<16x128xbf16, #tpu.memory_space<vmem>>, %arg7: memref<16x128xf32, #tpu.memory_space<vmem>>) attributes {dimension_semantics = [#tpu.dimension_semantics<parallel>, #tpu.dimension_semantics<parallel>, #tpu.dimension_semantics<arbitrary>], iteration_bounds = array<i64: 1, 1, 1>, scalar_prefetch = 0 : i64, scratch_operands = 1 : i64, tpu.core_type = #tpu.core_type<tc>, window_params = [{transform_indices = @transform_0, window_bounds = array<i64: 16, 128>}, {transform_indices = @transform_1, window_bounds = array<i64: 128, 128>}, {transform_indices = @transform_2, window_bounds = array<i64: 1, 128>}, {transform_indices = @transform_3, window_bounds = array<i64: 16, 128>}]} {
    %c0_i32 = arith.constant 0 : i32
    %0 = arith.cmpi eq, %arg2, %c0_i32 : i32
    %1 = arith.extui %0 : i1 to i32
    %c0_i32_0 = arith.constant 0 : i32
    %2 = arith.cmpi ne, %1, %c0_i32_0 : i32
    scf.if %2 {
      %cst_10 = arith.constant 0.000000e+00 : f32
      %12 = vector.broadcast %cst_10 : f32 to vector<16x128xf32>
      %c0_11 = arith.constant 0 : index
      %c0_12 = arith.constant 0 : index
      %13 = vector.load %arg7[%c0_11, %c0_12] : memref<16x128xf32, #tpu.memory_space<vmem>>, vector<16x128xf32>
      tpu.vector_store %arg7[%c0_11, %c0_12], %12 {strides = array<i32>} : memref<16x128xf32, #tpu.memory_space<vmem>>, vector<16x128xf32>,
    } else {
    }
    %c0 = arith.constant 0 : index
    %c0_1 = arith.constant 0 : index
    %3 = vector.load %arg3[%c0, %c0_1] : memref<16x128xbf16, #tpu.memory_space<vmem>>, vector<16x128xbf16>
    %c0_2 = arith.constant 0 : index
    %c0_3 = arith.constant 0 : index
    %4 = vector.load %arg7[%c0_2, %c0_3] : memref<16x128xf32, #tpu.memory_space<vmem>>, vector<16x128xf32>
    %c0_4 = arith.constant 0 : index
    %c0_5 = arith.constant 0 : index
    %5 = vector.load %arg4[%c0_4, %c0_5] : memref<128x128xbf16, #tpu.memory_space<vmem>>, vector<128x128xbf16>
    %cst = arith.constant dense<0.000000e+00> : vector<16x128xf32>
    %6 = tpu.matmul %3, %5, %cst {dimension_numbers = #tpu.dot_dimension_numbers<[1], [0], [0], [1], [0, 0, 1, 1], [], []>} : vector<16x128xbf16>, vector<128x128xbf16>, vector<16x128xf32> -> vector<16x128xf32>
    %7 = arith.addf %4, %6 : vector<16x128xf32>
    %c0_6 = arith.constant 0 : index
    %c0_7 = arith.constant 0 : index
    %8 = vector.load %arg7[%c0_6, %c0_7] : memref<16x128xf32, #tpu.memory_space<vmem>>, vector<16x128xf32>
    tpu.vector_store %arg7[%c0_6, %c0_7], %7 {strides = array<i32>} : memref<16x128xf32, #tpu.memory_space<vmem>>, vector<16x128xf32>,
    %c0_i32_8 = arith.constant 0 : i32
    %9 = arith.cmpi eq, %arg2, %c0_i32_8 : i32
    %10 = arith.extui %9 : i1 to i32
    %c0_i32_9 = arith.constant 0 : i32
    %11 = arith.cmpi ne, %10, %c0_i32_9 : i32
    scf.if %11 {
      %c0_10 = arith.constant 0 : index
      %c0_11 = arith.constant 0 : index
      %12 = vector.load %arg7[%c0_10, %c0_11] : memref<16x128xf32, #tpu.memory_space<vmem>>, vector<16x128xf32>
      %c0_12 = arith.constant 0 : index
      %c0_13 = arith.constant 0 : index
      %13 = vector.load %arg5[%c0_12, %c0_13] : memref<1x128xf32, #tpu.memory_space<vmem>>, vector<1x128xf32>
      %14 = vector.broadcast %13 : vector<1x128xf32> to vector<16x128xf32>
      %15 = arith.addf %12, %14 : vector<16x128xf32>
      %cst_14 = arith.constant 0.000000e+00 : f32
      %16 = vector.broadcast %cst_14 : f32 to vector<16x128xf32>
      %17 = arith.maximumf %15, %16 : vector<16x128xf32>
      %18 = arith.truncf %17 : vector<16x128xf32> to vector<16x128xbf16>
      %c0_15 = arith.constant 0 : index
      %c0_16 = arith.constant 0 : index
      %19 = vector.load %arg6[%c0_15, %c0_16] : memref<16x128xbf16, #tpu.memory_space<vmem>>, vector<16x128xbf16>
      tpu.vector_store %arg6[%c0_15, %c0_16], %18 {strides = array<i32>} : memref<16x128xbf16, #tpu.memory_space<vmem>>, vector<16x128xbf16>,
    } else {
    }
    return
  }
  func.func @transform_0(%arg0: i32, %arg1: i32, %arg2: i32) -> (i32, i32) {
    %c0_i32 = arith.constant 0 : i32
    return %arg0, %arg2 : i32, i32
  }
  func.func @transform_1(%arg0: i32, %arg1: i32, %arg2: i32) -> (i32, i32) {
    %c0_i32 = arith.constant 0 : i32
    return %arg2, %arg1 : i32, i32
  }
  func.func @transform_2(%arg0: i32, %arg1: i32, %arg2: i32) -> (i32, i32) {
    %c0_i32 = arith.constant 0 : i32
    %c0_i32_0 = arith.constant 0 : i32
    return %c0_i32, %arg1 : i32, i32
  }
  func.func @transform_3(%arg0: i32, %arg1: i32, %arg2: i32) -> (i32, i32) {
    %c0_i32 = arith.constant 0 : i32
    return %arg0, %arg1 : i32, i32
  }
}

module attributes {stable_mosaic.version = 11 : i64} {
  func.func @_tapconv_kernel(%arg0: i32, %arg1: i32, %arg2: i32, %arg3: memref<1x24x128xbf16, #tpu.memory_space<vmem>>, %arg4: memref<3x128x128xbf16, #tpu.memory_space<vmem>>, %arg5: memref<1x16x128xbf16, #tpu.memory_space<vmem>>, %arg6: memref<1x16x128xbf16, #tpu.memory_space<vmem>>) attributes {dimension_semantics = [#tpu.dimension_semantics<parallel>, #tpu.dimension_semantics<parallel>, #tpu.dimension_semantics<parallel>], iteration_bounds = array<i64: 2, 1, 1>, scalar_prefetch = 0 : i64, scratch_operands = 0 : i64, tpu.core_type = #tpu.core_type<tc>, window_params = [{transform_indices = @transform_0, window_bounds = array<i64: 1, 24, 128>}, {transform_indices = @transform_1, window_bounds = array<i64: 3, 128, 128>}, {transform_indices = @transform_2, window_bounds = array<i64: 1, 16, 128>}, {transform_indices = @transform_3, window_bounds = array<i64: 1, 16, 128>}]} {
    %c16_i32 = arith.constant 16 : i32
    %0 = arith.muli %arg1, %c16_i32 : i32
    %1 = tpu.assume_multiple %0, 8 : i32
    %c0 = arith.constant 0 : index
    %2 = arith.index_cast %1 : i32 to index
    %c0_0 = arith.constant 0 : index
    %3 = vector.load %arg3[%c0, %2, %c0_0] : memref<1x24x128xbf16, #tpu.memory_space<vmem>>, vector<1x24x128xbf16>
    %4 = vector.shape_cast %3 : vector<1x24x128xbf16> to vector<24x128xbf16>
    %cst = arith.constant 0.000000e+00 : f32
    %5 = vector.broadcast %cst : f32 to vector<16x128xf32>
    %6 = vector.extract_strided_slice %4 {offsets = [0, 0], sizes = [16, 128], strides = [1, 1]} : vector<24x128xbf16> to vector<16x128xbf16>
    %c0_1 = arith.constant 0 : index
    %c0_2 = arith.constant 0 : index
    %c0_3 = arith.constant 0 : index
    %7 = vector.load %arg4[%c0_1, %c0_2, %c0_3] : memref<3x128x128xbf16, #tpu.memory_space<vmem>>, vector<1x128x128xbf16>
    %8 = vector.shape_cast %7 : vector<1x128x128xbf16> to vector<128x128xbf16>
    %cst_4 = arith.constant dense<0.000000e+00> : vector<16x128xf32>
    %9 = tpu.matmul %6, %8, %cst_4 {dimension_numbers = #tpu.dot_dimension_numbers<[1], [0], [0], [1], [0, 0, 1, 1], [], []>} : vector<16x128xbf16>, vector<128x128xbf16>, vector<16x128xf32> -> vector<16x128xf32>
    %10 = arith.addf %5, %9 : vector<16x128xf32>
    %11 = vector.extract_strided_slice %4 {offsets = [1, 0], sizes = [16, 128], strides = [1, 1]} : vector<24x128xbf16> to vector<16x128xbf16>
    %c1 = arith.constant 1 : index
    %c0_5 = arith.constant 0 : index
    %c0_6 = arith.constant 0 : index
    %12 = vector.load %arg4[%c1, %c0_5, %c0_6] : memref<3x128x128xbf16, #tpu.memory_space<vmem>>, vector<1x128x128xbf16>
    %13 = vector.shape_cast %12 : vector<1x128x128xbf16> to vector<128x128xbf16>
    %cst_7 = arith.constant dense<0.000000e+00> : vector<16x128xf32>
    %14 = tpu.matmul %11, %13, %cst_7 {dimension_numbers = #tpu.dot_dimension_numbers<[1], [0], [0], [1], [0, 0, 1, 1], [], []>} : vector<16x128xbf16>, vector<128x128xbf16>, vector<16x128xf32> -> vector<16x128xf32>
    %15 = arith.addf %10, %14 : vector<16x128xf32>
    %16 = vector.extract_strided_slice %4 {offsets = [2, 0], sizes = [16, 128], strides = [1, 1]} : vector<24x128xbf16> to vector<16x128xbf16>
    %c2 = arith.constant 2 : index
    %c0_8 = arith.constant 0 : index
    %c0_9 = arith.constant 0 : index
    %17 = vector.load %arg4[%c2, %c0_8, %c0_9] : memref<3x128x128xbf16, #tpu.memory_space<vmem>>, vector<1x128x128xbf16>
    %18 = vector.shape_cast %17 : vector<1x128x128xbf16> to vector<128x128xbf16>
    %cst_10 = arith.constant dense<0.000000e+00> : vector<16x128xf32>
    %19 = tpu.matmul %16, %18, %cst_10 {dimension_numbers = #tpu.dot_dimension_numbers<[1], [0], [0], [1], [0, 0, 1, 1], [], []>} : vector<16x128xbf16>, vector<128x128xbf16>, vector<16x128xf32> -> vector<16x128xf32>
    %20 = arith.addf %15, %19 : vector<16x128xf32>
    %c0_11 = arith.constant 0 : index
    %c0_12 = arith.constant 0 : index
    %c0_13 = arith.constant 0 : index
    %21 = vector.load %arg5[%c0_11, %c0_12, %c0_13] : memref<1x16x128xbf16, #tpu.memory_space<vmem>>, vector<1x16x128xbf16>
    %22 = vector.shape_cast %21 : vector<1x16x128xbf16> to vector<16x128xbf16>
    %23 = arith.extf %22 : vector<16x128xbf16> to vector<16x128xf32>
    %24 = arith.mulf %20, %23 : vector<16x128xf32>
    %25 = arith.truncf %24 : vector<16x128xf32> to vector<16x128xbf16>
    %c0_14 = arith.constant 0 : index
    %c0_15 = arith.constant 0 : index
    %c0_16 = arith.constant 0 : index
    %26 = vector.load %arg6[%c0_14, %c0_15, %c0_16] : memref<1x16x128xbf16, #tpu.memory_space<vmem>>, vector<1x16x128xbf16>
    %27 = vector.shape_cast %26 : vector<1x16x128xbf16> to vector<16x128xbf16>
    %28 = vector.shape_cast %25 : vector<16x128xbf16> to vector<1x16x128xbf16>
    tpu.vector_store %arg6[%c0_14, %c0_15, %c0_16], %28 {strides = array<i32>} : memref<1x16x128xbf16, #tpu.memory_space<vmem>>, vector<1x16x128xbf16>,
    return
  }
  func.func @transform_0(%arg0: i32, %arg1: i32, %arg2: i32) -> (i32, i32, i32) {
    %c0_i32 = arith.constant 0 : i32
    %c0_i32_0 = arith.constant 0 : i32
    %c0_i32_1 = arith.constant 0 : i32
    return %arg0, %c0_i32, %c0_i32_0 : i32, i32, i32
  }
  func.func @transform_1(%arg0: i32, %arg1: i32, %arg2: i32) -> (i32, i32, i32) {
    %c0_i32 = arith.constant 0 : i32
    %c0_i32_0 = arith.constant 0 : i32
    %c0_i32_1 = arith.constant 0 : i32
    return %c0_i32, %c0_i32_0, %arg2 : i32, i32, i32
  }
  func.func @transform_2(%arg0: i32, %arg1: i32, %arg2: i32) -> (i32, i32, i32) {
    %c0_i32 = arith.constant 0 : i32
    return %arg0, %arg1, %arg2 : i32, i32, i32
  }
  func.func @transform_3(%arg0: i32, %arg1: i32, %arg2: i32) -> (i32, i32, i32) {
    %c0_i32 = arith.constant 0 : i32
    return %arg0, %arg1, %arg2 : i32, i32, i32
  }
}

module attributes {stable_mosaic.version = 11 : i64} {
  func.func @_mm_kernel(%arg0: i32, %arg1: i32, %arg2: i32, %arg3: memref<32x128xbf16, #tpu.memory_space<vmem>>, %arg4: memref<128x128xbf16, #tpu.memory_space<vmem>>, %arg5: memref<32x128xbf16, #tpu.memory_space<vmem>>, %arg6: memref<32x128xf32, #tpu.memory_space<vmem>>) attributes {dimension_semantics = [#tpu.dimension_semantics<parallel>, #tpu.dimension_semantics<parallel>, #tpu.dimension_semantics<arbitrary>], iteration_bounds = array<i64: 1, 1, 1>, scalar_prefetch = 0 : i64, scratch_operands = 1 : i64, tpu.core_type = #tpu.core_type<tc>, window_params = [{transform_indices = @transform_0, window_bounds = array<i64: 32, 128>}, {transform_indices = @transform_1, window_bounds = array<i64: 128, 128>}, {transform_indices = @transform_2, window_bounds = array<i64: 32, 128>}]} {
    %c0_i32 = arith.constant 0 : i32
    %0 = arith.cmpi eq, %arg2, %c0_i32 : i32
    %1 = arith.extui %0 : i1 to i32
    %c0_i32_0 = arith.constant 0 : i32
    %2 = arith.cmpi ne, %1, %c0_i32_0 : i32
    scf.if %2 {
      %cst_11 = arith.constant 0.000000e+00 : f32
      %14 = vector.broadcast %cst_11 : f32 to vector<32x128xf32>
      %c0_12 = arith.constant 0 : index
      %c0_13 = arith.constant 0 : index
      %15 = vector.load %arg6[%c0_12, %c0_13] : memref<32x128xf32, #tpu.memory_space<vmem>>, vector<32x128xf32>
      tpu.vector_store %arg6[%c0_12, %c0_13], %14 {strides = array<i32>} : memref<32x128xf32, #tpu.memory_space<vmem>>, vector<32x128xf32>,
    } else {
    }
    %c0 = arith.constant 0 : index
    %c0_1 = arith.constant 0 : index
    %3 = vector.load %arg3[%c0, %c0_1] : memref<32x128xbf16, #tpu.memory_space<vmem>>, vector<32x128xbf16>
    %cst = arith.constant 0.000000e+00 : bf16
    %4 = vector.broadcast %cst : bf16 to vector<32x128xbf16>
    %5 = arith.maximumf %3, %4 : vector<32x128xbf16>
    %c0_2 = arith.constant 0 : index
    %c0_3 = arith.constant 0 : index
    %6 = vector.load %arg6[%c0_2, %c0_3] : memref<32x128xf32, #tpu.memory_space<vmem>>, vector<32x128xf32>
    %c0_4 = arith.constant 0 : index
    %c0_5 = arith.constant 0 : index
    %7 = vector.load %arg4[%c0_4, %c0_5] : memref<128x128xbf16, #tpu.memory_space<vmem>>, vector<128x128xbf16>
    %cst_6 = arith.constant dense<0.000000e+00> : vector<32x128xf32>
    %8 = tpu.matmul %5, %7, %cst_6 {dimension_numbers = #tpu.dot_dimension_numbers<[1], [0], [0], [1], [0, 0, 1, 1], [], []>} : vector<32x128xbf16>, vector<128x128xbf16>, vector<32x128xf32> -> vector<32x128xf32>
    %9 = arith.addf %6, %8 : vector<32x128xf32>
    %c0_7 = arith.constant 0 : index
    %c0_8 = arith.constant 0 : index
    %10 = vector.load %arg6[%c0_7, %c0_8] : memref<32x128xf32, #tpu.memory_space<vmem>>, vector<32x128xf32>
    tpu.vector_store %arg6[%c0_7, %c0_8], %9 {strides = array<i32>} : memref<32x128xf32, #tpu.memory_space<vmem>>, vector<32x128xf32>,
    %c0_i32_9 = arith.constant 0 : i32
    %11 = arith.cmpi eq, %arg2, %c0_i32_9 : i32
    %12 = arith.extui %11 : i1 to i32
    %c0_i32_10 = arith.constant 0 : i32
    %13 = arith.cmpi ne, %12, %c0_i32_10 : i32
    scf.if %13 {
      %c0_11 = arith.constant 0 : index
      %c0_12 = arith.constant 0 : index
      %14 = vector.load %arg6[%c0_11, %c0_12] : memref<32x128xf32, #tpu.memory_space<vmem>>, vector<32x128xf32>
      %cst_13 = arith.constant 0.000000e+00 : f32
      %15 = vector.broadcast %cst_13 : f32 to vector<32x128xf32>
      %16 = arith.maximumf %14, %15 : vector<32x128xf32>
      %17 = arith.truncf %16 : vector<32x128xf32> to vector<32x128xbf16>
      %c0_14 = arith.constant 0 : index
      %c0_15 = arith.constant 0 : index
      %18 = vector.load %arg5[%c0_14, %c0_15] : memref<32x128xbf16, #tpu.memory_space<vmem>>, vector<32x128xbf16>
      tpu.vector_store %arg5[%c0_14, %c0_15], %17 {strides = array<i32>} : memref<32x128xbf16, #tpu.memory_space<vmem>>, vector<32x128xbf16>,
    } else {
    }
    return
  }
  func.func @transform_0(%arg0: i32, %arg1: i32, %arg2: i32) -> (i32, i32) {
    %c0_i32 = arith.constant 0 : i32
    return %arg0, %arg2 : i32, i32
  }
  func.func @transform_1(%arg0: i32, %arg1: i32, %arg2: i32) -> (i32, i32) {
    %c0_i32 = arith.constant 0 : i32
    return %arg2, %arg1 : i32, i32
  }
  func.func @transform_2(%arg0: i32, %arg1: i32, %arg2: i32) -> (i32, i32) {
    %c0_i32 = arith.constant 0 : i32
    return %arg0, %arg1 : i32, i32
  }
}

module attributes {stable_mosaic.version = 11 : i64} {
  func.func @_mm_kernel(%arg0: i32, %arg1: i32, %arg2: i32, %arg3: memref<16x128xbf16, #tpu.memory_space<vmem>>, %arg4: memref<128x128xbf16, #tpu.memory_space<vmem>>, %arg5: memref<1x128xf32, #tpu.memory_space<vmem>>, %arg6: memref<16x128xbf16, #tpu.memory_space<vmem>>, %arg7: memref<16x128xf32, #tpu.memory_space<vmem>>) attributes {dimension_semantics = [#tpu.dimension_semantics<parallel>, #tpu.dimension_semantics<parallel>, #tpu.dimension_semantics<arbitrary>], iteration_bounds = array<i64: 1, 1, 1>, scalar_prefetch = 0 : i64, scratch_operands = 1 : i64, tpu.core_type = #tpu.core_type<tc>, window_params = [{transform_indices = @transform_0, window_bounds = array<i64: 16, 128>}, {transform_indices = @transform_1, window_bounds = array<i64: 128, 128>}, {transform_indices = @transform_2, window_bounds = array<i64: 1, 128>}, {transform_indices = @transform_3, window_bounds = array<i64: 16, 128>}]} {
    %c0_i32 = arith.constant 0 : i32
    %0 = arith.cmpi eq, %arg2, %c0_i32 : i32
    %1 = arith.extui %0 : i1 to i32
    %c0_i32_0 = arith.constant 0 : i32
    %2 = arith.cmpi ne, %1, %c0_i32_0 : i32
    scf.if %2 {
      %cst_10 = arith.constant 0.000000e+00 : f32
      %12 = vector.broadcast %cst_10 : f32 to vector<16x128xf32>
      %c0_11 = arith.constant 0 : index
      %c0_12 = arith.constant 0 : index
      %13 = vector.load %arg7[%c0_11, %c0_12] : memref<16x128xf32, #tpu.memory_space<vmem>>, vector<16x128xf32>
      tpu.vector_store %arg7[%c0_11, %c0_12], %12 {strides = array<i32>} : memref<16x128xf32, #tpu.memory_space<vmem>>, vector<16x128xf32>,
    } else {
    }
    %c0 = arith.constant 0 : index
    %c0_1 = arith.constant 0 : index
    %3 = vector.load %arg3[%c0, %c0_1] : memref<16x128xbf16, #tpu.memory_space<vmem>>, vector<16x128xbf16>
    %c0_2 = arith.constant 0 : index
    %c0_3 = arith.constant 0 : index
    %4 = vector.load %arg7[%c0_2, %c0_3] : memref<16x128xf32, #tpu.memory_space<vmem>>, vector<16x128xf32>
    %c0_4 = arith.constant 0 : index
    %c0_5 = arith.constant 0 : index
    %5 = vector.load %arg4[%c0_4, %c0_5] : memref<128x128xbf16, #tpu.memory_space<vmem>>, vector<128x128xbf16>
    %cst = arith.constant dense<0.000000e+00> : vector<16x128xf32>
    %6 = tpu.matmul %3, %5, %cst {dimension_numbers = #tpu.dot_dimension_numbers<[1], [0], [0], [1], [0, 0, 1, 1], [], []>} : vector<16x128xbf16>, vector<128x128xbf16>, vector<16x128xf32> -> vector<16x128xf32>
    %7 = arith.addf %4, %6 : vector<16x128xf32>
    %c0_6 = arith.constant 0 : index
    %c0_7 = arith.constant 0 : index
    %8 = vector.load %arg7[%c0_6, %c0_7] : memref<16x128xf32, #tpu.memory_space<vmem>>, vector<16x128xf32>
    tpu.vector_store %arg7[%c0_6, %c0_7], %7 {strides = array<i32>} : memref<16x128xf32, #tpu.memory_space<vmem>>, vector<16x128xf32>,
    %c0_i32_8 = arith.constant 0 : i32
    %9 = arith.cmpi eq, %arg2, %c0_i32_8 : i32
    %10 = arith.extui %9 : i1 to i32
    %c0_i32_9 = arith.constant 0 : i32
    %11 = arith.cmpi ne, %10, %c0_i32_9 : i32
    scf.if %11 {
      %c0_10 = arith.constant 0 : index
      %c0_11 = arith.constant 0 : index
      %12 = vector.load %arg7[%c0_10, %c0_11] : memref<16x128xf32, #tpu.memory_space<vmem>>, vector<16x128xf32>
      %c0_12 = arith.constant 0 : index
      %c0_13 = arith.constant 0 : index
      %13 = vector.load %arg5[%c0_12, %c0_13] : memref<1x128xf32, #tpu.memory_space<vmem>>, vector<1x128xf32>
      %14 = vector.broadcast %13 : vector<1x128xf32> to vector<16x128xf32>
      %15 = arith.addf %12, %14 : vector<16x128xf32>
      %16 = arith.negf %15 : vector<16x128xf32>
      %17 = math.exp %16 : vector<16x128xf32>
      %cst_14 = arith.constant 1.000000e+00 : f32
      %18 = vector.broadcast %cst_14 : f32 to vector<16x128xf32>
      %19 = arith.addf %18, %17 : vector<16x128xf32>
      %20 = arith.divf %18, %19 : vector<16x128xf32>
      %21 = arith.truncf %20 : vector<16x128xf32> to vector<16x128xbf16>
      %c0_15 = arith.constant 0 : index
      %c0_16 = arith.constant 0 : index
      %22 = vector.load %arg6[%c0_15, %c0_16] : memref<16x128xbf16, #tpu.memory_space<vmem>>, vector<16x128xbf16>
      tpu.vector_store %arg6[%c0_15, %c0_16], %21 {strides = array<i32>} : memref<16x128xbf16, #tpu.memory_space<vmem>>, vector<16x128xbf16>,
    } else {
    }
    return
  }
  func.func @transform_0(%arg0: i32, %arg1: i32, %arg2: i32) -> (i32, i32) {
    %c0_i32 = arith.constant 0 : i32
    return %arg0, %arg2 : i32, i32
  }
  func.func @transform_1(%arg0: i32, %arg1: i32, %arg2: i32) -> (i32, i32) {
    %c0_i32 = arith.constant 0 : i32
    return %arg2, %arg1 : i32, i32
  }
  func.func @transform_2(%arg0: i32, %arg1: i32, %arg2: i32) -> (i32, i32) {
    %c0_i32 = arith.constant 0 : i32
    %c0_i32_0 = arith.constant 0 : i32
    return %c0_i32, %arg1 : i32, i32
  }
  func.func @transform_3(%arg0: i32, %arg1: i32, %arg2: i32) -> (i32, i32) {
    %c0_i32 = arith.constant 0 : i32
    return %arg0, %arg1 : i32, i32
  }
}

module attributes {stable_mosaic.version = 11 : i64} {
  func.func @_mm_kernel(%arg0: i32, %arg1: i32, %arg2: i32, %arg3: memref<32x128xbf16, #tpu.memory_space<vmem>>, %arg4: memref<128x128xbf16, #tpu.memory_space<vmem>>, %arg5: memref<32x128xbf16, #tpu.memory_space<vmem>>, %arg6: memref<32x128xf32, #tpu.memory_space<vmem>>) attributes {dimension_semantics = [#tpu.dimension_semantics<parallel>, #tpu.dimension_semantics<parallel>, #tpu.dimension_semantics<arbitrary>], iteration_bounds = array<i64: 1, 1, 1>, scalar_prefetch = 0 : i64, scratch_operands = 1 : i64, tpu.core_type = #tpu.core_type<tc>, window_params = [{transform_indices = @transform_0, window_bounds = array<i64: 32, 128>}, {transform_indices = @transform_1, window_bounds = array<i64: 128, 128>}, {transform_indices = @transform_2, window_bounds = array<i64: 32, 128>}]} {
    %c0_i32 = arith.constant 0 : i32
    %0 = arith.cmpi eq, %arg2, %c0_i32 : i32
    %1 = arith.extui %0 : i1 to i32
    %c0_i32_0 = arith.constant 0 : i32
    %2 = arith.cmpi ne, %1, %c0_i32_0 : i32
    scf.if %2 {
      %cst_11 = arith.constant 0.000000e+00 : f32
      %14 = vector.broadcast %cst_11 : f32 to vector<32x128xf32>
      %c0_12 = arith.constant 0 : index
      %c0_13 = arith.constant 0 : index
      %15 = vector.load %arg6[%c0_12, %c0_13] : memref<32x128xf32, #tpu.memory_space<vmem>>, vector<32x128xf32>
      tpu.vector_store %arg6[%c0_12, %c0_13], %14 {strides = array<i32>} : memref<32x128xf32, #tpu.memory_space<vmem>>, vector<32x128xf32>,
    } else {
    }
    %c0 = arith.constant 0 : index
    %c0_1 = arith.constant 0 : index
    %3 = vector.load %arg3[%c0, %c0_1] : memref<32x128xbf16, #tpu.memory_space<vmem>>, vector<32x128xbf16>
    %cst = arith.constant 0.000000e+00 : bf16
    %4 = vector.broadcast %cst : bf16 to vector<32x128xbf16>
    %5 = arith.maximumf %3, %4 : vector<32x128xbf16>
    %c0_2 = arith.constant 0 : index
    %c0_3 = arith.constant 0 : index
    %6 = vector.load %arg6[%c0_2, %c0_3] : memref<32x128xf32, #tpu.memory_space<vmem>>, vector<32x128xf32>
    %c0_4 = arith.constant 0 : index
    %c0_5 = arith.constant 0 : index
    %7 = vector.load %arg4[%c0_4, %c0_5] : memref<128x128xbf16, #tpu.memory_space<vmem>>, vector<128x128xbf16>
    %cst_6 = arith.constant dense<0.000000e+00> : vector<32x128xf32>
    %8 = tpu.matmul %5, %7, %cst_6 {dimension_numbers = #tpu.dot_dimension_numbers<[1], [0], [0], [1], [0, 0, 1, 1], [], []>} : vector<32x128xbf16>, vector<128x128xbf16>, vector<32x128xf32> -> vector<32x128xf32>
    %9 = arith.addf %6, %8 : vector<32x128xf32>
    %c0_7 = arith.constant 0 : index
    %c0_8 = arith.constant 0 : index
    %10 = vector.load %arg6[%c0_7, %c0_8] : memref<32x128xf32, #tpu.memory_space<vmem>>, vector<32x128xf32>
    tpu.vector_store %arg6[%c0_7, %c0_8], %9 {strides = array<i32>} : memref<32x128xf32, #tpu.memory_space<vmem>>, vector<32x128xf32>,
    %c0_i32_9 = arith.constant 0 : i32
    %11 = arith.cmpi eq, %arg2, %c0_i32_9 : i32
    %12 = arith.extui %11 : i1 to i32
    %c0_i32_10 = arith.constant 0 : i32
    %13 = arith.cmpi ne, %12, %c0_i32_10 : i32
    scf.if %13 {
      %c0_11 = arith.constant 0 : index
      %c0_12 = arith.constant 0 : index
      %14 = vector.load %arg6[%c0_11, %c0_12] : memref<32x128xf32, #tpu.memory_space<vmem>>, vector<32x128xf32>
      %15 = arith.truncf %14 : vector<32x128xf32> to vector<32x128xbf16>
      %c0_13 = arith.constant 0 : index
      %c0_14 = arith.constant 0 : index
      %16 = vector.load %arg5[%c0_13, %c0_14] : memref<32x128xbf16, #tpu.memory_space<vmem>>, vector<32x128xbf16>
      tpu.vector_store %arg5[%c0_13, %c0_14], %15 {strides = array<i32>} : memref<32x128xbf16, #tpu.memory_space<vmem>>, vector<32x128xbf16>,
    } else {
    }
    return
  }
  func.func @transform_0(%arg0: i32, %arg1: i32, %arg2: i32) -> (i32, i32) {
    %c0_i32 = arith.constant 0 : i32
    return %arg0, %arg2 : i32, i32
  }
  func.func @transform_1(%arg0: i32, %arg1: i32, %arg2: i32) -> (i32, i32) {
    %c0_i32 = arith.constant 0 : i32
    return %arg2, %arg1 : i32, i32
  }
  func.func @transform_2(%arg0: i32, %arg1: i32, %arg2: i32) -> (i32, i32) {
    %c0_i32 = arith.constant 0 : i32
    return %arg0, %arg1 : i32, i32
  }
}

module attributes {stable_mosaic.version = 11 : i64} {
  func.func @_tapconv_kernel(%arg0: i32, %arg1: i32, %arg2: i32, %arg3: memref<1x24x128xbf16, #tpu.memory_space<vmem>>, %arg4: memref<3x128x128xbf16, #tpu.memory_space<vmem>>, %arg5: memref<1x16x128xbf16, #tpu.memory_space<vmem>>, %arg6: memref<1x16x128xbf16, #tpu.memory_space<vmem>>) attributes {dimension_semantics = [#tpu.dimension_semantics<parallel>, #tpu.dimension_semantics<parallel>, #tpu.dimension_semantics<parallel>], iteration_bounds = array<i64: 2, 1, 1>, scalar_prefetch = 0 : i64, scratch_operands = 0 : i64, tpu.core_type = #tpu.core_type<tc>, window_params = [{transform_indices = @transform_0, window_bounds = array<i64: 1, 24, 128>}, {transform_indices = @transform_1, window_bounds = array<i64: 3, 128, 128>}, {transform_indices = @transform_2, window_bounds = array<i64: 1, 16, 128>}, {transform_indices = @transform_3, window_bounds = array<i64: 1, 16, 128>}]} {
    %c16_i32 = arith.constant 16 : i32
    %0 = arith.muli %arg1, %c16_i32 : i32
    %1 = tpu.assume_multiple %0, 8 : i32
    %c0 = arith.constant 0 : index
    %2 = arith.index_cast %1 : i32 to index
    %c0_0 = arith.constant 0 : index
    %3 = vector.load %arg3[%c0, %2, %c0_0] : memref<1x24x128xbf16, #tpu.memory_space<vmem>>, vector<1x24x128xbf16>
    %4 = vector.shape_cast %3 : vector<1x24x128xbf16> to vector<24x128xbf16>
    %cst = arith.constant 0.000000e+00 : f32
    %5 = vector.broadcast %cst : f32 to vector<16x128xf32>
    %6 = vector.extract_strided_slice %4 {offsets = [0, 0], sizes = [16, 128], strides = [1, 1]} : vector<24x128xbf16> to vector<16x128xbf16>
    %c0_1 = arith.constant 0 : index
    %c0_2 = arith.constant 0 : index
    %c0_3 = arith.constant 0 : index
    %7 = vector.load %arg4[%c0_1, %c0_2, %c0_3] : memref<3x128x128xbf16, #tpu.memory_space<vmem>>, vector<1x128x128xbf16>
    %8 = vector.shape_cast %7 : vector<1x128x128xbf16> to vector<128x128xbf16>
    %cst_4 = arith.constant dense<0.000000e+00> : vector<16x128xf32>
    %9 = tpu.matmul %6, %8, %cst_4 {dimension_numbers = #tpu.dot_dimension_numbers<[1], [0], [0], [1], [0, 0, 1, 1], [], []>} : vector<16x128xbf16>, vector<128x128xbf16>, vector<16x128xf32> -> vector<16x128xf32>
    %10 = arith.addf %5, %9 : vector<16x128xf32>
    %11 = vector.extract_strided_slice %4 {offsets = [2, 0], sizes = [16, 128], strides = [1, 1]} : vector<24x128xbf16> to vector<16x128xbf16>
    %c1 = arith.constant 1 : index
    %c0_5 = arith.constant 0 : index
    %c0_6 = arith.constant 0 : index
    %12 = vector.load %arg4[%c1, %c0_5, %c0_6] : memref<3x128x128xbf16, #tpu.memory_space<vmem>>, vector<1x128x128xbf16>
    %13 = vector.shape_cast %12 : vector<1x128x128xbf16> to vector<128x128xbf16>
    %cst_7 = arith.constant dense<0.000000e+00> : vector<16x128xf32>
    %14 = tpu.matmul %11, %13, %cst_7 {dimension_numbers = #tpu.dot_dimension_numbers<[1], [0], [0], [1], [0, 0, 1, 1], [], []>} : vector<16x128xbf16>, vector<128x128xbf16>, vector<16x128xf32> -> vector<16x128xf32>
    %15 = arith.addf %10, %14 : vector<16x128xf32>
    %16 = vector.extract_strided_slice %4 {offsets = [4, 0], sizes = [16, 128], strides = [1, 1]} : vector<24x128xbf16> to vector<16x128xbf16>
    %c2 = arith.constant 2 : index
    %c0_8 = arith.constant 0 : index
    %c0_9 = arith.constant 0 : index
    %17 = vector.load %arg4[%c2, %c0_8, %c0_9] : memref<3x128x128xbf16, #tpu.memory_space<vmem>>, vector<1x128x128xbf16>
    %18 = vector.shape_cast %17 : vector<1x128x128xbf16> to vector<128x128xbf16>
    %cst_10 = arith.constant dense<0.000000e+00> : vector<16x128xf32>
    %19 = tpu.matmul %16, %18, %cst_10 {dimension_numbers = #tpu.dot_dimension_numbers<[1], [0], [0], [1], [0, 0, 1, 1], [], []>} : vector<16x128xbf16>, vector<128x128xbf16>, vector<16x128xf32> -> vector<16x128xf32>
    %20 = arith.addf %15, %19 : vector<16x128xf32>
    %c0_11 = arith.constant 0 : index
    %c0_12 = arith.constant 0 : index
    %c0_13 = arith.constant 0 : index
    %21 = vector.load %arg5[%c0_11, %c0_12, %c0_13] : memref<1x16x128xbf16, #tpu.memory_space<vmem>>, vector<1x16x128xbf16>
    %22 = vector.shape_cast %21 : vector<1x16x128xbf16> to vector<16x128xbf16>
    %23 = arith.extf %22 : vector<16x128xbf16> to vector<16x128xf32>
    %24 = arith.mulf %20, %23 : vector<16x128xf32>
    %25 = arith.truncf %24 : vector<16x128xf32> to vector<16x128xbf16>
    %c0_14 = arith.constant 0 : index
    %c0_15 = arith.constant 0 : index
    %c0_16 = arith.constant 0 : index
    %26 = vector.load %arg6[%c0_14, %c0_15, %c0_16] : memref<1x16x128xbf16, #tpu.memory_space<vmem>>, vector<1x16x128xbf16>
    %27 = vector.shape_cast %26 : vector<1x16x128xbf16> to vector<16x128xbf16>
    %28 = vector.shape_cast %25 : vector<16x128xbf16> to vector<1x16x128xbf16>
    tpu.vector_store %arg6[%c0_14, %c0_15, %c0_16], %28 {strides = array<i32>} : memref<1x16x128xbf16, #tpu.memory_space<vmem>>, vector<1x16x128xbf16>,
    return
  }
  func.func @transform_0(%arg0: i32, %arg1: i32, %arg2: i32) -> (i32, i32, i32) {
    %c0_i32 = arith.constant 0 : i32
    %c0_i32_0 = arith.constant 0 : i32
    %c0_i32_1 = arith.constant 0 : i32
    return %arg0, %c0_i32, %c0_i32_0 : i32, i32, i32
  }
  func.func @transform_1(%arg0: i32, %arg1: i32, %arg2: i32) -> (i32, i32, i32) {
    %c0_i32 = arith.constant 0 : i32
    %c0_i32_0 = arith.constant 0 : i32
    %c0_i32_1 = arith.constant 0 : i32
    return %c0_i32, %c0_i32_0, %arg2 : i32, i32, i32
  }
  func.func @transform_2(%arg0: i32, %arg1: i32, %arg2: i32) -> (i32, i32, i32) {
    %c0_i32 = arith.constant 0 : i32
    return %arg0, %arg1, %arg2 : i32, i32, i32
  }
  func.func @transform_3(%arg0: i32, %arg1: i32, %arg2: i32) -> (i32, i32, i32) {
    %c0_i32 = arith.constant 0 : i32
    return %arg0, %arg1, %arg2 : i32, i32, i32
  }
}

module attributes {stable_mosaic.version = 11 : i64} {
  func.func @_mm_kernel(%arg0: i32, %arg1: i32, %arg2: i32, %arg3: memref<32x256xbf16, #tpu.memory_space<vmem>>, %arg4: memref<256x128xbf16, #tpu.memory_space<vmem>>, %arg5: memref<32x128xbf16, #tpu.memory_space<vmem>>, %arg6: memref<32x128xf32, #tpu.memory_space<vmem>>) attributes {dimension_semantics = [#tpu.dimension_semantics<parallel>, #tpu.dimension_semantics<parallel>, #tpu.dimension_semantics<arbitrary>], iteration_bounds = array<i64: 1, 1, 1>, scalar_prefetch = 0 : i64, scratch_operands = 1 : i64, tpu.core_type = #tpu.core_type<tc>, window_params = [{transform_indices = @transform_0, window_bounds = array<i64: 32, 256>}, {transform_indices = @transform_1, window_bounds = array<i64: 256, 128>}, {transform_indices = @transform_2, window_bounds = array<i64: 32, 128>}]} {
    %c0_i32 = arith.constant 0 : i32
    %0 = arith.cmpi eq, %arg2, %c0_i32 : i32
    %1 = arith.extui %0 : i1 to i32
    %c0_i32_0 = arith.constant 0 : i32
    %2 = arith.cmpi ne, %1, %c0_i32_0 : i32
    scf.if %2 {
      %cst_11 = arith.constant 0.000000e+00 : f32
      %14 = vector.broadcast %cst_11 : f32 to vector<32x128xf32>
      %c0_12 = arith.constant 0 : index
      %c0_13 = arith.constant 0 : index
      %15 = vector.load %arg6[%c0_12, %c0_13] : memref<32x128xf32, #tpu.memory_space<vmem>>, vector<32x128xf32>
      tpu.vector_store %arg6[%c0_12, %c0_13], %14 {strides = array<i32>} : memref<32x128xf32, #tpu.memory_space<vmem>>, vector<32x128xf32>,
    } else {
    }
    %c0 = arith.constant 0 : index
    %c0_1 = arith.constant 0 : index
    %3 = vector.load %arg3[%c0, %c0_1] : memref<32x256xbf16, #tpu.memory_space<vmem>>, vector<32x256xbf16>
    %cst = arith.constant 0.000000e+00 : bf16
    %4 = vector.broadcast %cst : bf16 to vector<32x256xbf16>
    %5 = arith.maximumf %3, %4 : vector<32x256xbf16>
    %c0_2 = arith.constant 0 : index
    %c0_3 = arith.constant 0 : index
    %6 = vector.load %arg6[%c0_2, %c0_3] : memref<32x128xf32, #tpu.memory_space<vmem>>, vector<32x128xf32>
    %c0_4 = arith.constant 0 : index
    %c0_5 = arith.constant 0 : index
    %7 = vector.load %arg4[%c0_4, %c0_5] : memref<256x128xbf16, #tpu.memory_space<vmem>>, vector<256x128xbf16>
    %cst_6 = arith.constant dense<0.000000e+00> : vector<32x128xf32>
    %8 = tpu.matmul %5, %7, %cst_6 {dimension_numbers = #tpu.dot_dimension_numbers<[1], [0], [0], [1], [0, 0, 1, 1], [], []>} : vector<32x256xbf16>, vector<256x128xbf16>, vector<32x128xf32> -> vector<32x128xf32>
    %9 = arith.addf %6, %8 : vector<32x128xf32>
    %c0_7 = arith.constant 0 : index
    %c0_8 = arith.constant 0 : index
    %10 = vector.load %arg6[%c0_7, %c0_8] : memref<32x128xf32, #tpu.memory_space<vmem>>, vector<32x128xf32>
    tpu.vector_store %arg6[%c0_7, %c0_8], %9 {strides = array<i32>} : memref<32x128xf32, #tpu.memory_space<vmem>>, vector<32x128xf32>,
    %c0_i32_9 = arith.constant 0 : i32
    %11 = arith.cmpi eq, %arg2, %c0_i32_9 : i32
    %12 = arith.extui %11 : i1 to i32
    %c0_i32_10 = arith.constant 0 : i32
    %13 = arith.cmpi ne, %12, %c0_i32_10 : i32
    scf.if %13 {
      %c0_11 = arith.constant 0 : index
      %c0_12 = arith.constant 0 : index
      %14 = vector.load %arg6[%c0_11, %c0_12] : memref<32x128xf32, #tpu.memory_space<vmem>>, vector<32x128xf32>
      %cst_13 = arith.constant 0.000000e+00 : f32
      %15 = vector.broadcast %cst_13 : f32 to vector<32x128xf32>
      %16 = arith.maximumf %14, %15 : vector<32x128xf32>
      %17 = arith.truncf %16 : vector<32x128xf32> to vector<32x128xbf16>
      %c0_14 = arith.constant 0 : index
      %c0_15 = arith.constant 0 : index
      %18 = vector.load %arg5[%c0_14, %c0_15] : memref<32x128xbf16, #tpu.memory_space<vmem>>, vector<32x128xbf16>
      tpu.vector_store %arg5[%c0_14, %c0_15], %17 {strides = array<i32>} : memref<32x128xbf16, #tpu.memory_space<vmem>>, vector<32x128xbf16>,
    } else {
    }
    return
  }
  func.func @transform_0(%arg0: i32, %arg1: i32, %arg2: i32) -> (i32, i32) {
    %c0_i32 = arith.constant 0 : i32
    return %arg0, %arg2 : i32, i32
  }
  func.func @transform_1(%arg0: i32, %arg1: i32, %arg2: i32) -> (i32, i32) {
    %c0_i32 = arith.constant 0 : i32
    return %arg2, %arg1 : i32, i32
  }
  func.func @transform_2(%arg0: i32, %arg1: i32, %arg2: i32) -> (i32, i32) {
    %c0_i32 = arith.constant 0 : i32
    return %arg0, %arg1 : i32, i32
  }
}

module attributes {stable_mosaic.version = 11 : i64} {
  func.func @_mm_kernel(%arg0: i32, %arg1: i32, %arg2: i32, %arg3: memref<32x256xbf16, #tpu.memory_space<vmem>>, %arg4: memref<256x128xbf16, #tpu.memory_space<vmem>>, %arg5: memref<32x128xbf16, #tpu.memory_space<vmem>>, %arg6: memref<32x128xf32, #tpu.memory_space<vmem>>) attributes {dimension_semantics = [#tpu.dimension_semantics<parallel>, #tpu.dimension_semantics<parallel>, #tpu.dimension_semantics<arbitrary>], iteration_bounds = array<i64: 1, 1, 1>, scalar_prefetch = 0 : i64, scratch_operands = 1 : i64, tpu.core_type = #tpu.core_type<tc>, window_params = [{transform_indices = @transform_0, window_bounds = array<i64: 32, 256>}, {transform_indices = @transform_1, window_bounds = array<i64: 256, 128>}, {transform_indices = @transform_2, window_bounds = array<i64: 32, 128>}]} {
    %c0_i32 = arith.constant 0 : i32
    %0 = arith.cmpi eq, %arg2, %c0_i32 : i32
    %1 = arith.extui %0 : i1 to i32
    %c0_i32_0 = arith.constant 0 : i32
    %2 = arith.cmpi ne, %1, %c0_i32_0 : i32
    scf.if %2 {
      %cst_11 = arith.constant 0.000000e+00 : f32
      %14 = vector.broadcast %cst_11 : f32 to vector<32x128xf32>
      %c0_12 = arith.constant 0 : index
      %c0_13 = arith.constant 0 : index
      %15 = vector.load %arg6[%c0_12, %c0_13] : memref<32x128xf32, #tpu.memory_space<vmem>>, vector<32x128xf32>
      tpu.vector_store %arg6[%c0_12, %c0_13], %14 {strides = array<i32>} : memref<32x128xf32, #tpu.memory_space<vmem>>, vector<32x128xf32>,
    } else {
    }
    %c0 = arith.constant 0 : index
    %c0_1 = arith.constant 0 : index
    %3 = vector.load %arg3[%c0, %c0_1] : memref<32x256xbf16, #tpu.memory_space<vmem>>, vector<32x256xbf16>
    %cst = arith.constant 0.000000e+00 : bf16
    %4 = vector.broadcast %cst : bf16 to vector<32x256xbf16>
    %5 = arith.maximumf %3, %4 : vector<32x256xbf16>
    %c0_2 = arith.constant 0 : index
    %c0_3 = arith.constant 0 : index
    %6 = vector.load %arg6[%c0_2, %c0_3] : memref<32x128xf32, #tpu.memory_space<vmem>>, vector<32x128xf32>
    %c0_4 = arith.constant 0 : index
    %c0_5 = arith.constant 0 : index
    %7 = vector.load %arg4[%c0_4, %c0_5] : memref<256x128xbf16, #tpu.memory_space<vmem>>, vector<256x128xbf16>
    %cst_6 = arith.constant dense<0.000000e+00> : vector<32x128xf32>
    %8 = tpu.matmul %5, %7, %cst_6 {dimension_numbers = #tpu.dot_dimension_numbers<[1], [0], [0], [1], [0, 0, 1, 1], [], []>} : vector<32x256xbf16>, vector<256x128xbf16>, vector<32x128xf32> -> vector<32x128xf32>
    %9 = arith.addf %6, %8 : vector<32x128xf32>
    %c0_7 = arith.constant 0 : index
    %c0_8 = arith.constant 0 : index
    %10 = vector.load %arg6[%c0_7, %c0_8] : memref<32x128xf32, #tpu.memory_space<vmem>>, vector<32x128xf32>
    tpu.vector_store %arg6[%c0_7, %c0_8], %9 {strides = array<i32>} : memref<32x128xf32, #tpu.memory_space<vmem>>, vector<32x128xf32>,
    %c0_i32_9 = arith.constant 0 : i32
    %11 = arith.cmpi eq, %arg2, %c0_i32_9 : i32
    %12 = arith.extui %11 : i1 to i32
    %c0_i32_10 = arith.constant 0 : i32
    %13 = arith.cmpi ne, %12, %c0_i32_10 : i32
    scf.if %13 {
      %c0_11 = arith.constant 0 : index
      %c0_12 = arith.constant 0 : index
      %14 = vector.load %arg6[%c0_11, %c0_12] : memref<32x128xf32, #tpu.memory_space<vmem>>, vector<32x128xf32>
      %15 = arith.truncf %14 : vector<32x128xf32> to vector<32x128xbf16>
      %c0_13 = arith.constant 0 : index
      %c0_14 = arith.constant 0 : index
      %16 = vector.load %arg5[%c0_13, %c0_14] : memref<32x128xbf16, #tpu.memory_space<vmem>>, vector<32x128xbf16>
      tpu.vector_store %arg5[%c0_13, %c0_14], %15 {strides = array<i32>} : memref<32x128xbf16, #tpu.memory_space<vmem>>, vector<32x128xbf16>,
    } else {
    }
    return
  }
  func.func @transform_0(%arg0: i32, %arg1: i32, %arg2: i32) -> (i32, i32) {
    %c0_i32 = arith.constant 0 : i32
    return %arg0, %arg2 : i32, i32
  }
  func.func @transform_1(%arg0: i32, %arg1: i32, %arg2: i32) -> (i32, i32) {
    %c0_i32 = arith.constant 0 : i32
    return %arg2, %arg1 : i32, i32
  }
  func.func @transform_2(%arg0: i32, %arg1: i32, %arg2: i32) -> (i32, i32) {
    %c0_i32 = arith.constant 0 : i32
    return %arg0, %arg1 : i32, i32
  }
}

module attributes {stable_mosaic.version = 11 : i64} {
  func.func @_stats_kernel(%arg0: i32, %arg1: i32, %arg2: memref<1x16x128xbf16, #tpu.memory_space<vmem>>, %arg3: memref<1x1x128xf32, #tpu.memory_space<vmem>>, %arg4: memref<1x1x128xf32, #tpu.memory_space<vmem>>, %arg5: memref<1x128xf32, #tpu.memory_space<vmem>>, %arg6: memref<1x128xf32, #tpu.memory_space<vmem>>) attributes {dimension_semantics = [#tpu.dimension_semantics<parallel>, #tpu.dimension_semantics<arbitrary>], iteration_bounds = array<i64: 2, 1>, scalar_prefetch = 0 : i64, scratch_operands = 2 : i64, tpu.core_type = #tpu.core_type<tc>, window_params = [{transform_indices = @transform_0, window_bounds = array<i64: 1, 16, 128>}, {transform_indices = @transform_1, window_bounds = array<i64: 1, 1, 128>}, {transform_indices = @transform_2, window_bounds = array<i64: 1, 1, 128>}]} {
    %c0_i32 = arith.constant 0 : i32
    %0 = arith.cmpi eq, %arg1, %c0_i32 : i32
    %1 = arith.extui %0 : i1 to i32
    %c0_i32_0 = arith.constant 0 : i32
    %2 = arith.cmpi ne, %1, %c0_i32_0 : i32
    scf.if %2 {
      %cst_16 = arith.constant 0.000000e+00 : f32
      %24 = vector.broadcast %cst_16 : f32 to vector<1x128xf32>
      %c0_17 = arith.constant 0 : index
      %c0_18 = arith.constant 0 : index
      %25 = vector.load %arg5[%c0_17, %c0_18] : memref<1x128xf32, #tpu.memory_space<vmem>>, vector<1x128xf32>
      tpu.vector_store %arg5[%c0_17, %c0_18], %24 {strides = array<i32>} : memref<1x128xf32, #tpu.memory_space<vmem>>, vector<1x128xf32>,
      %cst_19 = arith.constant 0.000000e+00 : f32
      %26 = vector.broadcast %cst_19 : f32 to vector<1x128xf32>
      %c0_20 = arith.constant 0 : index
      %c0_21 = arith.constant 0 : index
      %27 = vector.load %arg6[%c0_20, %c0_21] : memref<1x128xf32, #tpu.memory_space<vmem>>, vector<1x128xf32>
      tpu.vector_store %arg6[%c0_20, %c0_21], %26 {strides = array<i32>} : memref<1x128xf32, #tpu.memory_space<vmem>>, vector<1x128xf32>,
    } else {
    }
    %c0 = arith.constant 0 : index
    %c0_1 = arith.constant 0 : index
    %c0_2 = arith.constant 0 : index
    %3 = vector.load %arg2[%c0, %c0_1, %c0_2] : memref<1x16x128xbf16, #tpu.memory_space<vmem>>, vector<1x16x128xbf16>
    %4 = vector.shape_cast %3 : vector<1x16x128xbf16> to vector<16x128xbf16>
    %5 = arith.extf %4 : vector<16x128xbf16> to vector<16x128xf32>
    %cst = arith.constant 0.000000e+00 : f32
    %6 = vector.broadcast %cst : f32 to vector<16x128xf32>
    %7 = arith.maximumf %5, %6 : vector<16x128xf32>
    %cst_3 = arith.constant 0.999994993 : f32
    %8 = vector.broadcast %cst_3 : f32 to vector<16x128xf32>
    %9 = arith.mulf %7, %8 : vector<16x128xf32>
    %c0_4 = arith.constant 0 : index
    %c0_5 = arith.constant 0 : index
    %10 = vector.load %arg5[%c0_4, %c0_5] : memref<1x128xf32, #tpu.memory_space<vmem>>, vector<1x128xf32>
    %cst_6 = arith.constant dense<0.000000e+00> : vector<128xf32>
    %11 = vector.multi_reduction <add>, %9, %cst_6 [0] : vector<16x128xf32> to vector<128xf32>
    %12 = vector.shape_cast %11 : vector<128xf32> to vector<1x128xf32>
    %13 = arith.addf %10, %12 : vector<1x128xf32>
    %c0_7 = arith.constant 0 : index
    %c0_8 = arith.constant 0 : index
    %14 = vector.load %arg5[%c0_7, %c0_8] : memref<1x128xf32, #tpu.memory_space<vmem>>, vector<1x128xf32>
    tpu.vector_store %arg5[%c0_7, %c0_8], %13 {strides = array<i32>} : memref<1x128xf32, #tpu.memory_space<vmem>>, vector<1x128xf32>,
    %c0_9 = arith.constant 0 : index
    %c0_10 = arith.constant 0 : index
    %15 = vector.load %arg6[%c0_9, %c0_10] : memref<1x128xf32, #tpu.memory_space<vmem>>, vector<1x128xf32>
    %16 = arith.mulf %9, %9 : vector<16x128xf32>
    %cst_11 = arith.constant dense<0.000000e+00> : vector<128xf32>
    %17 = vector.multi_reduction <add>, %16, %cst_11 [0] : vector<16x128xf32> to vector<128xf32>
    %18 = vector.shape_cast %17 : vector<128xf32> to vector<1x128xf32>
    %19 = arith.addf %15, %18 : vector<1x128xf32>
    %c0_12 = arith.constant 0 : index
    %c0_13 = arith.constant 0 : index
    %20 = vector.load %arg6[%c0_12, %c0_13] : memref<1x128xf32, #tpu.memory_space<vmem>>, vector<1x128xf32>
    tpu.vector_store %arg6[%c0_12, %c0_13], %19 {strides = array<i32>} : memref<1x128xf32, #tpu.memory_space<vmem>>, vector<1x128xf32>,
    %c0_i32_14 = arith.constant 0 : i32
    %21 = arith.cmpi eq, %arg1, %c0_i32_14 : i32
    %22 = arith.extui %21 : i1 to i32
    %c0_i32_15 = arith.constant 0 : i32
    %23 = arith.cmpi ne, %22, %c0_i32_15 : i32
    scf.if %23 {
      %c0_16 = arith.constant 0 : index
      %c0_17 = arith.constant 0 : index
      %24 = vector.load %arg5[%c0_16, %c0_17] : memref<1x128xf32, #tpu.memory_space<vmem>>, vector<1x128xf32>
      %cst_18 = arith.constant 6.250000e-02 : f32
      %25 = vector.broadcast %cst_18 : f32 to vector<1x128xf32>
      %26 = arith.mulf %24, %25 : vector<1x128xf32>
      %c0_19 = arith.constant 0 : index
      %c0_20 = arith.constant 0 : index
      %27 = vector.load %arg6[%c0_19, %c0_20] : memref<1x128xf32, #tpu.memory_space<vmem>>, vector<1x128xf32>
      %cst_21 = arith.constant 1.600000e+01 : f32
      %28 = vector.broadcast %cst_21 : f32 to vector<1x128xf32>
      %29 = arith.mulf %28, %26 : vector<1x128xf32>
      %30 = arith.mulf %29, %26 : vector<1x128xf32>
      %31 = arith.subf %27, %30 : vector<1x128xf32>
      %cst_22 = arith.constant 0.0666666701 : f32
      %32 = vector.broadcast %cst_22 : f32 to vector<1x128xf32>
      %33 = arith.mulf %31, %32 : vector<1x128xf32>
      %c0_23 = arith.constant 0 : index
      %c0_24 = arith.constant 0 : index
      %c0_25 = arith.constant 0 : index
      %34 = vector.load %arg3[%c0_23, %c0_24, %c0_25] : memref<1x1x128xf32, #tpu.memory_space<vmem>>, vector<1x1x128xf32>
      %35 = vector.shape_cast %34 : vector<1x1x128xf32> to vector<1x128xf32>
      %36 = vector.shape_cast %26 : vector<1x128xf32> to vector<1x1x128xf32>
      tpu.vector_store %arg3[%c0_23, %c0_24, %c0_25], %36 {strides = array<i32>} : memref<1x1x128xf32, #tpu.memory_space<vmem>>, vector<1x1x128xf32>,
      %cst_26 = arith.constant 0.000000e+00 : f32
      %37 = vector.broadcast %cst_26 : f32 to vector<1x128xf32>
      %38 = arith.maximumf %33, %37 : vector<1x128xf32>
      %39 = math.sqrt %38 : vector<1x128xf32>
      %c0_27 = arith.constant 0 : index
      %c0_28 = arith.constant 0 : index
      %c0_29 = arith.constant 0 : index
      %40 = vector.load %arg4[%c0_27, %c0_28, %c0_29] : memref<1x1x128xf32, #tpu.memory_space<vmem>>, vector<1x1x128xf32>
      %41 = vector.shape_cast %40 : vector<1x1x128xf32> to vector<1x128xf32>
      %42 = vector.shape_cast %39 : vector<1x128xf32> to vector<1x1x128xf32>
      tpu.vector_store %arg4[%c0_27, %c0_28, %c0_29], %42 {strides = array<i32>} : memref<1x1x128xf32, #tpu.memory_space<vmem>>, vector<1x1x128xf32>,
    } else {
    }
    return
  }
  func.func @transform_0(%arg0: i32, %arg1: i32) -> (i32, i32, i32) {
    %c0_i32 = arith.constant 0 : i32
    %c0_i32_0 = arith.constant 0 : i32
    return %arg0, %arg1, %c0_i32 : i32, i32, i32
  }
  func.func @transform_1(%arg0: i32, %arg1: i32) -> (i32, i32, i32) {
    %c0_i32 = arith.constant 0 : i32
    %c0_i32_0 = arith.constant 0 : i32
    %c0_i32_1 = arith.constant 0 : i32
    return %arg0, %c0_i32, %c0_i32_0 : i32, i32, i32
  }
  func.func @transform_2(%arg0: i32, %arg1: i32) -> (i32, i32, i32) {
    %c0_i32 = arith.constant 0 : i32
    %c0_i32_0 = arith.constant 0 : i32
    %c0_i32_1 = arith.constant 0 : i32
    return %arg0, %c0_i32, %c0_i32_0 : i32, i32, i32
  }
}

module attributes {stable_mosaic.version = 11 : i64} {
  func.func @_mm_kernel(%arg0: i32, %arg1: i32, %arg2: i32, %arg3: memref<16x256xbf16, #tpu.memory_space<vmem>>, %arg4: memref<256x128xbf16, #tpu.memory_space<vmem>>, %arg5: memref<16x128xf32, #tpu.memory_space<vmem>>, %arg6: memref<16x128xf32, #tpu.memory_space<vmem>>) attributes {dimension_semantics = [#tpu.dimension_semantics<parallel>, #tpu.dimension_semantics<parallel>, #tpu.dimension_semantics<arbitrary>], iteration_bounds = array<i64: 1, 1, 1>, scalar_prefetch = 0 : i64, scratch_operands = 1 : i64, tpu.core_type = #tpu.core_type<tc>, window_params = [{transform_indices = @transform_0, window_bounds = array<i64: 16, 256>}, {transform_indices = @transform_1, window_bounds = array<i64: 256, 128>}, {transform_indices = @transform_2, window_bounds = array<i64: 16, 128>}]} {
    %c0_i32 = arith.constant 0 : i32
    %0 = arith.cmpi eq, %arg2, %c0_i32 : i32
    %1 = arith.extui %0 : i1 to i32
    %c0_i32_0 = arith.constant 0 : i32
    %2 = arith.cmpi ne, %1, %c0_i32_0 : i32
    scf.if %2 {
      %cst_10 = arith.constant 0.000000e+00 : f32
      %12 = vector.broadcast %cst_10 : f32 to vector<16x128xf32>
      %c0_11 = arith.constant 0 : index
      %c0_12 = arith.constant 0 : index
      %13 = vector.load %arg6[%c0_11, %c0_12] : memref<16x128xf32, #tpu.memory_space<vmem>>, vector<16x128xf32>
      tpu.vector_store %arg6[%c0_11, %c0_12], %12 {strides = array<i32>} : memref<16x128xf32, #tpu.memory_space<vmem>>, vector<16x128xf32>,
    } else {
    }
    %c0 = arith.constant 0 : index
    %c0_1 = arith.constant 0 : index
    %3 = vector.load %arg3[%c0, %c0_1] : memref<16x256xbf16, #tpu.memory_space<vmem>>, vector<16x256xbf16>
    %c0_2 = arith.constant 0 : index
    %c0_3 = arith.constant 0 : index
    %4 = vector.load %arg6[%c0_2, %c0_3] : memref<16x128xf32, #tpu.memory_space<vmem>>, vector<16x128xf32>
    %c0_4 = arith.constant 0 : index
    %c0_5 = arith.constant 0 : index
    %5 = vector.load %arg4[%c0_4, %c0_5] : memref<256x128xbf16, #tpu.memory_space<vmem>>, vector<256x128xbf16>
    %cst = arith.constant dense<0.000000e+00> : vector<16x128xf32>
    %6 = tpu.matmul %3, %5, %cst {dimension_numbers = #tpu.dot_dimension_numbers<[1], [0], [0], [1], [0, 0, 1, 1], [], []>} : vector<16x256xbf16>, vector<256x128xbf16>, vector<16x128xf32> -> vector<16x128xf32>
    %7 = arith.addf %4, %6 : vector<16x128xf32>
    %c0_6 = arith.constant 0 : index
    %c0_7 = arith.constant 0 : index
    %8 = vector.load %arg6[%c0_6, %c0_7] : memref<16x128xf32, #tpu.memory_space<vmem>>, vector<16x128xf32>
    tpu.vector_store %arg6[%c0_6, %c0_7], %7 {strides = array<i32>} : memref<16x128xf32, #tpu.memory_space<vmem>>, vector<16x128xf32>,
    %c0_i32_8 = arith.constant 0 : i32
    %9 = arith.cmpi eq, %arg2, %c0_i32_8 : i32
    %10 = arith.extui %9 : i1 to i32
    %c0_i32_9 = arith.constant 0 : i32
    %11 = arith.cmpi ne, %10, %c0_i32_9 : i32
    scf.if %11 {
      %c0_10 = arith.constant 0 : index
      %c0_11 = arith.constant 0 : index
      %12 = vector.load %arg6[%c0_10, %c0_11] : memref<16x128xf32, #tpu.memory_space<vmem>>, vector<16x128xf32>
      %c0_12 = arith.constant 0 : index
      %c0_13 = arith.constant 0 : index
      %13 = vector.load %arg5[%c0_12, %c0_13] : memref<16x128xf32, #tpu.memory_space<vmem>>, vector<16x128xf32>
      tpu.vector_store %arg5[%c0_12, %c0_13], %12 {strides = array<i32>} : memref<16x128xf32, #tpu.memory_space<vmem>>, vector<16x128xf32>,
    } else {
    }
    return
  }
  func.func @transform_0(%arg0: i32, %arg1: i32, %arg2: i32) -> (i32, i32) {
    %c0_i32 = arith.constant 0 : i32
    return %arg0, %arg2 : i32, i32
  }
  func.func @transform_1(%arg0: i32, %arg1: i32, %arg2: i32) -> (i32, i32) {
    %c0_i32 = arith.constant 0 : i32
    return %arg2, %arg1 : i32, i32
  }
  func.func @transform_2(%arg0: i32, %arg1: i32, %arg2: i32) -> (i32, i32) {
    %c0_i32 = arith.constant 0 : i32
    return %arg0, %arg1 : i32, i32
  }
}

</mosaic_0001>

<bundles_post_ra>
// kernel: _lambda_.226
= control target key start
LH: loop header
LB: loop body
LE: loop exit
PB: predicated region body
PF: predicated region fallthrough
CT: control target
= control target key end

     0   :  { %s1175_s9 = smov 0   ;;  %s1177_s10 = smov 0   ;;  %s1278_s0 = inlined_call_operand.vmem [shape: bf16[1024,128], index: 0, kind: input, shape index: {}]   ;;  %s1279_s1 = inlined_call_operand.vmem [shape: bf16[128,128], index: 1, kind: input, shape index: {}]   ;;  %s1280_s2 = inlined_call_operand.vmem [shape: bf16[1024,128], index: 2, kind: output, shape index: {}]  }
   0x1   :  { %s1179_s11 = smov 0  }
   0x2 LB: > { %s31_s12 = sadd.s32 1, %s1154_s10  ;;  %p866_p0 = scmp.ge.s32.totalorder %s1158_s11, 1  ;;  %s1158_s11 = sphi %s1179_s11, %s12_s11   ;;  %s1154_s10 = sphi %s1177_s10, %s1282_s10   ;;  %s1150_s9 = sphi %s1175_s9, %s1281_s9  }
   0x3   : > { %p33_p1 = scmp.ge.s32.totalorder %s31_s12, 4  ;;  %p155_p2 = scmp.lt.s32.totalorder %s1158_s11, 5 }
   0x5   : > { %s1284_s12 = smov (%p33_p1, %s31_s12), 0  ;;  %p156_p3 = pnand %p866_p0, %p155_p2 }
   0x6   : > { %s867_s21 = sshll.u32 (!%p156_p3), %s1150_s9, 5 }
   0x7   : > { %159 = sbr.rel (%p156_p3) target bundleno = 239 (0xef), region = 28  ;;  %p192_p4 = scmp.lt.s32.totalorder (!%p156_p3), %s867_s21, 127 }
   0xc   : > { %v992_v0 = vld [vmem:[%s1279_s1 + $0x38] sm:$0xff]  ;;  %v991_v1 = vld [vmem:[%s1279_s1 + $0x30] sm:$0xff]  ;;  %v990_v2 = vld [vmem:[%s1279_s1 + $0x28] sm:$0xff]  ;;  %s1286_s21 = smov (!%p192_p4, %s867_s21), 127 }
   0xd   : > { %478 = vmatpush.bf16.msra.mxu0 %v992_v0  ;;  %1088 = vmatpush.bf16.msra.mxu1 %v992_v0  ;;  %v989_v3 = vld [vmem:[%s1279_s1 + $0x20] sm:$0xff]  ;;  %v988_v4 = vld [vmem:[%s1279_s1 + $0x18] sm:$0xff]  ;;  %v987_v5 = vld [vmem:[%s1279_s1 + $0x10] sm:$0xff]  ;;  %s868_s28 = sshll.u32 %s1286_s21, 2 }
   0xe   : > { %1089 = vmatpush.bf16.msra.mxu2 %v992_v0  ;;  %1090 = vmatpush.bf16.msra.mxu3 %v992_v0  ;;  %v986_v6 = vld [vmem:[%s1279_s1 + $0x8] sm:$0xff]  ;;  %v985_v7 = vld [vmem:[%s1279_s1] sm:$0xff]  ;;  %s1228_s5 = scalar_lea.vmem %s1278_s0, %s868_s28  ;;  %s1251_s8 = scalar_lea.vmem %s1280_s2, %s868_s28 }
   0xf   : > { %v969_v8 = vld [vmem:[%s1228_s5] sm:$0xff]  ;;  %v970_v12 = vld [vmem:[%s1228_s5 + $0x8] sm:$0xff]  ;;  %v971_v16 = vld [vmem:[%s1228_s5 + $0x10] sm:$0xff] }
  0x10   : > { %v973_v9 = vld [vmem:[%s1228_s5 + $0x20] sm:$0xff]  ;;  %v974_v13 = vld [vmem:[%s1228_s5 + $0x28] sm:$0xff]  ;;  %v975_v17 = vld [vmem:[%s1228_s5 + $0x30] sm:$0xff] }
  0x11   : > { %479 = vmatpush.bf16.msra.mxu0 %v991_v1  ;;  %1091 = vmatpush.bf16.msra.mxu1 %v991_v1  ;;  %v977_v10 = vld [vmem:[%s1228_s5 + $0x40] sm:$0xff]  ;;  %v978_v14 = vld [vmem:[%s1228_s5 + $0x48] sm:$0xff]  ;;  %v979_v18 = vld [vmem:[%s1228_s5 + $0x50] sm:$0xff] }
  0x12   : > { %1092 = vmatpush.bf16.msra.mxu2 %v991_v1  ;;  %1093 = vmatpush.bf16.msra.mxu3 %v991_v1  ;;  %v981_v11 = vld [vmem:[%s1228_s5 + $0x60] sm:$0xff]  ;;  %v982_v15 = vld [vmem:[%s1228_s5 + $0x68] sm:$0xff]  ;;  %v983_v19 = vld [vmem:[%s1228_s5 + $0x70] sm:$0xff] }
  0x13   : > { %v972_v20 = vld [vmem:[%s1228_s5 + $0x18] sm:$0xff] }
  0x14   : > { %v976_v21 = vld [vmem:[%s1228_s5 + $0x38] sm:$0xff] }
  0x15   : > { %480 = vmatpush.bf16.msra.mxu0 %v990_v2  ;;  %1094 = vmatpush.bf16.msra.mxu1 %v990_v2  ;;  %v980_v22 = vld [vmem:[%s1228_s5 + $0x58] sm:$0xff] }
  0x16   : > { %1095 = vmatpush.bf16.msra.mxu2 %v990_v2  ;;  %1096 = vmatpush.bf16.msra.mxu3 %v990_v2  ;;  %v984_v23 = vld [vmem:[%s1228_s5 + $0x78] sm:$0xff] }
  0x19   : > { %481 = vmatpush.bf16.msra.mxu0 %v989_v3  ;;  %1097 = vmatpush.bf16.msra.mxu1 %v989_v3 }
  0x1a   : > { %1098 = vmatpush.bf16.msra.mxu2 %v989_v3  ;;  %1099 = vmatpush.bf16.msra.mxu3 %v989_v3 }
  0x1d   : > { %482 = vmatpush.bf16.msra.mxu0 %v988_v4  ;;  %1100 = vmatpush.bf16.msra.mxu1 %v988_v4 }
  0x1e   : > { %1101 = vmatpush.bf16.msra.mxu2 %v988_v4  ;;  %1102 = vmatpush.bf16.msra.mxu3 %v988_v4 }
  0x21   : > { %483 = vmatpush.bf16.msra.mxu0 %v987_v5  ;;  %1103 = vmatpush.bf16.msra.mxu1 %v987_v5 }
  0x22   : > { %1104 = vmatpush.bf16.msra.mxu2 %v987_v5  ;;  %1105 = vmatpush.bf16.msra.mxu3 %v987_v5 }
  0x25   : > { %484 = vmatpush.bf16.msra.mxu0 %v986_v6  ;;  %1106 = vmatpush.bf16.msra.mxu1 %v986_v6 }
  0x26   : > { %1107 = vmatpush.bf16.msra.mxu2 %v986_v6  ;;  %1108 = vmatpush.bf16.msra.mxu3 %v986_v6 }
  0x29   : > { %485 = vmatpush.bf16.msra.mxu0 %v985_v7  ;;  %1109 = vmatpush.bf16.msra.mxu1 %v985_v7 }
  0x2a   : > { %1110 = vmatpush.bf16.msra.mxu2 %v985_v7  ;;  %1111 = vmatpush.bf16.msra.mxu3 %v985_v7 }
  0x2c   : > { %486 = vmatmul.bf16.vlgmr.msra.gmra.mxu0 %v969_v8  ;;  %506 = vmatmul.bf16.vlgmr.msra.gmra.mxu1 %v973_v9 }
  0x2d   : > { %526 = vmatmul.bf16.vlgmr.msra.gmra.mxu2 %v977_v10  ;;  %546 = vmatmul.bf16.vlgmr.msra.gmra.mxu3 %v981_v11 }
  0x3c   : > { %491 = vmatmul.bf16.gmra.mxu0 %v970_v12  ;;  %511 = vmatmul.bf16.gmra.mxu1 %v974_v13 }
  0x3d   : > { %531 = vmatmul.bf16.gmra.mxu2 %v978_v14  ;;  %551 = vmatmul.bf16.gmra.mxu3 %v982_v15 }
  0x4c   : > { %496 = vmatmul.bf16.gmra.mxu0 %v971_v16  ;;  %516 = vmatmul.bf16.gmra.mxu1 %v975_v17 }
  0x4d   : > { %536 = vmatmul.bf16.gmra.mxu2 %v979_v18  ;;  %556 = vmatmul.bf16.gmra.mxu3 %v983_v19 }
  0x5c   : > { %501 = vmatmul.bf16.gmra.mxu0 %v972_v20  ;;  %521 = vmatmul.bf16.gmra.mxu1 %v976_v21 }
  0x5d   : > { %541 = vmatmul.bf16.gmra.mxu2 %v980_v22  ;;  %561 = vmatmul.bf16.gmra.mxu3 %v984_v23 }
  0xa9   : > { %v487_v24 = vpop.f32.mrf.mxu0  ;;  %v507_v25 = vpop.f32.mrf.mxu1 }
  0xaa   : > { %v666_v30 = vmax.f32 %v487_v24, 0.0  ;;  %v674_v31 = vmax.f32 %v507_v25, 0.0 }
  0xb0   : > { %v527_v26 = vpop.f32.mrf.mxu2  ;;  %v547_v27 = vpop.f32.mrf.mxu3 }
  0xb1   : > { %v489_v28 = vpop.f32.mrf.mxu0  ;;  %v509_v29 = vpop.f32.mrf.mxu1  ;;  %v682_v38 = vmax.f32 %v527_v26, 0.0  ;;  %v690_v39 = vmax.f32 %v547_v27, 0.0 }
  0xb2   : > { %v667_v32 = vmax.f32 %v489_v28, 0.0  ;;  %v675_v33 = vmax.f32 %v509_v29, 0.0 }
  0xb4   : > { %v996_v34 = vpack.c.bf16 %v667_v32, %v666_v30  ;;  %v1016_v35 = vpack.c.bf16 %v675_v33, %v674_v31 }
  0xb6   : > { %997 = vst [vmem:[%s1251_s8] sm:$0xff] %v996_v34  }
  0xb7   : > { %1076 = vst [vmem:[%s1251_s8 + $0x20] sm:$0xff] %v1016_v35  }
  0xb8   : > { %v529_v36 = vpop.f32.mrf.mxu2  ;;  %v549_v37 = vpop.f32.mrf.mxu3 }
  0xb9   : > { %v683_v40 = vmax.f32 %v529_v36, 0.0  ;;  %v691_v41 = vmax.f32 %v549_v37, 0.0  ;;  %v492_v42 = vpop.f32.mrf.mxu0  ;;  %v512_v43 = vpop.f32.mrf.mxu1 }
  0xba   : > { %v668_v50 = vmax.f32 %v492_v42, 0.0  ;;  %v676_v51 = vmax.f32 %v512_v43, 0.0 }
  0xbb   : > { %v1036_v44 = vpack.c.bf16 %v683_v40, %v682_v38  ;;  %v1056_v45 = vpack.c.bf16 %v691_v41, %v690_v39 }
  0xbd   : > { %1080 = vst [vmem:[%s1251_s8 + $0x40] sm:$0xff] %v1036_v44  }
  0xbe   : > { %1084 = vst [vmem:[%s1251_s8 + $0x60] sm:$0xff] %v1056_v45  }
  0xc0   : > { %v532_v46 = vpop.f32.mrf.mxu2  ;;  %v552_v47 = vpop.f32.mrf.mxu3 }
  0xc1   : > { %v494_v48 = vpop.f32.mrf.mxu0  ;;  %v514_v49 = vpop.f32.mrf.mxu1  ;;  %v684_v58 = vmax.f32 %v532_v46, 0.0  ;;  %v692_v59 = vmax.f32 %v552_v47, 0.0 }
  0xc2   : > { %v669_v52 = vmax.f32 %v494_v48, 0.0  ;;  %v677_v53 = vmax.f32 %v514_v49, 0.0 }
  0xc4   : > { %v1001_v54 = vpack.c.bf16 %v669_v52, %v668_v50  ;;  %v1021_v55 = vpack.c.bf16 %v677_v53, %v676_v51 }
  0xc6   : > { %1073 = vst [vmem:[%s1251_s8 + $0x8] sm:$0xff] %v1001_v54  }
  0xc7   : > { %1077 = vst [vmem:[%s1251_s8 + $0x28] sm:$0xff] %v1021_v55  }
  0xc8   : > { %v534_v56 = vpop.f32.mrf.mxu2  ;;  %v554_v57 = vpop.f32.mrf.mxu3 }
  0xc9   : > { %v685_v60 = vmax.f32 %v534_v56, 0.0  ;;  %v693_v61 = vmax.f32 %v554_v57, 0.0  ;;  %v497_v62 = vpop.f32.mrf.mxu0  ;;  %v517_v63 = vpop.f32.mrf.mxu1 }
  0xca   : > { %v670_v6 = vmax.f32 %v497_v62, 0.0  ;;  %v678_v7 = vmax.f32 %v517_v63, 0.0 }
  0xcb   : > { %v1041_v0 = vpack.c.bf16 %v685_v60, %v684_v58  ;;  %v1061_v1 = vpack.c.bf16 %v693_v61, %v692_v59 }
  0xcd   : > { %1081 = vst [vmem:[%s1251_s8 + $0x48] sm:$0xff] %v1041_v0  }
  0xce   : > { %1085 = vst [vmem:[%s1251_s8 + $0x68] sm:$0xff] %v1061_v1  }
  0xd0   : > { %v537_v2 = vpop.f32.mrf.mxu2  ;;  %v557_v3 = vpop.f32.mrf.mxu3 }
  0xd1   : > { %v499_v4 = vpop.f32.mrf.mxu0  ;;  %v519_v5 = vpop.f32.mrf.mxu1  ;;  %v686_v14 = vmax.f32 %v537_v2, 0.0  ;;  %v694_v15 = vmax.f32 %v557_v3, 0.0 }
  0xd2   : > { %v671_v8 = vmax.f32 %v499_v4, 0.0  ;;  %v679_v9 = vmax.f32 %v519_v5, 0.0 }
  0xd4   : > { %v1006_v10 = vpack.c.bf16 %v671_v8, %v670_v6  ;;  %v1026_v11 = vpack.c.bf16 %v679_v9, %v678_v7 }
  0xd6   : > { %1074 = vst [vmem:[%s1251_s8 + $0x10] sm:$0xff] %v1006_v10  }
  0xd7   : > { %1078 = vst [vmem:[%s1251_s8 + $0x30] sm:$0xff] %v1026_v11  }
  0xd8   : > { %v539_v12 = vpop.f32.mrf.mxu2  ;;  %v559_v13 = vpop.f32.mrf.mxu3 }
  0xd9   : > { %v687_v16 = vmax.f32 %v539_v12, 0.0  ;;  %v695_v17 = vmax.f32 %v559_v13, 0.0  ;;  %v502_v18 = vpop.f32.mrf.mxu0  ;;  %v522_v19 = vpop.f32.mrf.mxu1 }
  0xda   : > { %v672_v26 = vmax.f32 %v502_v18, 0.0  ;;  %v680_v27 = vmax.f32 %v522_v19, 0.0 }
  0xdb   : > { %v1046_v20 = vpack.c.bf16 %v687_v16, %v686_v14  ;;  %v1066_v21 = vpack.c.bf16 %v695_v17, %v694_v15 }
  0xdd   : > { %1082 = vst [vmem:[%s1251_s8 + $0x50] sm:$0xff] %v1046_v20  }
  0xde   : > { %1086 = vst [vmem:[%s1251_s8 + $0x70] sm:$0xff] %v1066_v21  }
  0xe0   : > { %v542_v22 = vpop.f32.mrf.mxu2  ;;  %v562_v23 = vpop.f32.mrf.mxu3 }
  0xe1   : > { %v504_v24 = vpop.f32.mrf.mxu0  ;;  %v524_v25 = vpop.f32.mrf.mxu1  ;;  %v688_v34 = vmax.f32 %v542_v22, 0.0  ;;  %v696_v35 = vmax.f32 %v562_v23, 0.0 }
  0xe2   : > { %v673_v28 = vmax.f32 %v504_v24, 0.0  ;;  %v681_v29 = vmax.f32 %v524_v25, 0.0 }
  0xe4   : > { %v1011_v30 = vpack.c.bf16 %v673_v28, %v672_v26  ;;  %v1031_v31 = vpack.c.bf16 %v681_v29, %v680_v27 }
  0xe6   : > { %1075 = vst [vmem:[%s1251_s8 + $0x18] sm:$0xff] %v1011_v30  }
  0xe7   : > { %1079 = vst [vmem:[%s1251_s8 + $0x38] sm:$0xff] %v1031_v31  }
  0xe8   : > { %v544_v32 = vpop.f32.mrf.mxu2  ;;  %v564_v33 = vpop.f32.mrf.mxu3 }
  0xe9   : > { %v689_v36 = vmax.f32 %v544_v32, 0.0  ;;  %v697_v37 = vmax.f32 %v564_v33, 0.0 }
  0xeb   : > { %v1051_v38 = vpack.c.bf16 %v689_v36, %v688_v34  ;;  %v1071_v39 = vpack.c.bf16 %v697_v37, %v696_v35 }
  0xed   : > { %1083 = vst [vmem:[%s1251_s8 + $0x58] sm:$0xff] %v1051_v38  }
  0xee   : > { %1087 = vst [vmem:[%s1251_s8 + $0x78] sm:$0xff] %v1071_v39  }
  0xef PF: > { %s12_s11 = sadd.s32 1, %s1158_s11   ;;  %s1281_s9 = smov %s1154_s10 }
  0xf0   : > { %p9_p5 = scmp.ge.s32.totalorder %s12_s11, 6   ;;  %s1282_s10 = smov %s1284_s12 }
  0xf2   :  { %11 = sbr.rel (!%p9_p5) target bundleno = 2 (0x2), region = 69 }

// kernel: _lambda_.227
= control target key start
LH: loop header
LB: loop body
LE: loop exit
PB: predicated region body
PF: predicated region fallthrough
CT: control target
= control target key end

     0   :  { %s1925_s9 = smov 0   ;;  %s1927_s10 = smov 0   ;;  %s2249_s0 = inlined_call_operand.vmem [shape: bf16[512,384], index: 0, kind: input, shape index: {}]   ;;  %s2250_s1 = inlined_call_operand.vmem [shape: bf16[384,128], index: 1, kind: input, shape index: {}]   ;;  %s2251_s2 = inlined_call_operand.vmem [shape: bf16[512,128], index: 2, kind: output, shape index: {}]  }
   0x1   :  { %s1929_s11 = smov 0  }
   0x2 LB: > { %s31_s12 = sadd.s32 1, %s1904_s10  ;;  %p1375_p0 = scmp.ge.s32.totalorder %s1908_s11, 1  ;;  %s1908_s11 = sphi %s1929_s11, %s12_s11   ;;  %s1904_s10 = sphi %s1927_s10, %s2253_s10   ;;  %s1900_s9 = sphi %s1925_s9, %s2252_s9  }
   0x3   : > { %p33_p1 = scmp.ge.s32.totalorder %s31_s12, 2  ;;  %p158_p2 = scmp.lt.s32.totalorder %s1908_s11, 3 }
   0x5   : > { %s2255_s12 = smov (%p33_p1, %s31_s12), 0  ;;  %p159_p3 = pnand %p1375_p0, %p158_p2 }
   0x6   : > { %s1376_s3 = sshll.u32 (!%p159_p3), %s1900_s9, 5 }
   0x7   : > { %162 = sbr.rel (%p159_p3) target bundleno = 369 (0x171), region = 28  ;;  %p198_p4 = scmp.lt.s32.totalorder (!%p159_p3), %s1376_s3, 63 }
   0xc   : > { %v1725_v0 = vld [vmem:[%s2250_s1 + $0x38] sm:$0xff]  ;;  %v1724_v3 = vld [vmem:[%s2250_s1 + $0x30] sm:$0xff]  ;;  %v1723_v6 = vld [vmem:[%s2250_s1 + $0x28] sm:$0xff]  ;;  %s2257_s3 = smov (!%p198_p4, %s1376_s3), 63 }
   0xd   : > { %v1951_v1 = vld [vmem:[%s2250_s1 + $0x78] sm:$0xff]  ;;  %806 = vmatpush.bf16.msra.mxu0 %v1725_v0  ;;  %1837 = vmatpush.bf16.msra.mxu3 %v1725_v0  ;;  %v1966_v4 = vld [vmem:[%s2250_s1 + $0x70] sm:$0xff]  ;;  %v1981_v7 = vld [vmem:[%s2250_s1 + $0x68] sm:$0xff]  ;;  %s1861_s21 = smul.u32 12, %s2257_s3  ;;  %s1379_s17 = sshll.u32 %s2257_s3, 2 }
   0xe   : > { %v1956_v2 = vld [vmem:[%s2250_s1 + $0xb8] sm:$0xff]  ;;  %895 = vmatpush.bf16.msra.mxu1 %v1951_v1  ;;  %v1971_v5 = vld [vmem:[%s2250_s1 + $0xb0] sm:$0xff]  ;;  %v1986_v8 = vld [vmem:[%s2250_s1 + $0xa8] sm:$0xff]  ;;  %s2162_s20 = scalar_lea.vmem %s2251_s2, %s1379_s17 }
   0xf   : > { %984 = vmatpush.bf16.msra.mxu2 %v1956_v2  ;;  %v1722_v9 = vld [vmem:[%s2250_s1 + $0x20] sm:$0xff]  ;;  %v1721_v12 = vld [vmem:[%s2250_s1 + $0x18] sm:$0xff]  ;;  %v1720_v15 = vld [vmem:[%s2250_s1 + $0x10] sm:$0xff]  ;;  %s2038_s30 = scalar_lea.vmem %s2249_s0, %s1861_s21 }
  0x10   : > { %v1997_v10 = vld [vmem:[%s2250_s1 + $0x60] sm:$0xff]  ;;  %v1729_v13 = vld [vmem:[%s2250_s1 + $0x58] sm:$0xff]  ;;  %v1728_v16 = vld [vmem:[%s2250_s1 + $0x50] sm:$0xff] }
  0x11   : > { %807 = vmatpush.bf16.msra.mxu0 %v1724_v3  ;;  %1838 = vmatpush.bf16.msra.mxu3 %v1724_v3  ;;  %v2002_v11 = vld [vmem:[%s2250_s1 + $0xa0] sm:$0xff]  ;;  %v2017_v14 = vld [vmem:[%s2250_s1 + $0x98] sm:$0xff]  ;;  %v2030_v17 = vld [vmem:[%s2250_s1 + $0x90] sm:$0xff] }
  0x12   : > { %896 = vmatpush.bf16.msra.mxu1 %v1966_v4  ;;  %v1719_v18 = vld [vmem:[%s2250_s1 + $0x8] sm:$0xff]  ;;  %v1718_v21 = vld [vmem:[%s2250_s1] sm:$0xff]  ;;  %v1384_v29 = vld [vmem:[%s2038_s30 + $0xc] sm:$0xf0] }
  0x13   : > { %985 = vmatpush.bf16.msra.mxu2 %v1971_v5  ;;  %v1727_v19 = vld [vmem:[%s2250_s1 + $0x48] sm:$0xff]  ;;  %v1726_v22 = vld [vmem:[%s2250_s1 + $0x40] sm:$0xff]  ;;  %v1672_v31 = vld [vmem:[%s2038_s30 + $0x10] sm:$0xf0] }
  0x14   : > { %v2047_v20 = vld [vmem:[%s2250_s1 + $0x88] sm:$0xff]  ;;  %v2058_v23 = vld [vmem:[%s2250_s1 + $0x80] sm:$0xff]  ;;  %v1394_v36 = vld [vmem:[%s2038_s30 + $0x18] sm:$0xf] }
  0x15   : > { %808 = vmatpush.bf16.msra.mxu0 %v1723_v6  ;;  %1839 = vmatpush.bf16.msra.mxu3 %v1723_v6  ;;  %v1382_v24 = vld [vmem:[%s2038_s30] sm:$0xf]  ;;  %v1671_v25 = vld [vmem:[%s2038_s30 + $0x8] sm:$0xf0]  ;;  %v1670_v28 = vld [vmem:[%s2038_s30 + $0x4] sm:$0xf] }
  0x16   : > { %897 = vmatpush.bf16.msra.mxu1 %v1981_v7  ;;  %v1526_v26 = vld [vmem:[%s2038_s30 + $0x120] sm:$0xf]  ;;  %v1707_v27 = vld [vmem:[%s2038_s30 + $0x128] sm:$0xf0]  ;;  %v1390_v30 = vld [vmem:[%s2038_s30 + $0x8] sm:$0xf]  ;;  %v1383_v32 = vor.u32 %v1671_v25, %v1382_v24  ;;  %v1387_v34 = vor.u32 %v1670_v28, %v1384_v29 }
  0x17   : > { %986 = vmatpush.bf16.msra.mxu2 %v1986_v8  ;;  %v1527_v33 = vor.u32 %v1707_v27, %v1526_v26  ;;  %v1391_v35 = vor.u32 %v1672_v31, %v1390_v30  ;;  %v1674_v37 = vld [vmem:[%s2038_s30 + $0x20] sm:$0xf0]  ;;  %v1538_v38 = vld [vmem:[%s2038_s30 + $0x138] sm:$0xf]  ;;  %v1673_v40 = vld [vmem:[%s2038_s30 + $0x1c] sm:$0xf] }
  0x18   : > { %v1710_v39 = vld [vmem:[%s2038_s30 + $0x140] sm:$0xf0]  ;;  %v1396_v41 = vld [vmem:[%s2038_s30 + $0x24] sm:$0xf0]  ;;  %v1402_v42 = vld [vmem:[%s2038_s30 + $0x20] sm:$0xf]  ;;  %v1395_v44 = vor.u32 %v1674_v37, %v1394_v36 }
  0x19   : > { %809 = vmatpush.bf16.msra.mxu0 %v1722_v9  ;;  %1840 = vmatpush.bf16.msra.mxu3 %v1722_v9  ;;  %v1675_v43 = vld [vmem:[%s2038_s30 + $0x28] sm:$0xf0]  ;;  %v1539_v45 = vor.u32 %v1710_v39, %v1538_v38  ;;  %v1399_v46 = vor.u32 %v1673_v40, %v1396_v41  ;;  %v1406_v48 = vld [vmem:[%s2038_s30 + $0x30] sm:$0xf]  ;;  %v1677_v49 = vld [vmem:[%s2038_s30 + $0x38] sm:$0xf0] }
  0x1a   : > { %898 = vmatpush.bf16.msra.mxu1 %v1997_v10  ;;  %v1403_v47 = vor.u32 %v1675_v43, %v1402_v42  ;;  %v1550_v50 = vld [vmem:[%s2038_s30 + $0x150] sm:$0xf]  ;;  %v1713_v51 = vld [vmem:[%s2038_s30 + $0x158] sm:$0xf0]  ;;  %v1676_v52 = vld [vmem:[%s2038_s30 + $0x34] sm:$0xf]  ;;  %v1407_v56 = vor.u32 %v1677_v49, %v1406_v48 }
  0x1b   : > { %987 = vmatpush.bf16.msra.mxu2 %v2002_v11  ;;  %v1408_v53 = vld [vmem:[%s2038_s30 + $0x3c] sm:$0xf0]  ;;  %v1414_v54 = vld [vmem:[%s2038_s30 + $0x38] sm:$0xf]  ;;  %v1678_v55 = vld [vmem:[%s2038_s30 + $0x40] sm:$0xf0]  ;;  %v1551_v57 = vor.u32 %v1713_v51, %v1550_v50 }
  0x1c   : > { %v1411_v58 = vor.u32 %v1676_v52, %v1408_v53  ;;  %v1415_v59 = vor.u32 %v1678_v55, %v1414_v54  ;;  %v1418_v60 = vld [vmem:[%s2038_s30 + $0x48] sm:$0xf]  ;;  %v1680_v61 = vld [vmem:[%s2038_s30 + $0x50] sm:$0xf0]  ;;  %v1679_v0 = vld [vmem:[%s2038_s30 + $0x4c] sm:$0xf] }
  0x1d   : > { %810 = vmatpush.bf16.msra.mxu0 %v1721_v12  ;;  %1841 = vmatpush.bf16.msra.mxu3 %v1721_v12  ;;  %v1562_v62 = vld [vmem:[%s2038_s30 + $0x168] sm:$0xf]  ;;  %v1716_v63 = vld [vmem:[%s2038_s30 + $0x170] sm:$0xf0]  ;;  %v1681_v3 = vld [vmem:[%s2038_s30 + $0x58] sm:$0xf0] }
  0x1e   : > { %899 = vmatpush.bf16.msra.mxu1 %v1729_v13  ;;  %v1683_v9 = vld [vmem:[%s2038_s30 + $0x68] sm:$0xf0]  ;;  %v1528_v12 = vld [vmem:[%s2038_s30 + $0x12c] sm:$0xf0]  ;;  %v1709_v24 = vld [vmem:[%s2038_s30 + $0x13c] sm:$0xf] }
  0x1f   : > { %988 = vmatpush.bf16.msra.mxu2 %v2017_v14  ;;  %v1540_v25 = vld [vmem:[%s2038_s30 + $0x144] sm:$0xf0]  ;;  %v1450_v26 = vld [vmem:[%s2038_s30 + $0x80] sm:$0xf]  ;;  %v1687_v27 = vld [vmem:[%s2038_s30 + $0x88] sm:$0xf0] }
  0x20   : > { %v1543_v29 = vor.u32 %v1709_v24, %v1540_v25  ;;  %v1451_v31 = vor.u32 %v1687_v27, %v1450_v26  ;;  %v1552_v36 = vld [vmem:[%s2038_s30 + $0x15c] sm:$0xf0]  ;;  %v1462_v38 = vld [vmem:[%s2038_s30 + $0x98] sm:$0xf]  ;;  %v1690_v39 = vld [vmem:[%s2038_s30 + $0xa0] sm:$0xf0] }
  0x21   : > { %811 = vmatpush.bf16.msra.mxu0 %v1720_v15  ;;  %1842 = vmatpush.bf16.msra.mxu3 %v1720_v15  ;;  %v1684_v15 = vld [vmem:[%s2038_s30 + $0x70] sm:$0xf0]  ;;  %v1456_v37 = vld [vmem:[%s2038_s30 + $0x9c] sm:$0xf0]  ;;  %v1463_v43 = vor.u32 %v1690_v39, %v1462_v38  ;;  %v1564_v48 = vld [vmem:[%s2038_s30 + $0x174] sm:$0xf0] }
  0x22   : > { %900 = vmatpush.bf16.msra.mxu1 %v1728_v16  ;;  %v1468_v49 = vld [vmem:[%s2038_s30 + $0xb4] sm:$0xf0]  ;;  %v1474_v50 = vld [vmem:[%s2038_s30 + $0xb0] sm:$0xf]  ;;  %v1693_v51 = vld [vmem:[%s2038_s30 + $0xb8] sm:$0xf0] }
  0x23   : > { %989 = vmatpush.bf16.msra.mxu2 %v2030_v17  ;;  %v1475_v55 = vor.u32 %v1693_v51, %v1474_v50  ;;  %v1502_v38 = vld [vmem:[%s2038_s30 + $0xf0] sm:$0xf]  ;;  %v1701_v39 = vld [vmem:[%s2038_s30 + $0xf8] sm:$0xf0] }
  0x24   : > { %v1503_v50 = vor.u32 %v1701_v39, %v1502_v38 }
  0x25   : > { %812 = vmatpush.bf16.msra.mxu0 %v1719_v18  ;;  %1843 = vmatpush.bf16.msra.mxu3 %v1719_v18 }
  0x26   : > { %901 = vmatpush.bf16.msra.mxu1 %v1727_v19 }
  0x27   : > { %990 = vmatpush.bf16.msra.mxu2 %v2047_v20 }
  0x29   : > { %813 = vmatpush.bf16.msra.mxu0 %v1718_v21  ;;  %1844 = vmatpush.bf16.msra.mxu3 %v1718_v21  ;;  %v1686_v21 = vld [vmem:[%s2038_s30 + $0x80] sm:$0xf0] }
  0x2a   : > { %902 = vmatpush.bf16.msra.mxu1 %v1726_v22 }
  0x2b   : > { %991 = vmatpush.bf16.msra.mxu2 %v2058_v23 }
  0x2c   : > { %814 = vmatmul.bf16.vlgmr.msra.gmra.mxu0 %v1383_v32  ;;  %874 = vmatmul.bf16.vlgmr.msra.gmra.mxu3 %v1527_v33  ;;  %v1454_v32 = vld [vmem:[%s2038_s30 + $0x90] sm:$0xf]  ;;  %v1689_v33 = vld [vmem:[%s2038_s30 + $0x98] sm:$0xf0] }
  0x2d   : > { %1845 = vmatpush.bf16.msrb.mxu3 %v1951_v1  ;;  %903 = vmatmul.bf16.vlgmr.msra.gmra.mxu1 %v1387_v34  ;;  %v1420_v1 = vld [vmem:[%s2038_s30 + $0x54] sm:$0xf0]  ;;  %v1688_v34 = vld [vmem:[%s2038_s30 + $0x94] sm:$0xf]  ;;  %v1455_v40 = vor.u32 %v1689_v33, %v1454_v32 }
  0x2e   : > { %992 = vmatmul.bf16.vlgmr.msra.gmra.mxu2 %v1391_v35  ;;  %v1423_v6 = vor.u32 %v1679_v0, %v1420_v1  ;;  %v1712_v35 = vld [vmem:[%s2038_s30 + $0x154] sm:$0xf]  ;;  %v1459_v42 = vor.u32 %v1688_v34, %v1456_v37 }
  0x2f   : > { %v1555_v41 = vor.u32 %v1712_v35, %v1552_v36 }
  0x31   : > { %1846 = vmatpush.bf16.msrb.mxu3 %v1966_v4  ;;  %v1419_v4 = vor.u32 %v1680_v61, %v1418_v60  ;;  %v1708_v60 = vld [vmem:[%s2038_s30 + $0x130] sm:$0xf0]  ;;  %v1480_v61 = vld [vmem:[%s2038_s30 + $0xcc] sm:$0xf0] }
  0x35   : > { %1847 = vmatpush.bf16.msrb.mxu3 %v1981_v7 }
  0x39   : > { %1848 = vmatpush.bf16.msrb.mxu3 %v1997_v10  ;;  %v1682_v10 = vld [vmem:[%s2038_s30 + $0x64] sm:$0xf] }
  0x3c   : > { %819 = vmatmul.bf16.gmra.mxu0 %v1395_v44  ;;  %879 = vmatmul.bf16.gmra.mxu3 %v1539_v45  ;;  %v1466_v44 = vld [vmem:[%s2038_s30 + $0xa8] sm:$0xf]  ;;  %v1692_v45 = vld [vmem:[%s2038_s30 + $0xb0] sm:$0xf0] }
  0x3d   : > { %1849 = vmatpush.bf16.msrb.mxu3 %v1729_v13  ;;  %908 = vmatmul.bf16.gmra.mxu1 %v1399_v46  ;;  %v1432_v13 = vld [vmem:[%s2038_s30 + $0x6c] sm:$0xf0]  ;;  %v1691_v46 = vld [vmem:[%s2038_s30 + $0xac] sm:$0xf]  ;;  %v1467_v52 = vor.u32 %v1692_v45, %v1466_v44  ;;  %v1510_v44 = vld [vmem:[%s2038_s30 + $0xf8] sm:$0xf] }
  0x3e   : > { %997 = vmatmul.bf16.gmra.mxu2 %v1403_v47  ;;  %v1435_v18 = vor.u32 %v1682_v10, %v1432_v13  ;;  %v1715_v47 = vld [vmem:[%s2038_s30 + $0x16c] sm:$0xf]  ;;  %v1471_v54 = vor.u32 %v1691_v46, %v1468_v49  ;;  %v1697_v13 = vld [vmem:[%s2038_s30 + $0xdc] sm:$0xf]  ;;  %v1702_v45 = vld [vmem:[%s2038_s30 + $0x100] sm:$0xf0] }
  0x3f   : > { %v1567_v53 = vor.u32 %v1715_v47, %v1564_v48 }
  0x41   : > { %1850 = vmatpush.bf16.msrb.mxu3 %v1728_v16 }
  0x45   : > { %1851 = vmatpush.bf16.msrb.mxu3 %v1727_v19 }
  0x49   : > { %1852 = vmatpush.bf16.msrb.mxu3 %v1726_v22  ;;  %v1685_v22 = vld [vmem:[%s2038_s30 + $0x7c] sm:$0xf] }
  0x4c   : > { %824 = vmatmul.bf16.gmra.mxu0 %v1407_v56  ;;  %884 = vmatmul.bf16.gmra.mxu3 %v1551_v57  ;;  %v1478_v56 = vld [vmem:[%s2038_s30 + $0xc0] sm:$0xf]  ;;  %v1695_v57 = vld [vmem:[%s2038_s30 + $0xc8] sm:$0xf0] }
  0x4d   : > { %1853 = vmatpush.bf16.msra.mxu3 %v1956_v2  ;;  %913 = vmatmul.bf16.gmra.mxu1 %v1411_v58  ;;  %v1426_v2 = vld [vmem:[%s2038_s30 + $0x50] sm:$0xf]  ;;  %v1694_v58 = vld [vmem:[%s2038_s30 + $0xc4] sm:$0xf]  ;;  %v1479_v0 = vor.u32 %v1695_v57, %v1478_v56 }
  0x4e   : > { %1002 = vmatmul.bf16.gmra.mxu2 %v1415_v59  ;;  %v1427_v7 = vor.u32 %v1681_v3, %v1426_v2  ;;  %v1534_v59 = vld [vmem:[%s2038_s30 + $0x128] sm:$0xf]  ;;  %v1483_v3 = vor.u32 %v1694_v58, %v1480_v61 }
  0x4f   : > { %v1535_v1 = vor.u32 %v1708_v60, %v1534_v59 }
  0x51   : > { %1854 = vmatpush.bf16.msra.mxu3 %v1971_v5  ;;  %v1563_v5 = vor.u32 %v1716_v63, %v1562_v62  ;;  %v1486_v62 = vld [vmem:[%s2038_s30 + $0xc8] sm:$0xf]  ;;  %v1696_v63 = vld [vmem:[%s2038_s30 + $0xd0] sm:$0xf0] }
  0x55   : > { %1855 = vmatpush.bf16.msra.mxu3 %v1986_v8  ;;  %v1430_v8 = vld [vmem:[%s2038_s30 + $0x60] sm:$0xf] }
  0x56   : > { %v1431_v16 = vor.u32 %v1683_v9, %v1430_v8 }
  0x59   : > { %1856 = vmatpush.bf16.msra.mxu3 %v2002_v11  ;;  %v1706_v11 = vld [vmem:[%s2038_s30 + $0x124] sm:$0xf] }
  0x5c   : > { %829 = vmatmul.bf16.gmra.mxu0 %v1419_v4  ;;  %889 = vmatmul.bf16.gmra.mxu3 %v1563_v5  ;;  %v1487_v4 = vor.u32 %v1696_v63, %v1486_v62 }
  0x5d   : > { %1857 = vmatpush.bf16.msra.mxu3 %v2017_v14  ;;  %918 = vmatmul.bf16.gmra.mxu1 %v1423_v6  ;;  %v1438_v14 = vld [vmem:[%s2038_s30 + $0x68] sm:$0xf] }
  0x5e   : > { %1007 = vmatmul.bf16.gmra.mxu2 %v1427_v7  ;;  %v1439_v19 = vor.u32 %v1684_v15, %v1438_v14  ;;  %v1546_v14 = vld [vmem:[%s2038_s30 + $0x140] sm:$0xf]  ;;  %v1711_v15 = vld [vmem:[%s2038_s30 + $0x148] sm:$0xf0] }
  0x5f   : > { %v1547_v25 = vor.u32 %v1711_v15, %v1546_v14 }
  0x61   : > { %1858 = vmatpush.bf16.msra.mxu3 %v2030_v17  ;;  %v1531_v17 = vor.u32 %v1706_v11, %v1528_v12  ;;  %v1490_v11 = vld [vmem:[%s2038_s30 + $0xd8] sm:$0xf]  ;;  %v1698_v12 = vld [vmem:[%s2038_s30 + $0xe0] sm:$0xf0] }
  0x62   : > { %v1491_v24 = vor.u32 %v1698_v12, %v1490_v11 }
  0x65   : > { %1859 = vmatpush.bf16.msra.mxu3 %v2047_v20  ;;  %v1442_v20 = vld [vmem:[%s2038_s30 + $0x78] sm:$0xf] }
  0x66   : > { %v1443_v28 = vor.u32 %v1686_v21, %v1442_v20 }
  0x69   : > { %1860 = vmatpush.bf16.msra.mxu3 %v2058_v23  ;;  %v1444_v23 = vld [vmem:[%s2038_s30 + $0x84] sm:$0xf0] }
  0x6a   : > { %v1447_v30 = vor.u32 %v1685_v22, %v1444_v23 }
  0x6c   : > { %834 = vmatmul.bf16.gmra.mxu0 %v1431_v16  ;;  %963 = vmatmul.bf16.vlgmr.msrb.gmra.mxu3 %v1531_v17  ;;  %v1492_v16 = vld [vmem:[%s2038_s30 + $0xe4] sm:$0xf0]  ;;  %v1498_v17 = vld [vmem:[%s2038_s30 + $0xe0] sm:$0xf] }
  0x6d   : > { %923 = vmatmul.bf16.gmra.mxu1 %v1435_v18  ;;  %v1699_v18 = vld [vmem:[%s2038_s30 + $0xe8] sm:$0xf0]  ;;  %v1495_v27 = vor.u32 %v1697_v13, %v1492_v16 }
  0x6e   : > { %1012 = vmatmul.bf16.gmra.mxu2 %v1439_v19 }
  0x7c   : > { %839 = vmatmul.bf16.gmra.mxu0 %v1443_v28  ;;  %968 = vmatmul.bf16.gmra.mxu3 %v1543_v29  ;;  %v1499_v28 = vor.u32 %v1699_v18, %v1498_v17 }
  0x7d   : > { %928 = vmatmul.bf16.gmra.mxu1 %v1447_v30 }
  0x7e   : > { %1017 = vmatmul.bf16.gmra.mxu2 %v1451_v31 }
  0x8c   : > { %844 = vmatmul.bf16.gmra.mxu0 %v1455_v40  ;;  %973 = vmatmul.bf16.gmra.mxu3 %v1555_v41  ;;  %v1700_v40 = vld [vmem:[%s2038_s30 + $0xf4] sm:$0xf]  ;;  %v1558_v41 = vld [vmem:[%s2038_s30 + $0x158] sm:$0xf] }
  0x8d   : > { %933 = vmatmul.bf16.gmra.mxu1 %v1459_v42  ;;  %v1714_v42 = vld [vmem:[%s2038_s30 + $0x160] sm:$0xf0] }
  0x8e   : > { %1022 = vmatmul.bf16.gmra.mxu2 %v1463_v43  ;;  %v1504_v43 = vld [vmem:[%s2038_s30 + $0xfc] sm:$0xf0]  ;;  %v1559_v51 = vor.u32 %v1714_v42, %v1558_v41 }
  0x9c   : > { %849 = vmatmul.bf16.gmra.mxu0 %v1467_v52  ;;  %978 = vmatmul.bf16.gmra.mxu3 %v1567_v53 }
  0x9d   : > { %938 = vmatmul.bf16.gmra.mxu1 %v1471_v54  ;;  %v1507_v54 = vor.u32 %v1700_v40, %v1504_v43 }
  0x9e   : > { %1027 = vmatmul.bf16.gmra.mxu2 %v1475_v55  ;;  %v1511_v55 = vor.u32 %v1702_v45, %v1510_v44 }
  0xa9   : > { %v815_v2 = vpop.f32.mrf.mxu0 }
  0xaa   : > { %v904_v5 = vpop.f32.mrf.mxu1 }
  0xab   : > { %v905_v10 = vadd.f32 %v904_v5, %v815_v2  ;;  %v1704_v2 = vld [vmem:[%s2038_s30 + $0x110] sm:$0xf0]  ;;  %v1717_v5 = vld [vmem:[%s2038_s30 + $0x178] sm:$0xf0] }
  0xac   : > { %854 = vmatmul.bf16.gmra.mxu0 %v1479_v0  ;;  %1052 = vmatmul.bf16.vlgmr.msra.gmra.mxu3 %v1535_v1  ;;  %v1514_v1 = vld [vmem:[%s2038_s30 + $0x108] sm:$0xf] }
  0xad   : > { %943 = vmatmul.bf16.gmra.mxu1 %v1483_v3  ;;  %v1703_v3 = vld [vmem:[%s2038_s30 + $0x10c] sm:$0xf]  ;;  %v1515_v14 = vor.u32 %v1704_v2, %v1514_v1 }
  0xae   : > { %1032 = vmatmul.bf16.gmra.mxu2 %v1487_v4  ;;  %v1570_v4 = vld [vmem:[%s2038_s30 + $0x170] sm:$0xf] }
  0xaf   : > { %v2146_v6 = vpop.f32.mrf.mxu3  ;;  %v1571_v15 = vor.u32 %v1717_v5, %v1570_v4 }
  0xb1   : > { %v993_v7 = vpop.f32.mrf.mxu2  ;;  %v817_v8 = vpop.f32.mrf.mxu0 }
  0xb2   : > { %v906_v9 = vpop.f32.mrf.mxu1  ;;  %v994_v19 = vadd.f32 %v993_v7, %v905_v10  ;;  %v1516_v7 = vld [vmem:[%s2038_s30 + $0x114] sm:$0xf0] }
  0xb3   : > { %v907_v20 = vadd.f32 %v906_v9, %v817_v8  ;;  %v1522_v8 = vld [vmem:[%s2038_s30 + $0x110] sm:$0xf]  ;;  %v1705_v9 = vld [vmem:[%s2038_s30 + $0x118] sm:$0xf0]  ;;  %v1519_v18 = vor.u32 %v1703_v3, %v1516_v7 }
  0xb4   : > { %v1172_v30 = vmax.f32 %v994_v19, 0.0  ;;  %v1523_v19 = vor.u32 %v1705_v9, %v1522_v8 }
  0xb7   : > { %v2156_v21 = vpop.f32.mrf.mxu3 }
  0xb9   : > { %v995_v22 = vpop.f32.mrf.mxu2  ;;  %v820_v26 = vpop.f32.mrf.mxu0 }
  0xba   : > { %v996_v23 = vadd.f32 %v995_v22, %v907_v20  ;;  %v909_v29 = vpop.f32.mrf.mxu1 }
  0xbb   : > { %v910_v37 = vadd.f32 %v909_v29, %v820_v26 }
  0xbc   : > { %v1173_v31 = vmax.f32 %v996_v23, 0.0  ;;  %859 = vmatmul.bf16.gmra.mxu0 %v1491_v24  ;;  %1057 = vmatmul.bf16.gmra.mxu3 %v1547_v25 }
  0xbd   : > { %948 = vmatmul.bf16.gmra.mxu1 %v1495_v27 }
  0xbe   : > { %v1745_v32 = vpack.c.bf16 %v1173_v31, %v1172_v30  ;;  %1037 = vmatmul.bf16.gmra.mxu2 %v1499_v28 }
  0xbf   : > { %v2165_v33 = vpop.f32.mrf.mxu3 }
  0xc0   : > { %1746 = vst [vmem:[%s2162_s20] sm:$0xff] %v1745_v32  }
  0xc1   : > { %v998_v34 = vpop.f32.mrf.mxu2  ;;  %v822_v35 = vpop.f32.mrf.mxu0 }
  0xc2   : > { %v911_v36 = vpop.f32.mrf.mxu1  ;;  %v999_v46 = vadd.f32 %v998_v34, %v910_v37 }
  0xc3   : > { %v912_v47 = vadd.f32 %v911_v36, %v822_v35 }
  0xc4   : > { %v1174_v57 = vmax.f32 %v999_v46, 0.0 }
  0xc7   : > { %v2175_v48 = vpop.f32.mrf.mxu3 }
  0xc9   : > { %v1000_v49 = vpop.f32.mrf.mxu2  ;;  %v825_v53 = vpop.f32.mrf.mxu0 }
  0xca   : > { %v1001_v52 = vadd.f32 %v1000_v49, %v912_v47  ;;  %v914_v56 = vpop.f32.mrf.mxu1 }
  0xcb   : > { %v915_v0 = vadd.f32 %v914_v56, %v825_v53 }
  0xcc   : > { %v1175_v58 = vmax.f32 %v1001_v52, 0.0  ;;  %864 = vmatmul.bf16.gmra.mxu0 %v1503_v50  ;;  %1062 = vmatmul.bf16.gmra.mxu3 %v1559_v51 }
  0xcd   : > { %953 = vmatmul.bf16.gmra.mxu1 %v1507_v54 }
  0xce   : > { %v1750_v59 = vpack.c.bf16 %v1175_v58, %v1174_v57  ;;  %1042 = vmatmul.bf16.gmra.mxu2 %v1511_v55 }
  0xcf   : > { %v2178_v60 = vpop.f32.mrf.mxu3 }
  0xd0   : > { %1822 = vst [vmem:[%s2162_s20 + $0x8] sm:$0xff] %v1750_v59  }
  0xd1   : > { %v1003_v61 = vpop.f32.mrf.mxu2  ;;  %v827_v62 = vpop.f32.mrf.mxu0 }
  0xd2   : > { %v916_v63 = vpop.f32.mrf.mxu1  ;;  %v1004_v10 = vadd.f32 %v1003_v61, %v915_v0 }
  0xd3   : > { %v917_v11 = vadd.f32 %v916_v63, %v827_v62 }
  0xd4   : > { %v1176_v22 = vmax.f32 %v1004_v10, 0.0 }
  0xd7   : > { %v2188_v12 = vpop.f32.mrf.mxu3 }
  0xd9   : > { %v1005_v13 = vpop.f32.mrf.mxu2  ;;  %v830_v17 = vpop.f32.mrf.mxu0 }
  0xda   : > { %v1006_v16 = vadd.f32 %v1005_v13, %v917_v11  ;;  %v919_v20 = vpop.f32.mrf.mxu1 }
  0xdb   : > { %v920_v29 = vadd.f32 %v919_v20, %v830_v17 }
  0xdc   : > { %v1177_v24 = vmax.f32 %v1006_v16, 0.0  ;;  %869 = vmatmul.bf16.gmra.mxu0 %v1515_v14  ;;  %1067 = vmatmul.bf16.gmra.mxu3 %v1571_v15 }
  0xdd   : > { %958 = vmatmul.bf16.gmra.mxu1 %v1519_v18 }
  0xde   : > { %v1755_v25 = vpack.c.bf16 %v1177_v24, %v1176_v22  ;;  %1047 = vmatmul.bf16.gmra.mxu2 %v1523_v19 }
  0xdf   : > { %v2191_v23 = vpop.f32.mrf.mxu3 }
  0xe0   : > { %1823 = vst [vmem:[%s2162_s20 + $0x10] sm:$0xff] %v1755_v25  }
  0xe1   : > { %v1008_v26 = vpop.f32.mrf.mxu2  ;;  %v832_v27 = vpop.f32.mrf.mxu0 }
  0xe2   : > { %v921_v28 = vpop.f32.mrf.mxu1  ;;  %v1009_v30 = vadd.f32 %v1008_v26, %v920_v29 }
  0xe3   : > { %v922_v31 = vadd.f32 %v921_v28, %v832_v27 }
  0xe4   : > { %v1178_v38 = vmax.f32 %v1009_v30, 0.0 }
  0xe7   : > { %v2193_v32 = vpop.f32.mrf.mxu3 }
  0xe9   : > { %v1010_v34 = vpop.f32.mrf.mxu2  ;;  %v835_v36 = vpop.f32.mrf.mxu0 }
  0xea   : > { %v1011_v35 = vadd.f32 %v1010_v34, %v922_v31  ;;  %v924_v37 = vpop.f32.mrf.mxu1 }
  0xeb   : > { %v925_v46 = vadd.f32 %v924_v37, %v835_v36 }
  0xec   : > { %v1179_v39 = vmax.f32 %v1011_v35, 0.0 }
  0xee   : > { %v1760_v40 = vpack.c.bf16 %v1179_v39, %v1178_v38 }
  0xef   : > { %v964_v41 = vpop.f32.mrf.mxu3 }
  0xf0   : > { %1824 = vst [vmem:[%s2162_s20 + $0x18] sm:$0xff] %v1760_v40   ;;  %v2197_v42 = vadd.f32 %v964_v41, %v2146_v6 }
  0xf1   : > { %v1013_v43 = vpop.f32.mrf.mxu2  ;;  %v837_v44 = vpop.f32.mrf.mxu0 }
  0xf2   : > { %v926_v45 = vpop.f32.mrf.mxu1  ;;  %v1014_v47 = vadd.f32 %v1013_v43, %v925_v46 }
  0xf3   : > { %v927_v49 = vadd.f32 %v926_v45, %v837_v44 }
  0xf4   : > { %v1180_v55 = vmax.f32 %v1014_v47, 0.0 }
  0xf7   : > { %v2199_v50 = vpop.f32.mrf.mxu3 }
  0xf9   : > { %v1015_v51 = vpop.f32.mrf.mxu2  ;;  %v840_v53 = vpop.f32.mrf.mxu0 }
  0xfa   : > { %v1016_v52 = vadd.f32 %v1015_v51, %v927_v49  ;;  %v929_v54 = vpop.f32.mrf.mxu1 }
  0xfb   : > { %v930_v63 = vadd.f32 %v929_v54, %v840_v53  ;;  %v967_v53 = vadd.f32 %v2199_v50, %v2156_v21 }
  0xfc   : > { %v1181_v56 = vmax.f32 %v1016_v52, 0.0 }
  0xfe   : > { %v1765_v57 = vpack.c.bf16 %v1181_v56, %v1180_v55 }
  0xff   : > { %v969_v58 = vpop.f32.mrf.mxu3 }
 0x100   : > { %1825 = vst [vmem:[%s2162_s20 + $0x20] sm:$0xff] %v1765_v57   ;;  %v2203_v6 = vadd.f32 %v969_v58, %v2165_v33 }
 0x101   : > { %v1018_v59 = vpop.f32.mrf.mxu2  ;;  %v842_v61 = vpop.f32.mrf.mxu0 }
 0x102   : > { %v931_v62 = vpop.f32.mrf.mxu1  ;;  %v1019_v0 = vadd.f32 %v1018_v59, %v930_v63 }
 0x103   : > { %v932_v1 = vadd.f32 %v931_v62, %v842_v61 }
 0x104   : > { %v1182_v8 = vmax.f32 %v1019_v0, 0.0 }
 0x107   : > { %v2205_v2 = vpop.f32.mrf.mxu3 }
 0x109   : > { %v1020_v3 = vpop.f32.mrf.mxu2  ;;  %v845_v5 = vpop.f32.mrf.mxu0 }
 0x10a   : > { %v1021_v4 = vadd.f32 %v1020_v3, %v932_v1  ;;  %v934_v7 = vpop.f32.mrf.mxu1 }
 0x10b   : > { %v935_v16 = vadd.f32 %v934_v7, %v845_v5 }
 0x10c   : > { %v1183_v9 = vmax.f32 %v1021_v4, 0.0 }
 0x10e   : > { %v1770_v10 = vpack.c.bf16 %v1183_v9, %v1182_v8 }
 0x10f   : > { %v974_v11 = vpop.f32.mrf.mxu3 }
 0x110   : > { %1826 = vst [vmem:[%s2162_s20 + $0x28] sm:$0xff] %v1770_v10   ;;  %v2209_v33 = vadd.f32 %v974_v11, %v2178_v60  ;;  %v972_v10 = vadd.f32 %v2205_v2, %v2175_v48 }
 0x111   : > { %v1023_v13 = vpop.f32.mrf.mxu2  ;;  %v847_v14 = vpop.f32.mrf.mxu0 }
 0x112   : > { %v936_v15 = vpop.f32.mrf.mxu1  ;;  %v1024_v17 = vadd.f32 %v1023_v13, %v935_v16 }
 0x113   : > { %v937_v18 = vadd.f32 %v936_v15, %v847_v14 }
 0x114   : > { %v1184_v26 = vmax.f32 %v1024_v17, 0.0 }
 0x117   : > { %v2211_v19 = vpop.f32.mrf.mxu3 }
 0x119   : > { %v1025_v20 = vpop.f32.mrf.mxu2  ;;  %v850_v24 = vpop.f32.mrf.mxu0 }
 0x11a   : > { %v1026_v22 = vadd.f32 %v1025_v20, %v937_v18  ;;  %v939_v25 = vpop.f32.mrf.mxu1 }
 0x11b   : > { %v940_v35 = vadd.f32 %v939_v25, %v850_v24 }
 0x11c   : > { %v1185_v27 = vmax.f32 %v1026_v22, 0.0 }
 0x11e   : > { %v1775_v28 = vpack.c.bf16 %v1185_v27, %v1184_v26 }
 0x11f   : > { %v979_v29 = vpop.f32.mrf.mxu3 }
 0x120   : > { %1827 = vst [vmem:[%s2162_s20 + $0x30] sm:$0xff] %v1775_v28   ;;  %v2215_v60 = vadd.f32 %v979_v29, %v2191_v23 }
 0x121   : > { %v1028_v30 = vpop.f32.mrf.mxu2  ;;  %v852_v31 = vpop.f32.mrf.mxu0 }
 0x122   : > { %v941_v34 = vpop.f32.mrf.mxu1  ;;  %v1029_v36 = vadd.f32 %v1028_v30, %v940_v35 }
 0x123   : > { %v942_v37 = vadd.f32 %v941_v34, %v852_v31  ;;  %v977_v34 = vadd.f32 %v2211_v19, %v2188_v12 }
 0x124   : > { %v1186_v44 = vmax.f32 %v1029_v36, 0.0 }
 0x127   : > { %v2217_v38 = vpop.f32.mrf.mxu3 }
 0x129   : > { %v1030_v39 = vpop.f32.mrf.mxu2  ;;  %v855_v41 = vpop.f32.mrf.mxu0 }
 0x12a   : > { %v1031_v40 = vadd.f32 %v1030_v39, %v942_v37  ;;  %v944_v43 = vpop.f32.mrf.mxu1 }
 0x12b   : > { %v945_v52 = vadd.f32 %v944_v43, %v855_v41 }
 0x12c   : > { %v1187_v45 = vmax.f32 %v1031_v40, 0.0 }
 0x12e   : > { %v1780_v46 = vpack.c.bf16 %v1187_v45, %v1186_v44 }
 0x12f   : > { %v1053_v47 = vpop.f32.mrf.mxu3 }
 0x130   : > { %1828 = vst [vmem:[%s2162_s20 + $0x38] sm:$0xff] %v1780_v46   ;;  %v1054_v54 = vadd.f32 %v1053_v47, %v2197_v42 }
 0x131   : > { %v1033_v49 = vpop.f32.mrf.mxu2  ;;  %v857_v23 = vpop.f32.mrf.mxu0 }
 0x132   : > { %v946_v51 = vpop.f32.mrf.mxu1  ;;  %v1034_v55 = vadd.f32 %v1033_v49, %v945_v52  ;;  %v1196_v63 = vmax.f32 %v1054_v54, 0.0 }
 0x133   : > { %v947_v56 = vadd.f32 %v946_v51, %v857_v23 }
 0x134   : > { %v1188_v3 = vmax.f32 %v1034_v55, 0.0  ;;  %v982_v55 = vadd.f32 %v2217_v38, %v2193_v32 }
 0x137   : > { %v1055_v57 = vpop.f32.mrf.mxu3 }
 0x138   : > { %v1056_v59 = vadd.f32 %v1055_v57, %v967_v53 }
 0x139   : > { %v1035_v58 = vpop.f32.mrf.mxu2  ;;  %v860_v62 = vpop.f32.mrf.mxu0 }
 0x13a   : > { %v1036_v61 = vadd.f32 %v1035_v58, %v947_v56  ;;  %v1197_v0 = vmax.f32 %v1056_v59, 0.0  ;;  %v949_v1 = vpop.f32.mrf.mxu1 }
 0x13b   : > { %v950_v9 = vadd.f32 %v949_v1, %v860_v62 }
 0x13c   : > { %v1189_v4 = vmax.f32 %v1036_v61, 0.0  ;;  %v1805_v5 = vpack.c.bf16 %v1197_v0, %v1196_v63 }
 0x13e   : > { %v1785_v7 = vpack.c.bf16 %v1189_v4, %v1188_v3  ;;  %1833 = vst [vmem:[%s2162_s20 + $0x60] sm:$0xff] %v1805_v5  }
 0x13f   : > { %v1058_v21 = vpop.f32.mrf.mxu3 }
 0x140   : > { %1829 = vst [vmem:[%s2162_s20 + $0x40] sm:$0xff] %v1785_v7   ;;  %v1059_v11 = vadd.f32 %v1058_v21, %v2203_v6 }
 0x141   : > { %v1038_v50 = vpop.f32.mrf.mxu2  ;;  %v862_v42 = vpop.f32.mrf.mxu0 }
 0x142   : > { %v951_v8 = vpop.f32.mrf.mxu1  ;;  %v1039_v13 = vadd.f32 %v1038_v50, %v950_v9  ;;  %v1198_v22 = vmax.f32 %v1059_v11, 0.0 }
 0x143   : > { %v952_v14 = vadd.f32 %v951_v8, %v862_v42 }
 0x144   : > { %v1190_v26 = vmax.f32 %v1039_v13, 0.0 }
 0x147   : > { %v1060_v15 = vpop.f32.mrf.mxu3 }
 0x148   : > { %v1061_v17 = vadd.f32 %v1060_v15, %v972_v10 }
 0x149   : > { %v1040_v16 = vpop.f32.mrf.mxu2  ;;  %v865_v20 = vpop.f32.mrf.mxu0 }
 0x14a   : > { %v1041_v18 = vadd.f32 %v1040_v16, %v952_v14  ;;  %v1199_v24 = vmax.f32 %v1061_v17, 0.0  ;;  %v954_v25 = vpop.f32.mrf.mxu1 }
 0x14b   : > { %v955_v31 = vadd.f32 %v954_v25, %v865_v20 }
 0x14c   : > { %v1191_v27 = vmax.f32 %v1041_v18, 0.0  ;;  %v1810_v28 = vpack.c.bf16 %v1199_v24, %v1198_v22 }
 0x14e   : > { %v1790_v29 = vpack.c.bf16 %v1191_v27, %v1190_v26  ;;  %1834 = vst [vmem:[%s2162_s20 + $0x68] sm:$0xff] %v1810_v28  }
 0x14f   : > { %v1063_v48 = vpop.f32.mrf.mxu3 }
 0x150   : > { %1830 = vst [vmem:[%s2162_s20 + $0x48] sm:$0xff] %v1790_v29   ;;  %v1064_v35 = vadd.f32 %v1063_v48, %v2209_v33 }
 0x151   : > { %v1043_v2 = vpop.f32.mrf.mxu2  ;;  %v867_v6 = vpop.f32.mrf.mxu0 }
 0x152   : > { %v956_v30 = vpop.f32.mrf.mxu1  ;;  %v1044_v36 = vadd.f32 %v1043_v2, %v955_v31  ;;  %v1200_v44 = vmax.f32 %v1064_v35, 0.0 }
 0x153   : > { %v957_v37 = vadd.f32 %v956_v30, %v867_v6 }
 0x154   : > { %v1192_v49 = vmax.f32 %v1044_v36, 0.0 }
 0x157   : > { %v1065_v39 = vpop.f32.mrf.mxu3 }
 0x158   : > { %v1066_v41 = vadd.f32 %v1065_v39, %v977_v34 }
 0x159   : > { %v1045_v40 = vpop.f32.mrf.mxu2  ;;  %v870_v46 = vpop.f32.mrf.mxu0 }
 0x15a   : > { %v1046_v43 = vadd.f32 %v1045_v40, %v957_v37  ;;  %v1201_v45 = vmax.f32 %v1066_v41, 0.0  ;;  %v959_v47 = vpop.f32.mrf.mxu1 }
 0x15b   : > { %v960_v33 = vadd.f32 %v959_v47, %v870_v46 }
 0x15c   : > { %v1193_v23 = vmax.f32 %v1046_v43, 0.0  ;;  %v1815_v51 = vpack.c.bf16 %v1201_v45, %v1200_v44 }
 0x15e   : > { %v1795_v52 = vpack.c.bf16 %v1193_v23, %v1192_v49  ;;  %1835 = vst [vmem:[%s2162_s20 + $0x70] sm:$0xff] %v1815_v51  }
 0x15f   : > { %v1068_v12 = vpop.f32.mrf.mxu3 }
 0x160   : > { %1831 = vst [vmem:[%s2162_s20 + $0x50] sm:$0xff] %v1795_v52   ;;  %v1069_v56 = vadd.f32 %v1068_v12, %v2215_v60 }
 0x161   : > { %v1048_v19 = vpop.f32.mrf.mxu2  ;;  %v872_v53 = vpop.f32.mrf.mxu0 }
 0x162   : > { %v961_v54 = vpop.f32.mrf.mxu1  ;;  %v1049_v57 = vadd.f32 %v1048_v19, %v960_v33  ;;  %v1202_v0 = vmax.f32 %v1069_v56, 0.0 }
 0x163   : > { %v962_v58 = vadd.f32 %v961_v54, %v872_v53 }
 0x164   : > { %v1194_v3 = vmax.f32 %v1049_v57, 0.0 }
 0x167   : > { %v1070_v59 = vpop.f32.mrf.mxu3 }
 0x168   : > { %v1071_v62 = vadd.f32 %v1070_v59, %v982_v55 }
 0x169   : > { %v1050_v61 = vpop.f32.mrf.mxu2 }
 0x16a   : > { %v1051_v63 = vadd.f32 %v1050_v61, %v962_v58  ;;  %v1203_v1 = vmax.f32 %v1071_v62, 0.0 }
 0x16c   : > { %v1195_v4 = vmax.f32 %v1051_v63, 0.0  ;;  %v1820_v5 = vpack.c.bf16 %v1203_v1, %v1202_v0 }
 0x16e   : > { %v1800_v7 = vpack.c.bf16 %v1195_v4, %v1194_v3  ;;  %1836 = vst [vmem:[%s2162_s20 + $0x78] sm:$0xff] %v1820_v5  }
 0x170   : > { %1832 = vst [vmem:[%s2162_s20 + $0x58] sm:$0xff] %v1800_v7  }
 0x171 PF: > { %s12_s11 = sadd.s32 1, %s1908_s11   ;;  %s2252_s9 = smov %s1904_s10 }
 0x172   : > { %p9_p5 = scmp.ge.s32.totalorder %s12_s11, 4   ;;  %s2253_s10 = smov %s2255_s12 }
 0x174   :  { %11 = sbr.rel (!%p9_p5) target bundleno = 2 (0x2), region = 69 }

// kernel: _lambda_.228
= control target key start
LH: loop header
LB: loop body
LE: loop exit
PB: predicated region body
PF: predicated region fallthrough
CT: control target
= control target key end

     0   :  { %s1143_s9 = smov 0   ;;  %s1145_s10 = smov 0   ;;  %s1246_s0 = inlined_call_operand.vmem [shape: bf16[512,128], index: 0, kind: input, shape index: {}]   ;;  %s1247_s1 = inlined_call_operand.vmem [shape: bf16[128,128], index: 1, kind: input, shape index: {}]   ;;  %s1248_s2 = inlined_call_operand.vmem [shape: bf16[512,128], index: 2, kind: output, shape index: {}]  }
   0x1   :  { %s1147_s11 = smov 0  }
   0x2 LB: > { %s31_s12 = sadd.s32 1, %s1122_s10  ;;  %p834_p0 = scmp.ge.s32.totalorder %s1126_s11, 1  ;;  %s1126_s11 = sphi %s1147_s11, %s12_s11   ;;  %s1122_s10 = sphi %s1145_s10, %s1250_s10   ;;  %s1118_s9 = sphi %s1143_s9, %s1249_s9  }
   0x3   : > { %p33_p1 = scmp.ge.s32.totalorder %s31_s12, 2  ;;  %p155_p2 = scmp.lt.s32.totalorder %s1126_s11, 3 }
   0x5   : > { %s1252_s12 = smov (%p33_p1, %s31_s12), 0  ;;  %p156_p3 = pnand %p834_p0, %p155_p2 }
   0x6   : > { %s835_s21 = sshll.u32 (!%p156_p3), %s1118_s9, 5 }
   0x7   : > { %159 = sbr.rel (%p156_p3) target bundleno = 237 (0xed), region = 28  ;;  %p192_p4 = scmp.lt.s32.totalorder (!%p156_p3), %s835_s21, 63 }
   0xc   : > { %v960_v0 = vld [vmem:[%s1247_s1 + $0x38] sm:$0xff]  ;;  %v959_v1 = vld [vmem:[%s1247_s1 + $0x30] sm:$0xff]  ;;  %v958_v2 = vld [vmem:[%s1247_s1 + $0x28] sm:$0xff]  ;;  %s1254_s21 = smov (!%p192_p4, %s835_s21), 63 }
   0xd   : > { %478 = vmatpush.bf16.msra.mxu0 %v960_v0  ;;  %1056 = vmatpush.bf16.msra.mxu1 %v960_v0  ;;  %v957_v3 = vld [vmem:[%s1247_s1 + $0x20] sm:$0xff]  ;;  %v956_v4 = vld [vmem:[%s1247_s1 + $0x18] sm:$0xff]  ;;  %v955_v5 = vld [vmem:[%s1247_s1 + $0x10] sm:$0xff]  ;;  %s836_s28 = sshll.u32 %s1254_s21, 2 }
   0xe   : > { %1057 = vmatpush.bf16.msra.mxu2 %v960_v0  ;;  %1058 = vmatpush.bf16.msra.mxu3 %v960_v0  ;;  %v954_v6 = vld [vmem:[%s1247_s1 + $0x8] sm:$0xff]  ;;  %v953_v7 = vld [vmem:[%s1247_s1] sm:$0xff]  ;;  %s1196_s5 = scalar_lea.vmem %s1246_s0, %s836_s28  ;;  %s1219_s8 = scalar_lea.vmem %s1248_s2, %s836_s28 }
   0xf   : > { %v937_v8 = vld [vmem:[%s1196_s5] sm:$0xff]  ;;  %v938_v12 = vld [vmem:[%s1196_s5 + $0x8] sm:$0xff]  ;;  %v939_v16 = vld [vmem:[%s1196_s5 + $0x10] sm:$0xff] }
  0x10   : > { %v941_v9 = vld [vmem:[%s1196_s5 + $0x20] sm:$0xff]  ;;  %v942_v13 = vld [vmem:[%s1196_s5 + $0x28] sm:$0xff]  ;;  %v943_v17 = vld [vmem:[%s1196_s5 + $0x30] sm:$0xff] }
  0x11   : > { %479 = vmatpush.bf16.msra.mxu0 %v959_v1  ;;  %1059 = vmatpush.bf16.msra.mxu1 %v959_v1  ;;  %v945_v10 = vld [vmem:[%s1196_s5 + $0x40] sm:$0xff]  ;;  %v946_v14 = vld [vmem:[%s1196_s5 + $0x48] sm:$0xff]  ;;  %v947_v18 = vld [vmem:[%s1196_s5 + $0x50] sm:$0xff] }
  0x12   : > { %1060 = vmatpush.bf16.msra.mxu2 %v959_v1  ;;  %1061 = vmatpush.bf16.msra.mxu3 %v959_v1  ;;  %v949_v11 = vld [vmem:[%s1196_s5 + $0x60] sm:$0xff]  ;;  %v950_v15 = vld [vmem:[%s1196_s5 + $0x68] sm:$0xff]  ;;  %v951_v19 = vld [vmem:[%s1196_s5 + $0x70] sm:$0xff] }
  0x13   : > { %v940_v20 = vld [vmem:[%s1196_s5 + $0x18] sm:$0xff] }
  0x14   : > { %v944_v21 = vld [vmem:[%s1196_s5 + $0x38] sm:$0xff] }
  0x15   : > { %480 = vmatpush.bf16.msra.mxu0 %v958_v2  ;;  %1062 = vmatpush.bf16.msra.mxu1 %v958_v2  ;;  %v948_v22 = vld [vmem:[%s1196_s5 + $0x58] sm:$0xff] }
  0x16   : > { %1063 = vmatpush.bf16.msra.mxu2 %v958_v2  ;;  %1064 = vmatpush.bf16.msra.mxu3 %v958_v2  ;;  %v952_v23 = vld [vmem:[%s1196_s5 + $0x78] sm:$0xff] }
  0x19   : > { %481 = vmatpush.bf16.msra.mxu0 %v957_v3  ;;  %1065 = vmatpush.bf16.msra.mxu1 %v957_v3 }
  0x1a   : > { %1066 = vmatpush.bf16.msra.mxu2 %v957_v3  ;;  %1067 = vmatpush.bf16.msra.mxu3 %v957_v3 }
  0x1d   : > { %482 = vmatpush.bf16.msra.mxu0 %v956_v4  ;;  %1068 = vmatpush.bf16.msra.mxu1 %v956_v4 }
  0x1e   : > { %1069 = vmatpush.bf16.msra.mxu2 %v956_v4  ;;  %1070 = vmatpush.bf16.msra.mxu3 %v956_v4 }
  0x21   : > { %483 = vmatpush.bf16.msra.mxu0 %v955_v5  ;;  %1071 = vmatpush.bf16.msra.mxu1 %v955_v5 }
  0x22   : > { %1072 = vmatpush.bf16.msra.mxu2 %v955_v5  ;;  %1073 = vmatpush.bf16.msra.mxu3 %v955_v5 }
  0x25   : > { %484 = vmatpush.bf16.msra.mxu0 %v954_v6  ;;  %1074 = vmatpush.bf16.msra.mxu1 %v954_v6 }
  0x26   : > { %1075 = vmatpush.bf16.msra.mxu2 %v954_v6  ;;  %1076 = vmatpush.bf16.msra.mxu3 %v954_v6 }
  0x29   : > { %485 = vmatpush.bf16.msra.mxu0 %v953_v7  ;;  %1077 = vmatpush.bf16.msra.mxu1 %v953_v7 }
  0x2a   : > { %1078 = vmatpush.bf16.msra.mxu2 %v953_v7  ;;  %1079 = vmatpush.bf16.msra.mxu3 %v953_v7 }
  0x2c   : > { %486 = vmatmul.bf16.vlgmr.msra.gmra.mxu0 %v937_v8  ;;  %506 = vmatmul.bf16.vlgmr.msra.gmra.mxu1 %v941_v9 }
  0x2d   : > { %526 = vmatmul.bf16.vlgmr.msra.gmra.mxu2 %v945_v10  ;;  %546 = vmatmul.bf16.vlgmr.msra.gmra.mxu3 %v949_v11 }
  0x3c   : > { %491 = vmatmul.bf16.gmra.mxu0 %v938_v12  ;;  %511 = vmatmul.bf16.gmra.mxu1 %v942_v13 }
  0x3d   : > { %531 = vmatmul.bf16.gmra.mxu2 %v946_v14  ;;  %551 = vmatmul.bf16.gmra.mxu3 %v950_v15 }
  0x4c   : > { %496 = vmatmul.bf16.gmra.mxu0 %v939_v16  ;;  %516 = vmatmul.bf16.gmra.mxu1 %v943_v17 }
  0x4d   : > { %536 = vmatmul.bf16.gmra.mxu2 %v947_v18  ;;  %556 = vmatmul.bf16.gmra.mxu3 %v951_v19 }
  0x5c   : > { %501 = vmatmul.bf16.gmra.mxu0 %v940_v20  ;;  %521 = vmatmul.bf16.gmra.mxu1 %v944_v21 }
  0x5d   : > { %541 = vmatmul.bf16.gmra.mxu2 %v948_v22  ;;  %561 = vmatmul.bf16.gmra.mxu3 %v952_v23 }
  0xa9   : > { %v487_v24 = vpop.f32.mrf.mxu0  ;;  %v507_v25 = vpop.f32.mrf.mxu1 }
  0xb0   : > { %v527_v26 = vpop.f32.mrf.mxu2  ;;  %v547_v27 = vpop.f32.mrf.mxu3 }
  0xb1   : > { %v489_v28 = vpop.f32.mrf.mxu0  ;;  %v509_v29 = vpop.f32.mrf.mxu1 }
  0xb2   : > { %v964_v30 = vpack.c.bf16 %v489_v28, %v487_v24  ;;  %v984_v31 = vpack.c.bf16 %v509_v29, %v507_v25 }
  0xb4   : > { %965 = vst [vmem:[%s1219_s8] sm:$0xff] %v964_v30  }
  0xb5   : > { %1044 = vst [vmem:[%s1219_s8 + $0x20] sm:$0xff] %v984_v31  }
  0xb8   : > { %v529_v32 = vpop.f32.mrf.mxu2  ;;  %v549_v33 = vpop.f32.mrf.mxu3 }
  0xb9   : > { %v1004_v34 = vpack.c.bf16 %v529_v32, %v527_v26  ;;  %v1024_v35 = vpack.c.bf16 %v549_v33, %v547_v27  ;;  %v492_v36 = vpop.f32.mrf.mxu0  ;;  %v512_v37 = vpop.f32.mrf.mxu1 }
  0xbb   : > { %1048 = vst [vmem:[%s1219_s8 + $0x40] sm:$0xff] %v1004_v34  }
  0xbc   : > { %1052 = vst [vmem:[%s1219_s8 + $0x60] sm:$0xff] %v1024_v35  }
  0xc0   : > { %v532_v38 = vpop.f32.mrf.mxu2  ;;  %v552_v39 = vpop.f32.mrf.mxu3 }
  0xc1   : > { %v494_v40 = vpop.f32.mrf.mxu0  ;;  %v514_v41 = vpop.f32.mrf.mxu1 }
  0xc2   : > { %v969_v42 = vpack.c.bf16 %v494_v40, %v492_v36  ;;  %v989_v43 = vpack.c.bf16 %v514_v41, %v512_v37 }
  0xc4   : > { %1041 = vst [vmem:[%s1219_s8 + $0x8] sm:$0xff] %v969_v42  }
  0xc5   : > { %1045 = vst [vmem:[%s1219_s8 + $0x28] sm:$0xff] %v989_v43  }
  0xc8   : > { %v534_v44 = vpop.f32.mrf.mxu2  ;;  %v554_v45 = vpop.f32.mrf.mxu3 }
  0xc9   : > { %v1009_v46 = vpack.c.bf16 %v534_v44, %v532_v38  ;;  %v1029_v47 = vpack.c.bf16 %v554_v45, %v552_v39  ;;  %v497_v48 = vpop.f32.mrf.mxu0  ;;  %v517_v49 = vpop.f32.mrf.mxu1 }
  0xcb   : > { %1049 = vst [vmem:[%s1219_s8 + $0x48] sm:$0xff] %v1009_v46  }
  0xcc   : > { %1053 = vst [vmem:[%s1219_s8 + $0x68] sm:$0xff] %v1029_v47  }
  0xd0   : > { %v537_v50 = vpop.f32.mrf.mxu2  ;;  %v557_v51 = vpop.f32.mrf.mxu3 }
  0xd1   : > { %v499_v52 = vpop.f32.mrf.mxu0  ;;  %v519_v53 = vpop.f32.mrf.mxu1 }
  0xd2   : > { %v974_v54 = vpack.c.bf16 %v499_v52, %v497_v48  ;;  %v994_v55 = vpack.c.bf16 %v519_v53, %v517_v49 }
  0xd4   : > { %1042 = vst [vmem:[%s1219_s8 + $0x10] sm:$0xff] %v974_v54  }
  0xd5   : > { %1046 = vst [vmem:[%s1219_s8 + $0x30] sm:$0xff] %v994_v55  }
  0xd8   : > { %v539_v56 = vpop.f32.mrf.mxu2  ;;  %v559_v57 = vpop.f32.mrf.mxu3 }
  0xd9   : > { %v1014_v58 = vpack.c.bf16 %v539_v56, %v537_v50  ;;  %v1034_v59 = vpack.c.bf16 %v559_v57, %v557_v51  ;;  %v502_v60 = vpop.f32.mrf.mxu0  ;;  %v522_v61 = vpop.f32.mrf.mxu1 }
  0xdb   : > { %1050 = vst [vmem:[%s1219_s8 + $0x50] sm:$0xff] %v1014_v58  }
  0xdc   : > { %1054 = vst [vmem:[%s1219_s8 + $0x70] sm:$0xff] %v1034_v59  }
  0xe0   : > { %v542_v62 = vpop.f32.mrf.mxu2  ;;  %v562_v63 = vpop.f32.mrf.mxu3 }
  0xe1   : > { %v504_v0 = vpop.f32.mrf.mxu0  ;;  %v524_v1 = vpop.f32.mrf.mxu1 }
  0xe2   : > { %v979_v2 = vpack.c.bf16 %v504_v0, %v502_v60  ;;  %v999_v3 = vpack.c.bf16 %v524_v1, %v522_v61 }
  0xe4   : > { %1043 = vst [vmem:[%s1219_s8 + $0x18] sm:$0xff] %v979_v2  }
  0xe5   : > { %1047 = vst [vmem:[%s1219_s8 + $0x38] sm:$0xff] %v999_v3  }
  0xe8   : > { %v544_v4 = vpop.f32.mrf.mxu2  ;;  %v564_v5 = vpop.f32.mrf.mxu3 }
  0xe9   : > { %v1019_v6 = vpack.c.bf16 %v544_v4, %v542_v62  ;;  %v1039_v7 = vpack.c.bf16 %v564_v5, %v562_v63 }
  0xeb   : > { %1051 = vst [vmem:[%s1219_s8 + $0x58] sm:$0xff] %v1019_v6  }
  0xec   : > { %1055 = vst [vmem:[%s1219_s8 + $0x78] sm:$0xff] %v1039_v7  }
  0xed PF: > { %s12_s11 = sadd.s32 1, %s1126_s11   ;;  %s1249_s9 = smov %s1122_s10 }
  0xee   : > { %p9_p5 = scmp.ge.s32.totalorder %s12_s11, 4   ;;  %s1250_s10 = smov %s1252_s12 }
  0xf0   :  { %11 = sbr.rel (!%p9_p5) target bundleno = 2 (0x2), region = 69 }

// kernel: _lambda_.229
= control target key start
LH: loop header
LB: loop body
LE: loop exit
PB: predicated region body
PF: predicated region fallthrough
CT: control target
= control target key end

     0   :  { %s2182_s12 = smov 0   ;;  %s2184_s13 = smov 0   ;;  %s2531_s0 = inlined_call_operand.vmem [shape: bf16[512,384], index: 0, kind: input, shape index: {}]   ;;  %s2532_s1 = inlined_call_operand.vmem [shape: bf16[384,128], index: 1, kind: input, shape index: {}]   ;;  %s2533_s2 = inlined_call_operand.vmem [shape: bf16[512,128], index: 2, kind: input, shape index: {}]   ;;  %s2534_s3 = inlined_call_operand.vmem [shape: bf16[512,128], index: 3, kind: output, shape index: {}]  }
   0x1   :  { %s2186_s14 = smov 0  }
   0x2 LB: > { %s32_s15 = sadd.s32 1, %s2156_s13  ;;  %p1546_p0 = scmp.ge.s32.totalorder %s2160_s14, 1  ;;  %s2160_s14 = sphi %s2186_s14, %s13_s14   ;;  %s2156_s13 = sphi %s2184_s13, %s2536_s13   ;;  %s2152_s12 = sphi %s2182_s12, %s2535_s12  }
   0x3   : > { %p34_p1 = scmp.ge.s32.totalorder %s32_s15, 2  ;;  %p199_p2 = scmp.lt.s32.totalorder %s2160_s14, 3 }
   0x5   : > { %s2538_s15 = smov (%p34_p1, %s32_s15), 0  ;;  %p200_p3 = pnand %p1546_p0, %p199_p2 }
   0x6   : > { %s1547_s7 = sshll.u32 (!%p200_p3), %s2152_s12, 5 }
   0x7   : > { %203 = sbr.rel (%p200_p3) target bundleno = 371 (0x173), region = 32  ;;  %p249_p4 = scmp.lt.s32.totalorder (!%p200_p3), %s1547_s7, 63 }
   0xc   : > { %v1898_v0 = vld [vmem:[%s2532_s1 + $0x38] sm:$0xff]  ;;  %v1897_v3 = vld [vmem:[%s2532_s1 + $0x30] sm:$0xff]  ;;  %v1896_v6 = vld [vmem:[%s2532_s1 + $0x28] sm:$0xff]  ;;  %s2540_s7 = smov (!%p249_p4, %s1547_s7), 63 }
   0xd   : > { %v2208_v1 = vld [vmem:[%s2532_s1 + $0x78] sm:$0xff]  ;;  %866 = vmatpush.bf16.msra.mxu0 %v1898_v0  ;;  %2089 = vmatpush.bf16.msra.mxu3 %v1898_v0  ;;  %v2223_v4 = vld [vmem:[%s2532_s1 + $0x70] sm:$0xff]  ;;  %v2238_v7 = vld [vmem:[%s2532_s1 + $0x68] sm:$0xff]  ;;  %s2113_s25 = smul.u32 12, %s2540_s7  ;;  %s1550_s22 = sshll.u32 %s2540_s7, 2 }
   0xe   : > { %v2213_v2 = vld [vmem:[%s2532_s1 + $0xb8] sm:$0xff]  ;;  %955 = vmatpush.bf16.msra.mxu1 %v2208_v1  ;;  %v2228_v5 = vld [vmem:[%s2532_s1 + $0xb0] sm:$0xff]  ;;  %v2243_v8 = vld [vmem:[%s2532_s1 + $0xa8] sm:$0xff]  ;;  %s2429_s28 = scalar_lea.vmem %s2534_s3, %s1550_s22 }
   0xf   : > { %1044 = vmatpush.bf16.msra.mxu2 %v2213_v2  ;;  %v1895_v9 = vld [vmem:[%s2532_s1 + $0x20] sm:$0xff]  ;;  %v1894_v12 = vld [vmem:[%s2532_s1 + $0x18] sm:$0xff]  ;;  %v1893_v15 = vld [vmem:[%s2532_s1 + $0x10] sm:$0xff]  ;;  %s2295_s8 = scalar_lea.vmem %s2531_s0, %s2113_s25  ;;  %s2411_s25 = scalar_lea.vmem %s2533_s2, %s1550_s22 }
  0x10   : > { %v2254_v10 = vld [vmem:[%s2532_s1 + $0x60] sm:$0xff]  ;;  %v1902_v13 = vld [vmem:[%s2532_s1 + $0x58] sm:$0xff]  ;;  %v1901_v16 = vld [vmem:[%s2532_s1 + $0x50] sm:$0xff] }
  0x11   : > { %867 = vmatpush.bf16.msra.mxu0 %v1897_v3  ;;  %2090 = vmatpush.bf16.msra.mxu3 %v1897_v3  ;;  %v2259_v11 = vld [vmem:[%s2532_s1 + $0xa0] sm:$0xff]  ;;  %v2274_v14 = vld [vmem:[%s2532_s1 + $0x98] sm:$0xff]  ;;  %v2287_v17 = vld [vmem:[%s2532_s1 + $0x90] sm:$0xff] }
  0x12   : > { %956 = vmatpush.bf16.msra.mxu1 %v2223_v4  ;;  %v1892_v18 = vld [vmem:[%s2532_s1 + $0x8] sm:$0xff]  ;;  %v1891_v21 = vld [vmem:[%s2532_s1] sm:$0xff]  ;;  %v1557_v29 = vld [vmem:[%s2295_s8 + $0xc] sm:$0xf0] }
  0x13   : > { %1045 = vmatpush.bf16.msra.mxu2 %v2228_v5  ;;  %v1900_v19 = vld [vmem:[%s2532_s1 + $0x48] sm:$0xff]  ;;  %v1899_v22 = vld [vmem:[%s2532_s1 + $0x40] sm:$0xff]  ;;  %v1845_v31 = vld [vmem:[%s2295_s8 + $0x10] sm:$0xf0] }
  0x14   : > { %v2304_v20 = vld [vmem:[%s2532_s1 + $0x88] sm:$0xff]  ;;  %v2315_v23 = vld [vmem:[%s2532_s1 + $0x80] sm:$0xff]  ;;  %v1567_v36 = vld [vmem:[%s2295_s8 + $0x18] sm:$0xf] }
  0x15   : > { %868 = vmatpush.bf16.msra.mxu0 %v1896_v6  ;;  %2091 = vmatpush.bf16.msra.mxu3 %v1896_v6  ;;  %v1555_v24 = vld [vmem:[%s2295_s8] sm:$0xf]  ;;  %v1844_v25 = vld [vmem:[%s2295_s8 + $0x8] sm:$0xf0]  ;;  %v1843_v28 = vld [vmem:[%s2295_s8 + $0x4] sm:$0xf] }
  0x16   : > { %957 = vmatpush.bf16.msra.mxu1 %v2238_v7  ;;  %v1699_v26 = vld [vmem:[%s2295_s8 + $0x120] sm:$0xf]  ;;  %v1880_v27 = vld [vmem:[%s2295_s8 + $0x128] sm:$0xf0]  ;;  %v1563_v30 = vld [vmem:[%s2295_s8 + $0x8] sm:$0xf]  ;;  %v1556_v32 = vor.u32 %v1844_v25, %v1555_v24  ;;  %v1560_v34 = vor.u32 %v1843_v28, %v1557_v29 }
  0x17   : > { %1046 = vmatpush.bf16.msra.mxu2 %v2243_v8  ;;  %v1700_v33 = vor.u32 %v1880_v27, %v1699_v26  ;;  %v1564_v35 = vor.u32 %v1845_v31, %v1563_v30  ;;  %v1847_v37 = vld [vmem:[%s2295_s8 + $0x20] sm:$0xf0]  ;;  %v1711_v38 = vld [vmem:[%s2295_s8 + $0x138] sm:$0xf]  ;;  %v1846_v40 = vld [vmem:[%s2295_s8 + $0x1c] sm:$0xf] }
  0x18   : > { %v1883_v39 = vld [vmem:[%s2295_s8 + $0x140] sm:$0xf0]  ;;  %v1569_v41 = vld [vmem:[%s2295_s8 + $0x24] sm:$0xf0]  ;;  %v1575_v42 = vld [vmem:[%s2295_s8 + $0x20] sm:$0xf]  ;;  %v1568_v44 = vor.u32 %v1847_v37, %v1567_v36 }
  0x19   : > { %869 = vmatpush.bf16.msra.mxu0 %v1895_v9  ;;  %2092 = vmatpush.bf16.msra.mxu3 %v1895_v9  ;;  %v1848_v43 = vld [vmem:[%s2295_s8 + $0x28] sm:$0xf0]  ;;  %v1712_v45 = vor.u32 %v1883_v39, %v1711_v38  ;;  %v1572_v46 = vor.u32 %v1846_v40, %v1569_v41  ;;  %v1579_v48 = vld [vmem:[%s2295_s8 + $0x30] sm:$0xf]  ;;  %v1850_v49 = vld [vmem:[%s2295_s8 + $0x38] sm:$0xf0] }
  0x1a   : > { %958 = vmatpush.bf16.msra.mxu1 %v2254_v10  ;;  %v1576_v47 = vor.u32 %v1848_v43, %v1575_v42  ;;  %v1723_v50 = vld [vmem:[%s2295_s8 + $0x150] sm:$0xf]  ;;  %v1886_v51 = vld [vmem:[%s2295_s8 + $0x158] sm:$0xf0]  ;;  %v1849_v52 = vld [vmem:[%s2295_s8 + $0x34] sm:$0xf]  ;;  %v1580_v56 = vor.u32 %v1850_v49, %v1579_v48 }
  0x1b   : > { %1047 = vmatpush.bf16.msra.mxu2 %v2259_v11  ;;  %v1581_v53 = vld [vmem:[%s2295_s8 + $0x3c] sm:$0xf0]  ;;  %v1587_v54 = vld [vmem:[%s2295_s8 + $0x38] sm:$0xf]  ;;  %v1851_v55 = vld [vmem:[%s2295_s8 + $0x40] sm:$0xf0]  ;;  %v1724_v57 = vor.u32 %v1886_v51, %v1723_v50 }
  0x1c   : > { %v1584_v58 = vor.u32 %v1849_v52, %v1581_v53  ;;  %v1588_v59 = vor.u32 %v1851_v55, %v1587_v54  ;;  %v1591_v60 = vld [vmem:[%s2295_s8 + $0x48] sm:$0xf]  ;;  %v1853_v61 = vld [vmem:[%s2295_s8 + $0x50] sm:$0xf0]  ;;  %v1852_v0 = vld [vmem:[%s2295_s8 + $0x4c] sm:$0xf] }
  0x1d   : > { %870 = vmatpush.bf16.msra.mxu0 %v1894_v12  ;;  %2093 = vmatpush.bf16.msra.mxu3 %v1894_v12  ;;  %v1735_v62 = vld [vmem:[%s2295_s8 + $0x168] sm:$0xf]  ;;  %v1889_v63 = vld [vmem:[%s2295_s8 + $0x170] sm:$0xf0]  ;;  %v1854_v3 = vld [vmem:[%s2295_s8 + $0x58] sm:$0xf0] }
  0x1e   : > { %959 = vmatpush.bf16.msra.mxu1 %v1902_v13  ;;  %v1856_v9 = vld [vmem:[%s2295_s8 + $0x68] sm:$0xf0]  ;;  %v1701_v12 = vld [vmem:[%s2295_s8 + $0x12c] sm:$0xf0]  ;;  %v1882_v24 = vld [vmem:[%s2295_s8 + $0x13c] sm:$0xf] }
  0x1f   : > { %1048 = vmatpush.bf16.msra.mxu2 %v2274_v14  ;;  %v1713_v25 = vld [vmem:[%s2295_s8 + $0x144] sm:$0xf0]  ;;  %v1623_v26 = vld [vmem:[%s2295_s8 + $0x80] sm:$0xf]  ;;  %v1860_v27 = vld [vmem:[%s2295_s8 + $0x88] sm:$0xf0] }
  0x20   : > { %v1716_v29 = vor.u32 %v1882_v24, %v1713_v25  ;;  %v1624_v31 = vor.u32 %v1860_v27, %v1623_v26  ;;  %v1725_v36 = vld [vmem:[%s2295_s8 + $0x15c] sm:$0xf0]  ;;  %v1635_v38 = vld [vmem:[%s2295_s8 + $0x98] sm:$0xf]  ;;  %v1863_v39 = vld [vmem:[%s2295_s8 + $0xa0] sm:$0xf0] }
  0x21   : > { %871 = vmatpush.bf16.msra.mxu0 %v1893_v15  ;;  %2094 = vmatpush.bf16.msra.mxu3 %v1893_v15  ;;  %v1857_v15 = vld [vmem:[%s2295_s8 + $0x70] sm:$0xf0]  ;;  %v1629_v37 = vld [vmem:[%s2295_s8 + $0x9c] sm:$0xf0]  ;;  %v1636_v43 = vor.u32 %v1863_v39, %v1635_v38  ;;  %v1737_v48 = vld [vmem:[%s2295_s8 + $0x174] sm:$0xf0] }
  0x22   : > { %960 = vmatpush.bf16.msra.mxu1 %v1901_v16  ;;  %v1641_v49 = vld [vmem:[%s2295_s8 + $0xb4] sm:$0xf0]  ;;  %v1647_v50 = vld [vmem:[%s2295_s8 + $0xb0] sm:$0xf]  ;;  %v1866_v51 = vld [vmem:[%s2295_s8 + $0xb8] sm:$0xf0] }
  0x23   : > { %1049 = vmatpush.bf16.msra.mxu2 %v2287_v17  ;;  %v1648_v55 = vor.u32 %v1866_v51, %v1647_v50  ;;  %v1887_v50 = vld [vmem:[%s2295_s8 + $0x160] sm:$0xf0]  ;;  %v1677_v51 = vld [vmem:[%s2295_s8 + $0xfc] sm:$0xf0] }
  0x25   : > { %872 = vmatpush.bf16.msra.mxu0 %v1892_v18  ;;  %2095 = vmatpush.bf16.msra.mxu3 %v1892_v18 }
  0x26   : > { %961 = vmatpush.bf16.msra.mxu1 %v1900_v19 }
  0x27   : > { %1050 = vmatpush.bf16.msra.mxu2 %v2304_v20 }
  0x29   : > { %873 = vmatpush.bf16.msra.mxu0 %v1891_v21  ;;  %2096 = vmatpush.bf16.msra.mxu3 %v1891_v21  ;;  %v1859_v21 = vld [vmem:[%s2295_s8 + $0x80] sm:$0xf0] }
  0x2a   : > { %962 = vmatpush.bf16.msra.mxu1 %v1899_v22 }
  0x2b   : > { %1051 = vmatpush.bf16.msra.mxu2 %v2315_v23 }
  0x2c   : > { %874 = vmatmul.bf16.vlgmr.msra.gmra.mxu0 %v1556_v32  ;;  %934 = vmatmul.bf16.vlgmr.msra.gmra.mxu3 %v1700_v33  ;;  %v1627_v32 = vld [vmem:[%s2295_s8 + $0x90] sm:$0xf]  ;;  %v1862_v33 = vld [vmem:[%s2295_s8 + $0x98] sm:$0xf0] }
  0x2d   : > { %2097 = vmatpush.bf16.msrb.mxu3 %v2208_v1  ;;  %963 = vmatmul.bf16.vlgmr.msra.gmra.mxu1 %v1560_v34  ;;  %v1593_v1 = vld [vmem:[%s2295_s8 + $0x54] sm:$0xf0]  ;;  %v1861_v34 = vld [vmem:[%s2295_s8 + $0x94] sm:$0xf]  ;;  %v1628_v40 = vor.u32 %v1862_v33, %v1627_v32 }
  0x2e   : > { %1052 = vmatmul.bf16.vlgmr.msra.gmra.mxu2 %v1564_v35  ;;  %v1596_v6 = vor.u32 %v1852_v0, %v1593_v1  ;;  %v1885_v35 = vld [vmem:[%s2295_s8 + $0x154] sm:$0xf]  ;;  %v1632_v42 = vor.u32 %v1861_v34, %v1629_v37 }
  0x2f   : > { %v1728_v41 = vor.u32 %v1885_v35, %v1725_v36 }
  0x31   : > { %2098 = vmatpush.bf16.msrb.mxu3 %v2223_v4  ;;  %v1592_v4 = vor.u32 %v1853_v61, %v1591_v60  ;;  %v1881_v60 = vld [vmem:[%s2295_s8 + $0x130] sm:$0xf0]  ;;  %v1653_v61 = vld [vmem:[%s2295_s8 + $0xcc] sm:$0xf0] }
  0x35   : > { %2099 = vmatpush.bf16.msrb.mxu3 %v2238_v7 }
  0x39   : > { %2100 = vmatpush.bf16.msrb.mxu3 %v2254_v10  ;;  %v1855_v10 = vld [vmem:[%s2295_s8 + $0x64] sm:$0xf] }
  0x3c   : > { %879 = vmatmul.bf16.gmra.mxu0 %v1568_v44  ;;  %939 = vmatmul.bf16.gmra.mxu3 %v1712_v45  ;;  %v1639_v44 = vld [vmem:[%s2295_s8 + $0xa8] sm:$0xf]  ;;  %v1865_v45 = vld [vmem:[%s2295_s8 + $0xb0] sm:$0xf0] }
  0x3d   : > { %2101 = vmatpush.bf16.msrb.mxu3 %v1902_v13  ;;  %968 = vmatmul.bf16.gmra.mxu1 %v1572_v46  ;;  %v1605_v13 = vld [vmem:[%s2295_s8 + $0x6c] sm:$0xf0]  ;;  %v1864_v46 = vld [vmem:[%s2295_s8 + $0xac] sm:$0xf]  ;;  %v1640_v52 = vor.u32 %v1865_v45, %v1639_v44  ;;  %v1874_v45 = vld [vmem:[%s2295_s8 + $0xf8] sm:$0xf0] }
  0x3e   : > { %1057 = vmatmul.bf16.gmra.mxu2 %v1576_v47  ;;  %v1608_v18 = vor.u32 %v1855_v10, %v1605_v13  ;;  %v1888_v47 = vld [vmem:[%s2295_s8 + $0x16c] sm:$0xf]  ;;  %v1644_v54 = vor.u32 %v1864_v46, %v1641_v49  ;;  %v1916_v10 = vld [vmem:[%s2411_s25] sm:$0xff]   ;;  %v1675_v44 = vld [vmem:[%s2295_s8 + $0xf0] sm:$0xf] }
  0x3f   : > { %v1740_v53 = vor.u32 %v1888_v47, %v1737_v48  ;;  %v1871_v13 = vld [vmem:[%s2295_s8 + $0xe0] sm:$0xf0]  ;;  %v1918_v25 = vunpack.c.h.bf16 %v1916_v10  ;;  %v1873_v48 = vld [vmem:[%s2295_s8 + $0xf4] sm:$0xf]  ;;  %v1731_v49 = vld [vmem:[%s2295_s8 + $0x158] sm:$0xf] }
  0x41   : > { %2102 = vmatpush.bf16.msrb.mxu3 %v1901_v16 }
  0x45   : > { %2103 = vmatpush.bf16.msrb.mxu3 %v1900_v19 }
  0x49   : > { %2104 = vmatpush.bf16.msrb.mxu3 %v1899_v22  ;;  %v1858_v22 = vld [vmem:[%s2295_s8 + $0x7c] sm:$0xf] }
  0x4c   : > { %884 = vmatmul.bf16.gmra.mxu0 %v1580_v56  ;;  %944 = vmatmul.bf16.gmra.mxu3 %v1724_v57  ;;  %v1651_v56 = vld [vmem:[%s2295_s8 + $0xc0] sm:$0xf]  ;;  %v1868_v57 = vld [vmem:[%s2295_s8 + $0xc8] sm:$0xf0] }
  0x4d   : > { %2105 = vmatpush.bf16.msra.mxu3 %v2213_v2  ;;  %973 = vmatmul.bf16.gmra.mxu1 %v1584_v58  ;;  %v1599_v2 = vld [vmem:[%s2295_s8 + $0x50] sm:$0xf]  ;;  %v1867_v58 = vld [vmem:[%s2295_s8 + $0xc4] sm:$0xf]  ;;  %v1652_v0 = vor.u32 %v1868_v57, %v1651_v56 }
  0x4e   : > { %1062 = vmatmul.bf16.gmra.mxu2 %v1588_v59  ;;  %v1600_v7 = vor.u32 %v1854_v3, %v1599_v2  ;;  %v1707_v59 = vld [vmem:[%s2295_s8 + $0x128] sm:$0xf]  ;;  %v1656_v3 = vor.u32 %v1867_v58, %v1653_v61  ;;  %v1676_v58 = vor.u32 %v1874_v45, %v1675_v44  ;;  %v2061_v45 = vld [vmem:[%s2411_s25 + $0x18] sm:$0xff]  }
  0x4f   : > { %v1708_v1 = vor.u32 %v1881_v60, %v1707_v59  ;;  %v1732_v59 = vor.u32 %v1887_v50, %v1731_v49 }
  0x51   : > { %2106 = vmatpush.bf16.msra.mxu3 %v2228_v5  ;;  %v1736_v5 = vor.u32 %v1889_v63, %v1735_v62  ;;  %v1659_v62 = vld [vmem:[%s2295_s8 + $0xc8] sm:$0xf]  ;;  %v1869_v63 = vld [vmem:[%s2295_s8 + $0xd0] sm:$0xf0] }
  0x55   : > { %2107 = vmatpush.bf16.msra.mxu3 %v2243_v8  ;;  %v1603_v8 = vld [vmem:[%s2295_s8 + $0x60] sm:$0xf] }
  0x56   : > { %v1604_v16 = vor.u32 %v1856_v9, %v1603_v8 }
  0x59   : > { %2108 = vmatpush.bf16.msra.mxu3 %v2259_v11  ;;  %v1879_v11 = vld [vmem:[%s2295_s8 + $0x124] sm:$0xf] }
  0x5c   : > { %889 = vmatmul.bf16.gmra.mxu0 %v1592_v4  ;;  %949 = vmatmul.bf16.gmra.mxu3 %v1736_v5  ;;  %v1660_v4 = vor.u32 %v1869_v63, %v1659_v62  ;;  %v1680_v63 = vor.u32 %v1873_v48, %v1677_v51  ;;  %v1929_v48 = vunpack.c.l.bf16 %v2061_v45  ;;  %v1930_v51 = vunpack.c.h.bf16 %v2061_v45 }
  0x5d   : > { %2109 = vmatpush.bf16.msra.mxu3 %v2274_v14  ;;  %978 = vmatmul.bf16.gmra.mxu1 %v1596_v6  ;;  %v1611_v14 = vld [vmem:[%s2295_s8 + $0x68] sm:$0xf] }
  0x5e   : > { %1067 = vmatmul.bf16.gmra.mxu2 %v1600_v7  ;;  %v1612_v19 = vor.u32 %v1857_v15, %v1611_v14  ;;  %v1917_v15 = vunpack.c.l.bf16 %v1916_v10 }
  0x61   : > { %2110 = vmatpush.bf16.msra.mxu3 %v2287_v17  ;;  %v1704_v17 = vor.u32 %v1879_v11, %v1701_v12  ;;  %v1663_v12 = vld [vmem:[%s2295_s8 + $0xd8] sm:$0xf] }
  0x62   : > { %v1664_v26 = vor.u32 %v1871_v13, %v1663_v12  ;;  %v1687_v13 = vld [vmem:[%s2295_s8 + $0x108] sm:$0xf] }
  0x65   : > { %2111 = vmatpush.bf16.msra.mxu3 %v2304_v20  ;;  %v1615_v20 = vld [vmem:[%s2295_s8 + $0x78] sm:$0xf] }
  0x66   : > { %v1616_v28 = vor.u32 %v1859_v21, %v1615_v20  ;;  %v1671_v20 = vld [vmem:[%s2295_s8 + $0xe0] sm:$0xf]  ;;  %v1872_v21 = vld [vmem:[%s2295_s8 + $0xe8] sm:$0xf0] }
  0x67   : > { %v1672_v32 = vor.u32 %v1872_v21, %v1671_v20  ;;  %v1689_v20 = vld [vmem:[%s2295_s8 + $0x114] sm:$0xf0]  ;;  %v1695_v21 = vld [vmem:[%s2295_s8 + $0x110] sm:$0xf] }
  0x69   : > { %2112 = vmatpush.bf16.msra.mxu3 %v2315_v23  ;;  %v1617_v23 = vld [vmem:[%s2295_s8 + $0x84] sm:$0xf0] }
  0x6a   : > { %v1620_v30 = vor.u32 %v1858_v22, %v1617_v23 }
  0x6c   : > { %894 = vmatmul.bf16.gmra.mxu0 %v1604_v16  ;;  %1023 = vmatmul.bf16.vlgmr.msrb.gmra.mxu3 %v1704_v17  ;;  %v1870_v16 = vld [vmem:[%s2295_s8 + $0xdc] sm:$0xf]  ;;  %v1719_v17 = vld [vmem:[%s2295_s8 + $0x140] sm:$0xf] }
  0x6d   : > { %983 = vmatmul.bf16.gmra.mxu1 %v1608_v18  ;;  %v1884_v18 = vld [vmem:[%s2295_s8 + $0x148] sm:$0xf0] }
  0x6e   : > { %1072 = vmatmul.bf16.gmra.mxu2 %v1612_v19  ;;  %v1665_v19 = vld [vmem:[%s2295_s8 + $0xe4] sm:$0xf0]  ;;  %v1720_v27 = vor.u32 %v1884_v18, %v1719_v17  ;;  %v1876_v17 = vld [vmem:[%s2295_s8 + $0x10c] sm:$0xf]  ;;  %v1743_v18 = vld [vmem:[%s2295_s8 + $0x170] sm:$0xf] }
  0x7c   : > { %899 = vmatmul.bf16.gmra.mxu0 %v1616_v28  ;;  %1028 = vmatmul.bf16.gmra.mxu3 %v1716_v29 }
  0x7d   : > { %988 = vmatmul.bf16.gmra.mxu1 %v1620_v30 }
  0x7e   : > { %1077 = vmatmul.bf16.gmra.mxu2 %v1624_v31  ;;  %v1668_v31 = vor.u32 %v1870_v16, %v1665_v19  ;;  %v1890_v19 = vld [vmem:[%s2295_s8 + $0x178] sm:$0xf0] }
  0x8c   : > { %904 = vmatmul.bf16.gmra.mxu0 %v1628_v40  ;;  %1033 = vmatmul.bf16.gmra.mxu3 %v1728_v41 }
  0x8d   : > { %993 = vmatmul.bf16.gmra.mxu1 %v1632_v42  ;;  %v2059_v42 = vld [vmem:[%s2411_s25 + $0x8] sm:$0xff]  }
  0x8e   : > { %1082 = vmatmul.bf16.gmra.mxu2 %v1636_v43  ;;  %v1921_v47 = vunpack.c.l.bf16 %v2059_v42  ;;  %v1922_v56 = vunpack.c.h.bf16 %v2059_v42 }
  0x9c   : > { %909 = vmatmul.bf16.gmra.mxu0 %v1640_v52  ;;  %1038 = vmatmul.bf16.gmra.mxu3 %v1740_v53  ;;  %v1683_v52 = vld [vmem:[%s2295_s8 + $0xf8] sm:$0xf]  ;;  %v1875_v53 = vld [vmem:[%s2295_s8 + $0x100] sm:$0xf0] }
  0x9d   : > { %998 = vmatmul.bf16.gmra.mxu1 %v1644_v54 }
  0x9e   : > { %1087 = vmatmul.bf16.gmra.mxu2 %v1648_v55 }
  0xa9   : > { %v875_v2 = vpop.f32.mrf.mxu0 }
  0xaa   : > { %v964_v5 = vpop.f32.mrf.mxu1 }
  0xab   : > { %v965_v8 = vadd.f32 %v964_v5, %v875_v2 }
  0xac   : > { %914 = vmatmul.bf16.gmra.mxu0 %v1652_v0  ;;  %1112 = vmatmul.bf16.vlgmr.msra.gmra.mxu3 %v1708_v1  ;;  %v1684_v0 = vor.u32 %v1875_v53, %v1683_v52 }
  0xad   : > { %1003 = vmatmul.bf16.gmra.mxu1 %v1656_v3 }
  0xae   : > { %1092 = vmatmul.bf16.gmra.mxu2 %v1660_v4 }
  0xaf   : > { %v2404_v6 = vpop.f32.mrf.mxu3 }
  0xb1   : > { %v1053_v7 = vpop.f32.mrf.mxu2  ;;  %v877_v9 = vpop.f32.mrf.mxu0 }
  0xb2   : > { %v966_v11 = vpop.f32.mrf.mxu1  ;;  %v1054_v14 = vadd.f32 %v1053_v7, %v965_v8 }
  0xb3   : > { %v967_v22 = vadd.f32 %v966_v11, %v877_v9  ;;  %v2060_v11 = vld [vmem:[%s2411_s25 + $0x10] sm:$0xff]  }
  0xb4   : > { %v1296_v28 = vadd.f32 %v1917_v15, %v1054_v14  ;;  %v1877_v14 = vld [vmem:[%s2295_s8 + $0x110] sm:$0xf0]  ;;  %v1925_v16 = vunpack.c.l.bf16 %v2060_v11 }
  0xb6   : > { %v1328_v35 = vmax.f32 %v1296_v28, 0.0  ;;  %v1688_v28 = vor.u32 %v1877_v14, %v1687_v13 }
  0xb7   : > { %v2422_v24 = vpop.f32.mrf.mxu3 }
  0xb9   : > { %v1055_v23 = vpop.f32.mrf.mxu2  ;;  %v880_v30 = vpop.f32.mrf.mxu0 }
  0xba   : > { %v1056_v29 = vadd.f32 %v1055_v23, %v967_v22  ;;  %v969_v33 = vpop.f32.mrf.mxu1  ;;  %v1878_v22 = vld [vmem:[%s2295_s8 + $0x118] sm:$0xf0] }
  0xbb   : > { %v970_v40 = vadd.f32 %v969_v33, %v880_v30  ;;  %v1692_v33 = vor.u32 %v1876_v17, %v1689_v20 }
  0xbc   : > { %v1297_v34 = vadd.f32 %v1918_v25, %v1056_v29  ;;  %919 = vmatmul.bf16.gmra.mxu0 %v1664_v26  ;;  %1117 = vmatmul.bf16.gmra.mxu3 %v1720_v27  ;;  %v1926_v26 = vunpack.c.h.bf16 %v2060_v11  ;;  %v1744_v29 = vor.u32 %v1890_v19, %v1743_v18 }
  0xbd   : > { %1008 = vmatmul.bf16.gmra.mxu1 %v1668_v31 }
  0xbe   : > { %v1329_v36 = vmax.f32 %v1297_v34, 0.0  ;;  %1097 = vmatmul.bf16.gmra.mxu2 %v1672_v32  ;;  %v1696_v34 = vor.u32 %v1878_v22, %v1695_v21 }
  0xbf   : > { %v2431_v38 = vpop.f32.mrf.mxu3 }
  0xc0   : > { %v1982_v37 = vpack.c.bf16 %v1329_v36, %v1328_v35 }
  0xc1   : > { %v1058_v39 = vpop.f32.mrf.mxu2  ;;  %v882_v41 = vpop.f32.mrf.mxu0 }
  0xc2   : > { %1983 = vst [vmem:[%s2429_s28] sm:$0xff] %v1982_v37   ;;  %v971_v43 = vpop.f32.mrf.mxu1  ;;  %v1059_v46 = vadd.f32 %v1058_v39, %v970_v40 }
  0xc3   : > { %v972_v54 = vadd.f32 %v971_v43, %v882_v41 }
  0xc4   : > { %v1298_v60 = vadd.f32 %v1921_v47, %v1059_v46 }
  0xc6   : > { %v1330_v3 = vmax.f32 %v1298_v60, 0.0 }
  0xc7   : > { %v2443_v55 = vpop.f32.mrf.mxu3 }
  0xc9   : > { %v1060_v57 = vpop.f32.mrf.mxu2  ;;  %v885_v62 = vpop.f32.mrf.mxu0 }
  0xca   : > { %v1061_v61 = vadd.f32 %v1060_v57, %v972_v54  ;;  %v974_v1 = vpop.f32.mrf.mxu1 }
  0xcb   : > { %v975_v9 = vadd.f32 %v974_v1, %v885_v62 }
  0xcc   : > { %v1299_v2 = vadd.f32 %v1922_v56, %v1061_v61  ;;  %924 = vmatmul.bf16.gmra.mxu0 %v1676_v58  ;;  %1122 = vmatmul.bf16.gmra.mxu3 %v1732_v59 }
  0xcd   : > { %1013 = vmatmul.bf16.gmra.mxu1 %v1680_v63 }
  0xce   : > { %v1331_v4 = vmax.f32 %v1299_v2, 0.0  ;;  %1102 = vmatmul.bf16.gmra.mxu2 %v1684_v0 }
  0xcf   : > { %v2445_v7 = vpop.f32.mrf.mxu3 }
  0xd0   : > { %v1987_v5 = vpack.c.bf16 %v1331_v4, %v1330_v3  ;;  %v2062_v3 = vld [vmem:[%s2411_s25 + $0x20] sm:$0xff]  }
  0xd1   : > { %v1063_v8 = vpop.f32.mrf.mxu2  ;;  %v887_v10 = vpop.f32.mrf.mxu0  ;;  %v1934_v11 = vunpack.c.h.bf16 %v2062_v3 }
  0xd2   : > { %2074 = vst [vmem:[%s2429_s28 + $0x8] sm:$0xff] %v1987_v5   ;;  %v976_v12 = vpop.f32.mrf.mxu1  ;;  %v1064_v15 = vadd.f32 %v1063_v8, %v975_v9  ;;  %v1933_v8 = vunpack.c.l.bf16 %v2062_v3 }
  0xd3   : > { %v977_v25 = vadd.f32 %v976_v12, %v887_v10 }
  0xd4   : > { %v1300_v30 = vadd.f32 %v1925_v16, %v1064_v15 }
  0xd6   : > { %v1332_v37 = vmax.f32 %v1300_v30, 0.0 }
  0xd7   : > { %v2457_v23 = vpop.f32.mrf.mxu3 }
  0xd9   : > { %v1065_v27 = vpop.f32.mrf.mxu2  ;;  %v890_v32 = vpop.f32.mrf.mxu0 }
  0xda   : > { %v1066_v31 = vadd.f32 %v1065_v27, %v977_v25  ;;  %v979_v35 = vpop.f32.mrf.mxu1  ;;  %v2063_v27 = vld [vmem:[%s2411_s25 + $0x28] sm:$0xff]  }
  0xdb   : > { %v980_v43 = vadd.f32 %v979_v35, %v890_v32  ;;  %v1937_v30 = vunpack.c.l.bf16 %v2063_v27 }
  0xdc   : > { %v1301_v36 = vadd.f32 %v1926_v26, %v1066_v31  ;;  %929 = vmatmul.bf16.gmra.mxu0 %v1688_v28  ;;  %1127 = vmatmul.bf16.gmra.mxu3 %v1744_v29 }
  0xdd   : > { %1018 = vmatmul.bf16.gmra.mxu1 %v1692_v33  ;;  %v1938_v33 = vunpack.c.h.bf16 %v2063_v27 }
  0xde   : > { %v1333_v39 = vmax.f32 %v1301_v36, 0.0  ;;  %1107 = vmatmul.bf16.gmra.mxu2 %v1696_v34 }
  0xdf   : > { %v2459_v41 = vpop.f32.mrf.mxu3 }
  0xe0   : > { %v1992_v40 = vpack.c.bf16 %v1333_v39, %v1332_v37 }
  0xe1   : > { %v1068_v42 = vpop.f32.mrf.mxu2  ;;  %v892_v44 = vpop.f32.mrf.mxu0 }
  0xe2   : > { %2075 = vst [vmem:[%s2429_s28 + $0x10] sm:$0xff] %v1992_v40   ;;  %v981_v46 = vpop.f32.mrf.mxu1  ;;  %v1069_v47 = vadd.f32 %v1068_v42, %v980_v43 }
  0xe3   : > { %v982_v49 = vadd.f32 %v981_v46, %v892_v44 }
  0xe4   : > { %v1302_v53 = vadd.f32 %v1929_v48, %v1069_v47 }
  0xe6   : > { %v1334_v59 = vmax.f32 %v1302_v53, 0.0 }
  0xe7   : > { %v2463_v50 = vpop.f32.mrf.mxu3 }
  0xe9   : > { %v1070_v52 = vpop.f32.mrf.mxu2  ;;  %v895_v56 = vpop.f32.mrf.mxu0 }
  0xea   : > { %v1071_v54 = vadd.f32 %v1070_v52, %v982_v49  ;;  %v984_v57 = vpop.f32.mrf.mxu1  ;;  %v2064_v49 = vld [vmem:[%s2411_s25 + $0x30] sm:$0xff]  }
  0xeb   : > { %v985_v1 = vadd.f32 %v984_v57, %v895_v56  ;;  %v1941_v53 = vunpack.c.l.bf16 %v2064_v49  ;;  %v1942_v57 = vunpack.c.h.bf16 %v2064_v49 }
  0xec   : > { %v1303_v58 = vadd.f32 %v1930_v51, %v1071_v54 }
  0xee   : > { %v1335_v60 = vmax.f32 %v1303_v58, 0.0 }
  0xef   : > { %v1024_v62 = vpop.f32.mrf.mxu3 }
  0xf0   : > { %v1997_v61 = vpack.c.bf16 %v1335_v60, %v1334_v59  ;;  %v2466_v63 = vadd.f32 %v1024_v62, %v2404_v6 }
  0xf1   : > { %v1073_v0 = vpop.f32.mrf.mxu2  ;;  %v897_v2 = vpop.f32.mrf.mxu0 }
  0xf2   : > { %2076 = vst [vmem:[%s2429_s28 + $0x18] sm:$0xff] %v1997_v61   ;;  %v986_v4 = vpop.f32.mrf.mxu1  ;;  %v1074_v5 = vadd.f32 %v1073_v0, %v985_v1 }
  0xf3   : > { %v987_v9 = vadd.f32 %v986_v4, %v897_v2 }
  0xf4   : > { %v1304_v13 = vadd.f32 %v1933_v8, %v1074_v5 }
  0xf6   : > { %v1336_v17 = vmax.f32 %v1304_v13, 0.0 }
  0xf7   : > { %v2470_v10 = vpop.f32.mrf.mxu3 }
  0xf9   : > { %v1075_v12 = vpop.f32.mrf.mxu2  ;;  %v900_v15 = vpop.f32.mrf.mxu0 }
  0xfa   : > { %v1076_v14 = vadd.f32 %v1075_v12, %v987_v9  ;;  %v989_v6 = vpop.f32.mrf.mxu1 }
  0xfb   : > { %v990_v25 = vadd.f32 %v989_v6, %v900_v15 }
  0xfc   : > { %v1305_v16 = vadd.f32 %v1934_v11, %v1076_v14  ;;  %v2065_v11 = vld [vmem:[%s2411_s25 + $0x38] sm:$0xff]  }
  0xfd   : > { %v1945_v14 = vunpack.c.l.bf16 %v2065_v11 }
  0xfe   : > { %v1337_v18 = vmax.f32 %v1305_v16, 0.0  ;;  %v1946_v16 = vunpack.c.h.bf16 %v2065_v11 }
  0xff   : > { %v1029_v20 = vpop.f32.mrf.mxu3 }
 0x100   : > { %v2002_v19 = vpack.c.bf16 %v1337_v18, %v1336_v17  ;;  %v2473_v21 = vadd.f32 %v1029_v20, %v2431_v38 }
 0x101   : > { %v1078_v22 = vpop.f32.mrf.mxu2  ;;  %v902_v26 = vpop.f32.mrf.mxu0 }
 0x102   : > { %2077 = vst [vmem:[%s2429_s28 + $0x20] sm:$0xff] %v2002_v19   ;;  %v991_v28 = vpop.f32.mrf.mxu1  ;;  %v1079_v29 = vadd.f32 %v1078_v22, %v990_v25 }
 0x103   : > { %v992_v31 = vadd.f32 %v991_v28, %v902_v26 }
 0x104   : > { %v1306_v35 = vadd.f32 %v1937_v30, %v1079_v29 }
 0x106   : > { %v1338_v40 = vmax.f32 %v1306_v35, 0.0 }
 0x107   : > { %v2477_v32 = vpop.f32.mrf.mxu3 }
 0x109   : > { %v1080_v34 = vpop.f32.mrf.mxu2  ;;  %v905_v37 = vpop.f32.mrf.mxu0 }
 0x10a   : > { %v1081_v36 = vadd.f32 %v1080_v34, %v992_v31  ;;  %v994_v38 = vpop.f32.mrf.mxu1  ;;  %v2070_v31 = vld [vmem:[%s2411_s25 + $0x60] sm:$0xff]  }
 0x10b   : > { %v995_v47 = vadd.f32 %v994_v38, %v905_v37  ;;  %v2066_v34 = vld [vmem:[%s2411_s25 + $0x40] sm:$0xff]   ;;  %v1965_v37 = vunpack.c.l.bf16 %v2070_v31 }
 0x10c   : > { %v1307_v39 = vadd.f32 %v1938_v33, %v1081_v36 }
 0x10e   : > { %v1339_v42 = vmax.f32 %v1307_v39, 0.0  ;;  %v1949_v39 = vunpack.c.l.bf16 %v2066_v34 }
 0x10f   : > { %v1034_v44 = vpop.f32.mrf.mxu3 }
 0x110   : > { %v2007_v43 = vpack.c.bf16 %v1339_v42, %v1338_v40  ;;  %v2480_v45 = vadd.f32 %v1034_v44, %v2445_v7  ;;  %v1027_v40 = vadd.f32 %v2470_v10, %v2422_v24  ;;  %v1966_v42 = vunpack.c.h.bf16 %v2070_v31 }
 0x111   : > { %v1083_v46 = vpop.f32.mrf.mxu2  ;;  %v907_v48 = vpop.f32.mrf.mxu0  ;;  %v1950_v44 = vunpack.c.h.bf16 %v2066_v34 }
 0x112   : > { %2078 = vst [vmem:[%s2429_s28 + $0x28] sm:$0xff] %v2007_v43   ;;  %v996_v51 = vpop.f32.mrf.mxu1  ;;  %v1084_v52 = vadd.f32 %v1083_v46, %v995_v47 }
 0x113   : > { %v997_v54 = vadd.f32 %v996_v51, %v907_v48 }
 0x114   : > { %v1308_v59 = vadd.f32 %v1941_v53, %v1084_v52 }
 0x116   : > { %v1340_v0 = vmax.f32 %v1308_v59, 0.0 }
 0x117   : > { %v2484_v56 = vpop.f32.mrf.mxu3 }
 0x119   : > { %v1085_v58 = vpop.f32.mrf.mxu2  ;;  %v910_v61 = vpop.f32.mrf.mxu0 }
 0x11a   : > { %v1086_v60 = vadd.f32 %v1085_v58, %v997_v54  ;;  %v999_v7 = vpop.f32.mrf.mxu1 }
 0x11b   : > { %v1000_v8 = vadd.f32 %v999_v7, %v910_v61 }
 0x11c   : > { %v1309_v62 = vadd.f32 %v1942_v57, %v1086_v60 }
 0x11e   : > { %v1341_v1 = vmax.f32 %v1309_v62, 0.0 }
 0x11f   : > { %v1039_v3 = vpop.f32.mrf.mxu3 }
 0x120   : > { %v2012_v2 = vpack.c.bf16 %v1341_v1, %v1340_v0  ;;  %v2487_v4 = vadd.f32 %v1039_v3, %v2459_v41  ;;  %v2071_v1 = vld [vmem:[%s2411_s25 + $0x68] sm:$0xff]  }
 0x121   : > { %v1088_v5 = vpop.f32.mrf.mxu2  ;;  %v912_v9 = vpop.f32.mrf.mxu0  ;;  %v2067_v3 = vld [vmem:[%s2411_s25 + $0x48] sm:$0xff]  }
 0x122   : > { %2079 = vst [vmem:[%s2429_s28 + $0x30] sm:$0xff] %v2012_v2   ;;  %v1001_v12 = vpop.f32.mrf.mxu1  ;;  %v1089_v13 = vadd.f32 %v1088_v5, %v1000_v8 }
 0x123   : > { %v1002_v15 = vadd.f32 %v1001_v12, %v912_v9  ;;  %v1969_v9 = vunpack.c.l.bf16 %v2071_v1  ;;  %v1953_v12 = vunpack.c.l.bf16 %v2067_v3 }
 0x124   : > { %v1310_v18 = vadd.f32 %v1945_v14, %v1089_v13  ;;  %v1032_v13 = vadd.f32 %v2477_v32, %v2443_v55  ;;  %v1970_v14 = vunpack.c.h.bf16 %v2071_v1 }
 0x126   : > { %v1342_v25 = vmax.f32 %v1310_v18, 0.0 }
 0x127   : > { %v2491_v6 = vpop.f32.mrf.mxu3 }
 0x129   : > { %v1090_v17 = vpop.f32.mrf.mxu2  ;;  %v915_v41 = vpop.f32.mrf.mxu0 }
 0x12a   : > { %v1091_v19 = vadd.f32 %v1090_v17, %v1002_v15  ;;  %v1004_v20 = vpop.f32.mrf.mxu1 }
 0x12b   : > { %v1005_v30 = vadd.f32 %v1004_v20, %v915_v41 }
 0x12c   : > { %v1311_v22 = vadd.f32 %v1946_v16, %v1091_v19  ;;  %v1954_v16 = vunpack.c.h.bf16 %v2067_v3  ;;  %v2069_v3 = vld [vmem:[%s2411_s25 + $0x58] sm:$0xff]  }
 0x12e   : > { %v1343_v26 = vmax.f32 %v1311_v22, 0.0 }
 0x12f   : > { %v1113_v28 = vpop.f32.mrf.mxu3 }
 0x130   : > { %v2017_v27 = vpack.c.bf16 %v1343_v26, %v1342_v25  ;;  %v1114_v36 = vadd.f32 %v1113_v28, %v2466_v63 }
 0x131   : > { %v1093_v29 = vpop.f32.mrf.mxu2  ;;  %v917_v33 = vpop.f32.mrf.mxu0 }
 0x132   : > { %2080 = vst [vmem:[%s2429_s28 + $0x38] sm:$0xff] %v2017_v27   ;;  %v1006_v35 = vpop.f32.mrf.mxu1  ;;  %v1094_v38 = vadd.f32 %v1093_v29, %v1005_v30  ;;  %v1320_v47 = vadd.f32 %v1965_v37, %v1114_v36  ;;  %v2072_v36 = vld [vmem:[%s2411_s25 + $0x70] sm:$0xff]  }
 0x133   : > { %v1007_v43 = vadd.f32 %v1006_v35, %v917_v33 }
 0x134   : > { %v1312_v51 = vadd.f32 %v1949_v39, %v1094_v38  ;;  %v1352_v58 = vmax.f32 %v1320_v47, 0.0  ;;  %v2068_v38 = vld [vmem:[%s2411_s25 + $0x50] sm:$0xff]   ;;  %v1974_v47 = vunpack.c.h.bf16 %v2072_v36 }
 0x136   : > { %v1344_v24 = vmax.f32 %v1312_v51, 0.0 }
 0x137   : > { %v1115_v46 = vpop.f32.mrf.mxu3 }
 0x138   : > { %v1116_v49 = vadd.f32 %v1115_v46, %v1027_v40  ;;  %v1037_v46 = vadd.f32 %v2484_v56, %v2457_v23 }
 0x139   : > { %v1095_v48 = vpop.f32.mrf.mxu2  ;;  %v920_v53 = vpop.f32.mrf.mxu0 }
 0x13a   : > { %v1096_v52 = vadd.f32 %v1095_v48, %v1007_v43  ;;  %v1321_v63 = vadd.f32 %v1966_v42, %v1116_v49  ;;  %v1009_v54 = vpop.f32.mrf.mxu1  ;;  %v1973_v42 = vunpack.c.l.bf16 %v2072_v36  ;;  %v1958_v49 = vunpack.c.h.bf16 %v2068_v38 }
 0x13b   : > { %v1010_v0 = vadd.f32 %v1009_v54, %v920_v53 }
 0x13c   : > { %v1313_v57 = vadd.f32 %v1950_v44, %v1096_v52  ;;  %v1353_v59 = vmax.f32 %v1321_v63, 0.0  ;;  %v1957_v44 = vunpack.c.l.bf16 %v2068_v38 }
 0x13e   : > { %v1345_v10 = vmax.f32 %v1313_v57, 0.0  ;;  %v2042_v60 = vpack.c.bf16 %v1353_v59, %v1352_v58 }
 0x13f   : > { %v1118_v7 = vpop.f32.mrf.mxu3 }
 0x140   : > { %v2022_v61 = vpack.c.bf16 %v1345_v10, %v1344_v24  ;;  %2085 = vst [vmem:[%s2429_s28 + $0x60] sm:$0xff] %v2042_v60   ;;  %v1119_v8 = vadd.f32 %v1118_v7, %v2473_v21 }
 0x141   : > { %v1098_v62 = vpop.f32.mrf.mxu2  ;;  %v922_v2 = vpop.f32.mrf.mxu0 }
 0x142   : > { %2081 = vst [vmem:[%s2429_s28 + $0x40] sm:$0xff] %v2022_v61   ;;  %v1011_v5 = vpop.f32.mrf.mxu1  ;;  %v1099_v11 = vadd.f32 %v1098_v62, %v1010_v0  ;;  %v1322_v18 = vadd.f32 %v1969_v9, %v1119_v8 }
 0x143   : > { %v1012_v15 = vadd.f32 %v1011_v5, %v922_v2  ;;  %v2073_v2 = vld [vmem:[%s2411_s25 + $0x78] sm:$0xff]  }
 0x144   : > { %v1314_v20 = vadd.f32 %v1953_v12, %v1099_v11  ;;  %v1354_v28 = vmax.f32 %v1322_v18, 0.0  ;;  %v1977_v8 = vunpack.c.l.bf16 %v2073_v2 }
 0x146   : > { %v1346_v55 = vmax.f32 %v1314_v20, 0.0 }
 0x147   : > { %v1120_v17 = vpop.f32.mrf.mxu3 }
 0x148   : > { %v1121_v41 = vadd.f32 %v1120_v17, %v1032_v13  ;;  %v1961_v13 = vunpack.c.l.bf16 %v2069_v3  ;;  %v1962_v17 = vunpack.c.h.bf16 %v2069_v3 }
 0x149   : > { %v1100_v19 = vpop.f32.mrf.mxu2  ;;  %v925_v25 = vpop.f32.mrf.mxu0 }
 0x14a   : > { %v1101_v22 = vadd.f32 %v1100_v19, %v1012_v15  ;;  %v1323_v21 = vadd.f32 %v1970_v14, %v1121_v41  ;;  %v1014_v26 = vpop.f32.mrf.mxu1  ;;  %v1042_v14 = vadd.f32 %v2491_v6, %v2463_v50  ;;  %v1978_v15 = vunpack.c.h.bf16 %v2073_v2 }
 0x14b   : > { %v1015_v35 = vadd.f32 %v1014_v26, %v925_v25 }
 0x14c   : > { %v1315_v27 = vadd.f32 %v1954_v16, %v1101_v22  ;;  %v1355_v29 = vmax.f32 %v1323_v21, 0.0 }
 0x14e   : > { %v1347_v32 = vmax.f32 %v1315_v27, 0.0  ;;  %v2047_v30 = vpack.c.bf16 %v1355_v29, %v1354_v28 }
 0x14f   : > { %v1123_v33 = vpop.f32.mrf.mxu3 }
 0x150   : > { %v2027_v31 = vpack.c.bf16 %v1347_v32, %v1346_v55  ;;  %2086 = vst [vmem:[%s2429_s28 + $0x68] sm:$0xff] %v2047_v30   ;;  %v1124_v40 = vadd.f32 %v1123_v33, %v2480_v45 }
 0x151   : > { %v1103_v34 = vpop.f32.mrf.mxu2  ;;  %v927_v37 = vpop.f32.mrf.mxu0 }
 0x152   : > { %2082 = vst [vmem:[%s2429_s28 + $0x48] sm:$0xff] %v2027_v31   ;;  %v1016_v39 = vpop.f32.mrf.mxu1  ;;  %v1104_v43 = vadd.f32 %v1103_v34, %v1015_v35  ;;  %v1324_v52 = vadd.f32 %v1973_v42, %v1124_v40 }
 0x153   : > { %v1017_v48 = vadd.f32 %v1016_v39, %v927_v37 }
 0x154   : > { %v1316_v54 = vadd.f32 %v1957_v44, %v1104_v43  ;;  %v1356_v10 = vmax.f32 %v1324_v52, 0.0 }
 0x156   : > { %v1348_v23 = vmax.f32 %v1316_v54, 0.0 }
 0x157   : > { %v1125_v51 = vpop.f32.mrf.mxu3 }
 0x158   : > { %v1126_v63 = vadd.f32 %v1125_v51, %v1037_v46 }
 0x159   : > { %v1105_v53 = vpop.f32.mrf.mxu2  ;;  %v930_v45 = vpop.f32.mrf.mxu0 }
 0x15a   : > { %v1106_v57 = vadd.f32 %v1105_v53, %v1017_v48  ;;  %v1325_v58 = vadd.f32 %v1974_v47, %v1126_v63  ;;  %v1019_v59 = vpop.f32.mrf.mxu1 }
 0x15b   : > { %v1020_v1 = vadd.f32 %v1019_v59, %v930_v45 }
 0x15c   : > { %v1317_v24 = vadd.f32 %v1958_v49, %v1106_v57  ;;  %v1357_v60 = vmax.f32 %v1325_v58, 0.0 }
 0x15e   : > { %v1349_v56 = vmax.f32 %v1317_v24, 0.0  ;;  %v2052_v61 = vpack.c.bf16 %v1357_v60, %v1356_v10 }
 0x15f   : > { %v1128_v62 = vpop.f32.mrf.mxu3 }
 0x160   : > { %v2032_v7 = vpack.c.bf16 %v1349_v56, %v1348_v23  ;;  %2087 = vst [vmem:[%s2429_s28 + $0x70] sm:$0xff] %v2052_v61   ;;  %v1129_v5 = vadd.f32 %v1128_v62, %v2487_v4 }
 0x161   : > { %v1108_v0 = vpop.f32.mrf.mxu2  ;;  %v932_v9 = vpop.f32.mrf.mxu0 }
 0x162   : > { %2083 = vst [vmem:[%s2429_s28 + $0x50] sm:$0xff] %v2032_v7   ;;  %v1021_v11 = vpop.f32.mrf.mxu1  ;;  %v1109_v12 = vadd.f32 %v1108_v0, %v1020_v1  ;;  %v1326_v19 = vadd.f32 %v1977_v8, %v1129_v5 }
 0x163   : > { %v1022_v16 = vadd.f32 %v1021_v11, %v932_v9 }
 0x164   : > { %v1318_v22 = vadd.f32 %v1961_v13, %v1109_v12  ;;  %v1358_v26 = vmax.f32 %v1326_v19, 0.0 }
 0x166   : > { %v1350_v28 = vmax.f32 %v1318_v22, 0.0 }
 0x167   : > { %v1130_v18 = vpop.f32.mrf.mxu3 }
 0x168   : > { %v1131_v20 = vadd.f32 %v1130_v18, %v1042_v14 }
 0x169   : > { %v1110_v41 = vpop.f32.mrf.mxu2 }
 0x16a   : > { %v1111_v25 = vadd.f32 %v1110_v41, %v1022_v16  ;;  %v1327_v4 = vadd.f32 %v1978_v15, %v1131_v20 }
 0x16c   : > { %v1319_v21 = vadd.f32 %v1962_v17, %v1111_v25  ;;  %v1359_v27 = vmax.f32 %v1327_v4, 0.0 }
 0x16e   : > { %v1351_v29 = vmax.f32 %v1319_v21, 0.0  ;;  %v2057_v55 = vpack.c.bf16 %v1359_v27, %v1358_v26 }
 0x170   : > { %v2037_v32 = vpack.c.bf16 %v1351_v29, %v1350_v28  ;;  %2088 = vst [vmem:[%s2429_s28 + $0x78] sm:$0xff] %v2057_v55  }
 0x172   : > { %2084 = vst [vmem:[%s2429_s28 + $0x58] sm:$0xff] %v2037_v32  }
 0x173 PF: > { %s13_s14 = sadd.s32 1, %s2160_s14   ;;  %s2535_s12 = smov %s2156_s13 }
 0x174   : > { %p10_p5 = scmp.ge.s32.totalorder %s13_s14, 4   ;;  %s2536_s13 = smov %s2538_s15 }
 0x176   :  { %12 = sbr.rel (!%p10_p5) target bundleno = 2 (0x2), region = 76 }

// kernel: _lambda_.232
= control target key start
LH: loop header
LB: loop body
LE: loop exit
PB: predicated region body
PF: predicated region fallthrough
CT: control target
= control target key end

     0   :  { %s2047_s1 = inlined_call_operand.vmem [shape: bf16[384,128], index: 1, kind: input, shape index: {}]   ;;  %s2048_s0 = inlined_call_operand.vmem [shape: bf16[256,384], index: 0, kind: input, shape index: {}]   ;;  %s2049_s2 = inlined_call_operand.vmem [shape: bf16[256,128], index: 2, kind: output, shape index: {}]  }
   0x1   :  { %v1400_v0 = vld [vmem:[%s2047_s1 + $0x38] sm:$0xff]  ;;  %v1399_v3 = vld [vmem:[%s2047_s1 + $0x30] sm:$0xff]  ;;  %v1398_v6 = vld [vmem:[%s2047_s1 + $0x28] sm:$0xff] }
   0x2   :  { %v1557_v1 = vld [vmem:[%s2047_s1 + $0x78] sm:$0xff]  ;;  %591 = vmatpush.bf16.msra.mxu0 %v1400_v0  ;;  %1512 = vmatpush.bf16.msra.mxu3 %v1400_v0  ;;  %v1572_v4 = vld [vmem:[%s2047_s1 + $0x70] sm:$0xff]  ;;  %v1406_v7 = vld [vmem:[%s2047_s1 + $0x68] sm:$0xff] }
   0x3   :  { %v1562_v2 = vld [vmem:[%s2047_s1 + $0xb8] sm:$0xff]  ;;  %680 = vmatpush.bf16.msra.mxu1 %v1557_v1  ;;  %v1577_v5 = vld [vmem:[%s2047_s1 + $0xb0] sm:$0xff]  ;;  %v1590_v8 = vld [vmem:[%s2047_s1 + $0xa8] sm:$0xff] }
   0x4   :  { %769 = vmatpush.bf16.msra.mxu2 %v1562_v2  ;;  %v1397_v9 = vld [vmem:[%s2047_s1 + $0x20] sm:$0xff]  ;;  %v1396_v12 = vld [vmem:[%s2047_s1 + $0x18] sm:$0xff]  ;;  %v1395_v15 = vld [vmem:[%s2047_s1 + $0x10] sm:$0xff] }
   0x5   :  { %v1405_v10 = vld [vmem:[%s2047_s1 + $0x60] sm:$0xff]  ;;  %v1404_v13 = vld [vmem:[%s2047_s1 + $0x58] sm:$0xff]  ;;  %v1403_v16 = vld [vmem:[%s2047_s1 + $0x50] sm:$0xff] }
   0x6   :  { %592 = vmatpush.bf16.msra.mxu0 %v1399_v3  ;;  %1513 = vmatpush.bf16.msra.mxu3 %v1399_v3  ;;  %v1602_v11 = vld [vmem:[%s2047_s1 + $0xa0] sm:$0xff]  ;;  %v1614_v14 = vld [vmem:[%s2047_s1 + $0x98] sm:$0xff]  ;;  %v1626_v17 = vld [vmem:[%s2047_s1 + $0x90] sm:$0xff] }
   0x7   :  { %681 = vmatpush.bf16.msra.mxu1 %v1572_v4  ;;  %v1394_v18 = vld [vmem:[%s2047_s1 + $0x8] sm:$0xff]  ;;  %v1393_v21 = vld [vmem:[%s2047_s1] sm:$0xff]  ;;  %v1061_v29 = vld [vmem:[%s2048_s0 + $0xc] sm:$0xf0] }
   0x8   :  { %770 = vmatpush.bf16.msra.mxu2 %v1577_v5  ;;  %v1402_v19 = vld [vmem:[%s2047_s1 + $0x48] sm:$0xff]  ;;  %v1401_v22 = vld [vmem:[%s2047_s1 + $0x40] sm:$0xff]  ;;  %v1347_v31 = vld [vmem:[%s2048_s0 + $0x10] sm:$0xf0] }
   0x9   :  { %v1638_v20 = vld [vmem:[%s2047_s1 + $0x88] sm:$0xff]  ;;  %v1649_v23 = vld [vmem:[%s2047_s1 + $0x80] sm:$0xff]  ;;  %v1071_v36 = vld [vmem:[%s2048_s0 + $0x18] sm:$0xf] }
   0xa   :  { %593 = vmatpush.bf16.msra.mxu0 %v1398_v6  ;;  %1514 = vmatpush.bf16.msra.mxu3 %v1398_v6  ;;  %v1059_v24 = vld [vmem:[%s2048_s0] sm:$0xf]  ;;  %v1346_v25 = vld [vmem:[%s2048_s0 + $0x8] sm:$0xf0]  ;;  %v1345_v28 = vld [vmem:[%s2048_s0 + $0x4] sm:$0xf] }
   0xb   :  { %682 = vmatpush.bf16.msra.mxu1 %v1406_v7  ;;  %v1203_v26 = vld [vmem:[%s2048_s0 + $0x120] sm:$0xf]  ;;  %v1382_v27 = vld [vmem:[%s2048_s0 + $0x128] sm:$0xf0]  ;;  %v1067_v30 = vld [vmem:[%s2048_s0 + $0x8] sm:$0xf]  ;;  %v1060_v32 = vor.u32 %v1346_v25, %v1059_v24  ;;  %v1064_v34 = vor.u32 %v1345_v28, %v1061_v29 }
   0xc   :  { %771 = vmatpush.bf16.msra.mxu2 %v1590_v8  ;;  %v1204_v33 = vor.u32 %v1382_v27, %v1203_v26  ;;  %v1068_v35 = vor.u32 %v1347_v31, %v1067_v30  ;;  %v1349_v37 = vld [vmem:[%s2048_s0 + $0x20] sm:$0xf0]  ;;  %v1215_v38 = vld [vmem:[%s2048_s0 + $0x138] sm:$0xf]  ;;  %v1348_v40 = vld [vmem:[%s2048_s0 + $0x1c] sm:$0xf] }
   0xd   :  { %v1385_v39 = vld [vmem:[%s2048_s0 + $0x140] sm:$0xf0]  ;;  %v1073_v41 = vld [vmem:[%s2048_s0 + $0x24] sm:$0xf0]  ;;  %v1079_v42 = vld [vmem:[%s2048_s0 + $0x20] sm:$0xf]  ;;  %v1072_v44 = vor.u32 %v1349_v37, %v1071_v36 }
   0xe   :  { %594 = vmatpush.bf16.msra.mxu0 %v1397_v9  ;;  %1515 = vmatpush.bf16.msra.mxu3 %v1397_v9  ;;  %v1350_v43 = vld [vmem:[%s2048_s0 + $0x28] sm:$0xf0]  ;;  %v1216_v45 = vor.u32 %v1385_v39, %v1215_v38  ;;  %v1076_v46 = vor.u32 %v1348_v40, %v1073_v41  ;;  %v1083_v48 = vld [vmem:[%s2048_s0 + $0x30] sm:$0xf]  ;;  %v1352_v49 = vld [vmem:[%s2048_s0 + $0x38] sm:$0xf0] }
   0xf   :  { %683 = vmatpush.bf16.msra.mxu1 %v1405_v10  ;;  %v1080_v47 = vor.u32 %v1350_v43, %v1079_v42  ;;  %v1227_v50 = vld [vmem:[%s2048_s0 + $0x150] sm:$0xf]  ;;  %v1388_v51 = vld [vmem:[%s2048_s0 + $0x158] sm:$0xf0]  ;;  %v1351_v52 = vld [vmem:[%s2048_s0 + $0x34] sm:$0xf]  ;;  %v1084_v56 = vor.u32 %v1352_v49, %v1083_v48 }
  0x10   :  { %772 = vmatpush.bf16.msra.mxu2 %v1602_v11  ;;  %v1085_v53 = vld [vmem:[%s2048_s0 + $0x3c] sm:$0xf0]  ;;  %v1091_v54 = vld [vmem:[%s2048_s0 + $0x38] sm:$0xf]  ;;  %v1353_v55 = vld [vmem:[%s2048_s0 + $0x40] sm:$0xf0]  ;;  %v1228_v57 = vor.u32 %v1388_v51, %v1227_v50 }
  0x11   :  { %v1088_v58 = vor.u32 %v1351_v52, %v1085_v53  ;;  %v1092_v59 = vor.u32 %v1353_v55, %v1091_v54  ;;  %v1095_v60 = vld [vmem:[%s2048_s0 + $0x48] sm:$0xf]  ;;  %v1355_v61 = vld [vmem:[%s2048_s0 + $0x50] sm:$0xf0]  ;;  %v1354_v0 = vld [vmem:[%s2048_s0 + $0x4c] sm:$0xf] }
  0x12   :  { %595 = vmatpush.bf16.msra.mxu0 %v1396_v12  ;;  %1516 = vmatpush.bf16.msra.mxu3 %v1396_v12  ;;  %v1239_v62 = vld [vmem:[%s2048_s0 + $0x168] sm:$0xf]  ;;  %v1391_v63 = vld [vmem:[%s2048_s0 + $0x170] sm:$0xf0]  ;;  %v1356_v3 = vld [vmem:[%s2048_s0 + $0x58] sm:$0xf0] }
  0x13   :  { %684 = vmatpush.bf16.msra.mxu1 %v1404_v13  ;;  %v1358_v9 = vld [vmem:[%s2048_s0 + $0x68] sm:$0xf0]  ;;  %v1205_v12 = vld [vmem:[%s2048_s0 + $0x12c] sm:$0xf0]  ;;  %v1217_v24 = vld [vmem:[%s2048_s0 + $0x144] sm:$0xf0] }
  0x14   :  { %773 = vmatpush.bf16.msra.mxu2 %v1614_v14  ;;  %v1121_v25 = vld [vmem:[%s2048_s0 + $0x84] sm:$0xf0]  ;;  %v1127_v26 = vld [vmem:[%s2048_s0 + $0x80] sm:$0xf]  ;;  %v1362_v27 = vld [vmem:[%s2048_s0 + $0x88] sm:$0xf0] }
  0x15   :  { %v1128_v31 = vor.u32 %v1362_v27, %v1127_v26  ;;  %v1229_v36 = vld [vmem:[%s2048_s0 + $0x15c] sm:$0xf0]  ;;  %v1139_v38 = vld [vmem:[%s2048_s0 + $0x98] sm:$0xf]  ;;  %v1365_v39 = vld [vmem:[%s2048_s0 + $0xa0] sm:$0xf0] }
  0x16   :  { %596 = vmatpush.bf16.msra.mxu0 %v1395_v15  ;;  %1517 = vmatpush.bf16.msra.mxu3 %v1395_v15  ;;  %v1359_v15 = vld [vmem:[%s2048_s0 + $0x70] sm:$0xf0]  ;;  %v1133_v37 = vld [vmem:[%s2048_s0 + $0x9c] sm:$0xf0]  ;;  %v1140_v43 = vor.u32 %v1365_v39, %v1139_v38  ;;  %v1241_v48 = vld [vmem:[%s2048_s0 + $0x174] sm:$0xf0] }
  0x17   :  { %685 = vmatpush.bf16.msra.mxu1 %v1403_v16  ;;  %v1145_v49 = vld [vmem:[%s2048_s0 + $0xb4] sm:$0xf0]  ;;  %v1151_v50 = vld [vmem:[%s2048_s0 + $0xb0] sm:$0xf]  ;;  %v1368_v51 = vld [vmem:[%s2048_s0 + $0xb8] sm:$0xf0] }
  0x18   :  { %774 = vmatpush.bf16.msra.mxu2 %v1626_v17  ;;  %v1152_v55 = vor.u32 %v1368_v51, %v1151_v50  ;;  %v1179_v38 = vld [vmem:[%s2048_s0 + $0xf0] sm:$0xf]  ;;  %v1376_v39 = vld [vmem:[%s2048_s0 + $0xf8] sm:$0xf0] }
  0x19   :  { %v1180_v50 = vor.u32 %v1376_v39, %v1179_v38 }
  0x1a   :  { %597 = vmatpush.bf16.msra.mxu0 %v1394_v18  ;;  %1518 = vmatpush.bf16.msra.mxu3 %v1394_v18 }
  0x1b   :  { %686 = vmatpush.bf16.msra.mxu1 %v1402_v19 }
  0x1c   :  { %775 = vmatpush.bf16.msra.mxu2 %v1638_v20 }
  0x1e   :  { %598 = vmatpush.bf16.msra.mxu0 %v1393_v21  ;;  %1519 = vmatpush.bf16.msra.mxu3 %v1393_v21  ;;  %v1361_v21 = vld [vmem:[%s2048_s0 + $0x80] sm:$0xf0] }
  0x1f   :  { %687 = vmatpush.bf16.msra.mxu1 %v1401_v22 }
  0x20   :  { %776 = vmatpush.bf16.msra.mxu2 %v1649_v23 }
  0x21   :  { %599 = vmatmul.bf16.vlgmr.msra.gmra.mxu0 %v1060_v32  ;;  %659 = vmatmul.bf16.vlgmr.msra.gmra.mxu3 %v1204_v33  ;;  %v1131_v32 = vld [vmem:[%s2048_s0 + $0x90] sm:$0xf]  ;;  %v1364_v33 = vld [vmem:[%s2048_s0 + $0x98] sm:$0xf0] }
  0x22   :  { %1520 = vmatpush.bf16.msrb.mxu3 %v1557_v1  ;;  %688 = vmatmul.bf16.vlgmr.msra.gmra.mxu1 %v1064_v34  ;;  %v1097_v1 = vld [vmem:[%s2048_s0 + $0x54] sm:$0xf0]  ;;  %v1363_v34 = vld [vmem:[%s2048_s0 + $0x94] sm:$0xf]  ;;  %v1132_v40 = vor.u32 %v1364_v33, %v1131_v32 }
  0x23   :  { %777 = vmatmul.bf16.vlgmr.msra.gmra.mxu2 %v1068_v35  ;;  %v1100_v6 = vor.u32 %v1354_v0, %v1097_v1  ;;  %v1387_v35 = vld [vmem:[%s2048_s0 + $0x154] sm:$0xf]  ;;  %v1136_v42 = vor.u32 %v1363_v34, %v1133_v37 }
  0x24   :  { %v1232_v41 = vor.u32 %v1387_v35, %v1229_v36 }
  0x26   :  { %1521 = vmatpush.bf16.msrb.mxu3 %v1572_v4  ;;  %v1096_v4 = vor.u32 %v1355_v61, %v1095_v60  ;;  %v1383_v60 = vld [vmem:[%s2048_s0 + $0x130] sm:$0xf0]  ;;  %v1157_v61 = vld [vmem:[%s2048_s0 + $0xcc] sm:$0xf0] }
  0x2a   :  { %1522 = vmatpush.bf16.msrb.mxu3 %v1406_v7 }
  0x2e   :  { %1523 = vmatpush.bf16.msrb.mxu3 %v1405_v10  ;;  %v1357_v10 = vld [vmem:[%s2048_s0 + $0x64] sm:$0xf] }
  0x31   :  { %604 = vmatmul.bf16.gmra.mxu0 %v1072_v44  ;;  %664 = vmatmul.bf16.gmra.mxu3 %v1216_v45  ;;  %v1143_v44 = vld [vmem:[%s2048_s0 + $0xa8] sm:$0xf]  ;;  %v1367_v45 = vld [vmem:[%s2048_s0 + $0xb0] sm:$0xf0] }
  0x32   :  { %1524 = vmatpush.bf16.msrb.mxu3 %v1404_v13  ;;  %693 = vmatmul.bf16.gmra.mxu1 %v1076_v46  ;;  %v1109_v13 = vld [vmem:[%s2048_s0 + $0x6c] sm:$0xf0]  ;;  %v1366_v46 = vld [vmem:[%s2048_s0 + $0xac] sm:$0xf]  ;;  %v1144_v52 = vor.u32 %v1367_v45, %v1143_v44  ;;  %v1187_v44 = vld [vmem:[%s2048_s0 + $0xf8] sm:$0xf] }
  0x33   :  { %782 = vmatmul.bf16.gmra.mxu2 %v1080_v47  ;;  %v1112_v18 = vor.u32 %v1357_v10, %v1109_v13  ;;  %v1390_v47 = vld [vmem:[%s2048_s0 + $0x16c] sm:$0xf]  ;;  %v1148_v54 = vor.u32 %v1366_v46, %v1145_v49  ;;  %v1372_v13 = vld [vmem:[%s2048_s0 + $0xdc] sm:$0xf]  ;;  %v1377_v45 = vld [vmem:[%s2048_s0 + $0x100] sm:$0xf0] }
  0x34   :  { %v1244_v53 = vor.u32 %v1390_v47, %v1241_v48 }
  0x36   :  { %1525 = vmatpush.bf16.msrb.mxu3 %v1403_v16 }
  0x3a   :  { %1526 = vmatpush.bf16.msrb.mxu3 %v1402_v19 }
  0x3e   :  { %1527 = vmatpush.bf16.msrb.mxu3 %v1401_v22  ;;  %v1360_v22 = vld [vmem:[%s2048_s0 + $0x7c] sm:$0xf] }
  0x3f   :  { %v1124_v30 = vor.u32 %v1360_v22, %v1121_v25 }
  0x41   :  { %609 = vmatmul.bf16.gmra.mxu0 %v1084_v56  ;;  %669 = vmatmul.bf16.gmra.mxu3 %v1228_v57  ;;  %v1155_v56 = vld [vmem:[%s2048_s0 + $0xc0] sm:$0xf]  ;;  %v1370_v57 = vld [vmem:[%s2048_s0 + $0xc8] sm:$0xf0] }
  0x42   :  { %1528 = vmatpush.bf16.msra.mxu3 %v1562_v2  ;;  %698 = vmatmul.bf16.gmra.mxu1 %v1088_v58  ;;  %v1103_v2 = vld [vmem:[%s2048_s0 + $0x50] sm:$0xf]  ;;  %v1369_v58 = vld [vmem:[%s2048_s0 + $0xc4] sm:$0xf]  ;;  %v1156_v0 = vor.u32 %v1370_v57, %v1155_v56 }
  0x43   :  { %787 = vmatmul.bf16.gmra.mxu2 %v1092_v59  ;;  %v1104_v7 = vor.u32 %v1356_v3, %v1103_v2  ;;  %v1211_v59 = vld [vmem:[%s2048_s0 + $0x128] sm:$0xf]  ;;  %v1160_v3 = vor.u32 %v1369_v58, %v1157_v61 }
  0x44   :  { %v1212_v1 = vor.u32 %v1383_v60, %v1211_v59 }
  0x46   :  { %1529 = vmatpush.bf16.msra.mxu3 %v1577_v5  ;;  %v1240_v5 = vor.u32 %v1391_v63, %v1239_v62  ;;  %v1163_v62 = vld [vmem:[%s2048_s0 + $0xc8] sm:$0xf]  ;;  %v1371_v63 = vld [vmem:[%s2048_s0 + $0xd0] sm:$0xf0] }
  0x4a   :  { %1530 = vmatpush.bf16.msra.mxu3 %v1590_v8  ;;  %v1107_v8 = vld [vmem:[%s2048_s0 + $0x60] sm:$0xf] }
  0x4b   :  { %v1108_v16 = vor.u32 %v1358_v9, %v1107_v8 }
  0x4e   :  { %1531 = vmatpush.bf16.msra.mxu3 %v1602_v11  ;;  %v1381_v11 = vld [vmem:[%s2048_s0 + $0x124] sm:$0xf] }
  0x51   :  { %614 = vmatmul.bf16.gmra.mxu0 %v1096_v4  ;;  %674 = vmatmul.bf16.gmra.mxu3 %v1240_v5  ;;  %v1164_v4 = vor.u32 %v1371_v63, %v1163_v62 }
  0x52   :  { %1532 = vmatpush.bf16.msra.mxu3 %v1614_v14  ;;  %703 = vmatmul.bf16.gmra.mxu1 %v1100_v6  ;;  %v1115_v14 = vld [vmem:[%s2048_s0 + $0x68] sm:$0xf] }
  0x53   :  { %792 = vmatmul.bf16.gmra.mxu2 %v1104_v7  ;;  %v1116_v19 = vor.u32 %v1359_v15, %v1115_v14  ;;  %v1223_v14 = vld [vmem:[%s2048_s0 + $0x140] sm:$0xf]  ;;  %v1386_v15 = vld [vmem:[%s2048_s0 + $0x148] sm:$0xf0] }
  0x56   :  { %1533 = vmatpush.bf16.msra.mxu3 %v1626_v17  ;;  %v1208_v17 = vor.u32 %v1381_v11, %v1205_v12  ;;  %v1167_v11 = vld [vmem:[%s2048_s0 + $0xd8] sm:$0xf]  ;;  %v1373_v12 = vld [vmem:[%s2048_s0 + $0xe0] sm:$0xf0] }
  0x5a   :  { %1534 = vmatpush.bf16.msra.mxu3 %v1638_v20  ;;  %v1119_v20 = vld [vmem:[%s2048_s0 + $0x78] sm:$0xf] }
  0x5b   :  { %v1120_v28 = vor.u32 %v1361_v21, %v1119_v20 }
  0x5e   :  { %1535 = vmatpush.bf16.msra.mxu3 %v1649_v23  ;;  %v1384_v23 = vld [vmem:[%s2048_s0 + $0x13c] sm:$0xf] }
  0x5f   :  { %v1220_v29 = vor.u32 %v1384_v23, %v1217_v24  ;;  %v1168_v23 = vor.u32 %v1373_v12, %v1167_v11  ;;  %v1224_v24 = vor.u32 %v1386_v15, %v1223_v14 }
  0x61   :  { %619 = vmatmul.bf16.gmra.mxu0 %v1108_v16  ;;  %748 = vmatmul.bf16.vlgmr.msrb.gmra.mxu3 %v1208_v17  ;;  %v1169_v16 = vld [vmem:[%s2048_s0 + $0xe4] sm:$0xf0]  ;;  %v1175_v17 = vld [vmem:[%s2048_s0 + $0xe0] sm:$0xf] }
  0x62   :  { %708 = vmatmul.bf16.gmra.mxu1 %v1112_v18  ;;  %v1374_v18 = vld [vmem:[%s2048_s0 + $0xe8] sm:$0xf0]  ;;  %v1172_v27 = vor.u32 %v1372_v13, %v1169_v16 }
  0x63   :  { %797 = vmatmul.bf16.gmra.mxu2 %v1116_v19 }
  0x71   :  { %624 = vmatmul.bf16.gmra.mxu0 %v1120_v28  ;;  %753 = vmatmul.bf16.gmra.mxu3 %v1220_v29  ;;  %v1176_v28 = vor.u32 %v1374_v18, %v1175_v17 }
  0x72   :  { %713 = vmatmul.bf16.gmra.mxu1 %v1124_v30 }
  0x73   :  { %802 = vmatmul.bf16.gmra.mxu2 %v1128_v31 }
  0x81   :  { %629 = vmatmul.bf16.gmra.mxu0 %v1132_v40  ;;  %758 = vmatmul.bf16.gmra.mxu3 %v1232_v41  ;;  %v1375_v40 = vld [vmem:[%s2048_s0 + $0xf4] sm:$0xf]  ;;  %v1235_v41 = vld [vmem:[%s2048_s0 + $0x158] sm:$0xf] }
  0x82   :  { %718 = vmatmul.bf16.gmra.mxu1 %v1136_v42  ;;  %v1389_v42 = vld [vmem:[%s2048_s0 + $0x160] sm:$0xf0] }
  0x83   :  { %807 = vmatmul.bf16.gmra.mxu2 %v1140_v43  ;;  %v1181_v43 = vld [vmem:[%s2048_s0 + $0xfc] sm:$0xf0]  ;;  %v1236_v51 = vor.u32 %v1389_v42, %v1235_v41 }
  0x91   :  { %634 = vmatmul.bf16.gmra.mxu0 %v1144_v52  ;;  %763 = vmatmul.bf16.gmra.mxu3 %v1244_v53 }
  0x92   :  { %723 = vmatmul.bf16.gmra.mxu1 %v1148_v54  ;;  %v1184_v54 = vor.u32 %v1375_v40, %v1181_v43 }
  0x93   :  { %812 = vmatmul.bf16.gmra.mxu2 %v1152_v55  ;;  %v1188_v55 = vor.u32 %v1377_v45, %v1187_v44 }
  0x9e   :  { %v600_v2 = vpop.f32.mrf.mxu0 }
  0x9f   :  { %v689_v5 = vpop.f32.mrf.mxu1 }
  0xa0   :  { %v690_v10 = vadd.f32 %v689_v5, %v600_v2  ;;  %v1379_v2 = vld [vmem:[%s2048_s0 + $0x110] sm:$0xf0]  ;;  %v1392_v5 = vld [vmem:[%s2048_s0 + $0x178] sm:$0xf0] }
  0xa1   :  { %639 = vmatmul.bf16.gmra.mxu0 %v1156_v0  ;;  %837 = vmatmul.bf16.vlgmr.msra.gmra.mxu3 %v1212_v1  ;;  %v1191_v1 = vld [vmem:[%s2048_s0 + $0x108] sm:$0xf] }
  0xa2   :  { %728 = vmatmul.bf16.gmra.mxu1 %v1160_v3  ;;  %v1378_v3 = vld [vmem:[%s2048_s0 + $0x10c] sm:$0xf]  ;;  %v1192_v14 = vor.u32 %v1379_v2, %v1191_v1 }
  0xa3   :  { %817 = vmatmul.bf16.gmra.mxu2 %v1164_v4  ;;  %v1247_v4 = vld [vmem:[%s2048_s0 + $0x170] sm:$0xf] }
  0xa4   :  { %v1879_v6 = vpop.f32.mrf.mxu3  ;;  %v1248_v15 = vor.u32 %v1392_v5, %v1247_v4 }
  0xa6   :  { %v778_v7 = vpop.f32.mrf.mxu2  ;;  %v602_v8 = vpop.f32.mrf.mxu0 }
  0xa7   :  { %v691_v9 = vpop.f32.mrf.mxu1  ;;  %v779_v19 = vadd.f32 %v778_v7, %v690_v10  ;;  %v1193_v7 = vld [vmem:[%s2048_s0 + $0x114] sm:$0xf0] }
  0xa8   :  { %v692_v20 = vadd.f32 %v691_v9, %v602_v8  ;;  %v1199_v8 = vld [vmem:[%s2048_s0 + $0x110] sm:$0xf]  ;;  %v1380_v9 = vld [vmem:[%s2048_s0 + $0x118] sm:$0xf0]  ;;  %v1196_v18 = vor.u32 %v1378_v3, %v1193_v7 }
  0xa9   :  { %v957_v30 = vmax.f32 %v779_v19, 0.0  ;;  %v1200_v19 = vor.u32 %v1380_v9, %v1199_v8 }
  0xac   :  { %v1905_v21 = vpop.f32.mrf.mxu3 }
  0xae   :  { %v780_v22 = vpop.f32.mrf.mxu2  ;;  %v605_v26 = vpop.f32.mrf.mxu0 }
  0xaf   :  { %v781_v25 = vadd.f32 %v780_v22, %v692_v20  ;;  %v694_v29 = vpop.f32.mrf.mxu1 }
  0xb0   :  { %v695_v37 = vadd.f32 %v694_v29, %v605_v26 }
  0xb1   :  { %v958_v31 = vmax.f32 %v781_v25, 0.0  ;;  %644 = vmatmul.bf16.gmra.mxu0 %v1168_v23  ;;  %842 = vmatmul.bf16.gmra.mxu3 %v1224_v24 }
  0xb2   :  { %733 = vmatmul.bf16.gmra.mxu1 %v1172_v27 }
  0xb3   :  { %v1420_v32 = vpack.c.bf16 %v958_v31, %v957_v30  ;;  %822 = vmatmul.bf16.gmra.mxu2 %v1176_v28 }
  0xb4   :  { %v1910_v33 = vpop.f32.mrf.mxu3 }
  0xb5   :  { %1421 = vst [vmem:[%s2049_s2] sm:$0xff] %v1420_v32  }
  0xb6   :  { %v783_v34 = vpop.f32.mrf.mxu2  ;;  %v607_v35 = vpop.f32.mrf.mxu0 }
  0xb7   :  { %v696_v36 = vpop.f32.mrf.mxu1  ;;  %v784_v46 = vadd.f32 %v783_v34, %v695_v37 }
  0xb8   :  { %v697_v47 = vadd.f32 %v696_v36, %v607_v35 }
  0xb9   :  { %v959_v57 = vmax.f32 %v784_v46, 0.0 }
  0xbc   :  { %v1936_v48 = vpop.f32.mrf.mxu3 }
  0xbe   :  { %v785_v49 = vpop.f32.mrf.mxu2  ;;  %v610_v53 = vpop.f32.mrf.mxu0 }
  0xbf   :  { %v786_v52 = vadd.f32 %v785_v49, %v697_v47  ;;  %v699_v56 = vpop.f32.mrf.mxu1 }
  0xc0   :  { %v700_v0 = vadd.f32 %v699_v56, %v610_v53 }
  0xc1   :  { %v960_v58 = vmax.f32 %v786_v52, 0.0  ;;  %649 = vmatmul.bf16.gmra.mxu0 %v1180_v50  ;;  %847 = vmatmul.bf16.gmra.mxu3 %v1236_v51 }
  0xc2   :  { %738 = vmatmul.bf16.gmra.mxu1 %v1184_v54 }
  0xc3   :  { %v1425_v59 = vpack.c.bf16 %v960_v58, %v959_v57  ;;  %827 = vmatmul.bf16.gmra.mxu2 %v1188_v55 }
  0xc4   :  { %v1941_v60 = vpop.f32.mrf.mxu3 }
  0xc5   :  { %1497 = vst [vmem:[%s2049_s2 + $0x8] sm:$0xff] %v1425_v59  }
  0xc6   :  { %v788_v61 = vpop.f32.mrf.mxu2  ;;  %v612_v62 = vpop.f32.mrf.mxu0 }
  0xc7   :  { %v701_v63 = vpop.f32.mrf.mxu1  ;;  %v789_v10 = vadd.f32 %v788_v61, %v700_v0 }
  0xc8   :  { %v702_v11 = vadd.f32 %v701_v63, %v612_v62 }
  0xc9   :  { %v961_v22 = vmax.f32 %v789_v10, 0.0 }
  0xcc   :  { %v1967_v12 = vpop.f32.mrf.mxu3 }
  0xce   :  { %v790_v13 = vpop.f32.mrf.mxu2  ;;  %v615_v17 = vpop.f32.mrf.mxu0 }
  0xcf   :  { %v791_v16 = vadd.f32 %v790_v13, %v702_v11  ;;  %v704_v20 = vpop.f32.mrf.mxu1 }
  0xd0   :  { %v705_v29 = vadd.f32 %v704_v20, %v615_v17 }
  0xd1   :  { %v962_v23 = vmax.f32 %v791_v16, 0.0  ;;  %654 = vmatmul.bf16.gmra.mxu0 %v1192_v14  ;;  %852 = vmatmul.bf16.gmra.mxu3 %v1248_v15 }
  0xd2   :  { %743 = vmatmul.bf16.gmra.mxu1 %v1196_v18 }
  0xd3   :  { %v1430_v24 = vpack.c.bf16 %v962_v23, %v961_v22  ;;  %832 = vmatmul.bf16.gmra.mxu2 %v1200_v19 }
  0xd4   :  { %v1972_v25 = vpop.f32.mrf.mxu3 }
  0xd5   :  { %1498 = vst [vmem:[%s2049_s2 + $0x10] sm:$0xff] %v1430_v24  }
  0xd6   :  { %v793_v26 = vpop.f32.mrf.mxu2  ;;  %v617_v27 = vpop.f32.mrf.mxu0 }
  0xd7   :  { %v706_v28 = vpop.f32.mrf.mxu1  ;;  %v794_v30 = vadd.f32 %v793_v26, %v705_v29 }
  0xd8   :  { %v707_v31 = vadd.f32 %v706_v28, %v617_v27 }
  0xd9   :  { %v963_v38 = vmax.f32 %v794_v30, 0.0 }
  0xdc   :  { %v1974_v32 = vpop.f32.mrf.mxu3 }
  0xde   :  { %v795_v34 = vpop.f32.mrf.mxu2  ;;  %v620_v36 = vpop.f32.mrf.mxu0 }
  0xdf   :  { %v796_v35 = vadd.f32 %v795_v34, %v707_v31  ;;  %v709_v37 = vpop.f32.mrf.mxu1 }
  0xe0   :  { %v710_v46 = vadd.f32 %v709_v37, %v620_v36 }
  0xe1   :  { %v964_v39 = vmax.f32 %v796_v35, 0.0 }
  0xe3   :  { %v1435_v40 = vpack.c.bf16 %v964_v39, %v963_v38 }
  0xe4   :  { %v749_v41 = vpop.f32.mrf.mxu3 }
  0xe5   :  { %1499 = vst [vmem:[%s2049_s2 + $0x18] sm:$0xff] %v1435_v40   ;;  %v1980_v42 = vadd.f32 %v749_v41, %v1879_v6 }
  0xe6   :  { %v798_v43 = vpop.f32.mrf.mxu2  ;;  %v622_v44 = vpop.f32.mrf.mxu0 }
  0xe7   :  { %v711_v45 = vpop.f32.mrf.mxu1  ;;  %v799_v47 = vadd.f32 %v798_v43, %v710_v46 }
  0xe8   :  { %v712_v49 = vadd.f32 %v711_v45, %v622_v44 }
  0xe9   :  { %v965_v55 = vmax.f32 %v799_v47, 0.0 }
  0xec   :  { %v1982_v50 = vpop.f32.mrf.mxu3 }
  0xee   :  { %v800_v51 = vpop.f32.mrf.mxu2  ;;  %v625_v53 = vpop.f32.mrf.mxu0 }
  0xef   :  { %v801_v52 = vadd.f32 %v800_v51, %v712_v49  ;;  %v714_v54 = vpop.f32.mrf.mxu1 }
  0xf0   :  { %v715_v63 = vadd.f32 %v714_v54, %v625_v53  ;;  %v752_v53 = vadd.f32 %v1982_v50, %v1905_v21 }
  0xf1   :  { %v966_v56 = vmax.f32 %v801_v52, 0.0 }
  0xf3   :  { %v1440_v57 = vpack.c.bf16 %v966_v56, %v965_v55 }
  0xf4   :  { %v754_v6 = vpop.f32.mrf.mxu3 }
  0xf5   :  { %1500 = vst [vmem:[%s2049_s2 + $0x20] sm:$0xff] %v1440_v57   ;;  %v1988_v58 = vadd.f32 %v754_v6, %v1910_v33 }
  0xf6   :  { %v803_v59 = vpop.f32.mrf.mxu2  ;;  %v627_v61 = vpop.f32.mrf.mxu0 }
  0xf7   :  { %v716_v62 = vpop.f32.mrf.mxu1  ;;  %v804_v0 = vadd.f32 %v803_v59, %v715_v63 }
  0xf8   :  { %v717_v1 = vadd.f32 %v716_v62, %v627_v61 }
  0xf9   :  { %v967_v8 = vmax.f32 %v804_v0, 0.0 }
  0xfc   :  { %v1990_v2 = vpop.f32.mrf.mxu3 }
  0xfe   :  { %v805_v3 = vpop.f32.mrf.mxu2  ;;  %v630_v5 = vpop.f32.mrf.mxu0 }
  0xff   :  { %v806_v4 = vadd.f32 %v805_v3, %v717_v1  ;;  %v719_v7 = vpop.f32.mrf.mxu1 }
 0x100   :  { %v720_v16 = vadd.f32 %v719_v7, %v630_v5 }
 0x101   :  { %v968_v9 = vmax.f32 %v806_v4, 0.0 }
 0x103   :  { %v1445_v10 = vpack.c.bf16 %v968_v9, %v967_v8 }
 0x104   :  { %v759_v33 = vpop.f32.mrf.mxu3 }
 0x105   :  { %1501 = vst [vmem:[%s2049_s2 + $0x28] sm:$0xff] %v1445_v10   ;;  %v1996_v11 = vadd.f32 %v759_v33, %v1941_v60  ;;  %v757_v10 = vadd.f32 %v1990_v2, %v1936_v48 }
 0x106   :  { %v808_v13 = vpop.f32.mrf.mxu2  ;;  %v632_v14 = vpop.f32.mrf.mxu0 }
 0x107   :  { %v721_v15 = vpop.f32.mrf.mxu1  ;;  %v809_v17 = vadd.f32 %v808_v13, %v720_v16 }
 0x108   :  { %v722_v18 = vadd.f32 %v721_v15, %v632_v14 }
 0x109   :  { %v969_v26 = vmax.f32 %v809_v17, 0.0 }
 0x10c   :  { %v1998_v19 = vpop.f32.mrf.mxu3 }
 0x10e   :  { %v810_v20 = vpop.f32.mrf.mxu2  ;;  %v635_v23 = vpop.f32.mrf.mxu0 }
 0x10f   :  { %v811_v22 = vadd.f32 %v810_v20, %v722_v18  ;;  %v724_v24 = vpop.f32.mrf.mxu1 }
 0x110   :  { %v725_v35 = vadd.f32 %v724_v24, %v635_v23 }
 0x111   :  { %v970_v27 = vmax.f32 %v811_v22, 0.0 }
 0x113   :  { %v1450_v28 = vpack.c.bf16 %v970_v27, %v969_v26 }
 0x114   :  { %v764_v60 = vpop.f32.mrf.mxu3 }
 0x115   :  { %1502 = vst [vmem:[%s2049_s2 + $0x30] sm:$0xff] %v1450_v28   ;;  %v2004_v29 = vadd.f32 %v764_v60, %v1972_v25 }
 0x116   :  { %v813_v30 = vpop.f32.mrf.mxu2  ;;  %v637_v31 = vpop.f32.mrf.mxu0 }
 0x117   :  { %v726_v34 = vpop.f32.mrf.mxu1  ;;  %v814_v36 = vadd.f32 %v813_v30, %v725_v35 }
 0x118   :  { %v727_v37 = vadd.f32 %v726_v34, %v637_v31  ;;  %v762_v34 = vadd.f32 %v1998_v19, %v1967_v12 }
 0x119   :  { %v971_v44 = vmax.f32 %v814_v36, 0.0 }
 0x11c   :  { %v2006_v38 = vpop.f32.mrf.mxu3 }
 0x11e   :  { %v815_v39 = vpop.f32.mrf.mxu2  ;;  %v640_v41 = vpop.f32.mrf.mxu0 }
 0x11f   :  { %v816_v40 = vadd.f32 %v815_v39, %v727_v37  ;;  %v729_v43 = vpop.f32.mrf.mxu1 }
 0x120   :  { %v730_v52 = vadd.f32 %v729_v43, %v640_v41 }
 0x121   :  { %v972_v45 = vmax.f32 %v816_v40, 0.0 }
 0x123   :  { %v1455_v46 = vpack.c.bf16 %v972_v45, %v971_v44 }
 0x124   :  { %v838_v25 = vpop.f32.mrf.mxu3 }
 0x125   :  { %1503 = vst [vmem:[%s2049_s2 + $0x38] sm:$0xff] %v1455_v46   ;;  %v839_v54 = vadd.f32 %v838_v25, %v1980_v42 }
 0x126   :  { %v818_v47 = vpop.f32.mrf.mxu2  ;;  %v642_v49 = vpop.f32.mrf.mxu0 }
 0x127   :  { %v731_v51 = vpop.f32.mrf.mxu1  ;;  %v819_v55 = vadd.f32 %v818_v47, %v730_v52  ;;  %v981_v63 = vmax.f32 %v839_v54, 0.0 }
 0x128   :  { %v732_v56 = vadd.f32 %v731_v51, %v642_v49 }
 0x129   :  { %v973_v3 = vmax.f32 %v819_v55, 0.0  ;;  %v767_v55 = vadd.f32 %v2006_v38, %v1974_v32 }
 0x12c   :  { %v840_v57 = vpop.f32.mrf.mxu3 }
 0x12d   :  { %v841_v59 = vadd.f32 %v840_v57, %v752_v53 }
 0x12e   :  { %v820_v6 = vpop.f32.mrf.mxu2  ;;  %v645_v62 = vpop.f32.mrf.mxu0 }
 0x12f   :  { %v821_v61 = vadd.f32 %v820_v6, %v732_v56  ;;  %v982_v0 = vmax.f32 %v841_v59, 0.0  ;;  %v734_v1 = vpop.f32.mrf.mxu1 }
 0x130   :  { %v735_v9 = vadd.f32 %v734_v1, %v645_v62 }
 0x131   :  { %v974_v4 = vmax.f32 %v821_v61, 0.0  ;;  %v1480_v5 = vpack.c.bf16 %v982_v0, %v981_v63 }
 0x133   :  { %v1460_v7 = vpack.c.bf16 %v974_v4, %v973_v3  ;;  %1508 = vst [vmem:[%s2049_s2 + $0x60] sm:$0xff] %v1480_v5  }
 0x134   :  { %v843_v21 = vpop.f32.mrf.mxu3 }
 0x135   :  { %1504 = vst [vmem:[%s2049_s2 + $0x40] sm:$0xff] %v1460_v7   ;;  %v844_v33 = vadd.f32 %v843_v21, %v1988_v58 }
 0x136   :  { %v823_v42 = vpop.f32.mrf.mxu2  ;;  %v647_v50 = vpop.f32.mrf.mxu0 }
 0x137   :  { %v736_v8 = vpop.f32.mrf.mxu1  ;;  %v824_v13 = vadd.f32 %v823_v42, %v735_v9  ;;  %v983_v22 = vmax.f32 %v844_v33, 0.0 }
 0x138   :  { %v737_v14 = vadd.f32 %v736_v8, %v647_v50 }
 0x139   :  { %v975_v26 = vmax.f32 %v824_v13, 0.0 }
 0x13c   :  { %v845_v15 = vpop.f32.mrf.mxu3 }
 0x13d   :  { %v846_v17 = vadd.f32 %v845_v15, %v757_v10 }
 0x13e   :  { %v825_v16 = vpop.f32.mrf.mxu2  ;;  %v650_v20 = vpop.f32.mrf.mxu0 }
 0x13f   :  { %v826_v18 = vadd.f32 %v825_v16, %v737_v14  ;;  %v984_v23 = vmax.f32 %v846_v17, 0.0  ;;  %v739_v24 = vpop.f32.mrf.mxu1 }
 0x140   :  { %v740_v31 = vadd.f32 %v739_v24, %v650_v20 }
 0x141   :  { %v976_v27 = vmax.f32 %v826_v18, 0.0  ;;  %v1485_v28 = vpack.c.bf16 %v984_v23, %v983_v22 }
 0x143   :  { %v1465_v60 = vpack.c.bf16 %v976_v27, %v975_v26  ;;  %1509 = vst [vmem:[%s2049_s2 + $0x68] sm:$0xff] %v1485_v28  }
 0x144   :  { %v848_v48 = vpop.f32.mrf.mxu3 }
 0x145   :  { %1505 = vst [vmem:[%s2049_s2 + $0x48] sm:$0xff] %v1465_v60   ;;  %v849_v35 = vadd.f32 %v848_v48, %v1996_v11 }
 0x146   :  { %v828_v58 = vpop.f32.mrf.mxu2  ;;  %v652_v2 = vpop.f32.mrf.mxu0 }
 0x147   :  { %v741_v30 = vpop.f32.mrf.mxu1  ;;  %v829_v36 = vadd.f32 %v828_v58, %v740_v31  ;;  %v985_v44 = vmax.f32 %v849_v35, 0.0 }
 0x148   :  { %v742_v37 = vadd.f32 %v741_v30, %v652_v2 }
 0x149   :  { %v977_v47 = vmax.f32 %v829_v36, 0.0 }
 0x14c   :  { %v850_v39 = vpop.f32.mrf.mxu3 }
 0x14d   :  { %v851_v41 = vadd.f32 %v850_v39, %v762_v34 }
 0x14e   :  { %v830_v40 = vpop.f32.mrf.mxu2  ;;  %v655_v46 = vpop.f32.mrf.mxu0 }
 0x14f   :  { %v831_v43 = vadd.f32 %v830_v40, %v742_v37  ;;  %v986_v45 = vmax.f32 %v851_v41, 0.0  ;;  %v744_v25 = vpop.f32.mrf.mxu1 }
 0x150   :  { %v745_v19 = vadd.f32 %v744_v25, %v655_v46 }
 0x151   :  { %v978_v49 = vmax.f32 %v831_v43, 0.0  ;;  %v1490_v51 = vpack.c.bf16 %v986_v45, %v985_v44 }
 0x153   :  { %v1470_v52 = vpack.c.bf16 %v978_v49, %v977_v47  ;;  %1510 = vst [vmem:[%s2049_s2 + $0x70] sm:$0xff] %v1490_v51  }
 0x154   :  { %v853_v12 = vpop.f32.mrf.mxu3 }
 0x155   :  { %1506 = vst [vmem:[%s2049_s2 + $0x50] sm:$0xff] %v1470_v52   ;;  %v854_v56 = vadd.f32 %v853_v12, %v2004_v29 }
 0x156   :  { %v833_v11 = vpop.f32.mrf.mxu2  ;;  %v657_v53 = vpop.f32.mrf.mxu0 }
 0x157   :  { %v746_v54 = vpop.f32.mrf.mxu1  ;;  %v834_v57 = vadd.f32 %v833_v11, %v745_v19  ;;  %v987_v0 = vmax.f32 %v854_v56, 0.0 }
 0x158   :  { %v747_v6 = vadd.f32 %v746_v54, %v657_v53 }
 0x159   :  { %v979_v3 = vmax.f32 %v834_v57, 0.0 }
 0x15c   :  { %v855_v59 = vpop.f32.mrf.mxu3 }
 0x15d   :  { %v856_v62 = vadd.f32 %v855_v59, %v767_v55 }
 0x15e   :  { %v835_v61 = vpop.f32.mrf.mxu2 }
 0x15f   :  { %v836_v63 = vadd.f32 %v835_v61, %v747_v6  ;;  %v988_v1 = vmax.f32 %v856_v62, 0.0 }
 0x161   :  { %v980_v4 = vmax.f32 %v836_v63, 0.0  ;;  %v1495_v5 = vpack.c.bf16 %v988_v1, %v987_v0 }
 0x163   :  { %v1475_v7 = vpack.c.bf16 %v980_v4, %v979_v3  ;;  %1511 = vst [vmem:[%s2049_s2 + $0x78] sm:$0xff] %v1495_v5  }
 0x165   :  { %1507 = vst [vmem:[%s2049_s2 + $0x58] sm:$0xff] %v1475_v7  }

// kernel: _lambda_.233
= control target key start
LH: loop header
LB: loop body
LE: loop exit
PB: predicated region body
PF: predicated region fallthrough
CT: control target
= control target key end

     0   :  { %s901_s1 = inlined_call_operand.vmem [shape: bf16[128,128], index: 1, kind: input, shape index: {}]   ;;  %s902_s0 = inlined_call_operand.vmem [shape: bf16[256,128], index: 0, kind: input, shape index: {}]   ;;  %s903_s2 = inlined_call_operand.vmem [shape: bf16[256,128], index: 2, kind: output, shape index: {}]  }
   0x1   :  { %v646_v0 = vld [vmem:[%s901_s1 + $0x38] sm:$0xff]  ;;  %v645_v1 = vld [vmem:[%s901_s1 + $0x30] sm:$0xff]  ;;  %v644_v2 = vld [vmem:[%s901_s1 + $0x28] sm:$0xff] }
   0x2   :  { %271 = vmatpush.bf16.msra.mxu0 %v646_v0  ;;  %742 = vmatpush.bf16.msra.mxu1 %v646_v0  ;;  %v643_v3 = vld [vmem:[%s901_s1 + $0x20] sm:$0xff]  ;;  %v642_v4 = vld [vmem:[%s901_s1 + $0x18] sm:$0xff]  ;;  %v641_v5 = vld [vmem:[%s901_s1 + $0x10] sm:$0xff] }
   0x3   :  { %743 = vmatpush.bf16.msra.mxu2 %v646_v0  ;;  %744 = vmatpush.bf16.msra.mxu3 %v646_v0  ;;  %v640_v6 = vld [vmem:[%s901_s1 + $0x8] sm:$0xff]  ;;  %v639_v7 = vld [vmem:[%s901_s1] sm:$0xff]  ;;  %v625_v16 = vld [vmem:[%s902_s0 + $0x10] sm:$0xff] }
   0x4   :  { %v623_v8 = vld [vmem:[%s902_s0] sm:$0xff]  ;;  %v624_v12 = vld [vmem:[%s902_s0 + $0x8] sm:$0xff]  ;;  %v629_v17 = vld [vmem:[%s902_s0 + $0x30] sm:$0xff] }
   0x5   :  { %v627_v9 = vld [vmem:[%s902_s0 + $0x20] sm:$0xff]  ;;  %v628_v13 = vld [vmem:[%s902_s0 + $0x28] sm:$0xff]  ;;  %v633_v18 = vld [vmem:[%s902_s0 + $0x50] sm:$0xff] }
   0x6   :  { %272 = vmatpush.bf16.msra.mxu0 %v645_v1  ;;  %745 = vmatpush.bf16.msra.mxu1 %v645_v1  ;;  %v631_v10 = vld [vmem:[%s902_s0 + $0x40] sm:$0xff]  ;;  %v632_v14 = vld [vmem:[%s902_s0 + $0x48] sm:$0xff]  ;;  %v637_v19 = vld [vmem:[%s902_s0 + $0x70] sm:$0xff] }
   0x7   :  { %746 = vmatpush.bf16.msra.mxu2 %v645_v1  ;;  %747 = vmatpush.bf16.msra.mxu3 %v645_v1  ;;  %v635_v11 = vld [vmem:[%s902_s0 + $0x60] sm:$0xff]  ;;  %v636_v15 = vld [vmem:[%s902_s0 + $0x68] sm:$0xff]  ;;  %v626_v20 = vld [vmem:[%s902_s0 + $0x18] sm:$0xff] }
   0x8   :  { %v630_v21 = vld [vmem:[%s902_s0 + $0x38] sm:$0xff] }
   0x9   :  { %v634_v22 = vld [vmem:[%s902_s0 + $0x58] sm:$0xff] }
   0xa   :  { %273 = vmatpush.bf16.msra.mxu0 %v644_v2  ;;  %748 = vmatpush.bf16.msra.mxu1 %v644_v2  ;;  %v638_v23 = vld [vmem:[%s902_s0 + $0x78] sm:$0xff] }
   0xb   :  { %749 = vmatpush.bf16.msra.mxu2 %v644_v2  ;;  %750 = vmatpush.bf16.msra.mxu3 %v644_v2 }
   0xe   :  { %274 = vmatpush.bf16.msra.mxu0 %v643_v3  ;;  %751 = vmatpush.bf16.msra.mxu1 %v643_v3 }
   0xf   :  { %752 = vmatpush.bf16.msra.mxu2 %v643_v3  ;;  %753 = vmatpush.bf16.msra.mxu3 %v643_v3 }
  0x12   :  { %275 = vmatpush.bf16.msra.mxu0 %v642_v4  ;;  %754 = vmatpush.bf16.msra.mxu1 %v642_v4 }
  0x13   :  { %755 = vmatpush.bf16.msra.mxu2 %v642_v4  ;;  %756 = vmatpush.bf16.msra.mxu3 %v642_v4 }
  0x16   :  { %276 = vmatpush.bf16.msra.mxu0 %v641_v5  ;;  %757 = vmatpush.bf16.msra.mxu1 %v641_v5 }
  0x17   :  { %758 = vmatpush.bf16.msra.mxu2 %v641_v5  ;;  %759 = vmatpush.bf16.msra.mxu3 %v641_v5 }
  0x1a   :  { %277 = vmatpush.bf16.msra.mxu0 %v640_v6  ;;  %760 = vmatpush.bf16.msra.mxu1 %v640_v6 }
  0x1b   :  { %761 = vmatpush.bf16.msra.mxu2 %v640_v6  ;;  %762 = vmatpush.bf16.msra.mxu3 %v640_v6 }
  0x1e   :  { %278 = vmatpush.bf16.msra.mxu0 %v639_v7  ;;  %763 = vmatpush.bf16.msra.mxu1 %v639_v7 }
  0x1f   :  { %764 = vmatpush.bf16.msra.mxu2 %v639_v7  ;;  %765 = vmatpush.bf16.msra.mxu3 %v639_v7 }
  0x21   :  { %279 = vmatmul.bf16.vlgmr.msra.gmra.mxu0 %v623_v8  ;;  %299 = vmatmul.bf16.vlgmr.msra.gmra.mxu1 %v627_v9 }
  0x22   :  { %319 = vmatmul.bf16.vlgmr.msra.gmra.mxu2 %v631_v10  ;;  %339 = vmatmul.bf16.vlgmr.msra.gmra.mxu3 %v635_v11 }
  0x31   :  { %284 = vmatmul.bf16.gmra.mxu0 %v624_v12  ;;  %304 = vmatmul.bf16.gmra.mxu1 %v628_v13 }
  0x32   :  { %324 = vmatmul.bf16.gmra.mxu2 %v632_v14  ;;  %344 = vmatmul.bf16.gmra.mxu3 %v636_v15 }
  0x41   :  { %289 = vmatmul.bf16.gmra.mxu0 %v625_v16  ;;  %309 = vmatmul.bf16.gmra.mxu1 %v629_v17 }
  0x42   :  { %329 = vmatmul.bf16.gmra.mxu2 %v633_v18  ;;  %349 = vmatmul.bf16.gmra.mxu3 %v637_v19 }
  0x51   :  { %294 = vmatmul.bf16.gmra.mxu0 %v626_v20  ;;  %314 = vmatmul.bf16.gmra.mxu1 %v630_v21 }
  0x52   :  { %334 = vmatmul.bf16.gmra.mxu2 %v634_v22  ;;  %354 = vmatmul.bf16.gmra.mxu3 %v638_v23 }
  0x9e   :  { %v280_v24 = vpop.f32.mrf.mxu0  ;;  %v300_v25 = vpop.f32.mrf.mxu1 }
  0xa5   :  { %v320_v26 = vpop.f32.mrf.mxu2  ;;  %v340_v27 = vpop.f32.mrf.mxu3 }
  0xa6   :  { %v282_v28 = vpop.f32.mrf.mxu0  ;;  %v302_v29 = vpop.f32.mrf.mxu1 }
  0xa7   :  { %v650_v30 = vpack.c.bf16 %v282_v28, %v280_v24  ;;  %v670_v31 = vpack.c.bf16 %v302_v29, %v300_v25 }
  0xa9   :  { %651 = vst [vmem:[%s903_s2] sm:$0xff] %v650_v30  }
  0xaa   :  { %730 = vst [vmem:[%s903_s2 + $0x20] sm:$0xff] %v670_v31  }
  0xad   :  { %v322_v32 = vpop.f32.mrf.mxu2  ;;  %v342_v33 = vpop.f32.mrf.mxu3 }
  0xae   :  { %v690_v34 = vpack.c.bf16 %v322_v32, %v320_v26  ;;  %v710_v35 = vpack.c.bf16 %v342_v33, %v340_v27  ;;  %v285_v36 = vpop.f32.mrf.mxu0  ;;  %v305_v37 = vpop.f32.mrf.mxu1 }
  0xb0   :  { %734 = vst [vmem:[%s903_s2 + $0x40] sm:$0xff] %v690_v34  }
  0xb1   :  { %738 = vst [vmem:[%s903_s2 + $0x60] sm:$0xff] %v710_v35  }
  0xb5   :  { %v325_v38 = vpop.f32.mrf.mxu2  ;;  %v345_v39 = vpop.f32.mrf.mxu3 }
  0xb6   :  { %v287_v40 = vpop.f32.mrf.mxu0  ;;  %v307_v41 = vpop.f32.mrf.mxu1 }
  0xb7   :  { %v655_v42 = vpack.c.bf16 %v287_v40, %v285_v36  ;;  %v675_v43 = vpack.c.bf16 %v307_v41, %v305_v37 }
  0xb9   :  { %727 = vst [vmem:[%s903_s2 + $0x8] sm:$0xff] %v655_v42  }
  0xba   :  { %731 = vst [vmem:[%s903_s2 + $0x28] sm:$0xff] %v675_v43  }
  0xbd   :  { %v327_v44 = vpop.f32.mrf.mxu2  ;;  %v347_v45 = vpop.f32.mrf.mxu3 }
  0xbe   :  { %v695_v46 = vpack.c.bf16 %v327_v44, %v325_v38  ;;  %v715_v47 = vpack.c.bf16 %v347_v45, %v345_v39  ;;  %v290_v48 = vpop.f32.mrf.mxu0  ;;  %v310_v49 = vpop.f32.mrf.mxu1 }
  0xc0   :  { %735 = vst [vmem:[%s903_s2 + $0x48] sm:$0xff] %v695_v46  }
  0xc1   :  { %739 = vst [vmem:[%s903_s2 + $0x68] sm:$0xff] %v715_v47  }
  0xc5   :  { %v330_v50 = vpop.f32.mrf.mxu2  ;;  %v350_v51 = vpop.f32.mrf.mxu3 }
  0xc6   :  { %v292_v52 = vpop.f32.mrf.mxu0  ;;  %v312_v53 = vpop.f32.mrf.mxu1 }
  0xc7   :  { %v660_v54 = vpack.c.bf16 %v292_v52, %v290_v48  ;;  %v680_v55 = vpack.c.bf16 %v312_v53, %v310_v49 }
  0xc9   :  { %728 = vst [vmem:[%s903_s2 + $0x10] sm:$0xff] %v660_v54  }
  0xca   :  { %732 = vst [vmem:[%s903_s2 + $0x30] sm:$0xff] %v680_v55  }
  0xcd   :  { %v332_v56 = vpop.f32.mrf.mxu2  ;;  %v352_v57 = vpop.f32.mrf.mxu3 }
  0xce   :  { %v700_v58 = vpack.c.bf16 %v332_v56, %v330_v50  ;;  %v720_v59 = vpack.c.bf16 %v352_v57, %v350_v51  ;;  %v295_v60 = vpop.f32.mrf.mxu0  ;;  %v315_v61 = vpop.f32.mrf.mxu1 }
  0xd0   :  { %736 = vst [vmem:[%s903_s2 + $0x50] sm:$0xff] %v700_v58  }
  0xd1   :  { %740 = vst [vmem:[%s903_s2 + $0x70] sm:$0xff] %v720_v59  }
  0xd5   :  { %v335_v62 = vpop.f32.mrf.mxu2  ;;  %v355_v63 = vpop.f32.mrf.mxu3 }
  0xd6   :  { %v297_v0 = vpop.f32.mrf.mxu0  ;;  %v317_v1 = vpop.f32.mrf.mxu1 }
  0xd7   :  { %v665_v2 = vpack.c.bf16 %v297_v0, %v295_v60  ;;  %v685_v3 = vpack.c.bf16 %v317_v1, %v315_v61 }
  0xd9   :  { %729 = vst [vmem:[%s903_s2 + $0x18] sm:$0xff] %v665_v2  }
  0xda   :  { %733 = vst [vmem:[%s903_s2 + $0x38] sm:$0xff] %v685_v3  }
  0xdd   :  { %v337_v4 = vpop.f32.mrf.mxu2  ;;  %v357_v5 = vpop.f32.mrf.mxu3 }
  0xde   :  { %v705_v6 = vpack.c.bf16 %v337_v4, %v335_v62  ;;  %v725_v7 = vpack.c.bf16 %v357_v5, %v355_v63 }
  0xe0   :  { %737 = vst [vmem:[%s903_s2 + $0x58] sm:$0xff] %v705_v6  }
  0xe1   :  { %741 = vst [vmem:[%s903_s2 + $0x78] sm:$0xff] %v725_v7  }

// kernel: _lambda_.234
= control target key start
LH: loop header
LB: loop body
LE: loop exit
PB: predicated region body
PF: predicated region fallthrough
CT: control target
= control target key end

     0   :  { %s2278_s1 = inlined_call_operand.vmem [shape: bf16[384,128], index: 1, kind: input, shape index: {}]   ;;  %s2279_s0 = inlined_call_operand.vmem [shape: bf16[256,384], index: 0, kind: input, shape index: {}]   ;;  %s2280_s2 = inlined_call_operand.vmem [shape: bf16[256,128], index: 2, kind: input, shape index: {}]   ;;  %s2281_s3 = inlined_call_operand.vmem [shape: bf16[256,128], index: 3, kind: output, shape index: {}]  }
   0x1   :  { %v1499_v0 = vld [vmem:[%s2278_s1 + $0x38] sm:$0xff]  ;;  %v1498_v3 = vld [vmem:[%s2278_s1 + $0x30] sm:$0xff]  ;;  %v1497_v6 = vld [vmem:[%s2278_s1 + $0x28] sm:$0xff] }
   0x2   :  { %v1740_v1 = vld [vmem:[%s2278_s1 + $0x78] sm:$0xff]  ;;  %594 = vmatpush.bf16.msra.mxu0 %v1499_v0  ;;  %1690 = vmatpush.bf16.msra.mxu3 %v1499_v0  ;;  %v1755_v4 = vld [vmem:[%s2278_s1 + $0x70] sm:$0xff]  ;;  %v1505_v7 = vld [vmem:[%s2278_s1 + $0x68] sm:$0xff] }
   0x3   :  { %v1745_v2 = vld [vmem:[%s2278_s1 + $0xb8] sm:$0xff]  ;;  %683 = vmatpush.bf16.msra.mxu1 %v1740_v1  ;;  %v1760_v5 = vld [vmem:[%s2278_s1 + $0xb0] sm:$0xff]  ;;  %v1773_v8 = vld [vmem:[%s2278_s1 + $0xa8] sm:$0xff] }
   0x4   :  { %772 = vmatpush.bf16.msra.mxu2 %v1745_v2  ;;  %v1496_v9 = vld [vmem:[%s2278_s1 + $0x20] sm:$0xff]  ;;  %v1495_v12 = vld [vmem:[%s2278_s1 + $0x18] sm:$0xff]  ;;  %v1494_v15 = vld [vmem:[%s2278_s1 + $0x10] sm:$0xff] }
   0x5   :  { %v1504_v10 = vld [vmem:[%s2278_s1 + $0x60] sm:$0xff]  ;;  %v1503_v13 = vld [vmem:[%s2278_s1 + $0x58] sm:$0xff]  ;;  %v1502_v16 = vld [vmem:[%s2278_s1 + $0x50] sm:$0xff] }
   0x6   :  { %595 = vmatpush.bf16.msra.mxu0 %v1498_v3  ;;  %1691 = vmatpush.bf16.msra.mxu3 %v1498_v3  ;;  %v1785_v11 = vld [vmem:[%s2278_s1 + $0xa0] sm:$0xff]  ;;  %v1797_v14 = vld [vmem:[%s2278_s1 + $0x98] sm:$0xff]  ;;  %v1809_v17 = vld [vmem:[%s2278_s1 + $0x90] sm:$0xff] }
   0x7   :  { %684 = vmatpush.bf16.msra.mxu1 %v1755_v4  ;;  %v1493_v18 = vld [vmem:[%s2278_s1 + $0x8] sm:$0xff]  ;;  %v1492_v21 = vld [vmem:[%s2278_s1] sm:$0xff]  ;;  %v1160_v29 = vld [vmem:[%s2279_s0 + $0xc] sm:$0xf0] }
   0x8   :  { %773 = vmatpush.bf16.msra.mxu2 %v1760_v5  ;;  %v1501_v19 = vld [vmem:[%s2278_s1 + $0x48] sm:$0xff]  ;;  %v1500_v22 = vld [vmem:[%s2278_s1 + $0x40] sm:$0xff]  ;;  %v1446_v31 = vld [vmem:[%s2279_s0 + $0x10] sm:$0xf0] }
   0x9   :  { %v1821_v20 = vld [vmem:[%s2278_s1 + $0x88] sm:$0xff]  ;;  %v1832_v23 = vld [vmem:[%s2278_s1 + $0x80] sm:$0xff]  ;;  %v1170_v36 = vld [vmem:[%s2279_s0 + $0x18] sm:$0xf] }
   0xa   :  { %596 = vmatpush.bf16.msra.mxu0 %v1497_v6  ;;  %1692 = vmatpush.bf16.msra.mxu3 %v1497_v6  ;;  %v1158_v24 = vld [vmem:[%s2279_s0] sm:$0xf]  ;;  %v1445_v25 = vld [vmem:[%s2279_s0 + $0x8] sm:$0xf0]  ;;  %v1444_v28 = vld [vmem:[%s2279_s0 + $0x4] sm:$0xf] }
   0xb   :  { %685 = vmatpush.bf16.msra.mxu1 %v1505_v7  ;;  %v1302_v26 = vld [vmem:[%s2279_s0 + $0x120] sm:$0xf]  ;;  %v1481_v27 = vld [vmem:[%s2279_s0 + $0x128] sm:$0xf0]  ;;  %v1166_v30 = vld [vmem:[%s2279_s0 + $0x8] sm:$0xf]  ;;  %v1159_v32 = vor.u32 %v1445_v25, %v1158_v24  ;;  %v1163_v34 = vor.u32 %v1444_v28, %v1160_v29 }
   0xc   :  { %774 = vmatpush.bf16.msra.mxu2 %v1773_v8  ;;  %v1303_v33 = vor.u32 %v1481_v27, %v1302_v26  ;;  %v1167_v35 = vor.u32 %v1446_v31, %v1166_v30  ;;  %v1448_v37 = vld [vmem:[%s2279_s0 + $0x20] sm:$0xf0]  ;;  %v1314_v38 = vld [vmem:[%s2279_s0 + $0x138] sm:$0xf]  ;;  %v1447_v40 = vld [vmem:[%s2279_s0 + $0x1c] sm:$0xf] }
   0xd   :  { %v1484_v39 = vld [vmem:[%s2279_s0 + $0x140] sm:$0xf0]  ;;  %v1172_v41 = vld [vmem:[%s2279_s0 + $0x24] sm:$0xf0]  ;;  %v1178_v42 = vld [vmem:[%s2279_s0 + $0x20] sm:$0xf]  ;;  %v1171_v44 = vor.u32 %v1448_v37, %v1170_v36 }
   0xe   :  { %597 = vmatpush.bf16.msra.mxu0 %v1496_v9  ;;  %1693 = vmatpush.bf16.msra.mxu3 %v1496_v9  ;;  %v1449_v43 = vld [vmem:[%s2279_s0 + $0x28] sm:$0xf0]  ;;  %v1315_v45 = vor.u32 %v1484_v39, %v1314_v38  ;;  %v1175_v46 = vor.u32 %v1447_v40, %v1172_v41  ;;  %v1182_v48 = vld [vmem:[%s2279_s0 + $0x30] sm:$0xf]  ;;  %v1451_v49 = vld [vmem:[%s2279_s0 + $0x38] sm:$0xf0] }
   0xf   :  { %686 = vmatpush.bf16.msra.mxu1 %v1504_v10  ;;  %v1179_v47 = vor.u32 %v1449_v43, %v1178_v42  ;;  %v1326_v50 = vld [vmem:[%s2279_s0 + $0x150] sm:$0xf]  ;;  %v1487_v51 = vld [vmem:[%s2279_s0 + $0x158] sm:$0xf0]  ;;  %v1450_v52 = vld [vmem:[%s2279_s0 + $0x34] sm:$0xf]  ;;  %v1183_v56 = vor.u32 %v1451_v49, %v1182_v48 }
  0x10   :  { %775 = vmatpush.bf16.msra.mxu2 %v1785_v11  ;;  %v1184_v53 = vld [vmem:[%s2279_s0 + $0x3c] sm:$0xf0]  ;;  %v1190_v54 = vld [vmem:[%s2279_s0 + $0x38] sm:$0xf]  ;;  %v1452_v55 = vld [vmem:[%s2279_s0 + $0x40] sm:$0xf0]  ;;  %v1327_v57 = vor.u32 %v1487_v51, %v1326_v50 }
  0x11   :  { %v1187_v58 = vor.u32 %v1450_v52, %v1184_v53  ;;  %v1191_v59 = vor.u32 %v1452_v55, %v1190_v54  ;;  %v1194_v60 = vld [vmem:[%s2279_s0 + $0x48] sm:$0xf]  ;;  %v1454_v61 = vld [vmem:[%s2279_s0 + $0x50] sm:$0xf0]  ;;  %v1453_v0 = vld [vmem:[%s2279_s0 + $0x4c] sm:$0xf] }
  0x12   :  { %598 = vmatpush.bf16.msra.mxu0 %v1495_v12  ;;  %1694 = vmatpush.bf16.msra.mxu3 %v1495_v12  ;;  %v1338_v62 = vld [vmem:[%s2279_s0 + $0x168] sm:$0xf]  ;;  %v1490_v63 = vld [vmem:[%s2279_s0 + $0x170] sm:$0xf0]  ;;  %v1455_v3 = vld [vmem:[%s2279_s0 + $0x58] sm:$0xf0] }
  0x13   :  { %687 = vmatpush.bf16.msra.mxu1 %v1503_v13  ;;  %v1457_v9 = vld [vmem:[%s2279_s0 + $0x68] sm:$0xf0]  ;;  %v1304_v12 = vld [vmem:[%s2279_s0 + $0x12c] sm:$0xf0]  ;;  %v1316_v24 = vld [vmem:[%s2279_s0 + $0x144] sm:$0xf0] }
  0x14   :  { %776 = vmatpush.bf16.msra.mxu2 %v1797_v14  ;;  %v1220_v25 = vld [vmem:[%s2279_s0 + $0x84] sm:$0xf0]  ;;  %v1226_v26 = vld [vmem:[%s2279_s0 + $0x80] sm:$0xf]  ;;  %v1461_v27 = vld [vmem:[%s2279_s0 + $0x88] sm:$0xf0] }
  0x15   :  { %v1227_v31 = vor.u32 %v1461_v27, %v1226_v26  ;;  %v1328_v36 = vld [vmem:[%s2279_s0 + $0x15c] sm:$0xf0]  ;;  %v1238_v38 = vld [vmem:[%s2279_s0 + $0x98] sm:$0xf]  ;;  %v1464_v39 = vld [vmem:[%s2279_s0 + $0xa0] sm:$0xf0] }
  0x16   :  { %599 = vmatpush.bf16.msra.mxu0 %v1494_v15  ;;  %1695 = vmatpush.bf16.msra.mxu3 %v1494_v15  ;;  %v1458_v15 = vld [vmem:[%s2279_s0 + $0x70] sm:$0xf0]  ;;  %v1232_v37 = vld [vmem:[%s2279_s0 + $0x9c] sm:$0xf0]  ;;  %v1239_v43 = vor.u32 %v1464_v39, %v1238_v38  ;;  %v1340_v48 = vld [vmem:[%s2279_s0 + $0x174] sm:$0xf0] }
  0x17   :  { %688 = vmatpush.bf16.msra.mxu1 %v1502_v16  ;;  %v1244_v49 = vld [vmem:[%s2279_s0 + $0xb4] sm:$0xf0]  ;;  %v1250_v50 = vld [vmem:[%s2279_s0 + $0xb0] sm:$0xf]  ;;  %v1467_v51 = vld [vmem:[%s2279_s0 + $0xb8] sm:$0xf0] }
  0x18   :  { %777 = vmatpush.bf16.msra.mxu2 %v1809_v17  ;;  %v1251_v55 = vor.u32 %v1467_v51, %v1250_v50  ;;  %v1488_v50 = vld [vmem:[%s2279_s0 + $0x160] sm:$0xf0]  ;;  %v1280_v51 = vld [vmem:[%s2279_s0 + $0xfc] sm:$0xf0] }
  0x1a   :  { %600 = vmatpush.bf16.msra.mxu0 %v1493_v18  ;;  %1696 = vmatpush.bf16.msra.mxu3 %v1493_v18 }
  0x1b   :  { %689 = vmatpush.bf16.msra.mxu1 %v1501_v19 }
  0x1c   :  { %778 = vmatpush.bf16.msra.mxu2 %v1821_v20 }
  0x1e   :  { %601 = vmatpush.bf16.msra.mxu0 %v1492_v21  ;;  %1697 = vmatpush.bf16.msra.mxu3 %v1492_v21  ;;  %v1460_v21 = vld [vmem:[%s2279_s0 + $0x80] sm:$0xf0] }
  0x1f   :  { %690 = vmatpush.bf16.msra.mxu1 %v1500_v22 }
  0x20   :  { %779 = vmatpush.bf16.msra.mxu2 %v1832_v23 }
  0x21   :  { %602 = vmatmul.bf16.vlgmr.msra.gmra.mxu0 %v1159_v32  ;;  %662 = vmatmul.bf16.vlgmr.msra.gmra.mxu3 %v1303_v33  ;;  %v1230_v32 = vld [vmem:[%s2279_s0 + $0x90] sm:$0xf]  ;;  %v1463_v33 = vld [vmem:[%s2279_s0 + $0x98] sm:$0xf0] }
  0x22   :  { %1698 = vmatpush.bf16.msrb.mxu3 %v1740_v1  ;;  %691 = vmatmul.bf16.vlgmr.msra.gmra.mxu1 %v1163_v34  ;;  %v1196_v1 = vld [vmem:[%s2279_s0 + $0x54] sm:$0xf0]  ;;  %v1462_v34 = vld [vmem:[%s2279_s0 + $0x94] sm:$0xf]  ;;  %v1231_v40 = vor.u32 %v1463_v33, %v1230_v32 }
  0x23   :  { %780 = vmatmul.bf16.vlgmr.msra.gmra.mxu2 %v1167_v35  ;;  %v1199_v6 = vor.u32 %v1453_v0, %v1196_v1  ;;  %v1486_v35 = vld [vmem:[%s2279_s0 + $0x154] sm:$0xf]  ;;  %v1235_v42 = vor.u32 %v1462_v34, %v1232_v37 }
  0x24   :  { %v1331_v41 = vor.u32 %v1486_v35, %v1328_v36 }
  0x26   :  { %1699 = vmatpush.bf16.msrb.mxu3 %v1755_v4  ;;  %v1195_v4 = vor.u32 %v1454_v61, %v1194_v60  ;;  %v1482_v60 = vld [vmem:[%s2279_s0 + $0x130] sm:$0xf0]  ;;  %v1256_v61 = vld [vmem:[%s2279_s0 + $0xcc] sm:$0xf0] }
  0x2a   :  { %1700 = vmatpush.bf16.msrb.mxu3 %v1505_v7 }
  0x2e   :  { %1701 = vmatpush.bf16.msrb.mxu3 %v1504_v10  ;;  %v1456_v10 = vld [vmem:[%s2279_s0 + $0x64] sm:$0xf] }
  0x31   :  { %607 = vmatmul.bf16.gmra.mxu0 %v1171_v44  ;;  %667 = vmatmul.bf16.gmra.mxu3 %v1315_v45  ;;  %v1242_v44 = vld [vmem:[%s2279_s0 + $0xa8] sm:$0xf]  ;;  %v1466_v45 = vld [vmem:[%s2279_s0 + $0xb0] sm:$0xf0] }
  0x32   :  { %1702 = vmatpush.bf16.msrb.mxu3 %v1503_v13  ;;  %696 = vmatmul.bf16.gmra.mxu1 %v1175_v46  ;;  %v1208_v13 = vld [vmem:[%s2279_s0 + $0x6c] sm:$0xf0]  ;;  %v1465_v46 = vld [vmem:[%s2279_s0 + $0xac] sm:$0xf]  ;;  %v1243_v52 = vor.u32 %v1466_v45, %v1242_v44  ;;  %v1475_v45 = vld [vmem:[%s2279_s0 + $0xf8] sm:$0xf0] }
  0x33   :  { %785 = vmatmul.bf16.gmra.mxu2 %v1179_v47  ;;  %v1211_v18 = vor.u32 %v1456_v10, %v1208_v13  ;;  %v1489_v47 = vld [vmem:[%s2279_s0 + $0x16c] sm:$0xf]  ;;  %v1247_v54 = vor.u32 %v1465_v46, %v1244_v49  ;;  %v1517_v10 = vld [vmem:[%s2280_s2] sm:$0xff]   ;;  %v1278_v44 = vld [vmem:[%s2279_s0 + $0xf0] sm:$0xf] }
  0x34   :  { %v1343_v53 = vor.u32 %v1489_v47, %v1340_v48  ;;  %v1472_v13 = vld [vmem:[%s2279_s0 + $0xe0] sm:$0xf0]  ;;  %v1474_v48 = vld [vmem:[%s2279_s0 + $0xf4] sm:$0xf]  ;;  %v1334_v49 = vld [vmem:[%s2279_s0 + $0x158] sm:$0xf] }
  0x36   :  { %1703 = vmatpush.bf16.msrb.mxu3 %v1502_v16 }
  0x3a   :  { %1704 = vmatpush.bf16.msrb.mxu3 %v1501_v19 }
  0x3e   :  { %1705 = vmatpush.bf16.msrb.mxu3 %v1500_v22  ;;  %v1459_v22 = vld [vmem:[%s2279_s0 + $0x7c] sm:$0xf] }
  0x3f   :  { %v1223_v30 = vor.u32 %v1459_v22, %v1220_v25 }
  0x41   :  { %612 = vmatmul.bf16.gmra.mxu0 %v1183_v56  ;;  %672 = vmatmul.bf16.gmra.mxu3 %v1327_v57  ;;  %v1254_v56 = vld [vmem:[%s2279_s0 + $0xc0] sm:$0xf]  ;;  %v1469_v57 = vld [vmem:[%s2279_s0 + $0xc8] sm:$0xf0] }
  0x42   :  { %1706 = vmatpush.bf16.msra.mxu3 %v1745_v2  ;;  %701 = vmatmul.bf16.gmra.mxu1 %v1187_v58  ;;  %v1202_v2 = vld [vmem:[%s2279_s0 + $0x50] sm:$0xf]  ;;  %v1468_v58 = vld [vmem:[%s2279_s0 + $0xc4] sm:$0xf]  ;;  %v1255_v0 = vor.u32 %v1469_v57, %v1254_v56 }
  0x43   :  { %790 = vmatmul.bf16.gmra.mxu2 %v1191_v59  ;;  %v1203_v7 = vor.u32 %v1455_v3, %v1202_v2  ;;  %v1310_v59 = vld [vmem:[%s2279_s0 + $0x128] sm:$0xf]  ;;  %v1259_v3 = vor.u32 %v1468_v58, %v1256_v61  ;;  %v1279_v58 = vor.u32 %v1475_v45, %v1278_v44  ;;  %v1662_v45 = vld [vmem:[%s2280_s2 + $0x18] sm:$0xff]  }
  0x44   :  { %v1311_v1 = vor.u32 %v1482_v60, %v1310_v59  ;;  %v1335_v59 = vor.u32 %v1488_v50, %v1334_v49 }
  0x46   :  { %1707 = vmatpush.bf16.msra.mxu3 %v1760_v5  ;;  %v1339_v5 = vor.u32 %v1490_v63, %v1338_v62  ;;  %v1262_v62 = vld [vmem:[%s2279_s0 + $0xc8] sm:$0xf]  ;;  %v1470_v63 = vld [vmem:[%s2279_s0 + $0xd0] sm:$0xf0] }
  0x4a   :  { %1708 = vmatpush.bf16.msra.mxu3 %v1773_v8  ;;  %v1206_v8 = vld [vmem:[%s2279_s0 + $0x60] sm:$0xf] }
  0x4b   :  { %v1207_v16 = vor.u32 %v1457_v9, %v1206_v8 }
  0x4e   :  { %1709 = vmatpush.bf16.msra.mxu3 %v1785_v11  ;;  %v1480_v11 = vld [vmem:[%s2279_s0 + $0x124] sm:$0xf] }
  0x51   :  { %617 = vmatmul.bf16.gmra.mxu0 %v1195_v4  ;;  %677 = vmatmul.bf16.gmra.mxu3 %v1339_v5  ;;  %v1263_v4 = vor.u32 %v1470_v63, %v1262_v62  ;;  %v1283_v63 = vor.u32 %v1474_v48, %v1280_v51  ;;  %v1530_v48 = vunpack.c.l.bf16 %v1662_v45  ;;  %v1531_v51 = vunpack.c.h.bf16 %v1662_v45 }
  0x52   :  { %1710 = vmatpush.bf16.msra.mxu3 %v1797_v14  ;;  %706 = vmatmul.bf16.gmra.mxu1 %v1199_v6  ;;  %v1214_v14 = vld [vmem:[%s2279_s0 + $0x68] sm:$0xf] }
  0x53   :  { %795 = vmatmul.bf16.gmra.mxu2 %v1203_v7  ;;  %v1215_v19 = vor.u32 %v1458_v15, %v1214_v14  ;;  %v1518_v15 = vunpack.c.l.bf16 %v1517_v10 }
  0x56   :  { %1711 = vmatpush.bf16.msra.mxu3 %v1809_v17  ;;  %v1307_v17 = vor.u32 %v1480_v11, %v1304_v12  ;;  %v1266_v12 = vld [vmem:[%s2279_s0 + $0xd8] sm:$0xf] }
  0x57   :  { %v1267_v26 = vor.u32 %v1472_v13, %v1266_v12  ;;  %v1290_v13 = vld [vmem:[%s2279_s0 + $0x108] sm:$0xf] }
  0x5a   :  { %1712 = vmatpush.bf16.msra.mxu3 %v1821_v20  ;;  %v1218_v20 = vld [vmem:[%s2279_s0 + $0x78] sm:$0xf] }
  0x5b   :  { %v1219_v28 = vor.u32 %v1460_v21, %v1218_v20  ;;  %v1274_v20 = vld [vmem:[%s2279_s0 + $0xe0] sm:$0xf]  ;;  %v1473_v21 = vld [vmem:[%s2279_s0 + $0xe8] sm:$0xf0] }
  0x5c   :  { %v1275_v32 = vor.u32 %v1473_v21, %v1274_v20  ;;  %v1292_v20 = vld [vmem:[%s2279_s0 + $0x114] sm:$0xf0]  ;;  %v1298_v21 = vld [vmem:[%s2279_s0 + $0x110] sm:$0xf] }
  0x5e   :  { %1713 = vmatpush.bf16.msra.mxu3 %v1832_v23  ;;  %v1483_v23 = vld [vmem:[%s2279_s0 + $0x13c] sm:$0xf] }
  0x5f   :  { %v1319_v29 = vor.u32 %v1483_v23, %v1316_v24  ;;  %v1519_v24 = vunpack.c.h.bf16 %v1517_v10 }
  0x61   :  { %622 = vmatmul.bf16.gmra.mxu0 %v1207_v16  ;;  %751 = vmatmul.bf16.vlgmr.msrb.gmra.mxu3 %v1307_v17  ;;  %v1471_v16 = vld [vmem:[%s2279_s0 + $0xdc] sm:$0xf]  ;;  %v1322_v17 = vld [vmem:[%s2279_s0 + $0x140] sm:$0xf] }
  0x62   :  { %711 = vmatmul.bf16.gmra.mxu1 %v1211_v18  ;;  %v1485_v18 = vld [vmem:[%s2279_s0 + $0x148] sm:$0xf0] }
  0x63   :  { %800 = vmatmul.bf16.gmra.mxu2 %v1215_v19  ;;  %v1268_v19 = vld [vmem:[%s2279_s0 + $0xe4] sm:$0xf0]  ;;  %v1323_v27 = vor.u32 %v1485_v18, %v1322_v17  ;;  %v1477_v17 = vld [vmem:[%s2279_s0 + $0x10c] sm:$0xf]  ;;  %v1346_v18 = vld [vmem:[%s2279_s0 + $0x170] sm:$0xf] }
  0x71   :  { %627 = vmatmul.bf16.gmra.mxu0 %v1219_v28  ;;  %756 = vmatmul.bf16.gmra.mxu3 %v1319_v29 }
  0x72   :  { %716 = vmatmul.bf16.gmra.mxu1 %v1223_v30 }
  0x73   :  { %805 = vmatmul.bf16.gmra.mxu2 %v1227_v31  ;;  %v1271_v31 = vor.u32 %v1471_v16, %v1268_v19  ;;  %v1491_v19 = vld [vmem:[%s2279_s0 + $0x178] sm:$0xf0] }
  0x81   :  { %632 = vmatmul.bf16.gmra.mxu0 %v1231_v40  ;;  %761 = vmatmul.bf16.gmra.mxu3 %v1331_v41 }
  0x82   :  { %721 = vmatmul.bf16.gmra.mxu1 %v1235_v42  ;;  %v1660_v42 = vld [vmem:[%s2280_s2 + $0x8] sm:$0xff]  }
  0x83   :  { %810 = vmatmul.bf16.gmra.mxu2 %v1239_v43  ;;  %v1522_v47 = vunpack.c.l.bf16 %v1660_v42  ;;  %v1523_v56 = vunpack.c.h.bf16 %v1660_v42 }
  0x91   :  { %637 = vmatmul.bf16.gmra.mxu0 %v1243_v52  ;;  %766 = vmatmul.bf16.gmra.mxu3 %v1343_v53  ;;  %v1286_v52 = vld [vmem:[%s2279_s0 + $0xf8] sm:$0xf]  ;;  %v1476_v53 = vld [vmem:[%s2279_s0 + $0x100] sm:$0xf0] }
  0x92   :  { %726 = vmatmul.bf16.gmra.mxu1 %v1247_v54 }
  0x93   :  { %815 = vmatmul.bf16.gmra.mxu2 %v1251_v55 }
  0x9e   :  { %v603_v2 = vpop.f32.mrf.mxu0 }
  0x9f   :  { %v692_v5 = vpop.f32.mrf.mxu1 }
  0xa0   :  { %v693_v8 = vadd.f32 %v692_v5, %v603_v2 }
  0xa1   :  { %642 = vmatmul.bf16.gmra.mxu0 %v1255_v0  ;;  %840 = vmatmul.bf16.vlgmr.msra.gmra.mxu3 %v1311_v1  ;;  %v1287_v0 = vor.u32 %v1476_v53, %v1286_v52 }
  0xa2   :  { %731 = vmatmul.bf16.gmra.mxu1 %v1259_v3 }
  0xa3   :  { %820 = vmatmul.bf16.gmra.mxu2 %v1263_v4 }
  0xa4   :  { %v2062_v6 = vpop.f32.mrf.mxu3 }
  0xa6   :  { %v781_v7 = vpop.f32.mrf.mxu2  ;;  %v605_v9 = vpop.f32.mrf.mxu0 }
  0xa7   :  { %v694_v11 = vpop.f32.mrf.mxu1  ;;  %v782_v14 = vadd.f32 %v781_v7, %v693_v8 }
  0xa8   :  { %v695_v22 = vadd.f32 %v694_v11, %v605_v9  ;;  %v1661_v11 = vld [vmem:[%s2280_s2 + $0x10] sm:$0xff]  }
  0xa9   :  { %v1024_v28 = vadd.f32 %v1518_v15, %v782_v14  ;;  %v1478_v14 = vld [vmem:[%s2279_s0 + $0x110] sm:$0xf0]  ;;  %v1526_v16 = vunpack.c.l.bf16 %v1661_v11 }
  0xab   :  { %v1056_v35 = vmax.f32 %v1024_v28, 0.0  ;;  %v1291_v28 = vor.u32 %v1478_v14, %v1290_v13 }
  0xac   :  { %v2091_v23 = vpop.f32.mrf.mxu3 }
  0xae   :  { %v783_v25 = vpop.f32.mrf.mxu2  ;;  %v608_v30 = vpop.f32.mrf.mxu0 }
  0xaf   :  { %v784_v29 = vadd.f32 %v783_v25, %v695_v22  ;;  %v697_v33 = vpop.f32.mrf.mxu1  ;;  %v1479_v22 = vld [vmem:[%s2279_s0 + $0x118] sm:$0xf0] }
  0xb0   :  { %v698_v40 = vadd.f32 %v697_v33, %v608_v30  ;;  %v1295_v33 = vor.u32 %v1477_v17, %v1292_v20 }
  0xb1   :  { %v1025_v34 = vadd.f32 %v1519_v24, %v784_v29  ;;  %647 = vmatmul.bf16.gmra.mxu0 %v1267_v26  ;;  %845 = vmatmul.bf16.gmra.mxu3 %v1323_v27  ;;  %v1527_v26 = vunpack.c.h.bf16 %v1661_v11  ;;  %v1347_v29 = vor.u32 %v1491_v19, %v1346_v18 }
  0xb2   :  { %736 = vmatmul.bf16.gmra.mxu1 %v1271_v31 }
  0xb3   :  { %v1057_v36 = vmax.f32 %v1025_v34, 0.0  ;;  %825 = vmatmul.bf16.gmra.mxu2 %v1275_v32  ;;  %v1299_v34 = vor.u32 %v1479_v22, %v1298_v21 }
  0xb4   :  { %v2093_v38 = vpop.f32.mrf.mxu3 }
  0xb5   :  { %v1583_v37 = vpack.c.bf16 %v1057_v36, %v1056_v35 }
  0xb6   :  { %v786_v39 = vpop.f32.mrf.mxu2  ;;  %v610_v41 = vpop.f32.mrf.mxu0 }
  0xb7   :  { %1584 = vst [vmem:[%s2281_s3] sm:$0xff] %v1583_v37   ;;  %v699_v43 = vpop.f32.mrf.mxu1  ;;  %v787_v46 = vadd.f32 %v786_v39, %v698_v40 }
  0xb8   :  { %v700_v54 = vadd.f32 %v699_v43, %v610_v41 }
  0xb9   :  { %v1026_v60 = vadd.f32 %v1522_v47, %v787_v46 }
  0xbb   :  { %v1058_v3 = vmax.f32 %v1026_v60, 0.0 }
  0xbc   :  { %v2125_v55 = vpop.f32.mrf.mxu3 }
  0xbe   :  { %v788_v57 = vpop.f32.mrf.mxu2  ;;  %v613_v62 = vpop.f32.mrf.mxu0 }
  0xbf   :  { %v789_v61 = vadd.f32 %v788_v57, %v700_v54  ;;  %v702_v1 = vpop.f32.mrf.mxu1 }
  0xc0   :  { %v703_v9 = vadd.f32 %v702_v1, %v613_v62 }
  0xc1   :  { %v1027_v2 = vadd.f32 %v1523_v56, %v789_v61  ;;  %652 = vmatmul.bf16.gmra.mxu0 %v1279_v58  ;;  %850 = vmatmul.bf16.gmra.mxu3 %v1335_v59 }
  0xc2   :  { %741 = vmatmul.bf16.gmra.mxu1 %v1283_v63 }
  0xc3   :  { %v1059_v4 = vmax.f32 %v1027_v2, 0.0  ;;  %830 = vmatmul.bf16.gmra.mxu2 %v1287_v0 }
  0xc4   :  { %v2127_v7 = vpop.f32.mrf.mxu3 }
  0xc5   :  { %v1588_v5 = vpack.c.bf16 %v1059_v4, %v1058_v3  ;;  %v1663_v3 = vld [vmem:[%s2280_s2 + $0x20] sm:$0xff]  }
  0xc6   :  { %v791_v8 = vpop.f32.mrf.mxu2  ;;  %v615_v10 = vpop.f32.mrf.mxu0  ;;  %v1535_v11 = vunpack.c.h.bf16 %v1663_v3 }
  0xc7   :  { %1675 = vst [vmem:[%s2281_s3 + $0x8] sm:$0xff] %v1588_v5   ;;  %v704_v12 = vpop.f32.mrf.mxu1  ;;  %v792_v15 = vadd.f32 %v791_v8, %v703_v9  ;;  %v1534_v8 = vunpack.c.l.bf16 %v1663_v3 }
  0xc8   :  { %v705_v24 = vadd.f32 %v704_v12, %v615_v10 }
  0xc9   :  { %v1028_v30 = vadd.f32 %v1526_v16, %v792_v15 }
  0xcb   :  { %v1060_v37 = vmax.f32 %v1028_v30, 0.0 }
  0xcc   :  { %v2159_v25 = vpop.f32.mrf.mxu3 }
  0xce   :  { %v793_v27 = vpop.f32.mrf.mxu2  ;;  %v618_v32 = vpop.f32.mrf.mxu0 }
  0xcf   :  { %v794_v31 = vadd.f32 %v793_v27, %v705_v24  ;;  %v707_v35 = vpop.f32.mrf.mxu1  ;;  %v1664_v27 = vld [vmem:[%s2280_s2 + $0x28] sm:$0xff]  }
  0xd0   :  { %v708_v43 = vadd.f32 %v707_v35, %v618_v32  ;;  %v1538_v30 = vunpack.c.l.bf16 %v1664_v27 }
  0xd1   :  { %v1029_v36 = vadd.f32 %v1527_v26, %v794_v31  ;;  %657 = vmatmul.bf16.gmra.mxu0 %v1291_v28  ;;  %855 = vmatmul.bf16.gmra.mxu3 %v1347_v29 }
  0xd2   :  { %746 = vmatmul.bf16.gmra.mxu1 %v1295_v33  ;;  %v1539_v33 = vunpack.c.h.bf16 %v1664_v27 }
  0xd3   :  { %v1061_v39 = vmax.f32 %v1029_v36, 0.0  ;;  %835 = vmatmul.bf16.gmra.mxu2 %v1299_v34 }
  0xd4   :  { %v2161_v41 = vpop.f32.mrf.mxu3 }
  0xd5   :  { %v1593_v40 = vpack.c.bf16 %v1061_v39, %v1060_v37 }
  0xd6   :  { %v796_v42 = vpop.f32.mrf.mxu2  ;;  %v620_v44 = vpop.f32.mrf.mxu0 }
  0xd7   :  { %1676 = vst [vmem:[%s2281_s3 + $0x10] sm:$0xff] %v1593_v40   ;;  %v709_v46 = vpop.f32.mrf.mxu1  ;;  %v797_v47 = vadd.f32 %v796_v42, %v708_v43 }
  0xd8   :  { %v710_v49 = vadd.f32 %v709_v46, %v620_v44 }
  0xd9   :  { %v1030_v53 = vadd.f32 %v1530_v48, %v797_v47 }
  0xdb   :  { %v1062_v59 = vmax.f32 %v1030_v53, 0.0 }
  0xdc   :  { %v2169_v50 = vpop.f32.mrf.mxu3 }
  0xde   :  { %v798_v52 = vpop.f32.mrf.mxu2  ;;  %v623_v56 = vpop.f32.mrf.mxu0 }
  0xdf   :  { %v799_v54 = vadd.f32 %v798_v52, %v710_v49  ;;  %v712_v57 = vpop.f32.mrf.mxu1  ;;  %v1665_v49 = vld [vmem:[%s2280_s2 + $0x30] sm:$0xff]  }
  0xe0   :  { %v713_v1 = vadd.f32 %v712_v57, %v623_v56  ;;  %v1542_v53 = vunpack.c.l.bf16 %v1665_v49  ;;  %v1543_v57 = vunpack.c.h.bf16 %v1665_v49 }
  0xe1   :  { %v1031_v58 = vadd.f32 %v1531_v51, %v799_v54 }
  0xe3   :  { %v1063_v60 = vmax.f32 %v1031_v58, 0.0 }
  0xe4   :  { %v752_v62 = vpop.f32.mrf.mxu3 }
  0xe5   :  { %v1598_v61 = vpack.c.bf16 %v1063_v60, %v1062_v59  ;;  %v2172_v63 = vadd.f32 %v752_v62, %v2062_v6 }
  0xe6   :  { %v801_v0 = vpop.f32.mrf.mxu2  ;;  %v625_v2 = vpop.f32.mrf.mxu0 }
  0xe7   :  { %1677 = vst [vmem:[%s2281_s3 + $0x18] sm:$0xff] %v1598_v61   ;;  %v714_v4 = vpop.f32.mrf.mxu1  ;;  %v802_v5 = vadd.f32 %v801_v0, %v713_v1 }
  0xe8   :  { %v715_v9 = vadd.f32 %v714_v4, %v625_v2 }
  0xe9   :  { %v1032_v12 = vadd.f32 %v1534_v8, %v802_v5 }
  0xeb   :  { %v1064_v17 = vmax.f32 %v1032_v12, 0.0 }
  0xec   :  { %v2180_v10 = vpop.f32.mrf.mxu3 }
  0xee   :  { %v803_v6 = vpop.f32.mrf.mxu2  ;;  %v628_v14 = vpop.f32.mrf.mxu0 }
  0xef   :  { %v804_v13 = vadd.f32 %v803_v6, %v715_v9  ;;  %v717_v15 = vpop.f32.mrf.mxu1 }
  0xf0   :  { %v718_v24 = vadd.f32 %v717_v15, %v628_v14 }
  0xf1   :  { %v1033_v16 = vadd.f32 %v1535_v11, %v804_v13  ;;  %v1666_v11 = vld [vmem:[%s2280_s2 + $0x38] sm:$0xff]  }
  0xf2   :  { %v1546_v13 = vunpack.c.l.bf16 %v1666_v11 }
  0xf3   :  { %v1065_v18 = vmax.f32 %v1033_v16, 0.0  ;;  %v1547_v16 = vunpack.c.h.bf16 %v1666_v11 }
  0xf4   :  { %v757_v20 = vpop.f32.mrf.mxu3 }
  0xf5   :  { %v1603_v19 = vpack.c.bf16 %v1065_v18, %v1064_v17  ;;  %v2183_v21 = vadd.f32 %v757_v20, %v2093_v38 }
  0xf6   :  { %v806_v22 = vpop.f32.mrf.mxu2  ;;  %v630_v26 = vpop.f32.mrf.mxu0 }
  0xf7   :  { %1678 = vst [vmem:[%s2281_s3 + $0x20] sm:$0xff] %v1603_v19   ;;  %v719_v28 = vpop.f32.mrf.mxu1  ;;  %v807_v29 = vadd.f32 %v806_v22, %v718_v24 }
  0xf8   :  { %v720_v31 = vadd.f32 %v719_v28, %v630_v26 }
  0xf9   :  { %v1034_v34 = vadd.f32 %v1538_v30, %v807_v29 }
  0xfb   :  { %v1066_v40 = vmax.f32 %v1034_v34, 0.0 }
  0xfc   :  { %v2191_v32 = vpop.f32.mrf.mxu3 }
  0xfe   :  { %v808_v38 = vpop.f32.mrf.mxu2  ;;  %v633_v36 = vpop.f32.mrf.mxu0 }
  0xff   :  { %v809_v35 = vadd.f32 %v808_v38, %v720_v31  ;;  %v722_v37 = vpop.f32.mrf.mxu1  ;;  %v1671_v31 = vld [vmem:[%s2280_s2 + $0x60] sm:$0xff]  }
 0x100   :  { %v723_v47 = vadd.f32 %v722_v37, %v633_v36  ;;  %v1667_v38 = vld [vmem:[%s2280_s2 + $0x40] sm:$0xff]   ;;  %v1566_v36 = vunpack.c.l.bf16 %v1671_v31 }
 0x101   :  { %v1035_v39 = vadd.f32 %v1539_v33, %v809_v35 }
 0x103   :  { %v1067_v42 = vmax.f32 %v1035_v39, 0.0  ;;  %v1550_v39 = vunpack.c.l.bf16 %v1667_v38 }
 0x104   :  { %v762_v44 = vpop.f32.mrf.mxu3 }
 0x105   :  { %v1608_v43 = vpack.c.bf16 %v1067_v42, %v1066_v40  ;;  %v2194_v45 = vadd.f32 %v762_v44, %v2127_v7  ;;  %v755_v40 = vadd.f32 %v2180_v10, %v2091_v23  ;;  %v1567_v42 = vunpack.c.h.bf16 %v1671_v31 }
 0x106   :  { %v811_v46 = vpop.f32.mrf.mxu2  ;;  %v635_v48 = vpop.f32.mrf.mxu0  ;;  %v1551_v44 = vunpack.c.h.bf16 %v1667_v38 }
 0x107   :  { %1679 = vst [vmem:[%s2281_s3 + $0x28] sm:$0xff] %v1608_v43   ;;  %v724_v51 = vpop.f32.mrf.mxu1  ;;  %v812_v52 = vadd.f32 %v811_v46, %v723_v47 }
 0x108   :  { %v725_v54 = vadd.f32 %v724_v51, %v635_v48 }
 0x109   :  { %v1036_v58 = vadd.f32 %v1542_v53, %v812_v52 }
 0x10b   :  { %v1068_v0 = vmax.f32 %v1036_v58, 0.0 }
 0x10c   :  { %v2202_v56 = vpop.f32.mrf.mxu3 }
 0x10e   :  { %v813_v7 = vpop.f32.mrf.mxu2  ;;  %v638_v60 = vpop.f32.mrf.mxu0 }
 0x10f   :  { %v814_v59 = vadd.f32 %v813_v7, %v725_v54  ;;  %v727_v61 = vpop.f32.mrf.mxu1 }
 0x110   :  { %v728_v8 = vadd.f32 %v727_v61, %v638_v60 }
 0x111   :  { %v1037_v62 = vadd.f32 %v1543_v57, %v814_v59 }
 0x113   :  { %v1069_v1 = vmax.f32 %v1037_v62, 0.0 }
 0x114   :  { %v767_v3 = vpop.f32.mrf.mxu3 }
 0x115   :  { %v1613_v2 = vpack.c.bf16 %v1069_v1, %v1068_v0  ;;  %v2205_v4 = vadd.f32 %v767_v3, %v2161_v41  ;;  %v1672_v1 = vld [vmem:[%s2280_s2 + $0x68] sm:$0xff]  }
 0x116   :  { %v816_v5 = vpop.f32.mrf.mxu2  ;;  %v640_v9 = vpop.f32.mrf.mxu0  ;;  %v1668_v3 = vld [vmem:[%s2280_s2 + $0x48] sm:$0xff]  }
 0x117   :  { %1680 = vst [vmem:[%s2281_s3 + $0x30] sm:$0xff] %v1613_v2   ;;  %v729_v6 = vpop.f32.mrf.mxu1  ;;  %v817_v12 = vadd.f32 %v816_v5, %v728_v8 }
 0x118   :  { %v730_v14 = vadd.f32 %v729_v6, %v640_v9  ;;  %v1570_v9 = vunpack.c.l.bf16 %v1672_v1  ;;  %v1554_v6 = vunpack.c.l.bf16 %v1668_v3 }
 0x119   :  { %v1038_v17 = vadd.f32 %v1546_v13, %v817_v12  ;;  %v760_v12 = vadd.f32 %v2191_v32, %v2125_v55  ;;  %v1571_v13 = vunpack.c.h.bf16 %v1672_v1 }
 0x11b   :  { %v1070_v24 = vmax.f32 %v1038_v17, 0.0 }
 0x11c   :  { %v2213_v15 = vpop.f32.mrf.mxu3 }
 0x11e   :  { %v818_v41 = vpop.f32.mrf.mxu2  ;;  %v643_v19 = vpop.f32.mrf.mxu0 }
 0x11f   :  { %v819_v18 = vadd.f32 %v818_v41, %v730_v14  ;;  %v732_v20 = vpop.f32.mrf.mxu1 }
 0x120   :  { %v733_v30 = vadd.f32 %v732_v20, %v643_v19 }
 0x121   :  { %v1039_v22 = vadd.f32 %v1547_v16, %v819_v18  ;;  %v1555_v16 = vunpack.c.h.bf16 %v1668_v3  ;;  %v1670_v3 = vld [vmem:[%s2280_s2 + $0x58] sm:$0xff]  }
 0x123   :  { %v1071_v26 = vmax.f32 %v1039_v22, 0.0 }
 0x124   :  { %v841_v28 = vpop.f32.mrf.mxu3 }
 0x125   :  { %v1618_v27 = vpack.c.bf16 %v1071_v26, %v1070_v24  ;;  %v842_v35 = vadd.f32 %v841_v28, %v2172_v63 }
 0x126   :  { %v821_v29 = vpop.f32.mrf.mxu2  ;;  %v645_v33 = vpop.f32.mrf.mxu0 }
 0x127   :  { %1681 = vst [vmem:[%s2281_s3 + $0x38] sm:$0xff] %v1618_v27   ;;  %v734_v34 = vpop.f32.mrf.mxu1  ;;  %v822_v37 = vadd.f32 %v821_v29, %v733_v30  ;;  %v1048_v47 = vadd.f32 %v1566_v36, %v842_v35  ;;  %v1673_v35 = vld [vmem:[%s2280_s2 + $0x70] sm:$0xff]  }
 0x128   :  { %v735_v43 = vadd.f32 %v734_v34, %v645_v33 }
 0x129   :  { %v1040_v51 = vadd.f32 %v1550_v39, %v822_v37  ;;  %v1080_v63 = vmax.f32 %v1048_v47, 0.0  ;;  %v1669_v37 = vld [vmem:[%s2280_s2 + $0x50] sm:$0xff]   ;;  %v1575_v47 = vunpack.c.h.bf16 %v1673_v35 }
 0x12b   :  { %v1072_v59 = vmax.f32 %v1040_v51, 0.0 }
 0x12c   :  { %v843_v46 = vpop.f32.mrf.mxu3 }
 0x12d   :  { %v844_v49 = vadd.f32 %v843_v46, %v755_v40  ;;  %v765_v46 = vadd.f32 %v2202_v56, %v2159_v25 }
 0x12e   :  { %v823_v48 = vpop.f32.mrf.mxu2  ;;  %v648_v53 = vpop.f32.mrf.mxu0 }
 0x12f   :  { %v824_v52 = vadd.f32 %v823_v48, %v735_v43  ;;  %v1049_v54 = vadd.f32 %v1567_v42, %v844_v49  ;;  %v737_v57 = vpop.f32.mrf.mxu1  ;;  %v1574_v42 = vunpack.c.l.bf16 %v1673_v35  ;;  %v1559_v49 = vunpack.c.h.bf16 %v1669_v37 }
 0x130   :  { %v738_v0 = vadd.f32 %v737_v57, %v648_v53 }
 0x131   :  { %v1041_v7 = vadd.f32 %v1551_v44, %v824_v52  ;;  %v1081_v58 = vmax.f32 %v1049_v54, 0.0  ;;  %v1558_v44 = vunpack.c.l.bf16 %v1669_v37 }
 0x133   :  { %v1073_v60 = vmax.f32 %v1041_v7, 0.0  ;;  %v1643_v61 = vpack.c.bf16 %v1081_v58, %v1080_v63 }
 0x134   :  { %v846_v23 = vpop.f32.mrf.mxu3 }
 0x135   :  { %v1623_v62 = vpack.c.bf16 %v1073_v60, %v1072_v59  ;;  %1686 = vst [vmem:[%s2281_s3 + $0x60] sm:$0xff] %v1643_v61   ;;  %v847_v8 = vadd.f32 %v846_v23, %v2183_v21 }
 0x136   :  { %v826_v10 = vpop.f32.mrf.mxu2  ;;  %v650_v2 = vpop.f32.mrf.mxu0 }
 0x137   :  { %1682 = vst [vmem:[%s2281_s3 + $0x40] sm:$0xff] %v1623_v62   ;;  %v739_v5 = vpop.f32.mrf.mxu1  ;;  %v827_v11 = vadd.f32 %v826_v10, %v738_v0  ;;  %v1050_v17 = vadd.f32 %v1570_v9, %v847_v8 }
 0x138   :  { %v740_v14 = vadd.f32 %v739_v5, %v650_v2  ;;  %v1674_v2 = vld [vmem:[%s2280_s2 + $0x78] sm:$0xff]  }
 0x139   :  { %v1042_v20 = vadd.f32 %v1554_v6, %v827_v11  ;;  %v1082_v21 = vmax.f32 %v1050_v17, 0.0  ;;  %v1578_v8 = vunpack.c.l.bf16 %v1674_v2 }
 0x13b   :  { %v1074_v30 = vmax.f32 %v1042_v20, 0.0 }
 0x13c   :  { %v848_v41 = vpop.f32.mrf.mxu3 }
 0x13d   :  { %v849_v19 = vadd.f32 %v848_v41, %v760_v12  ;;  %v1562_v12 = vunpack.c.l.bf16 %v1670_v3  ;;  %v1563_v41 = vunpack.c.h.bf16 %v1670_v3 }
 0x13e   :  { %v828_v18 = vpop.f32.mrf.mxu2  ;;  %v653_v24 = vpop.f32.mrf.mxu0 }
 0x13f   :  { %v829_v22 = vadd.f32 %v828_v18, %v740_v14  ;;  %v1051_v26 = vadd.f32 %v1571_v13, %v849_v19  ;;  %v742_v27 = vpop.f32.mrf.mxu1  ;;  %v770_v13 = vadd.f32 %v2213_v15, %v2169_v50  ;;  %v1579_v14 = vunpack.c.h.bf16 %v1674_v2 }
 0x140   :  { %v743_v34 = vadd.f32 %v742_v27, %v653_v24 }
 0x141   :  { %v1043_v28 = vadd.f32 %v1555_v16, %v829_v22  ;;  %v1083_v29 = vmax.f32 %v1051_v26, 0.0 }
 0x143   :  { %v1075_v31 = vmax.f32 %v1043_v28, 0.0  ;;  %v1648_v33 = vpack.c.bf16 %v1083_v29, %v1082_v21 }
 0x144   :  { %v851_v55 = vpop.f32.mrf.mxu3 }
 0x145   :  { %v1628_v38 = vpack.c.bf16 %v1075_v31, %v1074_v30  ;;  %1687 = vst [vmem:[%s2281_s3 + $0x68] sm:$0xff] %v1648_v33   ;;  %v852_v40 = vadd.f32 %v851_v55, %v2194_v45 }
 0x146   :  { %v831_v32 = vpop.f32.mrf.mxu2  ;;  %v655_v36 = vpop.f32.mrf.mxu0 }
 0x147   :  { %1683 = vst [vmem:[%s2281_s3 + $0x48] sm:$0xff] %v1628_v38   ;;  %v744_v39 = vpop.f32.mrf.mxu1  ;;  %v832_v43 = vadd.f32 %v831_v32, %v743_v34  ;;  %v1052_v52 = vadd.f32 %v1574_v42, %v852_v40 }
 0x148   :  { %v745_v48 = vadd.f32 %v744_v39, %v655_v36 }
 0x149   :  { %v1044_v57 = vadd.f32 %v1558_v44, %v832_v43  ;;  %v1084_v45 = vmax.f32 %v1052_v52, 0.0 }
 0x14b   :  { %v1076_v62 = vmax.f32 %v1044_v57, 0.0 }
 0x14c   :  { %v853_v51 = vpop.f32.mrf.mxu3 }
 0x14d   :  { %v854_v54 = vadd.f32 %v853_v51, %v765_v46 }
 0x14e   :  { %v833_v53 = vpop.f32.mrf.mxu2  ;;  %v658_v58 = vpop.f32.mrf.mxu0 }
 0x14f   :  { %v834_v7 = vadd.f32 %v833_v53, %v745_v48  ;;  %v1053_v63 = vadd.f32 %v1575_v47, %v854_v54  ;;  %v747_v59 = vpop.f32.mrf.mxu1 }
 0x150   :  { %v748_v1 = vadd.f32 %v747_v59, %v658_v58 }
 0x151   :  { %v1045_v60 = vadd.f32 %v1559_v49, %v834_v7  ;;  %v1085_v61 = vmax.f32 %v1053_v63, 0.0 }
 0x153   :  { %v1077_v23 = vmax.f32 %v1045_v60, 0.0  ;;  %v1653_v10 = vpack.c.bf16 %v1085_v61, %v1084_v45 }
 0x154   :  { %v856_v25 = vpop.f32.mrf.mxu3 }
 0x155   :  { %v1633_v0 = vpack.c.bf16 %v1077_v23, %v1076_v62  ;;  %1688 = vst [vmem:[%s2281_s3 + $0x70] sm:$0xff] %v1653_v10   ;;  %v857_v5 = vadd.f32 %v856_v25, %v2205_v4 }
 0x156   :  { %v836_v56 = vpop.f32.mrf.mxu2  ;;  %v660_v9 = vpop.f32.mrf.mxu0 }
 0x157   :  { %1684 = vst [vmem:[%s2281_s3 + $0x50] sm:$0xff] %v1633_v0   ;;  %v749_v11 = vpop.f32.mrf.mxu1  ;;  %v837_v6 = vadd.f32 %v836_v56, %v748_v1  ;;  %v1054_v18 = vadd.f32 %v1578_v8, %v857_v5 }
 0x158   :  { %v750_v16 = vadd.f32 %v749_v11, %v660_v9 }
 0x159   :  { %v1046_v22 = vadd.f32 %v1562_v12, %v837_v6  ;;  %v1086_v4 = vmax.f32 %v1054_v18, 0.0 }
 0x15b   :  { %v1078_v21 = vmax.f32 %v1046_v22, 0.0 }
 0x15c   :  { %v858_v17 = vpop.f32.mrf.mxu3 }
 0x15d   :  { %v859_v20 = vadd.f32 %v858_v17, %v770_v13 }
 0x15e   :  { %v838_v19 = vpop.f32.mrf.mxu2 }
 0x15f   :  { %v839_v24 = vadd.f32 %v838_v19, %v750_v16  ;;  %v1055_v26 = vadd.f32 %v1579_v14, %v859_v20 }
 0x161   :  { %v1047_v27 = vadd.f32 %v1563_v41, %v839_v24  ;;  %v1087_v28 = vmax.f32 %v1055_v26, 0.0 }
 0x163   :  { %v1079_v29 = vmax.f32 %v1047_v27, 0.0  ;;  %v1658_v30 = vpack.c.bf16 %v1087_v28, %v1086_v4 }
 0x165   :  { %v1638_v31 = vpack.c.bf16 %v1079_v29, %v1078_v21  ;;  %1689 = vst [vmem:[%s2281_s3 + $0x78] sm:$0xff] %v1658_v30  }
 0x167   :  { %1685 = vst [vmem:[%s2281_s3 + $0x58] sm:$0xff] %v1638_v31  }

// kernel: _lambda_.237
= control target key start
LH: loop header
LB: loop body
LE: loop exit
PB: predicated region body
PF: predicated region fallthrough
CT: control target
= control target key end

     0   :  { %s1267_s1 = inlined_call_operand.vmem [shape: bf16[384,128], index: 1, kind: input, shape index: {}]   ;;  %s1268_s0 = inlined_call_operand.vmem [shape: bf16[128,384], index: 0, kind: input, shape index: {}]   ;;  %s1269_s2 = inlined_call_operand.vmem [shape: bf16[128,128], index: 2, kind: output, shape index: {}]  }
   0x1   :  { %v872_v0 = vld [vmem:[%s1267_s1 + $0x38] sm:$0xff]  ;;  %v871_v3 = vld [vmem:[%s1267_s1 + $0x30] sm:$0xff]  ;;  %v870_v6 = vld [vmem:[%s1267_s1 + $0x28] sm:$0xff] }
   0x2   :  { %v981_v1 = vld [vmem:[%s1267_s1 + $0x78] sm:$0xff]  ;;  %399 = vmatpush.bf16.msra.mxu0 %v872_v0  ;;  %936 = vmatpush.bf16.msra.mxu3 %v872_v0  ;;  %v996_v4 = vld [vmem:[%s1267_s1 + $0x70] sm:$0xff]  ;;  %v878_v7 = vld [vmem:[%s1267_s1 + $0x68] sm:$0xff] }
   0x3   :  { %v986_v2 = vld [vmem:[%s1267_s1 + $0xb8] sm:$0xff]  ;;  %448 = vmatpush.bf16.msra.mxu1 %v981_v1  ;;  %v1001_v5 = vld [vmem:[%s1267_s1 + $0xb0] sm:$0xff]  ;;  %v1014_v8 = vld [vmem:[%s1267_s1 + $0xa8] sm:$0xff] }
   0x4   :  { %497 = vmatpush.bf16.msra.mxu2 %v986_v2  ;;  %v869_v9 = vld [vmem:[%s1267_s1 + $0x20] sm:$0xff]  ;;  %v868_v12 = vld [vmem:[%s1267_s1 + $0x18] sm:$0xff]  ;;  %v867_v15 = vld [vmem:[%s1267_s1 + $0x10] sm:$0xff] }
   0x5   :  { %v877_v10 = vld [vmem:[%s1267_s1 + $0x60] sm:$0xff]  ;;  %v876_v13 = vld [vmem:[%s1267_s1 + $0x58] sm:$0xff]  ;;  %v875_v16 = vld [vmem:[%s1267_s1 + $0x50] sm:$0xff] }
   0x6   :  { %400 = vmatpush.bf16.msra.mxu0 %v871_v3  ;;  %937 = vmatpush.bf16.msra.mxu3 %v871_v3  ;;  %v1026_v11 = vld [vmem:[%s1267_s1 + $0xa0] sm:$0xff]  ;;  %v1038_v14 = vld [vmem:[%s1267_s1 + $0x98] sm:$0xff]  ;;  %v1050_v17 = vld [vmem:[%s1267_s1 + $0x90] sm:$0xff] }
   0x7   :  { %449 = vmatpush.bf16.msra.mxu1 %v996_v4  ;;  %v866_v18 = vld [vmem:[%s1267_s1 + $0x8] sm:$0xff]  ;;  %v865_v21 = vld [vmem:[%s1267_s1] sm:$0xff]  ;;  %v723_v26 = vld [vmem:[%s1268_s0 + $0x90] sm:$0xf] }
   0x8   :  { %498 = vmatpush.bf16.msra.mxu2 %v1001_v5  ;;  %v874_v19 = vld [vmem:[%s1267_s1 + $0x48] sm:$0xff]  ;;  %v873_v22 = vld [vmem:[%s1267_s1 + $0x40] sm:$0xff]  ;;  %v860_v27 = vld [vmem:[%s1268_s0 + $0x98] sm:$0xf0] }
   0x9   :  { %v1062_v20 = vld [vmem:[%s1267_s1 + $0x88] sm:$0xff]  ;;  %v1073_v23 = vld [vmem:[%s1267_s1 + $0x80] sm:$0xff]  ;;  %v653_v29 = vld [vmem:[%s1268_s0 + $0xc] sm:$0xf0]  ;;  %v724_v33 = vor.u32 %v860_v27, %v723_v26 }
   0xa   :  { %401 = vmatpush.bf16.msra.mxu0 %v870_v6  ;;  %938 = vmatpush.bf16.msra.mxu3 %v870_v6  ;;  %v651_v24 = vld [vmem:[%s1268_s0] sm:$0xf]  ;;  %v842_v25 = vld [vmem:[%s1268_s0 + $0x8] sm:$0xf0]  ;;  %v841_v28 = vld [vmem:[%s1268_s0 + $0x4] sm:$0xf] }
   0xb   :  { %450 = vmatpush.bf16.msra.mxu1 %v878_v7  ;;  %v659_v30 = vld [vmem:[%s1268_s0 + $0x8] sm:$0xf]  ;;  %v843_v31 = vld [vmem:[%s1268_s0 + $0x10] sm:$0xf0]  ;;  %v652_v32 = vor.u32 %v842_v25, %v651_v24  ;;  %v656_v34 = vor.u32 %v841_v28, %v653_v29  ;;  %v663_v36 = vld [vmem:[%s1268_s0 + $0x18] sm:$0xf] }
   0xc   :  { %499 = vmatpush.bf16.msra.mxu2 %v1014_v8  ;;  %v660_v35 = vor.u32 %v843_v31, %v659_v30  ;;  %v845_v37 = vld [vmem:[%s1268_s0 + $0x20] sm:$0xf0]  ;;  %v735_v38 = vld [vmem:[%s1268_s0 + $0xa8] sm:$0xf]  ;;  %v863_v39 = vld [vmem:[%s1268_s0 + $0xb0] sm:$0xf0] }
   0xd   :  { %v844_v40 = vld [vmem:[%s1268_s0 + $0x1c] sm:$0xf]  ;;  %v665_v41 = vld [vmem:[%s1268_s0 + $0x24] sm:$0xf0]  ;;  %v671_v42 = vld [vmem:[%s1268_s0 + $0x20] sm:$0xf]  ;;  %v664_v44 = vor.u32 %v845_v37, %v663_v36  ;;  %v736_v45 = vor.u32 %v863_v39, %v735_v38 }
   0xe   :  { %402 = vmatpush.bf16.msra.mxu0 %v869_v9  ;;  %939 = vmatpush.bf16.msra.mxu3 %v869_v9  ;;  %v846_v43 = vld [vmem:[%s1268_s0 + $0x28] sm:$0xf0]  ;;  %v668_v46 = vor.u32 %v844_v40, %v665_v41  ;;  %v675_v48 = vld [vmem:[%s1268_s0 + $0x30] sm:$0xf]  ;;  %v848_v49 = vld [vmem:[%s1268_s0 + $0x38] sm:$0xf0] }
   0xf   :  { %451 = vmatpush.bf16.msra.mxu1 %v877_v10  ;;  %v672_v47 = vor.u32 %v846_v43, %v671_v42  ;;  %v847_v50 = vld [vmem:[%s1268_s0 + $0x34] sm:$0xf]  ;;  %v725_v52 = vld [vmem:[%s1268_s0 + $0x9c] sm:$0xf0]  ;;  %v683_v54 = vld [vmem:[%s1268_s0 + $0x38] sm:$0xf]  ;;  %v676_v56 = vor.u32 %v848_v49, %v675_v48 }
  0x10   :  { %500 = vmatpush.bf16.msra.mxu2 %v1026_v11  ;;  %v859_v51 = vld [vmem:[%s1268_s0 + $0x94] sm:$0xf]  ;;  %v677_v53 = vld [vmem:[%s1268_s0 + $0x3c] sm:$0xf0]  ;;  %v849_v55 = vld [vmem:[%s1268_s0 + $0x40] sm:$0xf0] }
  0x11   :  { %v728_v57 = vor.u32 %v859_v51, %v725_v52  ;;  %v680_v58 = vor.u32 %v847_v50, %v677_v53  ;;  %v684_v59 = vor.u32 %v849_v55, %v683_v54  ;;  %v687_v60 = vld [vmem:[%s1268_s0 + $0x48] sm:$0xf]  ;;  %v851_v61 = vld [vmem:[%s1268_s0 + $0x50] sm:$0xf0]  ;;  %v850_v62 = vld [vmem:[%s1268_s0 + $0x4c] sm:$0xf] }
  0x12   :  { %403 = vmatpush.bf16.msra.mxu0 %v868_v12  ;;  %940 = vmatpush.bf16.msra.mxu3 %v868_v12  ;;  %v862_v63 = vld [vmem:[%s1268_s0 + $0xac] sm:$0xf]  ;;  %v737_v0 = vld [vmem:[%s1268_s0 + $0xb4] sm:$0xf0]  ;;  %v852_v3 = vld [vmem:[%s1268_s0 + $0x58] sm:$0xf0] }
  0x13   :  { %452 = vmatpush.bf16.msra.mxu1 %v876_v13  ;;  %v854_v9 = vld [vmem:[%s1268_s0 + $0x68] sm:$0xf0]  ;;  %v861_v12 = vld [vmem:[%s1268_s0 + $0xa0] sm:$0xf0]  ;;  %v864_v24 = vld [vmem:[%s1268_s0 + $0xb8] sm:$0xf0] }
  0x14   :  { %501 = vmatpush.bf16.msra.mxu2 %v1038_v14  ;;  %v713_v25 = vld [vmem:[%s1268_s0 + $0x84] sm:$0xf0]  ;;  %v719_v26 = vld [vmem:[%s1268_s0 + $0x80] sm:$0xf]  ;;  %v858_v27 = vld [vmem:[%s1268_s0 + $0x88] sm:$0xf0] }
  0x15   :  { %v720_v31 = vor.u32 %v858_v27, %v719_v26 }
  0x16   :  { %404 = vmatpush.bf16.msra.mxu0 %v867_v15  ;;  %941 = vmatpush.bf16.msra.mxu3 %v867_v15  ;;  %v855_v15 = vld [vmem:[%s1268_s0 + $0x70] sm:$0xf0] }
  0x17   :  { %453 = vmatpush.bf16.msra.mxu1 %v875_v16 }
  0x18   :  { %502 = vmatpush.bf16.msra.mxu2 %v1050_v17 }
  0x1a   :  { %405 = vmatpush.bf16.msra.mxu0 %v866_v18  ;;  %942 = vmatpush.bf16.msra.mxu3 %v866_v18 }
  0x1b   :  { %454 = vmatpush.bf16.msra.mxu1 %v874_v19 }
  0x1c   :  { %503 = vmatpush.bf16.msra.mxu2 %v1062_v20 }
  0x1e   :  { %406 = vmatpush.bf16.msra.mxu0 %v865_v21  ;;  %943 = vmatpush.bf16.msra.mxu3 %v865_v21  ;;  %v857_v21 = vld [vmem:[%s1268_s0 + $0x80] sm:$0xf0] }
  0x1f   :  { %455 = vmatpush.bf16.msra.mxu1 %v873_v22 }
  0x20   :  { %504 = vmatpush.bf16.msra.mxu2 %v1073_v23 }
  0x21   :  { %407 = vmatmul.bf16.vlgmr.msra.gmra.mxu0 %v652_v32  ;;  %437 = vmatmul.bf16.vlgmr.msra.gmra.mxu3 %v724_v33 }
  0x22   :  { %944 = vmatpush.bf16.msrb.mxu3 %v981_v1  ;;  %456 = vmatmul.bf16.vlgmr.msra.gmra.mxu1 %v656_v34  ;;  %v689_v1 = vld [vmem:[%s1268_s0 + $0x54] sm:$0xf0] }
  0x23   :  { %505 = vmatmul.bf16.vlgmr.msra.gmra.mxu2 %v660_v35  ;;  %v692_v6 = vor.u32 %v850_v62, %v689_v1 }
  0x26   :  { %945 = vmatpush.bf16.msrb.mxu3 %v996_v4  ;;  %v688_v4 = vor.u32 %v851_v61, %v687_v60 }
  0x2a   :  { %946 = vmatpush.bf16.msrb.mxu3 %v878_v7 }
  0x2e   :  { %947 = vmatpush.bf16.msrb.mxu3 %v877_v10  ;;  %v853_v10 = vld [vmem:[%s1268_s0 + $0x64] sm:$0xf] }
  0x31   :  { %412 = vmatmul.bf16.gmra.mxu0 %v664_v44  ;;  %442 = vmatmul.bf16.gmra.mxu3 %v736_v45 }
  0x32   :  { %948 = vmatpush.bf16.msrb.mxu3 %v876_v13  ;;  %461 = vmatmul.bf16.gmra.mxu1 %v668_v46  ;;  %v701_v13 = vld [vmem:[%s1268_s0 + $0x6c] sm:$0xf0] }
  0x33   :  { %510 = vmatmul.bf16.gmra.mxu2 %v672_v47  ;;  %v704_v18 = vor.u32 %v853_v10, %v701_v13 }
  0x36   :  { %949 = vmatpush.bf16.msrb.mxu3 %v875_v16 }
  0x3a   :  { %950 = vmatpush.bf16.msrb.mxu3 %v874_v19 }
  0x3e   :  { %951 = vmatpush.bf16.msrb.mxu3 %v873_v22  ;;  %v856_v22 = vld [vmem:[%s1268_s0 + $0x7c] sm:$0xf] }
  0x3f   :  { %v716_v30 = vor.u32 %v856_v22, %v713_v25 }
  0x41   :  { %417 = vmatmul.bf16.gmra.mxu0 %v676_v56  ;;  %486 = vmatmul.bf16.vlgmr.msrb.gmra.mxu3 %v728_v57 }
  0x42   :  { %952 = vmatpush.bf16.msra.mxu3 %v986_v2  ;;  %466 = vmatmul.bf16.gmra.mxu1 %v680_v58  ;;  %v695_v2 = vld [vmem:[%s1268_s0 + $0x50] sm:$0xf] }
  0x43   :  { %515 = vmatmul.bf16.gmra.mxu2 %v684_v59  ;;  %v696_v7 = vor.u32 %v852_v3, %v695_v2 }
  0x46   :  { %953 = vmatpush.bf16.msra.mxu3 %v1001_v5  ;;  %v740_v5 = vor.u32 %v862_v63, %v737_v0 }
  0x4a   :  { %954 = vmatpush.bf16.msra.mxu3 %v1014_v8  ;;  %v699_v8 = vld [vmem:[%s1268_s0 + $0x60] sm:$0xf] }
  0x4b   :  { %v700_v16 = vor.u32 %v854_v9, %v699_v8 }
  0x4e   :  { %955 = vmatpush.bf16.msra.mxu3 %v1026_v11  ;;  %v731_v11 = vld [vmem:[%s1268_s0 + $0x98] sm:$0xf] }
  0x51   :  { %422 = vmatmul.bf16.gmra.mxu0 %v688_v4  ;;  %491 = vmatmul.bf16.gmra.mxu3 %v740_v5 }
  0x52   :  { %956 = vmatpush.bf16.msra.mxu3 %v1038_v14  ;;  %471 = vmatmul.bf16.gmra.mxu1 %v692_v6  ;;  %v707_v14 = vld [vmem:[%s1268_s0 + $0x68] sm:$0xf] }
  0x53   :  { %520 = vmatmul.bf16.gmra.mxu2 %v696_v7  ;;  %v708_v19 = vor.u32 %v855_v15, %v707_v14 }
  0x56   :  { %957 = vmatpush.bf16.msra.mxu3 %v1050_v17  ;;  %v732_v17 = vor.u32 %v861_v12, %v731_v11 }
  0x5a   :  { %958 = vmatpush.bf16.msra.mxu3 %v1062_v20  ;;  %v711_v20 = vld [vmem:[%s1268_s0 + $0x78] sm:$0xf] }
  0x5b   :  { %v712_v28 = vor.u32 %v857_v21, %v711_v20 }
  0x5e   :  { %959 = vmatpush.bf16.msra.mxu3 %v1073_v23  ;;  %v743_v23 = vld [vmem:[%s1268_s0 + $0xb0] sm:$0xf] }
  0x5f   :  { %v744_v29 = vor.u32 %v864_v24, %v743_v23 }
  0x61   :  { %427 = vmatmul.bf16.gmra.mxu0 %v700_v16  ;;  %535 = vmatmul.bf16.vlgmr.msra.gmra.mxu3 %v732_v17 }
  0x62   :  { %476 = vmatmul.bf16.gmra.mxu1 %v704_v18 }
  0x63   :  { %525 = vmatmul.bf16.gmra.mxu2 %v708_v19 }
  0x71   :  { %432 = vmatmul.bf16.gmra.mxu0 %v712_v28  ;;  %540 = vmatmul.bf16.gmra.mxu3 %v744_v29 }
  0x72   :  { %481 = vmatmul.bf16.gmra.mxu1 %v716_v30 }
  0x73   :  { %530 = vmatmul.bf16.gmra.mxu2 %v720_v31 }
  0x9e   :  { %v408_v32 = vpop.f32.mrf.mxu0 }
  0x9f   :  { %v457_v33 = vpop.f32.mrf.mxu1 }
  0xa0   :  { %v458_v38 = vadd.f32 %v457_v33, %v408_v32 }
  0xa4   :  { %v1231_v34 = vpop.f32.mrf.mxu3 }
  0xa6   :  { %v506_v35 = vpop.f32.mrf.mxu2  ;;  %v410_v36 = vpop.f32.mrf.mxu0 }
  0xa7   :  { %v459_v37 = vpop.f32.mrf.mxu1  ;;  %v507_v39 = vadd.f32 %v506_v35, %v458_v38 }
  0xa8   :  { %v460_v40 = vadd.f32 %v459_v37, %v410_v36 }
  0xa9   :  { %v597_v46 = vmax.f32 %v507_v39, 0.0 }
  0xac   :  { %v1233_v41 = vpop.f32.mrf.mxu3 }
  0xae   :  { %v508_v42 = vpop.f32.mrf.mxu2  ;;  %v413_v44 = vpop.f32.mrf.mxu0 }
  0xaf   :  { %v509_v43 = vadd.f32 %v508_v42, %v460_v40  ;;  %v462_v45 = vpop.f32.mrf.mxu1 }
  0xb0   :  { %v463_v53 = vadd.f32 %v462_v45, %v413_v44 }
  0xb1   :  { %v598_v47 = vmax.f32 %v509_v43, 0.0 }
  0xb3   :  { %v892_v48 = vpack.c.bf16 %v598_v47, %v597_v46 }
  0xb4   :  { %v1238_v49 = vpop.f32.mrf.mxu3 }
  0xb5   :  { %893 = vst [vmem:[%s1269_s2] sm:$0xff] %v892_v48  }
  0xb6   :  { %v511_v50 = vpop.f32.mrf.mxu2  ;;  %v415_v51 = vpop.f32.mrf.mxu0 }
  0xb7   :  { %v464_v52 = vpop.f32.mrf.mxu1  ;;  %v512_v54 = vadd.f32 %v511_v50, %v463_v53 }
  0xb8   :  { %v465_v55 = vadd.f32 %v464_v52, %v415_v51 }
  0xb9   :  { %v599_v61 = vmax.f32 %v512_v54, 0.0 }
  0xbc   :  { %v1240_v56 = vpop.f32.mrf.mxu3 }
  0xbe   :  { %v513_v57 = vpop.f32.mrf.mxu2  ;;  %v418_v59 = vpop.f32.mrf.mxu0 }
  0xbf   :  { %v514_v58 = vadd.f32 %v513_v57, %v465_v55  ;;  %v467_v60 = vpop.f32.mrf.mxu1 }
  0xc0   :  { %v468_v4 = vadd.f32 %v467_v60, %v418_v59 }
  0xc1   :  { %v600_v62 = vmax.f32 %v514_v58, 0.0 }
  0xc3   :  { %v897_v63 = vpack.c.bf16 %v600_v62, %v599_v61 }
  0xc4   :  { %v487_v0 = vpop.f32.mrf.mxu3 }
  0xc5   :  { %929 = vst [vmem:[%s1269_s2 + $0x8] sm:$0xff] %v897_v63   ;;  %v488_v36 = vadd.f32 %v487_v0, %v1231_v34 }
  0xc6   :  { %v516_v1 = vpop.f32.mrf.mxu2  ;;  %v420_v2 = vpop.f32.mrf.mxu0 }
  0xc7   :  { %v469_v3 = vpop.f32.mrf.mxu1  ;;  %v517_v5 = vadd.f32 %v516_v1, %v468_v4 }
  0xc8   :  { %v470_v6 = vadd.f32 %v469_v3, %v420_v2 }
  0xc9   :  { %v601_v12 = vmax.f32 %v517_v5, 0.0 }
  0xcc   :  { %v489_v7 = vpop.f32.mrf.mxu3 }
  0xcd   :  { %v490_v37 = vadd.f32 %v489_v7, %v1233_v41 }
  0xce   :  { %v518_v8 = vpop.f32.mrf.mxu2  ;;  %v423_v10 = vpop.f32.mrf.mxu0 }
  0xcf   :  { %v519_v9 = vadd.f32 %v518_v8, %v470_v6  ;;  %v472_v11 = vpop.f32.mrf.mxu1 }
  0xd0   :  { %v473_v19 = vadd.f32 %v472_v11, %v423_v10 }
  0xd1   :  { %v602_v13 = vmax.f32 %v519_v9, 0.0 }
  0xd3   :  { %v902_v14 = vpack.c.bf16 %v602_v13, %v601_v12 }
  0xd4   :  { %v492_v15 = vpop.f32.mrf.mxu3 }
  0xd5   :  { %930 = vst [vmem:[%s1269_s2 + $0x10] sm:$0xff] %v902_v14   ;;  %v493_v57 = vadd.f32 %v492_v15, %v1238_v49 }
  0xd6   :  { %v521_v16 = vpop.f32.mrf.mxu2  ;;  %v425_v17 = vpop.f32.mrf.mxu0 }
  0xd7   :  { %v474_v18 = vpop.f32.mrf.mxu1  ;;  %v522_v20 = vadd.f32 %v521_v16, %v473_v19 }
  0xd8   :  { %v475_v21 = vadd.f32 %v474_v18, %v425_v17 }
  0xd9   :  { %v603_v27 = vmax.f32 %v522_v20, 0.0 }
  0xdc   :  { %v494_v22 = vpop.f32.mrf.mxu3 }
  0xdd   :  { %v495_v60 = vadd.f32 %v494_v22, %v1240_v56 }
  0xde   :  { %v523_v23 = vpop.f32.mrf.mxu2  ;;  %v428_v25 = vpop.f32.mrf.mxu0 }
  0xdf   :  { %v524_v24 = vadd.f32 %v523_v23, %v475_v21  ;;  %v477_v26 = vpop.f32.mrf.mxu1 }
  0xe0   :  { %v478_v35 = vadd.f32 %v477_v26, %v428_v25 }
  0xe1   :  { %v604_v28 = vmax.f32 %v524_v24, 0.0 }
  0xe3   :  { %v907_v29 = vpack.c.bf16 %v604_v28, %v603_v27 }
  0xe4   :  { %v536_v30 = vpop.f32.mrf.mxu3 }
  0xe5   :  { %931 = vst [vmem:[%s1269_s2 + $0x18] sm:$0xff] %v907_v29   ;;  %v537_v38 = vadd.f32 %v536_v30, %v488_v36 }
  0xe6   :  { %v526_v31 = vpop.f32.mrf.mxu2  ;;  %v430_v32 = vpop.f32.mrf.mxu0 }
  0xe7   :  { %v479_v33 = vpop.f32.mrf.mxu1  ;;  %v527_v39 = vadd.f32 %v526_v31, %v478_v35  ;;  %v609_v46 = vmax.f32 %v537_v38, 0.0 }
  0xe8   :  { %v480_v40 = vadd.f32 %v479_v33, %v430_v32 }
  0xe9   :  { %v605_v51 = vmax.f32 %v527_v39, 0.0 }
  0xec   :  { %v538_v42 = vpop.f32.mrf.mxu3 }
  0xed   :  { %v539_v44 = vadd.f32 %v538_v42, %v490_v37 }
  0xee   :  { %v528_v43 = vpop.f32.mrf.mxu2  ;;  %v433_v48 = vpop.f32.mrf.mxu0 }
  0xef   :  { %v529_v45 = vadd.f32 %v528_v43, %v480_v40  ;;  %v610_v47 = vmax.f32 %v539_v44, 0.0  ;;  %v482_v50 = vpop.f32.mrf.mxu1 }
  0xf0   :  { %v483_v55 = vadd.f32 %v482_v50, %v433_v48 }
  0xf1   :  { %v606_v52 = vmax.f32 %v529_v45, 0.0  ;;  %v922_v53 = vpack.c.bf16 %v610_v47, %v609_v46 }
  0xf3   :  { %v912_v54 = vpack.c.bf16 %v606_v52, %v605_v51  ;;  %934 = vst [vmem:[%s1269_s2 + $0x30] sm:$0xff] %v922_v53  }
  0xf4   :  { %v541_v34 = vpop.f32.mrf.mxu3 }
  0xf5   :  { %932 = vst [vmem:[%s1269_s2 + $0x20] sm:$0xff] %v912_v54   ;;  %v542_v61 = vadd.f32 %v541_v34, %v493_v57 }
  0xf6   :  { %v531_v41 = vpop.f32.mrf.mxu2  ;;  %v435_v58 = vpop.f32.mrf.mxu0 }
  0xf7   :  { %v484_v59 = vpop.f32.mrf.mxu1  ;;  %v532_v62 = vadd.f32 %v531_v41, %v483_v55  ;;  %v611_v4 = vmax.f32 %v542_v61, 0.0 }
  0xf8   :  { %v485_v63 = vadd.f32 %v484_v59, %v435_v58 }
  0xf9   :  { %v607_v6 = vmax.f32 %v532_v62, 0.0 }
  0xfc   :  { %v543_v0 = vpop.f32.mrf.mxu3 }
  0xfd   :  { %v544_v2 = vadd.f32 %v543_v0, %v495_v60 }
  0xfe   :  { %v533_v1 = vpop.f32.mrf.mxu2 }
  0xff   :  { %v534_v3 = vadd.f32 %v533_v1, %v485_v63  ;;  %v612_v5 = vmax.f32 %v544_v2, 0.0 }
 0x101   :  { %v608_v7 = vmax.f32 %v534_v3, 0.0  ;;  %v927_v8 = vpack.c.bf16 %v612_v5, %v611_v4 }
 0x103   :  { %v917_v9 = vpack.c.bf16 %v608_v7, %v607_v6  ;;  %935 = vst [vmem:[%s1269_s2 + $0x38] sm:$0xff] %v927_v8  }
 0x105   :  { %933 = vst [vmem:[%s1269_s2 + $0x28] sm:$0xff] %v917_v9  }

// kernel: _lambda_.238
= control target key start
LH: loop header
LB: loop body
LE: loop exit
PB: predicated region body
PF: predicated region fallthrough
CT: control target
= control target key end

     0   :  { %s641_s1 = inlined_call_operand.vmem [shape: bf16[384,128], index: 1, kind: input, shape index: {}]   ;;  %s642_s0 = inlined_call_operand.vmem [shape: bf16[32,384], index: 0, kind: input, shape index: {}]   ;;  %s643_s2 = inlined_call_operand.vmem [shape: bf16[32,128], index: 2, kind: output, shape index: {}]  }
   0x1   :  { %v476_v0 = vld [vmem:[%s641_s1 + $0x38] sm:$0xff]  ;;  %v475_v3 = vld [vmem:[%s641_s1 + $0x30] sm:$0xff]  ;;  %v474_v6 = vld [vmem:[%s641_s1 + $0x28] sm:$0xff] }
   0x2   :  { %v484_v1 = vld [vmem:[%s641_s1 + $0x78] sm:$0xff]  ;;  %255 = vmatpush.bf16.msra.mxu0 %v476_v0  ;;  %v483_v4 = vld [vmem:[%s641_s1 + $0x70] sm:$0xff]  ;;  %504 = vmatpush.bf16.msra.mxu3 %v476_v0  ;;  %v482_v7 = vld [vmem:[%s641_s1 + $0x68] sm:$0xff] }
   0x3   :  { %v492_v2 = vld [vmem:[%s641_s1 + $0xb8] sm:$0xff]  ;;  %274 = vmatpush.bf16.msra.mxu1 %v484_v1  ;;  %v491_v5 = vld [vmem:[%s641_s1 + $0xb0] sm:$0xff]  ;;  %v490_v8 = vld [vmem:[%s641_s1 + $0xa8] sm:$0xff] }
   0x4   :  { %293 = vmatpush.bf16.msra.mxu2 %v492_v2  ;;  %v473_v9 = vld [vmem:[%s641_s1 + $0x20] sm:$0xff]  ;;  %v472_v12 = vld [vmem:[%s641_s1 + $0x18] sm:$0xff]  ;;  %v471_v15 = vld [vmem:[%s641_s1 + $0x10] sm:$0xff] }
   0x5   :  { %v481_v10 = vld [vmem:[%s641_s1 + $0x60] sm:$0xff]  ;;  %v480_v13 = vld [vmem:[%s641_s1 + $0x58] sm:$0xff]  ;;  %v479_v16 = vld [vmem:[%s641_s1 + $0x50] sm:$0xff] }
   0x6   :  { %256 = vmatpush.bf16.msra.mxu0 %v475_v3  ;;  %505 = vmatpush.bf16.msra.mxu3 %v475_v3  ;;  %v489_v11 = vld [vmem:[%s641_s1 + $0xa0] sm:$0xff]  ;;  %v488_v14 = vld [vmem:[%s641_s1 + $0x98] sm:$0xff]  ;;  %v487_v17 = vld [vmem:[%s641_s1 + $0x90] sm:$0xff] }
   0x7   :  { %275 = vmatpush.bf16.msra.mxu1 %v483_v4  ;;  %v470_v18 = vld [vmem:[%s641_s1 + $0x8] sm:$0xff]  ;;  %v469_v21 = vld [vmem:[%s641_s1] sm:$0xff]  ;;  %v347_v27 = vld [vmem:[%s642_s0 + $0xc] sm:$0xf0] }
   0x8   :  { %294 = vmatpush.bf16.msra.mxu2 %v491_v5  ;;  %v478_v19 = vld [vmem:[%s641_s1 + $0x48] sm:$0xff]  ;;  %v477_v22 = vld [vmem:[%s641_s1 + $0x40] sm:$0xff]  ;;  %v465_v29 = vld [vmem:[%s642_s0 + $0x10] sm:$0xf0] }
   0x9   :  { %v486_v20 = vld [vmem:[%s641_s1 + $0x88] sm:$0xff]  ;;  %v485_v23 = vld [vmem:[%s641_s1 + $0x80] sm:$0xff]  ;;  %v357_v30 = vld [vmem:[%s642_s0 + $0x18] sm:$0xf] }
   0xa   :  { %257 = vmatpush.bf16.msra.mxu0 %v474_v6  ;;  %506 = vmatpush.bf16.msra.mxu3 %v474_v6  ;;  %v345_v24 = vld [vmem:[%s642_s0] sm:$0xf]  ;;  %v464_v25 = vld [vmem:[%s642_s0 + $0x8] sm:$0xf0]  ;;  %v463_v26 = vld [vmem:[%s642_s0 + $0x4] sm:$0xf] }
   0xb   :  { %276 = vmatpush.bf16.msra.mxu1 %v482_v7  ;;  %v353_v28 = vld [vmem:[%s642_s0 + $0x8] sm:$0xf]  ;;  %v467_v31 = vld [vmem:[%s642_s0 + $0x20] sm:$0xf0]  ;;  %v346_v32 = vor.u32 %v464_v25, %v345_v24  ;;  %v350_v33 = vor.u32 %v463_v26, %v347_v27  ;;  %v466_v36 = vld [vmem:[%s642_s0 + $0x1c] sm:$0xf] }
   0xc   :  { %295 = vmatpush.bf16.msra.mxu2 %v490_v8  ;;  %v354_v34 = vor.u32 %v465_v29, %v353_v28  ;;  %v358_v35 = vor.u32 %v467_v31, %v357_v30  ;;  %v359_v37 = vld [vmem:[%s642_s0 + $0x24] sm:$0xf0]  ;;  %v365_v38 = vld [vmem:[%s642_s0 + $0x20] sm:$0xf]  ;;  %v468_v39 = vld [vmem:[%s642_s0 + $0x28] sm:$0xf0] }
   0xd   :  { %v362_v40 = vor.u32 %v466_v36, %v359_v37  ;;  %v366_v41 = vor.u32 %v468_v39, %v365_v38 }
   0xe   :  { %258 = vmatpush.bf16.msra.mxu0 %v473_v9  ;;  %507 = vmatpush.bf16.msra.mxu3 %v473_v9 }
   0xf   :  { %277 = vmatpush.bf16.msra.mxu1 %v481_v10 }
  0x10   :  { %296 = vmatpush.bf16.msra.mxu2 %v489_v11 }
  0x12   :  { %259 = vmatpush.bf16.msra.mxu0 %v472_v12  ;;  %508 = vmatpush.bf16.msra.mxu3 %v472_v12 }
  0x13   :  { %278 = vmatpush.bf16.msra.mxu1 %v480_v13 }
  0x14   :  { %297 = vmatpush.bf16.msra.mxu2 %v488_v14 }
  0x16   :  { %260 = vmatpush.bf16.msra.mxu0 %v471_v15  ;;  %509 = vmatpush.bf16.msra.mxu3 %v471_v15 }
  0x17   :  { %279 = vmatpush.bf16.msra.mxu1 %v479_v16 }
  0x18   :  { %298 = vmatpush.bf16.msra.mxu2 %v487_v17 }
  0x1a   :  { %261 = vmatpush.bf16.msra.mxu0 %v470_v18  ;;  %510 = vmatpush.bf16.msra.mxu3 %v470_v18 }
  0x1b   :  { %280 = vmatpush.bf16.msra.mxu1 %v478_v19 }
  0x1c   :  { %299 = vmatpush.bf16.msra.mxu2 %v486_v20 }
  0x1e   :  { %262 = vmatpush.bf16.msra.mxu0 %v469_v21  ;;  %511 = vmatpush.bf16.msra.mxu3 %v469_v21 }
  0x1f   :  { %281 = vmatpush.bf16.msra.mxu1 %v477_v22 }
  0x20   :  { %300 = vmatpush.bf16.msra.mxu2 %v485_v23 }
  0x21   :  { %263 = vmatmul.bf16.vlgmr.msra.gmra.mxu0 %v346_v32  ;;  %268 = vmatmul.bf16.vlgmr.msra.gmra.mxu3 %v358_v35 }
  0x22   :  { %282 = vmatmul.bf16.vlgmr.msra.gmra.mxu1 %v350_v33 }
  0x23   :  { %301 = vmatmul.bf16.vlgmr.msra.gmra.mxu2 %v354_v34 }
  0x32   :  { %287 = vmatmul.bf16.gmra.mxu1 %v362_v40 }
  0x33   :  { %306 = vmatmul.bf16.gmra.mxu2 %v366_v41 }
  0x9e   :  { %v264_v43 = vpop.f32.mrf.mxu0 }
  0x9f   :  { %v283_v42 = vpop.f32.mrf.mxu1 }
  0xa0   :  { %v284_v46 = vadd.f32 %v283_v42, %v264_v43 }
  0xa4   :  { %v269_v55 = vpop.f32.mrf.mxu3 }
  0xa6   :  { %v302_v44 = vpop.f32.mrf.mxu2  ;;  %v266_v47 = vpop.f32.mrf.mxu0 }
  0xa7   :  { %v285_v45 = vpop.f32.mrf.mxu1  ;;  %v303_v48 = vadd.f32 %v302_v44, %v284_v46 }
  0xa8   :  { %v286_v49 = vadd.f32 %v285_v45, %v266_v47 }
  0xa9   :  { %v327_v53 = vmax.f32 %v303_v48, 0.0 }
  0xac   :  { %v271_v60 = vpop.f32.mrf.mxu3 }
  0xae   :  { %v304_v50 = vpop.f32.mrf.mxu2 }
  0xaf   :  { %v305_v51 = vadd.f32 %v304_v50, %v286_v49  ;;  %v288_v52 = vpop.f32.mrf.mxu1 }
  0xb0   :  { %v289_v58 = vadd.f32 %v288_v52, %v269_v55 }
  0xb1   :  { %v328_v54 = vmax.f32 %v305_v51, 0.0 }
  0xb3   :  { %v496_v56 = vpack.c.bf16 %v328_v54, %v327_v53 }
  0xb5   :  { %497 = vst [vmem:[%s643_s2] sm:$0xff] %v496_v56  }
  0xb6   :  { %v307_v57 = vpop.f32.mrf.mxu2 }
  0xb7   :  { %v290_v59 = vpop.f32.mrf.mxu1  ;;  %v308_v61 = vadd.f32 %v307_v57, %v289_v58 }
  0xb8   :  { %v291_v62 = vadd.f32 %v290_v59, %v271_v60 }
  0xb9   :  { %v329_v1 = vmax.f32 %v308_v61, 0.0 }
  0xbe   :  { %v309_v63 = vpop.f32.mrf.mxu2 }
  0xbf   :  { %v310_v0 = vadd.f32 %v309_v63, %v291_v62 }
  0xc1   :  { %v330_v2 = vmax.f32 %v310_v0, 0.0 }
  0xc3   :  { %v501_v3 = vpack.c.bf16 %v330_v2, %v329_v1 }
  0xc5   :  { %503 = vst [vmem:[%s643_s2 + $0x8] sm:$0xff] %v501_v3  }

// kernel: _lambda_.240
= control target key start
LH: loop header
LB: loop body
LE: loop exit
PB: predicated region body
PF: predicated region fallthrough
CT: control target
= control target key end

     0   :  { %s237_s1 = inlined_call_operand.vmem [shape: bf16[128,128], index: 1, kind: input, shape index: {}]   ;;  %s238_s2 = inlined_call_operand.vmem [shape: f32[1,128], index: 2, kind: input, shape index: {}]   ;;  %s239_s0 = inlined_call_operand.vmem [shape: bf16[16,128], index: 0, kind: input, shape index: {}]   ;;  %s240_s3 = inlined_call_operand.vmem [shape: bf16[16,128], index: 3, kind: output, shape index: {}]  }
   0x1   :  { %v177_v0 = vld [vmem:[%s237_s1 + $0x38] sm:$0xff]  ;;  %v176_v1 = vld [vmem:[%s237_s1 + $0x30] sm:$0xff]  ;;  %v175_v2 = vld [vmem:[%s237_s1 + $0x28] sm:$0xff] }
   0x2   :  { %94 = vmatpush.bf16.msra.mxu0 %v177_v0  ;;  %v174_v3 = vld [vmem:[%s237_s1 + $0x20] sm:$0xff]  ;;  %v173_v4 = vld [vmem:[%s237_s1 + $0x18] sm:$0xff]  ;;  %v172_v5 = vld [vmem:[%s237_s1 + $0x10] sm:$0xff] }
   0x3   :  { %v171_v6 = vld [vmem:[%s237_s1 + $0x8] sm:$0xff]  ;;  %v170_v7 = vld [vmem:[%s237_s1] sm:$0xff] }
   0x4   :  { %v169_v8 = vld [vmem:[%s239_s0] sm:$0xff] }
   0x5   :  { %v183_v10 = vld [vmem:[%s238_s2] ss:$0 sm:$0xff] }
   0x6   :  { %95 = vmatpush.bf16.msra.mxu0 %v176_v1 }
   0xa   :  { %96 = vmatpush.bf16.msra.mxu0 %v175_v2 }
   0xe   :  { %97 = vmatpush.bf16.msra.mxu0 %v174_v3 }
  0x12   :  { %98 = vmatpush.bf16.msra.mxu0 %v173_v4 }
  0x16   :  { %99 = vmatpush.bf16.msra.mxu0 %v172_v5 }
  0x1a   :  { %100 = vmatpush.bf16.msra.mxu0 %v171_v6 }
  0x1e   :  { %101 = vmatpush.bf16.msra.mxu0 %v170_v7 }
  0x21   :  { %102 = vmatmul.bf16.vlgmr.msra.gmra.mxu0 %v169_v8 }
  0x9e   :  { %v103_v9 = vpop.f32.mrf.mxu0 }
  0x9f   :  { %v121_v11 = vadd.f32 %v183_v10, %v103_v9 }
  0xa1   :  { %v123_v14 = vmax.f32 %v121_v11, 0.0 }
  0xa6   :  { %v105_v12 = vpop.f32.mrf.mxu0 }
  0xa7   :  { %v122_v13 = vadd.f32 %v183_v10, %v105_v12 }
  0xa9   :  { %v124_v15 = vmax.f32 %v122_v13, 0.0 }
  0xab   :  { %v181_v16 = vpack.c.bf16 %v124_v15, %v123_v14 }
  0xad   :  { %182 = vst [vmem:[%s240_s3] sm:$0xff] %v181_v16  }

// kernel: _lambda_.241
= control target key start
LH: loop header
LB: loop body
LE: loop exit
PB: predicated region body
PF: predicated region fallthrough
CT: control target
= control target key end

     0   :  { %s283_s1 = inlined_call_operand.vmem [shape: bf16[128,128], index: 1, kind: input, shape index: {}]   ;;  %s284_s2 = inlined_call_operand.vmem [shape: f32[1,128], index: 2, kind: input, shape index: {}]   ;;  %s285_s0 = inlined_call_operand.vmem [shape: bf16[16,128], index: 0, kind: input, shape index: {}]   ;;  %s286_s3 = inlined_call_operand.vmem [shape: bf16[16,128], index: 3, kind: output, shape index: {}]  }
   0x1   :  { %v215_v0 = vld [vmem:[%s283_s1 + $0x38] sm:$0xff]  ;;  %v214_v1 = vld [vmem:[%s283_s1 + $0x30] sm:$0xff]  ;;  %v213_v2 = vld [vmem:[%s283_s1 + $0x28] sm:$0xff] }
   0x2   :  { %94 = vmatpush.bf16.msra.mxu0 %v215_v0  ;;  %v212_v3 = vld [vmem:[%s283_s1 + $0x20] sm:$0xff]  ;;  %v211_v4 = vld [vmem:[%s283_s1 + $0x18] sm:$0xff]  ;;  %v210_v5 = vld [vmem:[%s283_s1 + $0x10] sm:$0xff] }
   0x3   :  { %v209_v6 = vld [vmem:[%s283_s1 + $0x8] sm:$0xff]  ;;  %v208_v7 = vld [vmem:[%s283_s1] sm:$0xff] }
   0x4   :  { %v207_v8 = vld [vmem:[%s285_s0] sm:$0xff] }
   0x5   :  { %v221_v9 = vld [vmem:[%s284_s2] ss:$0 sm:$0xff] }
   0x6   :  { %95 = vmatpush.bf16.msra.mxu0 %v214_v1 }
   0xa   :  { %96 = vmatpush.bf16.msra.mxu0 %v213_v2 }
   0xe   :  { %97 = vmatpush.bf16.msra.mxu0 %v212_v3 }
  0x12   :  { %98 = vmatpush.bf16.msra.mxu0 %v211_v4 }
  0x16   :  { %99 = vmatpush.bf16.msra.mxu0 %v210_v5 }
  0x1a   :  { %100 = vmatpush.bf16.msra.mxu0 %v209_v6 }
  0x1e   :  { %101 = vmatpush.bf16.msra.mxu0 %v208_v7 }
  0x21   :  { %102 = vmatmul.bf16.vlgmr.msra.gmra.mxu0 %v207_v8 }
  0x9e   :  { %v103_v10 = vpop.f32.mrf.mxu0 }
  0x9f   :  { %v121_v11 = vadd.f32 %v221_v9, %v103_v10 }
  0xa1   :  { %v205_v12 = vmul.f32 -1.442695, %v121_v11 }
  0xa3   :  { %222 = vpow2.f32 %v205_v12 }
  0xa6   :  { %v105_v13 = vpop.f32.mrf.mxu0 }
  0xa7   :  { %v122_v14 = vadd.f32 %v221_v9, %v105_v13 }
  0xa9   :  { %v223_v15 = vpop.eup %222  ;;  %v206_v16 = vmul.f32 -1.442695, %v122_v14 }
  0xaa   :  { %v129_v17 = vadd.f32 1.0, %v223_v15 }
  0xab   :  { %224 = vpow2.f32 %v206_v16 }
  0xac   :  { %226 = vrcp.f32 %v129_v17  ;;  %vm136_vm1 = vweird.f32 %v129_v17  ;;  %v142_v28 = vand.u32 2147483648, %v129_v17  ;;  %v140_v30 = vand.u32 2147483647, %v129_v17 }
  0xae   :  { %v143_v35 = vor.u32 1.1754944e-38, %v142_v28  ;;  %vm141_vm6 = vcmp.eq.f32.partialorder %v140_v30, 8.507059e+37 }
  0xb1   :  { %v225_v18 = vpop.eup %224 }
  0xb2   :  { %v227_v19 = vpop.eup %226  ;;  %v130_v20 = vadd.f32 1.0, %v225_v18 }
  0xb3   :  { %v132_v21 = vmul.f32 %v227_v19, %v129_v17  ;;  %vm137_vm0 = vweird.f32 %v227_v19 }
  0xb4   :  { %228 = vrcp.f32 %v130_v20  ;;  %v157_v29 = vand.u32 2147483648, %v130_v20  ;;  %v155_v32 = vand.u32 2147483647, %v130_v20  ;;  %vm138_vm3 = vmor %vm136_vm1, %vm137_vm0  ;;  %vm151_vm4 = vweird.f32 %v130_v20 }
  0xb5   :  { %v133_v22 = vsub.f32 1.0, %v132_v21 }
  0xb6   :  { %v158_v36 = vor.u32 1.1754944e-38, %v157_v29  ;;  %vm156_vm7 = vcmp.eq.f32.partialorder %v155_v32, 8.507059e+37 }
  0xb7   :  { %v134_v23 = vmul.f32 %v227_v19, %v133_v22 }
  0xb9   :  { %v135_v26 = vadd.f32 %v227_v19, %v134_v23 }
  0xba   :  { %v229_v24 = vpop.eup %228 }
  0xbb   :  { %v147_v25 = vmul.f32 %v229_v24, %v130_v20  ;;  %vm152_vm2 = vweird.f32 %v229_v24  ;;  %v139_v33 = vsel %vm138_vm3, %v227_v19, %v135_v26 }
  0xbc   :  { %vm153_vm5 = vmor %vm151_vm4, %vm152_vm2  ;;  %v144_v38 = vsel %vm141_vm6, %v143_v35, %v139_v33 }
  0xbd   :  { %v148_v27 = vsub.f32 1.0, %v147_v25 }
  0xbf   :  { %v149_v31 = vmul.f32 %v229_v24, %v148_v27 }
  0xc1   :  { %v150_v34 = vadd.f32 %v229_v24, %v149_v31 }
  0xc3   :  { %v154_v37 = vsel %vm153_vm5, %v229_v24, %v150_v34 }
  0xc4   :  { %v159_v39 = vsel %vm156_vm7, %v158_v36, %v154_v37 }
  0xc5   :  { %v219_v40 = vpack.c.bf16 %v159_v39, %v144_v38 }
  0xc7   :  { %220 = vst [vmem:[%s286_s3] sm:$0xff] %v219_v40  }

// kernel: _lambda_.239
= control target key start
LH: loop header
LB: loop body
LE: loop exit
PB: predicated region body
PF: predicated region fallthrough
CT: control target
= control target key end

     0   :  { %7 = vsyncpa [#allocation4], 0  ;;  %s265_s12 = smov [#allocation3]   ;;  %s266_s14 = smov 64   ;;  %s298_s0 = inlined_call_operand.vmem [shape: bf16[32,128], index: 0, kind: input, shape index: {}]   ;;  %s299_s1 = inlined_call_operand.hbm [shape: bf16[128,128], index: 1, kind: input, shape index: {}]   ;;  %s300_s2 = inlined_call_operand.vmem [shape: bf16[32,128], index: 2, kind: output, shape index: {}]  }
   0x1   :  { %s14_s11 = sshll.u32 %s299_s1, 4  ;;  %s16_s13 = sshll.u32 %s265_s12, 4  ;;  %s15_s11 = int_to_ptr.hbm [resolvable:$true] %s14_s11  ;;  %s17_s13 = int_to_ptr.vmem [resolvable:$true] %s16_s13 }
   0x2   :  { %s267_s15 = smov 4  }
   0x3   :  { %22 = dma.hbm_to_vmem [thread:$0]  %s15_s11, 1024, %s17_s13, [#allocation4], %s266_s14, %s266_s14, %s267_s15  }
   0x4   :  { %263 = dma.done.wait [#allocation4], 1024  }
   0x5   :  { %264 = vsyncadd [#allocation4], 4294966272  ;;  %v207_v0 = vld [vmem:[#allocation3 + $0x38] sm:$0xff]  ;;  %v206_v1 = vld [vmem:[#allocation3 + $0x30] sm:$0xff] }
   0x6   :  { %117 = vmatpush.bf16.msra.mxu0 %v207_v0  ;;  %228 = vmatpush.bf16.msra.mxu1 %v207_v0  ;;  %v205_v2 = vld [vmem:[#allocation3 + $0x28] sm:$0xff]  ;;  %v204_v3 = vld [vmem:[#allocation3 + $0x20] sm:$0xff]  ;;  %v203_v4 = vld [vmem:[#allocation3 + $0x18] sm:$0xff] }
   0x7   :  { %v202_v5 = vld [vmem:[#allocation3 + $0x10] sm:$0xff]  ;;  %v209_v6 = vld [vmem:[%s298_s0] sm:$0xff]   ;;  %v226_v7 = vld [vmem:[%s298_s0 + $0x8] sm:$0xff]  }
   0x8   :  { %v210_v8 = vunpack.c.l.bf16 %v209_v6  ;;  %v211_v9 = vunpack.c.h.bf16 %v209_v6  ;;  %v214_v10 = vunpack.c.l.bf16 %v226_v7  ;;  %v215_v11 = vunpack.c.h.bf16 %v226_v7  ;;  %v201_v12 = vld [vmem:[#allocation3 + $0x8] sm:$0xff]  ;;  %v200_v17 = vld [vmem:[#allocation3] sm:$0xff] }
   0xa   :  { %118 = vmatpush.bf16.msra.mxu0 %v206_v1  ;;  %229 = vmatpush.bf16.msra.mxu1 %v206_v1  ;;  %v43_v13 = vmax.f32 %v210_v8, 0.0  ;;  %v44_v14 = vmax.f32 %v211_v9, 0.0  ;;  %v45_v15 = vmax.f32 %v214_v10, 0.0  ;;  %v46_v16 = vmax.f32 %v215_v11, 0.0 }
   0xc   :  { %v47_v18 = vpack.c.bf16 %v44_v14, %v43_v13  ;;  %v48_v19 = vpack.c.bf16 %v46_v16, %v45_v15 }
   0xe   :  { %119 = vmatpush.bf16.msra.mxu0 %v205_v2  ;;  %230 = vmatpush.bf16.msra.mxu1 %v205_v2 }
  0x12   :  { %120 = vmatpush.bf16.msra.mxu0 %v204_v3  ;;  %231 = vmatpush.bf16.msra.mxu1 %v204_v3 }
  0x16   :  { %121 = vmatpush.bf16.msra.mxu0 %v203_v4  ;;  %232 = vmatpush.bf16.msra.mxu1 %v203_v4 }
  0x1a   :  { %122 = vmatpush.bf16.msra.mxu0 %v202_v5  ;;  %233 = vmatpush.bf16.msra.mxu1 %v202_v5 }
  0x1e   :  { %123 = vmatpush.bf16.msra.mxu0 %v201_v12  ;;  %234 = vmatpush.bf16.msra.mxu1 %v201_v12 }
  0x22   :  { %124 = vmatpush.bf16.msra.mxu0 %v200_v17  ;;  %235 = vmatpush.bf16.msra.mxu1 %v200_v17 }
  0x25   :  { %125 = vmatmul.bf16.vlgmr.msra.gmra.mxu0 %v47_v18  ;;  %130 = vmatmul.bf16.vlgmr.msra.gmra.mxu1 %v48_v19 }
  0xa2   :  { %v126_v20 = vpop.f32.mrf.mxu0  ;;  %v131_v21 = vpop.f32.mrf.mxu1 }
  0xa3   :  { %v151_v24 = vmax.f32 %v126_v20, 0.0  ;;  %v153_v25 = vmax.f32 %v131_v21, 0.0 }
  0xaa   :  { %v128_v22 = vpop.f32.mrf.mxu0  ;;  %v133_v23 = vpop.f32.mrf.mxu1 }
  0xab   :  { %v152_v26 = vmax.f32 %v128_v22, 0.0  ;;  %v154_v27 = vmax.f32 %v133_v23, 0.0 }
  0xad   :  { %v219_v28 = vpack.c.bf16 %v152_v26, %v151_v24  ;;  %v224_v29 = vpack.c.bf16 %v154_v27, %v153_v25 }
  0xaf   :  { %220 = vst [vmem:[%s300_s2] sm:$0xff] %v219_v28  }
  0xb0   :  { %227 = vst [vmem:[%s300_s2 + $0x8] sm:$0xff] %v224_v29  }
  0xb1   :  { %167 = vsyncpa [#allocation4], 1 }

// kernel: _lambda_.244
= control target key start
LH: loop header
LB: loop body
LE: loop exit
PB: predicated region body
PF: predicated region fallthrough
CT: control target
= control target key end

     0   :  { %8 = vsyncpa [#allocation4], 0  ;;  %s230_s15 = smov [#allocation3]   ;;  %s231_s17 = smov 64   ;;  %s265_s0 = inlined_call_operand.vmem [shape: bf16[16,128], index: 0, kind: input, shape index: {}]   ;;  %s266_s1 = inlined_call_operand.hbm [shape: bf16[128,128], index: 1, kind: input, shape index: {}]   ;;  %s267_s2 = inlined_call_operand.vmem [shape: f32[1,128], index: 2, kind: input, shape index: {}]   ;;  %s268_s3 = inlined_call_operand.vmem [shape: bf16[16,128], index: 3, kind: output, shape index: {}]  }
   0x1   :  { %s15_s14 = sshll.u32 %s266_s1, 4  ;;  %s17_s16 = sshll.u32 %s230_s15, 4  ;;  %s16_s14 = int_to_ptr.hbm [resolvable:$true] %s15_s14  ;;  %s18_s16 = int_to_ptr.vmem [resolvable:$true] %s17_s16 }
   0x2   :  { %s232_s18 = smov 4  }
   0x3   :  { %23 = dma.hbm_to_vmem [thread:$0]  %s16_s14, 1024, %s18_s16, [#allocation4], %s231_s17, %s231_s17, %s232_s18  }
   0x4   :  { %228 = dma.done.wait [#allocation4], 1024  }
   0x5   :  { %229 = vsyncadd [#allocation4], 4294966272  ;;  %v194_v0 = vld [vmem:[#allocation3 + $0x38] sm:$0xff]  ;;  %v193_v1 = vld [vmem:[#allocation3 + $0x30] sm:$0xff] }
   0x6   :  { %110 = vmatpush.bf16.msra.mxu0 %v194_v0  ;;  %v192_v2 = vld [vmem:[#allocation3 + $0x28] sm:$0xff]  ;;  %v191_v3 = vld [vmem:[#allocation3 + $0x20] sm:$0xff]  ;;  %v190_v4 = vld [vmem:[#allocation3 + $0x18] sm:$0xff] }
   0x7   :  { %v189_v5 = vld [vmem:[#allocation3 + $0x10] sm:$0xff]  ;;  %v188_v6 = vld [vmem:[#allocation3 + $0x8] sm:$0xff]  ;;  %v187_v7 = vld [vmem:[#allocation3] sm:$0xff] }
   0x8   :  { %v186_v8 = vld [vmem:[%s265_s0] sm:$0xff] }
   0x9   :  { %v203_v10 = vld [vmem:[%s267_s2] ss:$0 sm:$0xff] }
   0xa   :  { %111 = vmatpush.bf16.msra.mxu0 %v193_v1 }
   0xe   :  { %112 = vmatpush.bf16.msra.mxu0 %v192_v2 }
  0x12   :  { %113 = vmatpush.bf16.msra.mxu0 %v191_v3 }
  0x16   :  { %114 = vmatpush.bf16.msra.mxu0 %v190_v4 }
  0x1a   :  { %115 = vmatpush.bf16.msra.mxu0 %v189_v5 }
  0x1e   :  { %116 = vmatpush.bf16.msra.mxu0 %v188_v6 }
  0x22   :  { %117 = vmatpush.bf16.msra.mxu0 %v187_v7 }
  0x25   :  { %118 = vmatmul.bf16.vlgmr.msra.gmra.mxu0 %v186_v8 }
  0xa2   :  { %v119_v9 = vpop.f32.mrf.mxu0 }
  0xa3   :  { %v137_v11 = vadd.f32 %v203_v10, %v119_v9 }
  0xa5   :  { %v139_v14 = vmax.f32 %v137_v11, 0.0 }
  0xaa   :  { %v121_v12 = vpop.f32.mrf.mxu0 }
  0xab   :  { %v138_v13 = vadd.f32 %v203_v10, %v121_v12 }
  0xad   :  { %v140_v15 = vmax.f32 %v138_v13, 0.0 }
  0xaf   :  { %v198_v16 = vpack.c.bf16 %v140_v15, %v139_v14 }
  0xb1   :  { %199 = vst [vmem:[%s268_s3] sm:$0xff] %v198_v16  }
  0xb2   :  { %149 = vsyncpa [#allocation4], 1 }

// kernel: _lambda_.242
= control target key start
LH: loop header
LB: loop body
LE: loop exit
PB: predicated region body
PF: predicated region fallthrough
CT: control target
= control target key end

     0   :  { %s939_s12 = smov 0   ;;  %s941_s13 = smov 0   ;;  %s1051_s0 = inlined_call_operand.vmem [shape: bf16[2,24,128], index: 0, kind: input, shape index: {}]   ;;  %s1052_s1 = inlined_call_operand.vmem [shape: bf16[3,128,128], index: 1, kind: input, shape index: {}]   ;;  %s1053_s2 = inlined_call_operand.vmem [shape: bf16[2,16,128], index: 2, kind: input, shape index: {}]   ;;  %s1054_s3 = inlined_call_operand.vmem [shape: bf16[2,16,128], index: 3, kind: output, shape index: {}]  }
   0x1   :  { %s943_s14 = smov 0  }
   0x2 LB: > { %s32_s15 = sadd.s32 1, %s913_s13  ;;  %p694_p0 = scmp.ge.s32.totalorder %s917_s14, 1  ;;  %s917_s14 = sphi %s943_s14, %s13_s14   ;;  %s913_s13 = sphi %s941_s13, %s1056_s13   ;;  %s909_s12 = sphi %s939_s12, %s1055_s12  }
   0x3   : > { %p34_p1 = scmp.ge.s32.totalorder %s32_s15, 2  ;;  %p191_p2 = scmp.lt.s32.totalorder %s917_s14, 3 }
   0x5   : > { %s1058_s15 = smov (%p34_p1, %s32_s15), 0  ;;  %p192_p3 = pnand %p694_p0, %p191_p2 }
   0x6   : > { %p238_p4 = scmp.lt.s32.totalorder (!%p192_p3), %s909_s12, 1 }
   0x7   : > { %195 = sbr.rel (%p192_p3) target bundleno = 193 (0xc1), region = 32 }
   0xc   : > { %v852_v0 = vld [vmem:[%s1052_s1 + $0x78] sm:$0xff]  ;;  %v851_v3 = vld [vmem:[%s1052_s1 + $0x70] sm:$0xff]  ;;  %s1060_s12 = smov (!%p238_p4, %s909_s12), 1  ;;  %v850_v6 = vld [vmem:[%s1052_s1 + $0x68] sm:$0xff]  ;;  %vm322_vm0 = vsmask.f32 7424 }
   0xd   : > { %v844_v1 = vld [vmem:[%s1052_s1 + $0x38] sm:$0xff]  ;;  %384 = vmatpush.bf16.msra.mxu0 %v852_v0  ;;  %v843_v4 = vld [vmem:[%s1052_s1 + $0x30] sm:$0xff]  ;;  %s870_s28 = smul.u32 12, %s1060_s12  ;;  %v842_v7 = vld [vmem:[%s1052_s1 + $0x28] sm:$0xff]  ;;  %vm478_vm1 = vcmask 1046528   ;;  %s834_s22 = sshll.u32 %s1060_s12, 3 }
   0xe   : > { %v860_v2 = vld [vmem:[%s1052_s1 + $0xb8] sm:$0xff]  ;;  %447 = vmatpush.bf16.msra.mxu1 %v844_v1  ;;  %v859_v5 = vld [vmem:[%s1052_s1 + $0xb0] sm:$0xff]  ;;  %v858_v8 = vld [vmem:[%s1052_s1 + $0xa8] sm:$0xff]  ;;  %s258_s25 = scalar_lea.vmem %s1053_s2, %s834_s22  ;;  %s271_s12 = scalar_lea.vmem %s1054_s3, %s834_s22 }
   0xf   : > { %531 = vmatpush.bf16.msra.mxu2 %v860_v2  ;;  %s242_s10 = scalar_lea.vmem %s1051_s0, %s870_s28  ;;  %v849_v9 = vld [vmem:[%s1052_s1 + $0x60] sm:$0xff]  ;;  %v848_v13 = vld [vmem:[%s1052_s1 + $0x58] sm:$0xff]  ;;  %v847_v18 = vld [vmem:[%s1052_s1 + $0x50] sm:$0xff] }
  0x10   : > { %v841_v10 = vld [vmem:[%s1052_s1 + $0x20] sm:$0xff]  ;;  %v280_v12 = vld [vmem:[%s242_s10 + $0x8] sm:$0xf]  ;;  %v840_v14 = vld [vmem:[%s1052_s1 + $0x18] sm:$0xff] }
  0x11   : > { %385 = vmatpush.bf16.msra.mxu0 %v851_v3  ;;  %v857_v11 = vld [vmem:[%s1052_s1 + $0xa0] sm:$0xff]  ;;  %v319_v16 = vunpack.c.l.b16 %v280_v12  ;;  %v856_v17 = vld [vmem:[%s1052_s1 + $0x98] sm:$0xff]  ;;  %v839_v19 = vld [vmem:[%s1052_s1 + $0x10] sm:$0xff] }
  0x12   : > { %448 = vmatpush.bf16.msra.mxu1 %v843_v4  ;;  %v836_v15 = vld [vmem:[%s242_s10] sm:$0xff]  ;;  %v855_v22 = vld [vmem:[%s1052_s1 + $0x90] sm:$0xff]  ;;  %v846_v23 = vld [vmem:[%s1052_s1 + $0x48] sm:$0xff] }
  0x13   : > { %532 = vmatpush.bf16.msra.mxu2 %v859_v5  ;;  %v321_v20 = vpack.c.b16 %v319_v16, %v319_v16  ;;  %v326_v21 = vshll.u32 %v836_v15, 16  ;;  %v838_v24 = vld [vmem:[%s1052_s1 + $0x8] sm:$0xff]  ;;  %v324_v25 = vshrl.u32 %v836_v15, 16  ;;  %v845_v29 = vld [vmem:[%s1052_s1 + $0x40] sm:$0xff]  ;;  %v479_v34 = vrot.slane %v836_v15, 1 }
  0x14   : > { %v854_v28 = vld [vmem:[%s1052_s1 + $0x88] sm:$0xff]  ;;  %v837_v30 = vld [vmem:[%s1052_s1] sm:$0xff] }
  0x15   : > { %386 = vmatpush.bf16.msra.mxu0 %v850_v6  ;;  %v328_v26 = vrot.slane %v326_v21, 1  ;;  %v331_v27 = vshll.u32 %v321_v20, 16  ;;  %v853_v33 = vld [vmem:[%s1052_s1 + $0x80] sm:$0xff]  ;;  %v480_v35 = vrot.slane %v321_v20, 1 }
  0x16   : > { %449 = vmatpush.bf16.msra.mxu1 %v842_v7  ;;  %v862_v42 = vld [vmem:[%s258_s25] sm:$0xff]  }
  0x17   : > { %533 = vmatpush.bf16.msra.mxu2 %v858_v8  ;;  %v329_v31 = vor.u32 %v328_v26, %v324_v25  ;;  %v333_v32 = vrot.slane %v331_v27, 1  ;;  %v481_v37 = vsel %vm478_vm1, %v479_v34, %v480_v35  ;;  %v863_v46 = vunpack.c.l.bf16 %v862_v42 }
  0x18   : > { %v864_v48 = vunpack.c.h.bf16 %v862_v42 }
  0x19   : > { %387 = vmatpush.bf16.msra.mxu0 %v849_v9  ;;  %v334_v36 = vsel %vm322_vm0, %v329_v31, %v333_v32 }
  0x1a   : > { %450 = vmatpush.bf16.msra.mxu1 %v841_v10 }
  0x1b   : > { %534 = vmatpush.bf16.msra.mxu2 %v857_v11 }
  0x1d   : > { %388 = vmatpush.bf16.msra.mxu0 %v848_v13 }
  0x1e   : > { %451 = vmatpush.bf16.msra.mxu1 %v840_v14 }
  0x1f   : > { %535 = vmatpush.bf16.msra.mxu2 %v856_v17 }
  0x21   : > { %389 = vmatpush.bf16.msra.mxu0 %v847_v18 }
  0x22   : > { %452 = vmatpush.bf16.msra.mxu1 %v839_v19 }
  0x23   : > { %536 = vmatpush.bf16.msra.mxu2 %v855_v22 }
  0x25   : > { %390 = vmatpush.bf16.msra.mxu0 %v846_v23 }
  0x26   : > { %453 = vmatpush.bf16.msra.mxu1 %v838_v24 }
  0x27   : > { %537 = vmatpush.bf16.msra.mxu2 %v854_v28 }
  0x29   : > { %391 = vmatpush.bf16.msra.mxu0 %v845_v29 }
  0x2a   : > { %454 = vmatpush.bf16.msra.mxu1 %v837_v30 }
  0x2b   : > { %538 = vmatpush.bf16.msra.mxu2 %v853_v33 }
  0x2c   : > { %392 = vmatmul.bf16.vlgmr.msra.gmra.mxu0 %v334_v36 }
  0x2d   : > { %455 = vmatmul.bf16.vlgmr.msra.gmra.mxu1 %v836_v15 }
  0x2e   : > { %539 = vmatmul.bf16.vlgmr.msra.gmra.mxu2 %v481_v37 }
  0xa9   : > { %v393_v38 = vpop.f32.mrf.mxu0 }
  0xaa   : > { %v456_v39 = vpop.f32.mrf.mxu1 }
  0xab   : > { %v457_v41 = vadd.f32 %v456_v39, %v393_v38 }
  0xb1   : > { %v540_v40 = vpop.f32.mrf.mxu2  ;;  %v395_v43 = vpop.f32.mrf.mxu0 }
  0xb2   : > { %v458_v44 = vpop.f32.mrf.mxu1  ;;  %v545_v45 = vadd.f32 %v540_v40, %v457_v41 }
  0xb3   : > { %v459_v47 = vadd.f32 %v458_v44, %v395_v43 }
  0xb4   : > { %v551_v51 = vmul.f32 %v863_v46, %v545_v45 }
  0xb9   : > { %v542_v49 = vpop.f32.mrf.mxu2 }
  0xba   : > { %v546_v50 = vadd.f32 %v542_v49, %v459_v47 }
  0xbc   : > { %v552_v52 = vmul.f32 %v864_v48, %v546_v50 }
  0xbe   : > { %v868_v53 = vpack.c.bf16 %v552_v52, %v551_v51 }
  0xc0   : > { %869 = vst [vmem:[%s271_s12] sm:$0xff] %v868_v53  }
  0xc1 PF: > { %s13_s14 = sadd.s32 1, %s917_s14   ;;  %s1055_s12 = smov %s913_s13 }
  0xc2   : > { %p10_p5 = scmp.ge.s32.totalorder %s13_s14, 4   ;;  %s1056_s13 = smov %s1058_s15 }
  0xc4   :  { %12 = sbr.rel (!%p10_p5) target bundleno = 2 (0x2), region = 71 }

// kernel: _lambda_.251
= control target key start
LH: loop header
LB: loop body
LE: loop exit
PB: predicated region body
PF: predicated region fallthrough
CT: control target
= control target key end

     0   :  { %s270_s1 = inlined_call_operand.vmem [shape: bf16[128,128], index: 1, kind: input, shape index: {}]   ;;  %s271_s0 = inlined_call_operand.vmem [shape: bf16[32,128], index: 0, kind: input, shape index: {}]   ;;  %s272_s2 = inlined_call_operand.vmem [shape: bf16[32,128], index: 2, kind: output, shape index: {}]  }
   0x1   :  { %v190_v0 = vld [vmem:[%s270_s1 + $0x38] sm:$0xff]  ;;  %v189_v1 = vld [vmem:[%s270_s1 + $0x30] sm:$0xff]  ;;  %v188_v2 = vld [vmem:[%s270_s1 + $0x28] sm:$0xff] }
   0x2   :  { %101 = vmatpush.bf16.msra.mxu0 %v190_v0  ;;  %211 = vmatpush.bf16.msra.mxu1 %v190_v0  ;;  %v187_v3 = vld [vmem:[%s270_s1 + $0x20] sm:$0xff]  ;;  %v186_v4 = vld [vmem:[%s270_s1 + $0x18] sm:$0xff]  ;;  %v185_v5 = vld [vmem:[%s270_s1 + $0x10] sm:$0xff] }
   0x3   :  { %v192_v6 = vld [vmem:[%s271_s0] sm:$0xff]   ;;  %v209_v7 = vld [vmem:[%s271_s0 + $0x8] sm:$0xff]  }
   0x4   :  { %v193_v8 = vunpack.c.l.bf16 %v192_v6  ;;  %v194_v9 = vunpack.c.h.bf16 %v192_v6  ;;  %v197_v10 = vunpack.c.l.bf16 %v209_v7  ;;  %v198_v11 = vunpack.c.h.bf16 %v209_v7  ;;  %v184_v12 = vld [vmem:[%s270_s1 + $0x8] sm:$0xff]  ;;  %v183_v17 = vld [vmem:[%s270_s1] sm:$0xff] }
   0x6   :  { %102 = vmatpush.bf16.msra.mxu0 %v189_v1  ;;  %212 = vmatpush.bf16.msra.mxu1 %v189_v1  ;;  %v27_v13 = vmax.f32 %v193_v8, 0.0  ;;  %v28_v14 = vmax.f32 %v194_v9, 0.0  ;;  %v29_v15 = vmax.f32 %v197_v10, 0.0  ;;  %v30_v16 = vmax.f32 %v198_v11, 0.0 }
   0x8   :  { %v31_v18 = vpack.c.bf16 %v28_v14, %v27_v13  ;;  %v32_v19 = vpack.c.bf16 %v30_v16, %v29_v15 }
   0xa   :  { %103 = vmatpush.bf16.msra.mxu0 %v188_v2  ;;  %213 = vmatpush.bf16.msra.mxu1 %v188_v2 }
   0xe   :  { %104 = vmatpush.bf16.msra.mxu0 %v187_v3  ;;  %214 = vmatpush.bf16.msra.mxu1 %v187_v3 }
  0x12   :  { %105 = vmatpush.bf16.msra.mxu0 %v186_v4  ;;  %215 = vmatpush.bf16.msra.mxu1 %v186_v4 }
  0x16   :  { %106 = vmatpush.bf16.msra.mxu0 %v185_v5  ;;  %216 = vmatpush.bf16.msra.mxu1 %v185_v5 }
  0x1a   :  { %107 = vmatpush.bf16.msra.mxu0 %v184_v12  ;;  %217 = vmatpush.bf16.msra.mxu1 %v184_v12 }
  0x1e   :  { %108 = vmatpush.bf16.msra.mxu0 %v183_v17  ;;  %218 = vmatpush.bf16.msra.mxu1 %v183_v17 }
  0x21   :  { %109 = vmatmul.bf16.vlgmr.msra.gmra.mxu0 %v31_v18  ;;  %114 = vmatmul.bf16.vlgmr.msra.gmra.mxu1 %v32_v19 }
  0x9e   :  { %v110_v20 = vpop.f32.mrf.mxu0  ;;  %v115_v21 = vpop.f32.mrf.mxu1 }
  0x9f   :  { %v135_v24 = vmax.f32 %v110_v20, 0.0  ;;  %v137_v25 = vmax.f32 %v115_v21, 0.0 }
  0xa6   :  { %v112_v22 = vpop.f32.mrf.mxu0  ;;  %v117_v23 = vpop.f32.mrf.mxu1 }
  0xa7   :  { %v136_v26 = vmax.f32 %v112_v22, 0.0  ;;  %v138_v27 = vmax.f32 %v117_v23, 0.0 }
  0xa9   :  { %v202_v28 = vpack.c.bf16 %v136_v26, %v135_v24  ;;  %v207_v29 = vpack.c.bf16 %v138_v27, %v137_v25 }
  0xab   :  { %203 = vst [vmem:[%s272_s2] sm:$0xff] %v202_v28  }
  0xac   :  { %210 = vst [vmem:[%s272_s2 + $0x8] sm:$0xff] %v207_v29  }

// kernel: _lambda_.287
= control target key start
LH: loop header
LB: loop body
LE: loop exit
PB: predicated region body
PF: predicated region fallthrough
CT: control target
= control target key end

     0   :  { %7 = vsyncpa [#allocation4], 0  ;;  %s261_s12 = smov [#allocation3]   ;;  %s262_s14 = smov 64   ;;  %s294_s0 = inlined_call_operand.vmem [shape: bf16[32,128], index: 0, kind: input, shape index: {}]   ;;  %s295_s1 = inlined_call_operand.hbm [shape: bf16[128,128], index: 1, kind: input, shape index: {}]   ;;  %s296_s2 = inlined_call_operand.vmem [shape: bf16[32,128], index: 2, kind: output, shape index: {}]  }
   0x1   :  { %s14_s11 = sshll.u32 %s295_s1, 4  ;;  %s16_s13 = sshll.u32 %s261_s12, 4  ;;  %s15_s11 = int_to_ptr.hbm [resolvable:$true] %s14_s11  ;;  %s17_s13 = int_to_ptr.vmem [resolvable:$true] %s16_s13 }
   0x2   :  { %s263_s15 = smov 4  }
   0x3   :  { %22 = dma.hbm_to_vmem [thread:$0]  %s15_s11, 1024, %s17_s13, [#allocation4], %s262_s14, %s262_s14, %s263_s15  }
   0x4   :  { %259 = dma.done.wait [#allocation4], 1024  }
   0x5   :  { %260 = vsyncadd [#allocation4], 4294966272  ;;  %v203_v0 = vld [vmem:[#allocation3 + $0x38] sm:$0xff]  ;;  %v202_v1 = vld [vmem:[#allocation3 + $0x30] sm:$0xff] }
   0x6   :  { %117 = vmatpush.bf16.msra.mxu0 %v203_v0  ;;  %224 = vmatpush.bf16.msra.mxu1 %v203_v0  ;;  %v201_v2 = vld [vmem:[#allocation3 + $0x28] sm:$0xff]  ;;  %v200_v3 = vld [vmem:[#allocation3 + $0x20] sm:$0xff]  ;;  %v199_v4 = vld [vmem:[#allocation3 + $0x18] sm:$0xff] }
   0x7   :  { %v198_v5 = vld [vmem:[#allocation3 + $0x10] sm:$0xff]  ;;  %v205_v6 = vld [vmem:[%s294_s0] sm:$0xff]   ;;  %v222_v7 = vld [vmem:[%s294_s0 + $0x8] sm:$0xff]  }
   0x8   :  { %v206_v8 = vunpack.c.l.bf16 %v205_v6  ;;  %v207_v9 = vunpack.c.h.bf16 %v205_v6  ;;  %v210_v10 = vunpack.c.l.bf16 %v222_v7  ;;  %v211_v11 = vunpack.c.h.bf16 %v222_v7  ;;  %v197_v12 = vld [vmem:[#allocation3 + $0x8] sm:$0xff]  ;;  %v196_v17 = vld [vmem:[#allocation3] sm:$0xff] }
   0xa   :  { %118 = vmatpush.bf16.msra.mxu0 %v202_v1  ;;  %225 = vmatpush.bf16.msra.mxu1 %v202_v1  ;;  %v43_v13 = vmax.f32 %v206_v8, 0.0  ;;  %v44_v14 = vmax.f32 %v207_v9, 0.0  ;;  %v45_v15 = vmax.f32 %v210_v10, 0.0  ;;  %v46_v16 = vmax.f32 %v211_v11, 0.0 }
   0xc   :  { %v47_v18 = vpack.c.bf16 %v44_v14, %v43_v13  ;;  %v48_v19 = vpack.c.bf16 %v46_v16, %v45_v15 }
   0xe   :  { %119 = vmatpush.bf16.msra.mxu0 %v201_v2  ;;  %226 = vmatpush.bf16.msra.mxu1 %v201_v2 }
  0x12   :  { %120 = vmatpush.bf16.msra.mxu0 %v200_v3  ;;  %227 = vmatpush.bf16.msra.mxu1 %v200_v3 }
  0x16   :  { %121 = vmatpush.bf16.msra.mxu0 %v199_v4  ;;  %228 = vmatpush.bf16.msra.mxu1 %v199_v4 }
  0x1a   :  { %122 = vmatpush.bf16.msra.mxu0 %v198_v5  ;;  %229 = vmatpush.bf16.msra.mxu1 %v198_v5 }
  0x1e   :  { %123 = vmatpush.bf16.msra.mxu0 %v197_v12  ;;  %230 = vmatpush.bf16.msra.mxu1 %v197_v12 }
  0x22   :  { %124 = vmatpush.bf16.msra.mxu0 %v196_v17  ;;  %231 = vmatpush.bf16.msra.mxu1 %v196_v17 }
  0x25   :  { %125 = vmatmul.bf16.vlgmr.msra.gmra.mxu0 %v47_v18  ;;  %130 = vmatmul.bf16.vlgmr.msra.gmra.mxu1 %v48_v19 }
  0xa2   :  { %v126_v20 = vpop.f32.mrf.mxu0  ;;  %v131_v21 = vpop.f32.mrf.mxu1 }
  0xaa   :  { %v128_v22 = vpop.f32.mrf.mxu0  ;;  %v133_v23 = vpop.f32.mrf.mxu1 }
  0xab   :  { %v215_v24 = vpack.c.bf16 %v128_v22, %v126_v20  ;;  %v220_v25 = vpack.c.bf16 %v133_v23, %v131_v21 }
  0xad   :  { %216 = vst [vmem:[%s296_s2] sm:$0xff] %v215_v24  }
  0xae   :  { %223 = vst [vmem:[%s296_s2 + $0x8] sm:$0xff] %v220_v25  }
  0xaf   :  { %163 = vsyncpa [#allocation4], 1 }

// kernel: _lambda_.281
= control target key start
LH: loop header
LB: loop body
LE: loop exit
PB: predicated region body
PF: predicated region fallthrough
CT: control target
= control target key end

     0   :  { %8 = vsyncpa [#allocation4], 0  ;;  %s276_s15 = smov [#allocation3]   ;;  %s277_s17 = smov 64   ;;  %s311_s0 = inlined_call_operand.vmem [shape: bf16[16,128], index: 0, kind: input, shape index: {}]   ;;  %s312_s1 = inlined_call_operand.hbm [shape: bf16[128,128], index: 1, kind: input, shape index: {}]   ;;  %s313_s2 = inlined_call_operand.vmem [shape: f32[1,128], index: 2, kind: input, shape index: {}]   ;;  %s314_s3 = inlined_call_operand.vmem [shape: bf16[16,128], index: 3, kind: output, shape index: {}]  }
   0x1   :  { %s15_s14 = sshll.u32 %s312_s1, 4  ;;  %s17_s16 = sshll.u32 %s276_s15, 4  ;;  %s16_s14 = int_to_ptr.hbm [resolvable:$true] %s15_s14  ;;  %s18_s16 = int_to_ptr.vmem [resolvable:$true] %s17_s16 }
   0x2   :  { %s278_s18 = smov 4  }
   0x3   :  { %23 = dma.hbm_to_vmem [thread:$0]  %s16_s14, 1024, %s18_s16, [#allocation4], %s277_s17, %s277_s17, %s278_s18  }
   0x4   :  { %274 = dma.done.wait [#allocation4], 1024  }
   0x5   :  { %275 = vsyncadd [#allocation4], 4294966272  ;;  %v232_v0 = vld [vmem:[#allocation3 + $0x38] sm:$0xff]  ;;  %v231_v1 = vld [vmem:[#allocation3 + $0x30] sm:$0xff] }
   0x6   :  { %110 = vmatpush.bf16.msra.mxu0 %v232_v0  ;;  %v230_v2 = vld [vmem:[#allocation3 + $0x28] sm:$0xff]  ;;  %v229_v3 = vld [vmem:[#allocation3 + $0x20] sm:$0xff]  ;;  %v228_v4 = vld [vmem:[#allocation3 + $0x18] sm:$0xff] }
   0x7   :  { %v227_v5 = vld [vmem:[#allocation3 + $0x10] sm:$0xff]  ;;  %v226_v6 = vld [vmem:[#allocation3 + $0x8] sm:$0xff]  ;;  %v225_v7 = vld [vmem:[#allocation3] sm:$0xff] }
   0x8   :  { %v224_v8 = vld [vmem:[%s311_s0] sm:$0xff] }
   0x9   :  { %v241_v9 = vld [vmem:[%s313_s2] ss:$0 sm:$0xff] }
   0xa   :  { %111 = vmatpush.bf16.msra.mxu0 %v231_v1 }
   0xe   :  { %112 = vmatpush.bf16.msra.mxu0 %v230_v2 }
  0x12   :  { %113 = vmatpush.bf16.msra.mxu0 %v229_v3 }
  0x16   :  { %114 = vmatpush.bf16.msra.mxu0 %v228_v4 }
  0x1a   :  { %115 = vmatpush.bf16.msra.mxu0 %v227_v5 }
  0x1e   :  { %116 = vmatpush.bf16.msra.mxu0 %v226_v6 }
  0x22   :  { %117 = vmatpush.bf16.msra.mxu0 %v225_v7 }
  0x25   :  { %118 = vmatmul.bf16.vlgmr.msra.gmra.mxu0 %v224_v8 }
  0xa2   :  { %v119_v10 = vpop.f32.mrf.mxu0 }
  0xa3   :  { %v137_v11 = vadd.f32 %v241_v9, %v119_v10 }
  0xa5   :  { %v222_v12 = vmul.f32 -1.442695, %v137_v11 }
  0xa7   :  { %242 = vpow2.f32 %v222_v12 }
  0xaa   :  { %v121_v13 = vpop.f32.mrf.mxu0 }
  0xab   :  { %v138_v14 = vadd.f32 %v241_v9, %v121_v13 }
  0xad   :  { %v243_v15 = vpop.eup %242  ;;  %v223_v16 = vmul.f32 -1.442695, %v138_v14 }
  0xae   :  { %v145_v17 = vadd.f32 1.0, %v243_v15 }
  0xaf   :  { %244 = vpow2.f32 %v223_v16 }
  0xb0   :  { %246 = vrcp.f32 %v145_v17  ;;  %vm152_vm1 = vweird.f32 %v145_v17  ;;  %v158_v28 = vand.u32 2147483648, %v145_v17  ;;  %v156_v30 = vand.u32 2147483647, %v145_v17 }
  0xb2   :  { %v159_v35 = vor.u32 1.1754944e-38, %v158_v28  ;;  %vm157_vm6 = vcmp.eq.f32.partialorder %v156_v30, 8.507059e+37 }
  0xb5   :  { %v245_v18 = vpop.eup %244 }
  0xb6   :  { %v247_v19 = vpop.eup %246  ;;  %v146_v20 = vadd.f32 1.0, %v245_v18 }
  0xb7   :  { %v148_v21 = vmul.f32 %v247_v19, %v145_v17  ;;  %vm153_vm0 = vweird.f32 %v247_v19 }
  0xb8   :  { %248 = vrcp.f32 %v146_v20  ;;  %v173_v29 = vand.u32 2147483648, %v146_v20  ;;  %v171_v32 = vand.u32 2147483647, %v146_v20  ;;  %vm154_vm3 = vmor %vm152_vm1, %vm153_vm0  ;;  %vm167_vm4 = vweird.f32 %v146_v20 }
  0xb9   :  { %v149_v22 = vsub.f32 1.0, %v148_v21 }
  0xba   :  { %v174_v36 = vor.u32 1.1754944e-38, %v173_v29  ;;  %vm172_vm7 = vcmp.eq.f32.partialorder %v171_v32, 8.507059e+37 }
  0xbb   :  { %v150_v23 = vmul.f32 %v247_v19, %v149_v22 }
  0xbd   :  { %v151_v26 = vadd.f32 %v247_v19, %v150_v23 }
  0xbe   :  { %v249_v24 = vpop.eup %248 }
  0xbf   :  { %v163_v25 = vmul.f32 %v249_v24, %v146_v20  ;;  %vm168_vm2 = vweird.f32 %v249_v24  ;;  %v155_v33 = vsel %vm154_vm3, %v247_v19, %v151_v26 }
  0xc0   :  { %vm169_vm5 = vmor %vm167_vm4, %vm168_vm2  ;;  %v160_v38 = vsel %vm157_vm6, %v159_v35, %v155_v33 }
  0xc1   :  { %v164_v27 = vsub.f32 1.0, %v163_v25 }
  0xc3   :  { %v165_v31 = vmul.f32 %v249_v24, %v164_v27 }
  0xc5   :  { %v166_v34 = vadd.f32 %v249_v24, %v165_v31 }
  0xc7   :  { %v170_v37 = vsel %vm169_vm5, %v249_v24, %v166_v34 }
  0xc8   :  { %v175_v39 = vsel %vm172_vm7, %v174_v36, %v170_v37 }
  0xc9   :  { %v236_v40 = vpack.c.bf16 %v175_v39, %v160_v38 }
  0xcb   :  { %237 = vst [vmem:[%s314_s3] sm:$0xff] %v236_v40  }
  0xcc   :  { %185 = vsyncpa [#allocation4], 1 }

// kernel: _lambda_.291
= control target key start
LH: loop header
LB: loop body
LE: loop exit
PB: predicated region body
PF: predicated region fallthrough
CT: control target
= control target key end

     0   :  { %s930_s12 = smov 0   ;;  %s932_s13 = smov 0   ;;  %s1042_s0 = inlined_call_operand.vmem [shape: bf16[2,24,128], index: 0, kind: input, shape index: {}]   ;;  %s1043_s1 = inlined_call_operand.vmem [shape: bf16[3,128,128], index: 1, kind: input, shape index: {}]   ;;  %s1044_s2 = inlined_call_operand.vmem [shape: bf16[2,16,128], index: 2, kind: input, shape index: {}]   ;;  %s1045_s3 = inlined_call_operand.vmem [shape: bf16[2,16,128], index: 3, kind: output, shape index: {}]  }
   0x1   :  { %s934_s14 = smov 0  }
   0x2 LB: > { %s32_s15 = sadd.s32 1, %s904_s13  ;;  %p685_p0 = scmp.ge.s32.totalorder %s908_s14, 1  ;;  %s908_s14 = sphi %s934_s14, %s13_s14   ;;  %s904_s13 = sphi %s932_s13, %s1047_s13   ;;  %s900_s12 = sphi %s930_s12, %s1046_s12  }
   0x3   : > { %p34_p1 = scmp.ge.s32.totalorder %s32_s15, 2  ;;  %p191_p2 = scmp.lt.s32.totalorder %s908_s14, 3 }
   0x5   : > { %s1049_s15 = smov (%p34_p1, %s32_s15), 0  ;;  %p192_p3 = pnand %p685_p0, %p191_p2 }
   0x6   : > { %p238_p4 = scmp.lt.s32.totalorder (!%p192_p3), %s900_s12, 1 }
   0x7   : > { %195 = sbr.rel (%p192_p3) target bundleno = 193 (0xc1), region = 32 }
   0xc   : > { %v843_v0 = vld [vmem:[%s1043_s1 + $0x78] sm:$0xff]  ;;  %v842_v3 = vld [vmem:[%s1043_s1 + $0x70] sm:$0xff]  ;;  %s1051_s12 = smov (!%p238_p4, %s900_s12), 1  ;;  %v841_v6 = vld [vmem:[%s1043_s1 + $0x68] sm:$0xff]  ;;  %vm322_vm0 = vcmask 1046528   ;;  %vm469_vm1 = vcmask 1045504  }
   0xd   : > { %v835_v1 = vld [vmem:[%s1043_s1 + $0x38] sm:$0xff]  ;;  %375 = vmatpush.bf16.msra.mxu0 %v843_v0  ;;  %v834_v4 = vld [vmem:[%s1043_s1 + $0x30] sm:$0xff]  ;;  %v833_v7 = vld [vmem:[%s1043_s1 + $0x28] sm:$0xff]  ;;  %s861_s7 = smul.u32 12, %s1051_s12  ;;  %s825_s22 = sshll.u32 %s1051_s12, 3 }
   0xe   : > { %v851_v2 = vld [vmem:[%s1043_s1 + $0xb8] sm:$0xff]  ;;  %438 = vmatpush.bf16.msra.mxu1 %v835_v1  ;;  %v850_v5 = vld [vmem:[%s1043_s1 + $0xb0] sm:$0xff]  ;;  %v849_v8 = vld [vmem:[%s1043_s1 + $0xa8] sm:$0xff]  ;;  %s258_s25 = scalar_lea.vmem %s1044_s2, %s825_s22  ;;  %s271_s12 = scalar_lea.vmem %s1045_s3, %s825_s22 }
   0xf   : > { %522 = vmatpush.bf16.msra.mxu2 %v851_v2  ;;  %v840_v9 = vld [vmem:[%s1043_s1 + $0x60] sm:$0xff]  ;;  %s242_s20 = scalar_lea.vmem %s1042_s0, %s861_s7  ;;  %v839_v12 = vld [vmem:[%s1043_s1 + $0x58] sm:$0xff]  ;;  %v838_v16 = vld [vmem:[%s1043_s1 + $0x50] sm:$0xff] }
  0x10   : > { %v832_v10 = vld [vmem:[%s1043_s1 + $0x20] sm:$0xff]  ;;  %v831_v13 = vld [vmem:[%s1043_s1 + $0x18] sm:$0xff]  ;;  %v280_v15 = vld [vmem:[%s242_s20 + $0x8] sm:$0xf] }
  0x11   : > { %376 = vmatpush.bf16.msra.mxu0 %v842_v3  ;;  %v848_v11 = vld [vmem:[%s1043_s1 + $0xa0] sm:$0xff]  ;;  %v847_v14 = vld [vmem:[%s1043_s1 + $0x98] sm:$0xff]  ;;  %v830_v17 = vld [vmem:[%s1043_s1 + $0x10] sm:$0xff]  ;;  %v319_v18 = vunpack.c.l.b16 %v280_v15 }
  0x12   : > { %439 = vmatpush.bf16.msra.mxu1 %v834_v4  ;;  %v846_v19 = vld [vmem:[%s1043_s1 + $0x90] sm:$0xff]  ;;  %v837_v20 = vld [vmem:[%s1043_s1 + $0x48] sm:$0xff]  ;;  %v827_v22 = vld [vmem:[%s242_s20] sm:$0xff] }
  0x13   : > { %523 = vmatpush.bf16.msra.mxu2 %v850_v5  ;;  %v829_v21 = vld [vmem:[%s1043_s1 + $0x8] sm:$0xff]  ;;  %v321_v23 = vpack.c.b16 %v319_v18, %v319_v18  ;;  %v836_v25 = vld [vmem:[%s1043_s1 + $0x40] sm:$0xff]  ;;  %v323_v27 = vrot.slane %v827_v22, 1  ;;  %v470_v30 = vrot.slane %v827_v22, 2 }
  0x14   : > { %v845_v24 = vld [vmem:[%s1043_s1 + $0x88] sm:$0xff]  ;;  %v828_v26 = vld [vmem:[%s1043_s1] sm:$0xff] }
  0x15   : > { %377 = vmatpush.bf16.msra.mxu0 %v841_v6  ;;  %v324_v28 = vrot.slane %v321_v23, 1  ;;  %v844_v29 = vld [vmem:[%s1043_s1 + $0x80] sm:$0xff]  ;;  %v471_v31 = vrot.slane %v321_v23, 2 }
  0x16   : > { %440 = vmatpush.bf16.msra.mxu1 %v833_v7  ;;  %v853_v38 = vld [vmem:[%s258_s25] sm:$0xff]  }
  0x17   : > { %524 = vmatpush.bf16.msra.mxu2 %v849_v8  ;;  %v325_v32 = vsel %vm322_vm0, %v323_v27, %v324_v28  ;;  %v472_v33 = vsel %vm469_vm1, %v470_v30, %v471_v31  ;;  %v854_v42 = vunpack.c.l.bf16 %v853_v38  ;;  %v855_v44 = vunpack.c.h.bf16 %v853_v38 }
  0x19   : > { %378 = vmatpush.bf16.msra.mxu0 %v840_v9 }
  0x1a   : > { %441 = vmatpush.bf16.msra.mxu1 %v832_v10 }
  0x1b   : > { %525 = vmatpush.bf16.msra.mxu2 %v848_v11 }
  0x1d   : > { %379 = vmatpush.bf16.msra.mxu0 %v839_v12 }
  0x1e   : > { %442 = vmatpush.bf16.msra.mxu1 %v831_v13 }
  0x1f   : > { %526 = vmatpush.bf16.msra.mxu2 %v847_v14 }
  0x21   : > { %380 = vmatpush.bf16.msra.mxu0 %v838_v16 }
  0x22   : > { %443 = vmatpush.bf16.msra.mxu1 %v830_v17 }
  0x23   : > { %527 = vmatpush.bf16.msra.mxu2 %v846_v19 }
  0x25   : > { %381 = vmatpush.bf16.msra.mxu0 %v837_v20 }
  0x26   : > { %444 = vmatpush.bf16.msra.mxu1 %v829_v21 }
  0x27   : > { %528 = vmatpush.bf16.msra.mxu2 %v845_v24 }
  0x29   : > { %382 = vmatpush.bf16.msra.mxu0 %v836_v25 }
  0x2a   : > { %445 = vmatpush.bf16.msra.mxu1 %v828_v26 }
  0x2b   : > { %529 = vmatpush.bf16.msra.mxu2 %v844_v29 }
  0x2c   : > { %383 = vmatmul.bf16.vlgmr.msra.gmra.mxu0 %v325_v32 }
  0x2d   : > { %446 = vmatmul.bf16.vlgmr.msra.gmra.mxu1 %v827_v22 }
  0x2e   : > { %530 = vmatmul.bf16.vlgmr.msra.gmra.mxu2 %v472_v33 }
  0xa9   : > { %v384_v34 = vpop.f32.mrf.mxu0 }
  0xaa   : > { %v447_v35 = vpop.f32.mrf.mxu1 }
  0xab   : > { %v448_v37 = vadd.f32 %v447_v35, %v384_v34 }
  0xb1   : > { %v531_v36 = vpop.f32.mrf.mxu2  ;;  %v386_v39 = vpop.f32.mrf.mxu0 }
  0xb2   : > { %v449_v40 = vpop.f32.mrf.mxu1  ;;  %v536_v41 = vadd.f32 %v531_v36, %v448_v37 }
  0xb3   : > { %v450_v43 = vadd.f32 %v449_v40, %v386_v39 }
  0xb4   : > { %v542_v47 = vmul.f32 %v854_v42, %v536_v41 }
  0xb9   : > { %v533_v45 = vpop.f32.mrf.mxu2 }
  0xba   : > { %v537_v46 = vadd.f32 %v533_v45, %v450_v43 }
  0xbc   : > { %v543_v48 = vmul.f32 %v855_v44, %v537_v46 }
  0xbe   : > { %v859_v49 = vpack.c.bf16 %v543_v48, %v542_v47 }
  0xc0   : > { %860 = vst [vmem:[%s271_s12] sm:$0xff] %v859_v49  }
  0xc1 PF: > { %s13_s14 = sadd.s32 1, %s908_s14   ;;  %s1046_s12 = smov %s904_s13 }
  0xc2   : > { %p10_p5 = scmp.ge.s32.totalorder %s13_s14, 4   ;;  %s1047_s13 = smov %s1049_s15 }
  0xc4   :  { %12 = sbr.rel (!%p10_p5) target bundleno = 2 (0x2), region = 71 }

// kernel: _lambda_.324
= control target key start
LH: loop header
LB: loop body
LE: loop exit
PB: predicated region body
PF: predicated region fallthrough
CT: control target
= control target key end

     0   :  { %s432_s1 = inlined_call_operand.vmem [shape: bf16[256,128], index: 1, kind: input, shape index: {}]   ;;  %s433_s0 = inlined_call_operand.vmem [shape: bf16[32,256], index: 0, kind: input, shape index: {}]   ;;  %s434_s2 = inlined_call_operand.vmem [shape: bf16[32,128], index: 2, kind: output, shape index: {}]  }
   0x1   :  { %v315_v0 = vld [vmem:[%s432_s1 + $0x38] sm:$0xff]  ;;  %v314_v2 = vld [vmem:[%s432_s1 + $0x30] sm:$0xff]  ;;  %v313_v4 = vld [vmem:[%s432_s1 + $0x28] sm:$0xff] }
   0x2   :  { %v323_v1 = vld [vmem:[%s432_s1 + $0x78] sm:$0xff]  ;;  %175 = vmatpush.bf16.msra.mxu0 %v315_v0  ;;  %335 = vmatpush.bf16.msra.mxu2 %v315_v0  ;;  %v322_v3 = vld [vmem:[%s432_s1 + $0x70] sm:$0xff]  ;;  %v321_v5 = vld [vmem:[%s432_s1 + $0x68] sm:$0xff] }
   0x3   :  { %194 = vmatpush.bf16.msra.mxu1 %v323_v1  ;;  %343 = vmatpush.bf16.msra.mxu3 %v323_v1  ;;  %v312_v6 = vld [vmem:[%s432_s1 + $0x20] sm:$0xff]  ;;  %v311_v8 = vld [vmem:[%s432_s1 + $0x18] sm:$0xff]  ;;  %v310_v10 = vld [vmem:[%s432_s1 + $0x10] sm:$0xff] }
   0x4   :  { %v320_v7 = vld [vmem:[%s432_s1 + $0x60] sm:$0xff]  ;;  %v319_v9 = vld [vmem:[%s432_s1 + $0x58] sm:$0xff]  ;;  %v20_v12 = vld [vmem:[%s433_s0 + $0x8] sm:$0xff] }
   0x5   :  { %v19_v11 = vld [vmem:[%s433_s0] sm:$0xff]  ;;  %v21_v13 = vld [vmem:[%s433_s0 + $0x10] sm:$0xff]  ;;  %v22_v14 = vld [vmem:[%s433_s0 + $0x18] sm:$0xff]  ;;  %v25_v17 = vunpack.c.l.bf16 %v20_v12  ;;  %v26_v22 = vunpack.c.h.bf16 %v20_v12 }
   0x6   :  { %176 = vmatpush.bf16.msra.mxu0 %v314_v2  ;;  %336 = vmatpush.bf16.msra.mxu2 %v314_v2  ;;  %v318_v15 = vld [vmem:[%s432_s1 + $0x50] sm:$0xff]  ;;  %v23_v16 = vunpack.c.l.bf16 %v19_v11  ;;  %v27_v18 = vunpack.c.l.bf16 %v21_v13  ;;  %v29_v19 = vunpack.c.l.bf16 %v22_v14  ;;  %v309_v20 = vld [vmem:[%s432_s1 + $0x8] sm:$0xff]  ;;  %v24_v21 = vunpack.c.h.bf16 %v19_v11  ;;  %v308_v30 = vld [vmem:[%s432_s1] sm:$0xff] }
   0x7   :  { %195 = vmatpush.bf16.msra.mxu1 %v322_v3  ;;  %344 = vmatpush.bf16.msra.mxu3 %v322_v3  ;;  %v28_v23 = vunpack.c.h.bf16 %v21_v13  ;;  %v30_v24 = vunpack.c.h.bf16 %v22_v14  ;;  %v317_v25 = vld [vmem:[%s432_s1 + $0x48] sm:$0xff]  ;;  %v33_v27 = vmax.f32 %v25_v17, 0.0  ;;  %v34_v32 = vmax.f32 %v26_v22, 0.0  ;;  %v316_v35 = vld [vmem:[%s432_s1 + $0x40] sm:$0xff] }
   0x8   :  { %v31_v26 = vmax.f32 %v23_v16, 0.0  ;;  %v35_v28 = vmax.f32 %v27_v18, 0.0  ;;  %v37_v29 = vmax.f32 %v29_v19, 0.0  ;;  %v32_v31 = vmax.f32 %v24_v21, 0.0 }
   0x9   :  { %v36_v33 = vmax.f32 %v28_v23, 0.0  ;;  %v38_v34 = vmax.f32 %v30_v24, 0.0 }
   0xa   :  { %177 = vmatpush.bf16.msra.mxu0 %v313_v4  ;;  %337 = vmatpush.bf16.msra.mxu2 %v313_v4  ;;  %v39_v36 = vpack.c.bf16 %v33_v27, %v31_v26  ;;  %v41_v37 = vpack.c.bf16 %v37_v29, %v35_v28  ;;  %v40_v38 = vpack.c.bf16 %v34_v32, %v32_v31 }
   0xb   :  { %196 = vmatpush.bf16.msra.mxu1 %v321_v5  ;;  %345 = vmatpush.bf16.msra.mxu3 %v321_v5  ;;  %v42_v39 = vpack.c.bf16 %v38_v34, %v36_v33 }
   0xe   :  { %178 = vmatpush.bf16.msra.mxu0 %v312_v6  ;;  %338 = vmatpush.bf16.msra.mxu2 %v312_v6 }
   0xf   :  { %197 = vmatpush.bf16.msra.mxu1 %v320_v7  ;;  %346 = vmatpush.bf16.msra.mxu3 %v320_v7 }
  0x12   :  { %179 = vmatpush.bf16.msra.mxu0 %v311_v8  ;;  %339 = vmatpush.bf16.msra.mxu2 %v311_v8 }
  0x13   :  { %198 = vmatpush.bf16.msra.mxu1 %v319_v9  ;;  %347 = vmatpush.bf16.msra.mxu3 %v319_v9 }
  0x16   :  { %180 = vmatpush.bf16.msra.mxu0 %v310_v10  ;;  %340 = vmatpush.bf16.msra.mxu2 %v310_v10 }
  0x17   :  { %199 = vmatpush.bf16.msra.mxu1 %v318_v15  ;;  %348 = vmatpush.bf16.msra.mxu3 %v318_v15 }
  0x1a   :  { %181 = vmatpush.bf16.msra.mxu0 %v309_v20  ;;  %341 = vmatpush.bf16.msra.mxu2 %v309_v20 }
  0x1b   :  { %200 = vmatpush.bf16.msra.mxu1 %v317_v25  ;;  %349 = vmatpush.bf16.msra.mxu3 %v317_v25 }
  0x1e   :  { %182 = vmatpush.bf16.msra.mxu0 %v308_v30  ;;  %342 = vmatpush.bf16.msra.mxu2 %v308_v30 }
  0x1f   :  { %201 = vmatpush.bf16.msra.mxu1 %v316_v35  ;;  %350 = vmatpush.bf16.msra.mxu3 %v316_v35 }
  0x21   :  { %183 = vmatmul.bf16.vlgmr.msra.gmra.mxu0 %v39_v36  ;;  %188 = vmatmul.bf16.vlgmr.msra.gmra.mxu2 %v41_v37 }
  0x22   :  { %202 = vmatmul.bf16.vlgmr.msra.gmra.mxu1 %v40_v38  ;;  %207 = vmatmul.bf16.vlgmr.msra.gmra.mxu3 %v42_v39 }
  0x9e   :  { %v184_v40 = vpop.f32.mrf.mxu0 }
  0x9f   :  { %v203_v41 = vpop.f32.mrf.mxu1 }
  0xa0   :  { %v204_v44 = vadd.f32 %v203_v41, %v184_v40 }
  0xa2   :  { %v228_v48 = vmax.f32 %v204_v44, 0.0 }
  0xa4   :  { %v189_v42 = vpop.f32.mrf.mxu2 }
  0xa5   :  { %v208_v43 = vpop.f32.mrf.mxu3 }
  0xa6   :  { %v186_v45 = vpop.f32.mrf.mxu0  ;;  %v209_v50 = vadd.f32 %v208_v43, %v189_v42 }
  0xa7   :  { %v205_v46 = vpop.f32.mrf.mxu1 }
  0xa8   :  { %v206_v47 = vadd.f32 %v205_v46, %v186_v45  ;;  %v230_v55 = vmax.f32 %v209_v50, 0.0 }
  0xaa   :  { %v229_v49 = vmax.f32 %v206_v47, 0.0 }
  0xac   :  { %v327_v51 = vpack.c.bf16 %v229_v49, %v228_v48  ;;  %v191_v52 = vpop.f32.mrf.mxu2 }
  0xad   :  { %v210_v53 = vpop.f32.mrf.mxu3 }
  0xae   :  { %328 = vst [vmem:[%s434_s2] sm:$0xff] %v327_v51   ;;  %v211_v54 = vadd.f32 %v210_v53, %v191_v52 }
  0xb0   :  { %v231_v56 = vmax.f32 %v211_v54, 0.0 }
  0xb2   :  { %v332_v57 = vpack.c.bf16 %v231_v56, %v230_v55 }
  0xb4   :  { %334 = vst [vmem:[%s434_s2 + $0x8] sm:$0xff] %v332_v57  }

// kernel: _lambda_.384
= control target key start
LH: loop header
LB: loop body
LE: loop exit
PB: predicated region body
PF: predicated region fallthrough
CT: control target
= control target key end

     0   :  { %s428_s1 = inlined_call_operand.vmem [shape: bf16[256,128], index: 1, kind: input, shape index: {}]   ;;  %s429_s0 = inlined_call_operand.vmem [shape: bf16[32,256], index: 0, kind: input, shape index: {}]   ;;  %s430_s2 = inlined_call_operand.vmem [shape: bf16[32,128], index: 2, kind: output, shape index: {}]  }
   0x1   :  { %v311_v0 = vld [vmem:[%s428_s1 + $0x38] sm:$0xff]  ;;  %v310_v2 = vld [vmem:[%s428_s1 + $0x30] sm:$0xff]  ;;  %v309_v4 = vld [vmem:[%s428_s1 + $0x28] sm:$0xff] }
   0x2   :  { %v319_v1 = vld [vmem:[%s428_s1 + $0x78] sm:$0xff]  ;;  %175 = vmatpush.bf16.msra.mxu0 %v311_v0  ;;  %331 = vmatpush.bf16.msra.mxu2 %v311_v0  ;;  %v318_v3 = vld [vmem:[%s428_s1 + $0x70] sm:$0xff]  ;;  %v317_v5 = vld [vmem:[%s428_s1 + $0x68] sm:$0xff] }
   0x3   :  { %194 = vmatpush.bf16.msra.mxu1 %v319_v1  ;;  %339 = vmatpush.bf16.msra.mxu3 %v319_v1  ;;  %v308_v6 = vld [vmem:[%s428_s1 + $0x20] sm:$0xff]  ;;  %v307_v8 = vld [vmem:[%s428_s1 + $0x18] sm:$0xff]  ;;  %v306_v10 = vld [vmem:[%s428_s1 + $0x10] sm:$0xff] }
   0x4   :  { %v316_v7 = vld [vmem:[%s428_s1 + $0x60] sm:$0xff]  ;;  %v315_v9 = vld [vmem:[%s428_s1 + $0x58] sm:$0xff]  ;;  %v20_v12 = vld [vmem:[%s429_s0 + $0x8] sm:$0xff] }
   0x5   :  { %v19_v11 = vld [vmem:[%s429_s0] sm:$0xff]  ;;  %v21_v13 = vld [vmem:[%s429_s0 + $0x10] sm:$0xff]  ;;  %v22_v14 = vld [vmem:[%s429_s0 + $0x18] sm:$0xff]  ;;  %v25_v17 = vunpack.c.l.bf16 %v20_v12  ;;  %v26_v22 = vunpack.c.h.bf16 %v20_v12 }
   0x6   :  { %176 = vmatpush.bf16.msra.mxu0 %v310_v2  ;;  %332 = vmatpush.bf16.msra.mxu2 %v310_v2  ;;  %v314_v15 = vld [vmem:[%s428_s1 + $0x50] sm:$0xff]  ;;  %v23_v16 = vunpack.c.l.bf16 %v19_v11  ;;  %v27_v18 = vunpack.c.l.bf16 %v21_v13  ;;  %v29_v19 = vunpack.c.l.bf16 %v22_v14  ;;  %v305_v20 = vld [vmem:[%s428_s1 + $0x8] sm:$0xff]  ;;  %v24_v21 = vunpack.c.h.bf16 %v19_v11  ;;  %v304_v30 = vld [vmem:[%s428_s1] sm:$0xff] }
   0x7   :  { %195 = vmatpush.bf16.msra.mxu1 %v318_v3  ;;  %340 = vmatpush.bf16.msra.mxu3 %v318_v3  ;;  %v28_v23 = vunpack.c.h.bf16 %v21_v13  ;;  %v30_v24 = vunpack.c.h.bf16 %v22_v14  ;;  %v313_v25 = vld [vmem:[%s428_s1 + $0x48] sm:$0xff]  ;;  %v33_v27 = vmax.f32 %v25_v17, 0.0  ;;  %v34_v32 = vmax.f32 %v26_v22, 0.0  ;;  %v312_v35 = vld [vmem:[%s428_s1 + $0x40] sm:$0xff] }
   0x8   :  { %v31_v26 = vmax.f32 %v23_v16, 0.0  ;;  %v35_v28 = vmax.f32 %v27_v18, 0.0  ;;  %v37_v29 = vmax.f32 %v29_v19, 0.0  ;;  %v32_v31 = vmax.f32 %v24_v21, 0.0 }
   0x9   :  { %v36_v33 = vmax.f32 %v28_v23, 0.0  ;;  %v38_v34 = vmax.f32 %v30_v24, 0.0 }
   0xa   :  { %177 = vmatpush.bf16.msra.mxu0 %v309_v4  ;;  %333 = vmatpush.bf16.msra.mxu2 %v309_v4  ;;  %v39_v36 = vpack.c.bf16 %v33_v27, %v31_v26  ;;  %v41_v37 = vpack.c.bf16 %v37_v29, %v35_v28  ;;  %v40_v38 = vpack.c.bf16 %v34_v32, %v32_v31 }
   0xb   :  { %196 = vmatpush.bf16.msra.mxu1 %v317_v5  ;;  %341 = vmatpush.bf16.msra.mxu3 %v317_v5  ;;  %v42_v39 = vpack.c.bf16 %v38_v34, %v36_v33 }
   0xe   :  { %178 = vmatpush.bf16.msra.mxu0 %v308_v6  ;;  %334 = vmatpush.bf16.msra.mxu2 %v308_v6 }
   0xf   :  { %197 = vmatpush.bf16.msra.mxu1 %v316_v7  ;;  %342 = vmatpush.bf16.msra.mxu3 %v316_v7 }
  0x12   :  { %179 = vmatpush.bf16.msra.mxu0 %v307_v8  ;;  %335 = vmatpush.bf16.msra.mxu2 %v307_v8 }
  0x13   :  { %198 = vmatpush.bf16.msra.mxu1 %v315_v9  ;;  %343 = vmatpush.bf16.msra.mxu3 %v315_v9 }
  0x16   :  { %180 = vmatpush.bf16.msra.mxu0 %v306_v10  ;;  %336 = vmatpush.bf16.msra.mxu2 %v306_v10 }
  0x17   :  { %199 = vmatpush.bf16.msra.mxu1 %v314_v15  ;;  %344 = vmatpush.bf16.msra.mxu3 %v314_v15 }
  0x1a   :  { %181 = vmatpush.bf16.msra.mxu0 %v305_v20  ;;  %337 = vmatpush.bf16.msra.mxu2 %v305_v20 }
  0x1b   :  { %200 = vmatpush.bf16.msra.mxu1 %v313_v25  ;;  %345 = vmatpush.bf16.msra.mxu3 %v313_v25 }
  0x1e   :  { %182 = vmatpush.bf16.msra.mxu0 %v304_v30  ;;  %338 = vmatpush.bf16.msra.mxu2 %v304_v30 }
  0x1f   :  { %201 = vmatpush.bf16.msra.mxu1 %v312_v35  ;;  %346 = vmatpush.bf16.msra.mxu3 %v312_v35 }
  0x21   :  { %183 = vmatmul.bf16.vlgmr.msra.gmra.mxu0 %v39_v36  ;;  %188 = vmatmul.bf16.vlgmr.msra.gmra.mxu2 %v41_v37 }
  0x22   :  { %202 = vmatmul.bf16.vlgmr.msra.gmra.mxu1 %v40_v38  ;;  %207 = vmatmul.bf16.vlgmr.msra.gmra.mxu3 %v42_v39 }
  0x9e   :  { %v184_v40 = vpop.f32.mrf.mxu0 }
  0x9f   :  { %v203_v41 = vpop.f32.mrf.mxu1 }
  0xa0   :  { %v204_v46 = vadd.f32 %v203_v41, %v184_v40 }
  0xa4   :  { %v189_v42 = vpop.f32.mrf.mxu2 }
  0xa5   :  { %v208_v43 = vpop.f32.mrf.mxu3 }
  0xa6   :  { %v186_v44 = vpop.f32.mrf.mxu0  ;;  %v209_v51 = vadd.f32 %v208_v43, %v189_v42 }
  0xa7   :  { %v205_v45 = vpop.f32.mrf.mxu1 }
  0xa8   :  { %v206_v47 = vadd.f32 %v205_v45, %v186_v44 }
  0xaa   :  { %v323_v48 = vpack.c.bf16 %v206_v47, %v204_v46 }
  0xac   :  { %324 = vst [vmem:[%s430_s2] sm:$0xff] %v323_v48   ;;  %v191_v49 = vpop.f32.mrf.mxu2 }
  0xad   :  { %v210_v50 = vpop.f32.mrf.mxu3 }
  0xae   :  { %v211_v52 = vadd.f32 %v210_v50, %v191_v49 }
  0xb0   :  { %v328_v53 = vpack.c.bf16 %v211_v52, %v209_v51 }
  0xb2   :  { %330 = vst [vmem:[%s430_s2 + $0x8] sm:$0xff] %v328_v53  }

// kernel: _lambda_.450
= control target key start
LH: loop header
LB: loop body
LE: loop exit
PB: predicated region body
PF: predicated region fallthrough
CT: control target
= control target key end

     0   :  { %s405_s9 = smov 0   ;;  %s407_s10 = smov 0   ;;  %s446_s0 = inlined_call_operand.vmem [shape: bf16[2,16,128], index: 0, kind: input, shape index: {}]   ;;  %s447_s1 = inlined_call_operand.vmem [shape: f32[2,1,128], index: 1, kind: output, shape index: {0}]   ;;  %s448_s2 = inlined_call_operand.vmem [shape: f32[2,1,128], index: 2, kind: output, shape index: {1}]  }
   0x1   :  { %s409_s11 = smov 0  }
   0x2 LB: > { %s25_s12 = sadd.s32 1, %s383_s10  ;;  %p328_p0 = scmp.ge.s32.totalorder %s387_s11, 1  ;;  %s387_s11 = sphi %s409_s11, %s13_s11   ;;  %s383_s10 = sphi %s407_s10, %s450_s10   ;;  %s379_s9 = sphi %s405_s9, %s449_s9  }
   0x3   : > { %p27_p1 = scmp.ge.s32.totalorder %s25_s12, 2  ;;  %p134_p2 = scmp.lt.s32.totalorder %s387_s11, 3 }
   0x5   : > { %s452_s12 = smov (%p27_p1, %s25_s12), 0  ;;  %p135_p3 = pnand %p328_p0, %p134_p2 }
   0x6   : > { %p162_p4 = scmp.lt.s32.totalorder (!%p135_p3), %s379_s9, 1 }
   0x7   : > { %138 = sbr.rel (%p135_p3) target bundleno = 80 (0x50), region = 24 }
   0xc   : > { %v389_v0 = vmov 0.0   ;;  %s454_s9 = smov (!%p162_p4, %s379_s9), 1 }
   0xd   : > { %181 = vst [vmem:[#allocation2] sm:$0x1] %v389_v0  ;;  %s333_s13 = sshll.u32 %s454_s9, 3  ;;  %s173_s19 = scalar_lea.vmem %s447_s1, %s454_s9 }
   0xe   : > { %182 = vst [vmem:[#allocation3] sm:$0x1] %v389_v0  ;;  %s169_s16 = scalar_lea.vmem %s446_s0, %s333_s13  ;;  %s176_s22 = scalar_lea.vmem %s448_s2, %s454_s9 }
   0xf   : > { %v335_v1 = vld [vmem:[%s169_s16] sm:$0xff]  }
  0x10   : > { %v336_v2 = vunpack.c.l.bf16 %v335_v1  ;;  %v337_v3 = vunpack.c.h.bf16 %v335_v1 }
  0x12   : > { %v187_v4 = vmax.f32 %v336_v2, 0.0  ;;  %v188_v5 = vmax.f32 %v337_v3, 0.0 }
  0x14   : > { %v189_v6 = vmul.f32 0.999995, %v187_v4  ;;  %v190_v7 = vmul.f32 0.999995, %v188_v5  ;;  %v191_v21 = vld [vmem:[#allocation2] sm:$0x1] }
  0x15   : > { %v201_v24 = vld [vmem:[#allocation3] sm:$0x1] }
  0x16   : > { %v192_v8 = vadd.f32 %v190_v7, %v189_v6  ;;  %v202_v9 = vmul.f32 %v189_v6, %v189_v6  ;;  %v203_v10 = vmul.f32 %v190_v7, %v190_v7 }
  0x18   : > { %v193_v11 = vrot.slane %v192_v8, 4  ;;  %v204_v12 = vadd.f32 %v203_v10, %v202_v9 }
  0x1a   : > { %v194_v13 = vadd.f32 %v193_v11, %v192_v8  ;;  %v205_v14 = vrot.slane %v204_v12, 4 }
  0x1c   : > { %v195_v15 = vrot.slane %v194_v13, 2  ;;  %v206_v16 = vadd.f32 %v205_v14, %v204_v12 }
  0x1e   : > { %v196_v17 = vadd.f32 %v195_v15, %v194_v13  ;;  %v207_v18 = vrot.slane %v206_v16, 2 }
  0x20   : > { %v197_v19 = vrot.slane %v196_v17, 1  ;;  %v208_v20 = vadd.f32 %v207_v18, %v206_v16 }
  0x22   : > { %v198_v22 = vadd.f32 %v197_v19, %v196_v17  ;;  %v209_v23 = vrot.slane %v208_v20, 1 }
  0x24   : > { %v199_v25 = vadd.f32 %v198_v22, %v191_v21  ;;  %v210_v26 = vadd.f32 %v209_v23, %v208_v20 }
  0x26   : > { %200 = vst [vmem:[#allocation2] sm:$0x1] %v199_v25  ;;  %v211_v27 = vadd.f32 %v210_v26, %v201_v24 }
  0x28   : > { %212 = vst [vmem:[#allocation3] sm:$0x1] %v211_v27 }
  0x2d   : > { %v216_v28 = vld [vmem:[#allocation2] sm:$0x1] }
  0x2e   : > { %v217_v29 = vmul.f32 0.0625, %v216_v28 }
  0x2f   : > { %v218_v31 = vld [vmem:[#allocation3] sm:$0x1] }
  0x30   : > { %v219_v30 = vmul.f32 16.0, %v217_v29  ;;  %223 = vst [vmem:[%s173_s19] sm:$0x1] %v217_v29 }
  0x32   : > { %v220_v32 = vmul.f32 %v219_v30, %v217_v29 }
  0x34   : > { %v221_v33 = vsub.f32 %v218_v31, %v220_v32 }
  0x36   : > { %v222_v34 = vmul.f32 0.06666667, %v221_v33 }
  0x38   : > { %v224_v35 = vmax.f32 %v222_v34, 0.0 }
  0x3a   : > { %363 = vrsqrt.f32 %v224_v35  ;;  %vm232_vm0 = vcmp.eq.f32.partialorder %v224_v35, inf  ;;  %v235_v43 = vand.u32 2147483648, %v224_v35  ;;  %vm234_vm1 = vcmp.eq.f32.partialorder %v224_v35, 0.0 }
  0x40   : > { %v364_v36 = vpop.eup %363 }
  0x41   : > { %v226_v37 = vmul.f32 %v364_v36, %v224_v35 }
  0x43   : > { %v227_v38 = vmul.f32 %v364_v36, %v226_v37 }
  0x45   : > { %v228_v39 = vmul.f32 0.5, %v227_v38 }
  0x47   : > { %v229_v40 = vsub.f32 1.5, %v228_v39 }
  0x49   : > { %v230_v41 = vmul.f32 %v364_v36, %v229_v40 }
  0x4b   : > { %v231_v42 = vmul.f32 %v230_v41, %v224_v35 }
  0x4d   : > { %v233_v44 = vsel %vm232_vm0, %v224_v35, %v231_v42 }
  0x4e   : > { %v236_v45 = vsel %vm234_vm1, %v235_v43, %v233_v44 }
  0x4f   : > { %237 = vst [vmem:[%s176_s22] sm:$0x1] %v236_v45 }
  0x50 PF: > { %s13_s11 = sadd.s32 1, %s387_s11   ;;  %s449_s9 = smov %s383_s10 }
  0x51   : > { %p10_p5 = scmp.ge.s32.totalorder %s13_s11, 4   ;;  %s450_s10 = smov %s452_s12 }
  0x53   :  { %12 = sbr.rel (!%p10_p5) target bundleno = 2 (0x2), region = 74 }

// kernel: _lambda_.451
= control target key start
LH: loop header
LB: loop body
LE: loop exit
PB: predicated region body
PF: predicated region fallthrough
CT: control target
= control target key end

     0   :  { %s373_s1 = inlined_call_operand.vmem [shape: bf16[256,128], index: 1, kind: input, shape index: {}]   ;;  %s374_s0 = inlined_call_operand.vmem [shape: bf16[16,256], index: 0, kind: input, shape index: {}]   ;;  %s375_s2 = inlined_call_operand.vmem [shape: f32[16,128], index: 2, kind: output, shape index: {}]  }
   0x1   :  { %v283_v0 = vld [vmem:[%s373_s1 + $0x38] sm:$0xff]  ;;  %v282_v2 = vld [vmem:[%s373_s1 + $0x30] sm:$0xff]  ;;  %v281_v4 = vld [vmem:[%s373_s1 + $0x28] sm:$0xff] }
   0x2   :  { %v291_v1 = vld [vmem:[%s373_s1 + $0x78] sm:$0xff]  ;;  %159 = vmatpush.bf16.msra.mxu0 %v283_v0  ;;  %v290_v3 = vld [vmem:[%s373_s1 + $0x70] sm:$0xff]  ;;  %v289_v5 = vld [vmem:[%s373_s1 + $0x68] sm:$0xff] }
   0x3   :  { %173 = vmatpush.bf16.msra.mxu1 %v291_v1  ;;  %v280_v6 = vld [vmem:[%s373_s1 + $0x20] sm:$0xff]  ;;  %v279_v8 = vld [vmem:[%s373_s1 + $0x18] sm:$0xff]  ;;  %v278_v10 = vld [vmem:[%s373_s1 + $0x10] sm:$0xff] }
   0x4   :  { %v288_v7 = vld [vmem:[%s373_s1 + $0x60] sm:$0xff]  ;;  %v287_v9 = vld [vmem:[%s373_s1 + $0x58] sm:$0xff]  ;;  %v286_v11 = vld [vmem:[%s373_s1 + $0x50] sm:$0xff] }
   0x5   :  { %v277_v12 = vld [vmem:[%s373_s1 + $0x8] sm:$0xff]  ;;  %v276_v14 = vld [vmem:[%s373_s1] sm:$0xff] }
   0x6   :  { %160 = vmatpush.bf16.msra.mxu0 %v282_v2  ;;  %v285_v13 = vld [vmem:[%s373_s1 + $0x48] sm:$0xff]  ;;  %v284_v15 = vld [vmem:[%s373_s1 + $0x40] sm:$0xff] }
   0x7   :  { %174 = vmatpush.bf16.msra.mxu1 %v290_v3  ;;  %v204_v16 = vld [vmem:[%s374_s0] sm:$0xf]  ;;  %v275_v17 = vld [vmem:[%s374_s0 + $0x4] sm:$0xf0]  ;;  %v274_v18 = vld [vmem:[%s374_s0 + $0x4] sm:$0xf] }
   0x8   :  { %v206_v19 = vld [vmem:[%s374_s0 + $0x8] sm:$0xf0]  ;;  %v205_v20 = vor.u32 %v275_v17, %v204_v16 }
   0x9   :  { %v209_v21 = vor.u32 %v274_v18, %v206_v19 }
   0xa   :  { %161 = vmatpush.bf16.msra.mxu0 %v281_v4 }
   0xb   :  { %175 = vmatpush.bf16.msra.mxu1 %v289_v5 }
   0xe   :  { %162 = vmatpush.bf16.msra.mxu0 %v280_v6 }
   0xf   :  { %176 = vmatpush.bf16.msra.mxu1 %v288_v7 }
  0x12   :  { %163 = vmatpush.bf16.msra.mxu0 %v279_v8 }
  0x13   :  { %177 = vmatpush.bf16.msra.mxu1 %v287_v9 }
  0x16   :  { %164 = vmatpush.bf16.msra.mxu0 %v278_v10 }
  0x17   :  { %178 = vmatpush.bf16.msra.mxu1 %v286_v11 }
  0x1a   :  { %165 = vmatpush.bf16.msra.mxu0 %v277_v12 }
  0x1b   :  { %179 = vmatpush.bf16.msra.mxu1 %v285_v13 }
  0x1e   :  { %166 = vmatpush.bf16.msra.mxu0 %v276_v14 }
  0x1f   :  { %180 = vmatpush.bf16.msra.mxu1 %v284_v15 }
  0x21   :  { %167 = vmatmul.bf16.vlgmr.msra.gmra.mxu0 %v205_v20 }
  0x22   :  { %181 = vmatmul.bf16.vlgmr.msra.gmra.mxu1 %v209_v21 }
  0x9e   :  { %v168_v22 = vpop.f32.mrf.mxu0 }
  0x9f   :  { %v182_v23 = vpop.f32.mrf.mxu1 }
  0xa0   :  { %v183_v24 = vadd.f32 %v182_v23, %v168_v22 }
  0xa2   :  { %196 = vst [vmem:[%s375_s2] sm:$0xff] %v183_v24 }
  0xa6   :  { %v170_v25 = vpop.f32.mrf.mxu0 }
  0xa7   :  { %v184_v26 = vpop.f32.mrf.mxu1 }
  0xa8   :  { %v185_v27 = vadd.f32 %v184_v26, %v170_v25 }
  0xaa   :  { %197 = vst [vmem:[%s375_s2 + $0x8] sm:$0xff] %v185_v27 }

</bundles_post_ra>
